<compile_context>
chip_gen: v5e
topology: v5e:2x2
jax: 0.10.0
libtpu: 0.0.40
codegen_flags: <defaults>
</compile_context>

<pallas_src>
import functools

import jax
import jax.numpy as jnp
from jax.experimental import pallas as pl
from jax.experimental.pallas import tpu as pltpu

_LANE = 128
_TAPS = tuple((oy, ox) for oy in (-1, 0, 1) for ox in (-1, 0, 1))


def _round_up(x, m):
    return (x + m - 1) // m * m


def _fused_convblock_kernel(x_ref, m_ref, w1_ref, b1_ref, w2_ref, b2_ref,
                            o_ref, acc1_ref, mid_ref, acc2_ref, *, W):
    """Fused ConvBlock forward for one image, spatially flattened to (H*W, C).

    x_ref  : (H*W, Cin_p)         input image (channels lane-padded)
    m_ref  : (9, H*W, 1)          per-tap 0/1 masks (border zero padding)
    w1_ref : (9, Cin_p, Cmid_p)   conv1 weights (tap-major, BN1 scale folded)
    b1_ref : (1, Cmid_p)          BN1 folded bias
    w2_ref : (9, Cmid_p, Cout_p)  conv2 weights (BN2 scale folded)
    b2_ref : (1, Cout_p)          BN2 folded bias
    o_ref  : (H*W, Cout_p)        output
    acc1_ref/acc2_ref : f32 VMEM accumulators; mid_ref: conv1 activation.
    """

    def conv3x3(src_ref, w_ref, acc_ref):
        # 3x3 conv as 9 shifted (H*W, Cin) @ (Cin, Cout) MXU matmuls.  The
        # tap shift is a static roll of the flattened spatial axis; m_ref[k]
        # zeroes rows whose tap falls outside the image (== zero padding).
        acc_ref[...] = jnp.zeros_like(acc_ref)
        for k, (oy, ox) in enumerate(_TAPS):
            d = oy * W + ox
            tap = src_ref[...]
            if d != 0:
                tap = jnp.roll(tap, -d, axis=0) * m_ref[k]
            acc_ref[...] += jnp.dot(tap, w_ref[k],
                                    preferred_element_type=jnp.float32)

    # conv1 (+ folded BN1) + ReLU; the activation stays in VMEM.
    conv3x3(x_ref, w1_ref, acc1_ref)
    mid_ref[...] = jnp.maximum(acc1_ref[...] + b1_ref[...],
                               0.0).astype(mid_ref.dtype)

    # TODO(synk): nn.Dropout2d is the identity in eval mode; training-mode
    # channel dropout (pltpu.prng_*) is not implemented.

    # conv2 (+ folded BN2) + ReLU -> single lane-dense output store.
    conv3x3(mid_ref, w2_ref, acc2_ref)
    o_ref[...] = jnp.maximum(acc2_ref[...] + b2_ref[...],
                             0.0).astype(o_ref.dtype)


def _conv_block_pallas(x_flat, tap_masks, w1, b1, w2, b2, *, W, out_dtype,
                       compute_dtype):
    N, HW, Cin_p = x_flat.shape
    Cmid_p = w1.shape[-1]
    Cout_p = w2.shape[-1]

    kernel = functools.partial(_fused_convblock_kernel, W=W)

    csize = jnp.dtype(compute_dtype).itemsize
    osize = jnp.dtype(out_dtype).itemsize
    # BlockSpec double-buffers each input/output block; scratch is single.
    block_bytes = (csize * (HW * Cin_p + 9 * HW + 9 * Cin_p * Cmid_p
                            + 9 * Cmid_p * Cout_p)
                   + 4 * (Cmid_p + Cout_p) + osize * HW * Cout_p)
    scratch_bytes = 4 * HW * Cmid_p + csize * HW * Cmid_p + 4 * HW * Cout_p
    vmem_limit = int(min(max(2 * (2 * block_bytes + scratch_bytes),
                             16 * 1024 * 1024), 32 * 1024 * 1024))

    return pl.pallas_call(
        kernel,
        out_shape=jax.ShapeDtypeStruct((N, HW, Cout_p), out_dtype),
        grid_spec=pltpu.PrefetchScalarGridSpec(
            num_scalar_prefetch=0,
            # One image per grid step; "parallel" lets batch elements shard
            # across TensorCores (v7x megacore).
            # TODO(synk): for very large images (e.g. UNet 256x256x256 on
            # v7x's 64 MiB VMEM) add a spatial row-tile axis with a 2-row halo.
            grid=(N,),
            in_specs=[
                pl.BlockSpec((None, HW, Cin_p), lambda n: (n, 0, 0)),
                pl.BlockSpec((9, HW, 1), lambda n: (0, 0, 0)),
                pl.BlockSpec((9, Cin_p, Cmid_p), lambda n: (0, 0, 0)),
                pl.BlockSpec((1, Cmid_p), lambda n: (0, 0)),
                pl.BlockSpec((9, Cmid_p, Cout_p), lambda n: (0, 0, 0)),
                pl.BlockSpec((1, Cout_p), lambda n: (0, 0)),
            ],
            out_specs=pl.BlockSpec((None, HW, Cout_p), lambda n: (n, 0, 0)),
            scratch_shapes=[
                pltpu.VMEM((HW, Cmid_p), jnp.float32),    # conv1 accumulator
                pltpu.VMEM((HW, Cmid_p), compute_dtype),  # relu(bn1(conv1(x)))
                pltpu.VMEM((HW, Cout_p), jnp.float32),    # conv2 accumulator
            ],
        ),
        compiler_params=pltpu.CompilerParams(
            dimension_semantics=("parallel",),
            vmem_limit_bytes=vmem_limit,
        ),
    )(x_flat, tap_masks, w1, b1, w2, b2)


def conv_block_forward(x_nchw, params, compute_dtype=jnp.float32):
    """Equivalent of ConvBlock.forward (eval mode).  Input/output NCHW.

    compute_dtype=jnp.bfloat16 halves HBM/VMEM traffic and roughly doubles
    MXU throughput on v6e/v7x (accumulation stays f32); default f32 keeps
    tight numerical parity with the PyTorch module.
    """
    N, Cin, H, W = x_nchw.shape
    Cmid = params["w1"].shape[0]
    Cout = params["w2"].shape[0]
    Cin_p = _round_up(Cin, _LANE)
    Cmid_p = _round_up(Cmid, _LANE)
    Cout_p = _round_up(Cout, _LANE)
    HW = H * W

    # NCHW -> NHWC, zero-pad channels to a lane multiple, flatten spatial.
    # This is a single XLA copy fused with the unavoidable layout transpose;
    # it is NOT a per-layer spatial pad (the 3x3 halo is handled in-kernel
    # and the conv1->conv2 intermediate never touches HBM).
    x = jnp.transpose(x_nchw, (0, 2, 3, 1))
    x = jnp.pad(x, ((0, 0), (0, 0), (0, 0), (0, Cin_p - Cin)))
    x_flat = x.reshape(N, HW, Cin_p).astype(compute_dtype)

    # Per-tap validity masks (1 inside the image, 0 where the tap reads the
    # zero padding); shared by both convs, 9*H*W floats.
    yy, xx = jnp.meshgrid(jnp.arange(H), jnp.arange(W), indexing="ij")
    masks = []
    for oy, ox in _TAPS:
        valid = ((yy + oy >= 0) & (yy + oy < H) &
                 (xx + ox >= 0) & (xx + ox < W))
        masks.append(valid.reshape(HW, 1))
    tap_masks = jnp.stack(masks, axis=0).astype(compute_dtype)  # (9, HW, 1)

    def prep_w(w_oihw, scale, cin, cin_p, cout, cout_p):
        # Fold eval-mode BN scale into the conv weights (free at runtime),
        # reorder OIHW -> (tap=ky*3+kx, Cin, Cout), lane-pad both channel dims.
        w = w_oihw * scale[:, None, None, None]
        w = jnp.transpose(w, (2, 3, 1, 0)).reshape(9, cin, cout)
        w = jnp.pad(w, ((0, 0), (0, cin_p - cin), (0, cout_p - cout)))
        return w.astype(compute_dtype)

    def prep_b(b, cout, cout_p):
        return jnp.pad(b, (0, cout_p - cout)).reshape(1, cout_p).astype(jnp.float32)

    w1 = prep_w(params["w1"], params["s1"], Cin, Cin_p, Cmid, Cmid_p)
    b1 = prep_b(params["b1"], Cmid, Cmid_p)
    w2 = prep_w(params["w2"], params["s2"], Cmid, Cmid_p, Cout, Cout_p)
    b2 = prep_b(params["b2"], Cout, Cout_p)

    out_flat = _conv_block_pallas(x_flat, tap_masks, w1, b1, w2, b2,
                                  W=W, out_dtype=x_nchw.dtype,
                                  compute_dtype=compute_dtype)
    out = out_flat.reshape(N, H, W, Cout_p)[..., :Cout]
    return jnp.transpose(out, (0, 3, 1, 2))


def init_conv_block_params(key, in_channels, out_channels, eps=1e-5):
    """Deterministic synthetic parameters matching nn.Conv2d/nn.BatchNorm2d."""
    k = jax.random.split(key, 6)
    w1 = 0.1 * jax.random.normal(k[0], (out_channels, in_channels, 3, 3), jnp.float32)
    w2 = 0.1 * jax.random.normal(k[1], (out_channels, out_channels, 3, 3), jnp.float32)
    g1 = 1.0 + 0.1 * jax.random.normal(k[2], (out_channels,), jnp.float32)
    b1 = 0.1 * jax.random.normal(k[3], (out_channels,), jnp.float32)
    g2 = 1.0 + 0.1 * jax.random.normal(k[4], (out_channels,), jnp.float32)
    b2 = 0.1 * jax.random.normal(k[5], (out_channels,), jnp.float32)
    rm = jnp.zeros((out_channels,), jnp.float32)   # running_mean
    rv = jnp.ones((out_channels,), jnp.float32)    # running_var
    # Fold eval-mode BN into per-channel scale/bias.
    s1 = g1 / jnp.sqrt(rv + eps)
    bb1 = b1 - rm * s1
    s2 = g2 / jnp.sqrt(rv + eps)
    bb2 = b2 - rm * s2
    return {"w1": w1, "s1": s1, "b1": bb1, "w2": w2, "s2": s2, "b2": bb2}


def _reference_forward(x_nchw, params):
    """Pure-JAX reference using lax.conv for a correctness check."""
    def step(x, w, s, b):
        y = jax.lax.conv_general_dilated(
            x, w, window_strides=(1, 1), padding="SAME",
            dimension_numbers=("NCHW", "OIHW", "NCHW"))
        y = y * s[None, :, None, None] + b[None, :, None, None]
        return jnp.maximum(y, 0.0)
    x = step(x_nchw, params["w1"], params["s1"], params["b1"])
    x = step(x, params["w2"], params["s2"], params["b2"])
    return x


if __name__ == "__main__":
    key = jax.random.PRNGKey(0)
    kx, kp = jax.random.split(key)

    N, Cin, Cout, H, W = 2, 4, 8, 16, 16
    x = jax.random.normal(kx, (N, Cin, H, W), jnp.float32)
    params = init_conv_block_params(kp, Cin, Cout)

    out = conv_block_forward(x, params)
    out = jax.block_until_ready(out)

    ref = _reference_forward(x, params)
    assert out.shape == (N, Cout, H, W)
    assert jnp.allclose(out, ref, atol=1e-3, rtol=1e-3), float(
        jnp.max(jnp.abs(out - ref)))

    print("KERNEL_OK")
</pallas_src>

<mosaic_0001>
module attributes {stable_mosaic.version = 11 : i64} {
  func.func @_fused_convblock_kernel(%arg0: i32, %arg1: memref<1x256x128xf32, #tpu.memory_space<vmem>>, %arg2: memref<9x256x1xf32, #tpu.memory_space<vmem>>, %arg3: memref<9x128x128xf32, #tpu.memory_space<vmem>>, %arg4: memref<1x128xf32, #tpu.memory_space<vmem>>, %arg5: memref<9x128x128xf32, #tpu.memory_space<vmem>>, %arg6: memref<1x128xf32, #tpu.memory_space<vmem>>, %arg7: memref<1x256x128xf32, #tpu.memory_space<vmem>>, %arg8: memref<256x128xf32, #tpu.memory_space<vmem>>, %arg9: memref<256x128xf32, #tpu.memory_space<vmem>>, %arg10: memref<256x128xf32, #tpu.memory_space<vmem>>) attributes {dimension_semantics = [#tpu.dimension_semantics<parallel>], iteration_bounds = array<i64: 2>, scalar_prefetch = 0 : i64, scratch_operands = 3 : i64, tpu.core_type = #tpu.core_type<tc>, window_params = [{transform_indices = @transform_0, window_bounds = array<i64: 1, 256, 128>}, {pipeline_mode = #tpu.pipeline_mode<synchronous>, transform_indices = @transform_1, window_bounds = array<i64: 9, 256, 1>}, {pipeline_mode = #tpu.pipeline_mode<synchronous>, transform_indices = @transform_2, window_bounds = array<i64: 9, 128, 128>}, {pipeline_mode = #tpu.pipeline_mode<synchronous>, transform_indices = @transform_3, window_bounds = array<i64: 1, 128>}, {pipeline_mode = #tpu.pipeline_mode<synchronous>, transform_indices = @transform_4, window_bounds = array<i64: 9, 128, 128>}, {pipeline_mode = #tpu.pipeline_mode<synchronous>, transform_indices = @transform_5, window_bounds = array<i64: 1, 128>}, {transform_indices = @transform_6, window_bounds = array<i64: 1, 256, 128>}]} {
    %cst = arith.constant 0.000000e+00 : f32
    %0 = vector.broadcast %cst : f32 to vector<256x128xf32>
    %c0 = arith.constant 0 : index
    %c0_0 = arith.constant 0 : index
    %1 = vector.load %arg8[%c0, %c0_0] : memref<256x128xf32, #tpu.memory_space<vmem>>, vector<256x128xf32>
    tpu.vector_store %arg8[%c0, %c0_0], %0 {strides = array<i32>} : memref<256x128xf32, #tpu.memory_space<vmem>>, vector<256x128xf32>,
    %c0_1 = arith.constant 0 : index
    %c0_2 = arith.constant 0 : index
    %c0_3 = arith.constant 0 : index
    %2 = vector.load %arg1[%c0_1, %c0_2, %c0_3] : memref<1x256x128xf32, #tpu.memory_space<vmem>>, vector<1x256x128xf32>
    %3 = vector.shape_cast %2 : vector<1x256x128xf32> to vector<256x128xf32>
    %4 = vector.extract_strided_slice %3 {offsets = [239, 0], sizes = [17, 128], strides = [1, 1]} : vector<256x128xf32> to vector<17x128xf32>
    %5 = vector.extract_strided_slice %3 {offsets = [0, 0], sizes = [239, 128], strides = [1, 1]} : vector<256x128xf32> to vector<239x128xf32>
    %6 = tpu.concatenate %4, %5 in 0 : vector<17x128xf32>, vector<239x128xf32> -> vector<256x128xf32>
    %c0_4 = arith.constant 0 : index
    %c0_5 = arith.constant 0 : index
    %c0_6 = arith.constant 0 : index
    %7 = vector.load %arg2[%c0_4, %c0_5, %c0_6] : memref<9x256x1xf32, #tpu.memory_space<vmem>>, vector<1x256x1xf32>
    %8 = vector.shape_cast %7 : vector<1x256x1xf32> to vector<256x1xf32>
    %9 = vector.broadcast %8 : vector<256x1xf32> to vector<256x128xf32>
    %10 = arith.mulf %6, %9 : vector<256x128xf32>
    %c0_7 = arith.constant 0 : index
    %c0_8 = arith.constant 0 : index
    %11 = vector.load %arg8[%c0_7, %c0_8] : memref<256x128xf32, #tpu.memory_space<vmem>>, vector<256x128xf32>
    %c0_9 = arith.constant 0 : index
    %c0_10 = arith.constant 0 : index
    %c0_11 = arith.constant 0 : index
    %12 = vector.load %arg3[%c0_9, %c0_10, %c0_11] : memref<9x128x128xf32, #tpu.memory_space<vmem>>, vector<1x128x128xf32>
    %13 = vector.shape_cast %12 : vector<1x128x128xf32> to vector<128x128xf32>
    %cst_12 = arith.constant dense<0.000000e+00> : vector<256x128xf32>
    %14 = tpu.matmul %10, %13, %cst_12 {dimension_numbers = #tpu.dot_dimension_numbers<[1], [0], [0], [1], [0, 0, 1, 1], [], []>} : vector<256x128xf32>, vector<128x128xf32>, vector<256x128xf32> -> vector<256x128xf32>
    %15 = arith.addf %11, %14 : vector<256x128xf32>
    %c0_13 = arith.constant 0 : index
    %c0_14 = arith.constant 0 : index
    %16 = vector.load %arg8[%c0_13, %c0_14] : memref<256x128xf32, #tpu.memory_space<vmem>>, vector<256x128xf32>
    tpu.vector_store %arg8[%c0_13, %c0_14], %15 {strides = array<i32>} : memref<256x128xf32, #tpu.memory_space<vmem>>, vector<256x128xf32>,
    %c0_15 = arith.constant 0 : index
    %c0_16 = arith.constant 0 : index
    %c0_17 = arith.constant 0 : index
    %17 = vector.load %arg1[%c0_15, %c0_16, %c0_17] : memref<1x256x128xf32, #tpu.memory_space<vmem>>, vector<1x256x128xf32>
    %18 = vector.shape_cast %17 : vector<1x256x128xf32> to vector<256x128xf32>
    %19 = vector.extract_strided_slice %18 {offsets = [240, 0], sizes = [16, 128], strides = [1, 1]} : vector<256x128xf32> to vector<16x128xf32>
    %20 = vector.extract_strided_slice %18 {offsets = [0, 0], sizes = [240, 128], strides = [1, 1]} : vector<256x128xf32> to vector<240x128xf32>
    %21 = tpu.concatenate %19, %20 in 0 : vector<16x128xf32>, vector<240x128xf32> -> vector<256x128xf32>
    %c1 = arith.constant 1 : index
    %c0_18 = arith.constant 0 : index
    %c0_19 = arith.constant 0 : index
    %22 = vector.load %arg2[%c1, %c0_18, %c0_19] : memref<9x256x1xf32, #tpu.memory_space<vmem>>, vector<1x256x1xf32>
    %23 = vector.shape_cast %22 : vector<1x256x1xf32> to vector<256x1xf32>
    %24 = vector.broadcast %23 : vector<256x1xf32> to vector<256x128xf32>
    %25 = arith.mulf %21, %24 : vector<256x128xf32>
    %c0_20 = arith.constant 0 : index
    %c0_21 = arith.constant 0 : index
    %26 = vector.load %arg8[%c0_20, %c0_21] : memref<256x128xf32, #tpu.memory_space<vmem>>, vector<256x128xf32>
    %c1_22 = arith.constant 1 : index
    %c0_23 = arith.constant 0 : index
    %c0_24 = arith.constant 0 : index
    %27 = vector.load %arg3[%c1_22, %c0_23, %c0_24] : memref<9x128x128xf32, #tpu.memory_space<vmem>>, vector<1x128x128xf32>
    %28 = vector.shape_cast %27 : vector<1x128x128xf32> to vector<128x128xf32>
    %cst_25 = arith.constant dense<0.000000e+00> : vector<256x128xf32>
    %29 = tpu.matmul %25, %28, %cst_25 {dimension_numbers = #tpu.dot_dimension_numbers<[1], [0], [0], [1], [0, 0, 1, 1], [], []>} : vector<256x128xf32>, vector<128x128xf32>, vector<256x128xf32> -> vector<256x128xf32>
    %30 = arith.addf %26, %29 : vector<256x128xf32>
    %c0_26 = arith.constant 0 : index
    %c0_27 = arith.constant 0 : index
    %31 = vector.load %arg8[%c0_26, %c0_27] : memref<256x128xf32, #tpu.memory_space<vmem>>, vector<256x128xf32>
    tpu.vector_store %arg8[%c0_26, %c0_27], %30 {strides = array<i32>} : memref<256x128xf32, #tpu.memory_space<vmem>>, vector<256x128xf32>,
    %c0_28 = arith.constant 0 : index
    %c0_29 = arith.constant 0 : index
    %c0_30 = arith.constant 0 : index
    %32 = vector.load %arg1[%c0_28, %c0_29, %c0_30] : memref<1x256x128xf32, #tpu.memory_space<vmem>>, vector<1x256x128xf32>
    %33 = vector.shape_cast %32 : vector<1x256x128xf32> to vector<256x128xf32>
    %34 = vector.extract_strided_slice %33 {offsets = [241, 0], sizes = [15, 128], strides = [1, 1]} : vector<256x128xf32> to vector<15x128xf32>
    %35 = vector.extract_strided_slice %33 {offsets = [0, 0], sizes = [241, 128], strides = [1, 1]} : vector<256x128xf32> to vector<241x128xf32>
    %36 = tpu.concatenate %34, %35 in 0 : vector<15x128xf32>, vector<241x128xf32> -> vector<256x128xf32>
    %c2 = arith.constant 2 : index
    %c0_31 = arith.constant 0 : index
    %c0_32 = arith.constant 0 : index
    %37 = vector.load %arg2[%c2, %c0_31, %c0_32] : memref<9x256x1xf32, #tpu.memory_space<vmem>>, vector<1x256x1xf32>
    %38 = vector.shape_cast %37 : vector<1x256x1xf32> to vector<256x1xf32>
    %39 = vector.broadcast %38 : vector<256x1xf32> to vector<256x128xf32>
    %40 = arith.mulf %36, %39 : vector<256x128xf32>
    %c0_33 = arith.constant 0 : index
    %c0_34 = arith.constant 0 : index
    %41 = vector.load %arg8[%c0_33, %c0_34] : memref<256x128xf32, #tpu.memory_space<vmem>>, vector<256x128xf32>
    %c2_35 = arith.constant 2 : index
    %c0_36 = arith.constant 0 : index
    %c0_37 = arith.constant 0 : index
    %42 = vector.load %arg3[%c2_35, %c0_36, %c0_37] : memref<9x128x128xf32, #tpu.memory_space<vmem>>, vector<1x128x128xf32>
    %43 = vector.shape_cast %42 : vector<1x128x128xf32> to vector<128x128xf32>
    %cst_38 = arith.constant dense<0.000000e+00> : vector<256x128xf32>
    %44 = tpu.matmul %40, %43, %cst_38 {dimension_numbers = #tpu.dot_dimension_numbers<[1], [0], [0], [1], [0, 0, 1, 1], [], []>} : vector<256x128xf32>, vector<128x128xf32>, vector<256x128xf32> -> vector<256x128xf32>
    %45 = arith.addf %41, %44 : vector<256x128xf32>
    %c0_39 = arith.constant 0 : index
    %c0_40 = arith.constant 0 : index
    %46 = vector.load %arg8[%c0_39, %c0_40] : memref<256x128xf32, #tpu.memory_space<vmem>>, vector<256x128xf32>
    tpu.vector_store %arg8[%c0_39, %c0_40], %45 {strides = array<i32>} : memref<256x128xf32, #tpu.memory_space<vmem>>, vector<256x128xf32>,
    %c0_41 = arith.constant 0 : index
    %c0_42 = arith.constant 0 : index
    %c0_43 = arith.constant 0 : index
    %47 = vector.load %arg1[%c0_41, %c0_42, %c0_43] : memref<1x256x128xf32, #tpu.memory_space<vmem>>, vector<1x256x128xf32>
    %48 = vector.shape_cast %47 : vector<1x256x128xf32> to vector<256x128xf32>
    %49 = vector.extract_strided_slice %48 {offsets = [255, 0], sizes = [1, 128], strides = [1, 1]} : vector<256x128xf32> to vector<1x128xf32>
    %50 = vector.extract_strided_slice %48 {offsets = [0, 0], sizes = [255, 128], strides = [1, 1]} : vector<256x128xf32> to vector<255x128xf32>
    %51 = tpu.concatenate %49, %50 in 0 : vector<1x128xf32>, vector<255x128xf32> -> vector<256x128xf32>
    %c3 = arith.constant 3 : index
    %c0_44 = arith.constant 0 : index
    %c0_45 = arith.constant 0 : index
    %52 = vector.load %arg2[%c3, %c0_44, %c0_45] : memref<9x256x1xf32, #tpu.memory_space<vmem>>, vector<1x256x1xf32>
    %53 = vector.shape_cast %52 : vector<1x256x1xf32> to vector<256x1xf32>
    %54 = vector.broadcast %53 : vector<256x1xf32> to vector<256x128xf32>
    %55 = arith.mulf %51, %54 : vector<256x128xf32>
    %c0_46 = arith.constant 0 : index
    %c0_47 = arith.constant 0 : index
    %56 = vector.load %arg8[%c0_46, %c0_47] : memref<256x128xf32, #tpu.memory_space<vmem>>, vector<256x128xf32>
    %c3_48 = arith.constant 3 : index
    %c0_49 = arith.constant 0 : index
    %c0_50 = arith.constant 0 : index
    %57 = vector.load %arg3[%c3_48, %c0_49, %c0_50] : memref<9x128x128xf32, #tpu.memory_space<vmem>>, vector<1x128x128xf32>
    %58 = vector.shape_cast %57 : vector<1x128x128xf32> to vector<128x128xf32>
    %cst_51 = arith.constant dense<0.000000e+00> : vector<256x128xf32>
    %59 = tpu.matmul %55, %58, %cst_51 {dimension_numbers = #tpu.dot_dimension_numbers<[1], [0], [0], [1], [0, 0, 1, 1], [], []>} : vector<256x128xf32>, vector<128x128xf32>, vector<256x128xf32> -> vector<256x128xf32>
    %60 = arith.addf %56, %59 : vector<256x128xf32>
    %c0_52 = arith.constant 0 : index
    %c0_53 = arith.constant 0 : index
    %61 = vector.load %arg8[%c0_52, %c0_53] : memref<256x128xf32, #tpu.memory_space<vmem>>, vector<256x128xf32>
    tpu.vector_store %arg8[%c0_52, %c0_53], %60 {strides = array<i32>} : memref<256x128xf32, #tpu.memory_space<vmem>>, vector<256x128xf32>,
    %c0_54 = arith.constant 0 : index
    %c0_55 = arith.constant 0 : index
    %c0_56 = arith.constant 0 : index
    %62 = vector.load %arg1[%c0_54, %c0_55, %c0_56] : memref<1x256x128xf32, #tpu.memory_space<vmem>>, vector<1x256x128xf32>
    %63 = vector.shape_cast %62 : vector<1x256x128xf32> to vector<256x128xf32>
    %c0_57 = arith.constant 0 : index
    %c0_58 = arith.constant 0 : index
    %64 = vector.load %arg8[%c0_57, %c0_58] : memref<256x128xf32, #tpu.memory_space<vmem>>, vector<256x128xf32>
    %c4 = arith.constant 4 : index
    %c0_59 = arith.constant 0 : index
    %c0_60 = arith.constant 0 : index
    %65 = vector.load %arg3[%c4, %c0_59, %c0_60] : memref<9x128x128xf32, #tpu.memory_space<vmem>>, vector<1x128x128xf32>
    %66 = vector.shape_cast %65 : vector<1x128x128xf32> to vector<128x128xf32>
    %cst_61 = arith.constant dense<0.000000e+00> : vector<256x128xf32>
    %67 = tpu.matmul %63, %66, %cst_61 {dimension_numbers = #tpu.dot_dimension_numbers<[1], [0], [0], [1], [0, 0, 1, 1], [], []>} : vector<256x128xf32>, vector<128x128xf32>, vector<256x128xf32> -> vector<256x128xf32>
    %68 = arith.addf %64, %67 : vector<256x128xf32>
    %c0_62 = arith.constant 0 : index
    %c0_63 = arith.constant 0 : index
    %69 = vector.load %arg8[%c0_62, %c0_63] : memref<256x128xf32, #tpu.memory_space<vmem>>, vector<256x128xf32>
    tpu.vector_store %arg8[%c0_62, %c0_63], %68 {strides = array<i32>} : memref<256x128xf32, #tpu.memory_space<vmem>>, vector<256x128xf32>,
    %c0_64 = arith.constant 0 : index
    %c0_65 = arith.constant 0 : index
    %c0_66 = arith.constant 0 : index
    %70 = vector.load %arg1[%c0_64, %c0_65, %c0_66] : memref<1x256x128xf32, #tpu.memory_space<vmem>>, vector<1x256x128xf32>
    %71 = vector.shape_cast %70 : vector<1x256x128xf32> to vector<256x128xf32>
    %72 = vector.extract_strided_slice %71 {offsets = [1, 0], sizes = [255, 128], strides = [1, 1]} : vector<256x128xf32> to vector<255x128xf32>
    %73 = vector.extract_strided_slice %71 {offsets = [0, 0], sizes = [1, 128], strides = [1, 1]} : vector<256x128xf32> to vector<1x128xf32>
    %74 = tpu.concatenate %72, %73 in 0 : vector<255x128xf32>, vector<1x128xf32> -> vector<256x128xf32>
    %c5 = arith.constant 5 : index
    %c0_67 = arith.constant 0 : index
    %c0_68 = arith.constant 0 : index
    %75 = vector.load %arg2[%c5, %c0_67, %c0_68] : memref<9x256x1xf32, #tpu.memory_space<vmem>>, vector<1x256x1xf32>
    %76 = vector.shape_cast %75 : vector<1x256x1xf32> to vector<256x1xf32>
    %77 = vector.broadcast %76 : vector<256x1xf32> to vector<256x128xf32>
    %78 = arith.mulf %74, %77 : vector<256x128xf32>
    %c0_69 = arith.constant 0 : index
    %c0_70 = arith.constant 0 : index
    %79 = vector.load %arg8[%c0_69, %c0_70] : memref<256x128xf32, #tpu.memory_space<vmem>>, vector<256x128xf32>
    %c5_71 = arith.constant 5 : index
    %c0_72 = arith.constant 0 : index
    %c0_73 = arith.constant 0 : index
    %80 = vector.load %arg3[%c5_71, %c0_72, %c0_73] : memref<9x128x128xf32, #tpu.memory_space<vmem>>, vector<1x128x128xf32>
    %81 = vector.shape_cast %80 : vector<1x128x128xf32> to vector<128x128xf32>
    %cst_74 = arith.constant dense<0.000000e+00> : vector<256x128xf32>
    %82 = tpu.matmul %78, %81, %cst_74 {dimension_numbers = #tpu.dot_dimension_numbers<[1], [0], [0], [1], [0, 0, 1, 1], [], []>} : vector<256x128xf32>, vector<128x128xf32>, vector<256x128xf32> -> vector<256x128xf32>
    %83 = arith.addf %79, %82 : vector<256x128xf32>
    %c0_75 = arith.constant 0 : index
    %c0_76 = arith.constant 0 : index
    %84 = vector.load %arg8[%c0_75, %c0_76] : memref<256x128xf32, #tpu.memory_space<vmem>>, vector<256x128xf32>
    tpu.vector_store %arg8[%c0_75, %c0_76], %83 {strides = array<i32>} : memref<256x128xf32, #tpu.memory_space<vmem>>, vector<256x128xf32>,
    %c0_77 = arith.constant 0 : index
    %c0_78 = arith.constant 0 : index
    %c0_79 = arith.constant 0 : index
    %85 = vector.load %arg1[%c0_77, %c0_78, %c0_79] : memref<1x256x128xf32, #tpu.memory_space<vmem>>, vector<1x256x128xf32>
    %86 = vector.shape_cast %85 : vector<1x256x128xf32> to vector<256x128xf32>
    %87 = vector.extract_strided_slice %86 {offsets = [15, 0], sizes = [241, 128], strides = [1, 1]} : vector<256x128xf32> to vector<241x128xf32>
    %88 = vector.extract_strided_slice %86 {offsets = [0, 0], sizes = [15, 128], strides = [1, 1]} : vector<256x128xf32> to vector<15x128xf32>
    %89 = tpu.concatenate %87, %88 in 0 : vector<241x128xf32>, vector<15x128xf32> -> vector<256x128xf32>
    %c6 = arith.constant 6 : index
    %c0_80 = arith.constant 0 : index
    %c0_81 = arith.constant 0 : index
    %90 = vector.load %arg2[%c6, %c0_80, %c0_81] : memref<9x256x1xf32, #tpu.memory_space<vmem>>, vector<1x256x1xf32>
    %91 = vector.shape_cast %90 : vector<1x256x1xf32> to vector<256x1xf32>
    %92 = vector.broadcast %91 : vector<256x1xf32> to vector<256x128xf32>
    %93 = arith.mulf %89, %92 : vector<256x128xf32>
    %c0_82 = arith.constant 0 : index
    %c0_83 = arith.constant 0 : index
    %94 = vector.load %arg8[%c0_82, %c0_83] : memref<256x128xf32, #tpu.memory_space<vmem>>, vector<256x128xf32>
    %c6_84 = arith.constant 6 : index
    %c0_85 = arith.constant 0 : index
    %c0_86 = arith.constant 0 : index
    %95 = vector.load %arg3[%c6_84, %c0_85, %c0_86] : memref<9x128x128xf32, #tpu.memory_space<vmem>>, vector<1x128x128xf32>
    %96 = vector.shape_cast %95 : vector<1x128x128xf32> to vector<128x128xf32>
    %cst_87 = arith.constant dense<0.000000e+00> : vector<256x128xf32>
    %97 = tpu.matmul %93, %96, %cst_87 {dimension_numbers = #tpu.dot_dimension_numbers<[1], [0], [0], [1], [0, 0, 1, 1], [], []>} : vector<256x128xf32>, vector<128x128xf32>, vector<256x128xf32> -> vector<256x128xf32>
    %98 = arith.addf %94, %97 : vector<256x128xf32>
    %c0_88 = arith.constant 0 : index
    %c0_89 = arith.constant 0 : index
    %99 = vector.load %arg8[%c0_88, %c0_89] : memref<256x128xf32, #tpu.memory_space<vmem>>, vector<256x128xf32>
    tpu.vector_store %arg8[%c0_88, %c0_89], %98 {strides = array<i32>} : memref<256x128xf32, #tpu.memory_space<vmem>>, vector<256x128xf32>,
    %c0_90 = arith.constant 0 : index
    %c0_91 = arith.constant 0 : index
    %c0_92 = arith.constant 0 : index
    %100 = vector.load %arg1[%c0_90, %c0_91, %c0_92] : memref<1x256x128xf32, #tpu.memory_space<vmem>>, vector<1x256x128xf32>
    %101 = vector.shape_cast %100 : vector<1x256x128xf32> to vector<256x128xf32>
    %102 = vector.extract_strided_slice %101 {offsets = [16, 0], sizes = [240, 128], strides = [1, 1]} : vector<256x128xf32> to vector<240x128xf32>
    %103 = vector.extract_strided_slice %101 {offsets = [0, 0], sizes = [16, 128], strides = [1, 1]} : vector<256x128xf32> to vector<16x128xf32>
    %104 = tpu.concatenate %102, %103 in 0 : vector<240x128xf32>, vector<16x128xf32> -> vector<256x128xf32>
    %c7 = arith.constant 7 : index
    %c0_93 = arith.constant 0 : index
    %c0_94 = arith.constant 0 : index
    %105 = vector.load %arg2[%c7, %c0_93, %c0_94] : memref<9x256x1xf32, #tpu.memory_space<vmem>>, vector<1x256x1xf32>
    %106 = vector.shape_cast %105 : vector<1x256x1xf32> to vector<256x1xf32>
    %107 = vector.broadcast %106 : vector<256x1xf32> to vector<256x128xf32>
    %108 = arith.mulf %104, %107 : vector<256x128xf32>
    %c0_95 = arith.constant 0 : index
    %c0_96 = arith.constant 0 : index
    %109 = vector.load %arg8[%c0_95, %c0_96] : memref<256x128xf32, #tpu.memory_space<vmem>>, vector<256x128xf32>
    %c7_97 = arith.constant 7 : index
    %c0_98 = arith.constant 0 : index
    %c0_99 = arith.constant 0 : index
    %110 = vector.load %arg3[%c7_97, %c0_98, %c0_99] : memref<9x128x128xf32, #tpu.memory_space<vmem>>, vector<1x128x128xf32>
    %111 = vector.shape_cast %110 : vector<1x128x128xf32> to vector<128x128xf32>
    %cst_100 = arith.constant dense<0.000000e+00> : vector<256x128xf32>
    %112 = tpu.matmul %108, %111, %cst_100 {dimension_numbers = #tpu.dot_dimension_numbers<[1], [0], [0], [1], [0, 0, 1, 1], [], []>} : vector<256x128xf32>, vector<128x128xf32>, vector<256x128xf32> -> vector<256x128xf32>
    %113 = arith.addf %109, %112 : vector<256x128xf32>
    %c0_101 = arith.constant 0 : index
    %c0_102 = arith.constant 0 : index
    %114 = vector.load %arg8[%c0_101, %c0_102] : memref<256x128xf32, #tpu.memory_space<vmem>>, vector<256x128xf32>
    tpu.vector_store %arg8[%c0_101, %c0_102], %113 {strides = array<i32>} : memref<256x128xf32, #tpu.memory_space<vmem>>, vector<256x128xf32>,
    %c0_103 = arith.constant 0 : index
    %c0_104 = arith.constant 0 : index
    %c0_105 = arith.constant 0 : index
    %115 = vector.load %arg1[%c0_103, %c0_104, %c0_105] : memref<1x256x128xf32, #tpu.memory_space<vmem>>, vector<1x256x128xf32>
    %116 = vector.shape_cast %115 : vector<1x256x128xf32> to vector<256x128xf32>
    %117 = vector.extract_strided_slice %116 {offsets = [17, 0], sizes = [239, 128], strides = [1, 1]} : vector<256x128xf32> to vector<239x128xf32>
    %118 = vector.extract_strided_slice %116 {offsets = [0, 0], sizes = [17, 128], strides = [1, 1]} : vector<256x128xf32> to vector<17x128xf32>
    %119 = tpu.concatenate %117, %118 in 0 : vector<239x128xf32>, vector<17x128xf32> -> vector<256x128xf32>
    %c8 = arith.constant 8 : index
    %c0_106 = arith.constant 0 : index
    %c0_107 = arith.constant 0 : index
    %120 = vector.load %arg2[%c8, %c0_106, %c0_107] : memref<9x256x1xf32, #tpu.memory_space<vmem>>, vector<1x256x1xf32>
    %121 = vector.shape_cast %120 : vector<1x256x1xf32> to vector<256x1xf32>
    %122 = vector.broadcast %121 : vector<256x1xf32> to vector<256x128xf32>
    %123 = arith.mulf %119, %122 : vector<256x128xf32>
    %c0_108 = arith.constant 0 : index
    %c0_109 = arith.constant 0 : index
    %124 = vector.load %arg8[%c0_108, %c0_109] : memref<256x128xf32, #tpu.memory_space<vmem>>, vector<256x128xf32>
    %c8_110 = arith.constant 8 : index
    %c0_111 = arith.constant 0 : index
    %c0_112 = arith.constant 0 : index
    %125 = vector.load %arg3[%c8_110, %c0_111, %c0_112] : memref<9x128x128xf32, #tpu.memory_space<vmem>>, vector<1x128x128xf32>
    %126 = vector.shape_cast %125 : vector<1x128x128xf32> to vector<128x128xf32>
    %cst_113 = arith.constant dense<0.000000e+00> : vector<256x128xf32>
    %127 = tpu.matmul %123, %126, %cst_113 {dimension_numbers = #tpu.dot_dimension_numbers<[1], [0], [0], [1], [0, 0, 1, 1], [], []>} : vector<256x128xf32>, vector<128x128xf32>, vector<256x128xf32> -> vector<256x128xf32>
    %128 = arith.addf %124, %127 : vector<256x128xf32>
    %c0_114 = arith.constant 0 : index
    %c0_115 = arith.constant 0 : index
    %129 = vector.load %arg8[%c0_114, %c0_115] : memref<256x128xf32, #tpu.memory_space<vmem>>, vector<256x128xf32>
    tpu.vector_store %arg8[%c0_114, %c0_115], %128 {strides = array<i32>} : memref<256x128xf32, #tpu.memory_space<vmem>>, vector<256x128xf32>,
    %c0_116 = arith.constant 0 : index
    %c0_117 = arith.constant 0 : index
    %130 = vector.load %arg8[%c0_116, %c0_117] : memref<256x128xf32, #tpu.memory_space<vmem>>, vector<256x128xf32>
    %c0_118 = arith.constant 0 : index
    %c0_119 = arith.constant 0 : index
    %131 = vector.load %arg4[%c0_118, %c0_119] : memref<1x128xf32, #tpu.memory_space<vmem>>, vector<1x128xf32>
    %132 = vector.broadcast %131 : vector<1x128xf32> to vector<256x128xf32>
    %133 = arith.addf %130, %132 : vector<256x128xf32>
    %cst_120 = arith.constant 0.000000e+00 : f32
    %134 = vector.broadcast %cst_120 : f32 to vector<256x128xf32>
    %135 = arith.maximumf %133, %134 : vector<256x128xf32>
    %c0_121 = arith.constant 0 : index
    %c0_122 = arith.constant 0 : index
    %136 = vector.load %arg9[%c0_121, %c0_122] : memref<256x128xf32, #tpu.memory_space<vmem>>, vector<256x128xf32>
    tpu.vector_store %arg9[%c0_121, %c0_122], %135 {strides = array<i32>} : memref<256x128xf32, #tpu.memory_space<vmem>>, vector<256x128xf32>,
    %cst_123 = arith.constant 0.000000e+00 : f32
    %137 = vector.broadcast %cst_123 : f32 to vector<256x128xf32>
    %c0_124 = arith.constant 0 : index
    %c0_125 = arith.constant 0 : index
    %138 = vector.load %arg10[%c0_124, %c0_125] : memref<256x128xf32, #tpu.memory_space<vmem>>, vector<256x128xf32>
    tpu.vector_store %arg10[%c0_124, %c0_125], %137 {strides = array<i32>} : memref<256x128xf32, #tpu.memory_space<vmem>>, vector<256x128xf32>,
    %c0_126 = arith.constant 0 : index
    %c0_127 = arith.constant 0 : index
    %139 = vector.load %arg9[%c0_126, %c0_127] : memref<256x128xf32, #tpu.memory_space<vmem>>, vector<256x128xf32>
    %140 = vector.extract_strided_slice %139 {offsets = [239, 0], sizes = [17, 128], strides = [1, 1]} : vector<256x128xf32> to vector<17x128xf32>
    %141 = vector.extract_strided_slice %139 {offsets = [0, 0], sizes = [239, 128], strides = [1, 1]} : vector<256x128xf32> to vector<239x128xf32>
    %142 = tpu.concatenate %140, %141 in 0 : vector<17x128xf32>, vector<239x128xf32> -> vector<256x128xf32>
    %c0_128 = arith.constant 0 : index
    %c0_129 = arith.constant 0 : index
    %c0_130 = arith.constant 0 : index
    %143 = vector.load %arg2[%c0_128, %c0_129, %c0_130] : memref<9x256x1xf32, #tpu.memory_space<vmem>>, vector<1x256x1xf32>
    %144 = vector.shape_cast %143 : vector<1x256x1xf32> to vector<256x1xf32>
    %145 = vector.broadcast %144 : vector<256x1xf32> to vector<256x128xf32>
    %146 = arith.mulf %142, %145 : vector<256x128xf32>
    %c0_131 = arith.constant 0 : index
    %c0_132 = arith.constant 0 : index
    %147 = vector.load %arg10[%c0_131, %c0_132] : memref<256x128xf32, #tpu.memory_space<vmem>>, vector<256x128xf32>
    %c0_133 = arith.constant 0 : index
    %c0_134 = arith.constant 0 : index
    %c0_135 = arith.constant 0 : index
    %148 = vector.load %arg5[%c0_133, %c0_134, %c0_135] : memref<9x128x128xf32, #tpu.memory_space<vmem>>, vector<1x128x128xf32>
    %149 = vector.shape_cast %148 : vector<1x128x128xf32> to vector<128x128xf32>
    %cst_136 = arith.constant dense<0.000000e+00> : vector<256x128xf32>
    %150 = tpu.matmul %146, %149, %cst_136 {dimension_numbers = #tpu.dot_dimension_numbers<[1], [0], [0], [1], [0, 0, 1, 1], [], []>} : vector<256x128xf32>, vector<128x128xf32>, vector<256x128xf32> -> vector<256x128xf32>
    %151 = arith.addf %147, %150 : vector<256x128xf32>
    %c0_137 = arith.constant 0 : index
    %c0_138 = arith.constant 0 : index
    %152 = vector.load %arg10[%c0_137, %c0_138] : memref<256x128xf32, #tpu.memory_space<vmem>>, vector<256x128xf32>
    tpu.vector_store %arg10[%c0_137, %c0_138], %151 {strides = array<i32>} : memref<256x128xf32, #tpu.memory_space<vmem>>, vector<256x128xf32>,
    %c0_139 = arith.constant 0 : index
    %c0_140 = arith.constant 0 : index
    %153 = vector.load %arg9[%c0_139, %c0_140] : memref<256x128xf32, #tpu.memory_space<vmem>>, vector<256x128xf32>
    %154 = vector.extract_strided_slice %153 {offsets = [240, 0], sizes = [16, 128], strides = [1, 1]} : vector<256x128xf32> to vector<16x128xf32>
    %155 = vector.extract_strided_slice %153 {offsets = [0, 0], sizes = [240, 128], strides = [1, 1]} : vector<256x128xf32> to vector<240x128xf32>
    %156 = tpu.concatenate %154, %155 in 0 : vector<16x128xf32>, vector<240x128xf32> -> vector<256x128xf32>
    %c1_141 = arith.constant 1 : index
    %c0_142 = arith.constant 0 : index
    %c0_143 = arith.constant 0 : index
    %157 = vector.load %arg2[%c1_141, %c0_142, %c0_143] : memref<9x256x1xf32, #tpu.memory_space<vmem>>, vector<1x256x1xf32>
    %158 = vector.shape_cast %157 : vector<1x256x1xf32> to vector<256x1xf32>
    %159 = vector.broadcast %158 : vector<256x1xf32> to vector<256x128xf32>
    %160 = arith.mulf %156, %159 : vector<256x128xf32>
    %c0_144 = arith.constant 0 : index
    %c0_145 = arith.constant 0 : index
    %161 = vector.load %arg10[%c0_144, %c0_145] : memref<256x128xf32, #tpu.memory_space<vmem>>, vector<256x128xf32>
    %c1_146 = arith.constant 1 : index
    %c0_147 = arith.constant 0 : index
    %c0_148 = arith.constant 0 : index
    %162 = vector.load %arg5[%c1_146, %c0_147, %c0_148] : memref<9x128x128xf32, #tpu.memory_space<vmem>>, vector<1x128x128xf32>
    %163 = vector.shape_cast %162 : vector<1x128x128xf32> to vector<128x128xf32>
    %cst_149 = arith.constant dense<0.000000e+00> : vector<256x128xf32>
    %164 = tpu.matmul %160, %163, %cst_149 {dimension_numbers = #tpu.dot_dimension_numbers<[1], [0], [0], [1], [0, 0, 1, 1], [], []>} : vector<256x128xf32>, vector<128x128xf32>, vector<256x128xf32> -> vector<256x128xf32>
    %165 = arith.addf %161, %164 : vector<256x128xf32>
    %c0_150 = arith.constant 0 : index
    %c0_151 = arith.constant 0 : index
    %166 = vector.load %arg10[%c0_150, %c0_151] : memref<256x128xf32, #tpu.memory_space<vmem>>, vector<256x128xf32>
    tpu.vector_store %arg10[%c0_150, %c0_151], %165 {strides = array<i32>} : memref<256x128xf32, #tpu.memory_space<vmem>>, vector<256x128xf32>,
    %c0_152 = arith.constant 0 : index
    %c0_153 = arith.constant 0 : index
    %167 = vector.load %arg9[%c0_152, %c0_153] : memref<256x128xf32, #tpu.memory_space<vmem>>, vector<256x128xf32>
    %168 = vector.extract_strided_slice %167 {offsets = [241, 0], sizes = [15, 128], strides = [1, 1]} : vector<256x128xf32> to vector<15x128xf32>
    %169 = vector.extract_strided_slice %167 {offsets = [0, 0], sizes = [241, 128], strides = [1, 1]} : vector<256x128xf32> to vector<241x128xf32>
    %170 = tpu.concatenate %168, %169 in 0 : vector<15x128xf32>, vector<241x128xf32> -> vector<256x128xf32>
    %c2_154 = arith.constant 2 : index
    %c0_155 = arith.constant 0 : index
    %c0_156 = arith.constant 0 : index
    %171 = vector.load %arg2[%c2_154, %c0_155, %c0_156] : memref<9x256x1xf32, #tpu.memory_space<vmem>>, vector<1x256x1xf32>
    %172 = vector.shape_cast %171 : vector<1x256x1xf32> to vector<256x1xf32>
    %173 = vector.broadcast %172 : vector<256x1xf32> to vector<256x128xf32>
    %174 = arith.mulf %170, %173 : vector<256x128xf32>
    %c0_157 = arith.constant 0 : index
    %c0_158 = arith.constant 0 : index
    %175 = vector.load %arg10[%c0_157, %c0_158] : memref<256x128xf32, #tpu.memory_space<vmem>>, vector<256x128xf32>
    %c2_159 = arith.constant 2 : index
    %c0_160 = arith.constant 0 : index
    %c0_161 = arith.constant 0 : index
    %176 = vector.load %arg5[%c2_159, %c0_160, %c0_161] : memref<9x128x128xf32, #tpu.memory_space<vmem>>, vector<1x128x128xf32>
    %177 = vector.shape_cast %176 : vector<1x128x128xf32> to vector<128x128xf32>
    %cst_162 = arith.constant dense<0.000000e+00> : vector<256x128xf32>
    %178 = tpu.matmul %174, %177, %cst_162 {dimension_numbers = #tpu.dot_dimension_numbers<[1], [0], [0], [1], [0, 0, 1, 1], [], []>} : vector<256x128xf32>, vector<128x128xf32>, vector<256x128xf32> -> vector<256x128xf32>
    %179 = arith.addf %175, %178 : vector<256x128xf32>
    %c0_163 = arith.constant 0 : index
    %c0_164 = arith.constant 0 : index
    %180 = vector.load %arg10[%c0_163, %c0_164] : memref<256x128xf32, #tpu.memory_space<vmem>>, vector<256x128xf32>
    tpu.vector_store %arg10[%c0_163, %c0_164], %179 {strides = array<i32>} : memref<256x128xf32, #tpu.memory_space<vmem>>, vector<256x128xf32>,
    %c0_165 = arith.constant 0 : index
    %c0_166 = arith.constant 0 : index
    %181 = vector.load %arg9[%c0_165, %c0_166] : memref<256x128xf32, #tpu.memory_space<vmem>>, vector<256x128xf32>
    %182 = vector.extract_strided_slice %181 {offsets = [255, 0], sizes = [1, 128], strides = [1, 1]} : vector<256x128xf32> to vector<1x128xf32>
    %183 = vector.extract_strided_slice %181 {offsets = [0, 0], sizes = [255, 128], strides = [1, 1]} : vector<256x128xf32> to vector<255x128xf32>
    %184 = tpu.concatenate %182, %183 in 0 : vector<1x128xf32>, vector<255x128xf32> -> vector<256x128xf32>
    %c3_167 = arith.constant 3 : index
    %c0_168 = arith.constant 0 : index
    %c0_169 = arith.constant 0 : index
    %185 = vector.load %arg2[%c3_167, %c0_168, %c0_169] : memref<9x256x1xf32, #tpu.memory_space<vmem>>, vector<1x256x1xf32>
    %186 = vector.shape_cast %185 : vector<1x256x1xf32> to vector<256x1xf32>
    %187 = vector.broadcast %186 : vector<256x1xf32> to vector<256x128xf32>
    %188 = arith.mulf %184, %187 : vector<256x128xf32>
    %c0_170 = arith.constant 0 : index
    %c0_171 = arith.constant 0 : index
    %189 = vector.load %arg10[%c0_170, %c0_171] : memref<256x128xf32, #tpu.memory_space<vmem>>, vector<256x128xf32>
    %c3_172 = arith.constant 3 : index
    %c0_173 = arith.constant 0 : index
    %c0_174 = arith.constant 0 : index
    %190 = vector.load %arg5[%c3_172, %c0_173, %c0_174] : memref<9x128x128xf32, #tpu.memory_space<vmem>>, vector<1x128x128xf32>
    %191 = vector.shape_cast %190 : vector<1x128x128xf32> to vector<128x128xf32>
    %cst_175 = arith.constant dense<0.000000e+00> : vector<256x128xf32>
    %192 = tpu.matmul %188, %191, %cst_175 {dimension_numbers = #tpu.dot_dimension_numbers<[1], [0], [0], [1], [0, 0, 1, 1], [], []>} : vector<256x128xf32>, vector<128x128xf32>, vector<256x128xf32> -> vector<256x128xf32>
    %193 = arith.addf %189, %192 : vector<256x128xf32>
    %c0_176 = arith.constant 0 : index
    %c0_177 = arith.constant 0 : index
    %194 = vector.load %arg10[%c0_176, %c0_177] : memref<256x128xf32, #tpu.memory_space<vmem>>, vector<256x128xf32>
    tpu.vector_store %arg10[%c0_176, %c0_177], %193 {strides = array<i32>} : memref<256x128xf32, #tpu.memory_space<vmem>>, vector<256x128xf32>,
    %c0_178 = arith.constant 0 : index
    %c0_179 = arith.constant 0 : index
    %195 = vector.load %arg9[%c0_178, %c0_179] : memref<256x128xf32, #tpu.memory_space<vmem>>, vector<256x128xf32>
    %c0_180 = arith.constant 0 : index
    %c0_181 = arith.constant 0 : index
    %196 = vector.load %arg10[%c0_180, %c0_181] : memref<256x128xf32, #tpu.memory_space<vmem>>, vector<256x128xf32>
    %c4_182 = arith.constant 4 : index
    %c0_183 = arith.constant 0 : index
    %c0_184 = arith.constant 0 : index
    %197 = vector.load %arg5[%c4_182, %c0_183, %c0_184] : memref<9x128x128xf32, #tpu.memory_space<vmem>>, vector<1x128x128xf32>
    %198 = vector.shape_cast %197 : vector<1x128x128xf32> to vector<128x128xf32>
    %cst_185 = arith.constant dense<0.000000e+00> : vector<256x128xf32>
    %199 = tpu.matmul %195, %198, %cst_185 {dimension_numbers = #tpu.dot_dimension_numbers<[1], [0], [0], [1], [0, 0, 1, 1], [], []>} : vector<256x128xf32>, vector<128x128xf32>, vector<256x128xf32> -> vector<256x128xf32>
    %200 = arith.addf %196, %199 : vector<256x128xf32>
    %c0_186 = arith.constant 0 : index
    %c0_187 = arith.constant 0 : index
    %201 = vector.load %arg10[%c0_186, %c0_187] : memref<256x128xf32, #tpu.memory_space<vmem>>, vector<256x128xf32>
    tpu.vector_store %arg10[%c0_186, %c0_187], %200 {strides = array<i32>} : memref<256x128xf32, #tpu.memory_space<vmem>>, vector<256x128xf32>,
    %c0_188 = arith.constant 0 : index
    %c0_189 = arith.constant 0 : index
    %202 = vector.load %arg9[%c0_188, %c0_189] : memref<256x128xf32, #tpu.memory_space<vmem>>, vector<256x128xf32>
    %203 = vector.extract_strided_slice %202 {offsets = [1, 0], sizes = [255, 128], strides = [1, 1]} : vector<256x128xf32> to vector<255x128xf32>
    %204 = vector.extract_strided_slice %202 {offsets = [0, 0], sizes = [1, 128], strides = [1, 1]} : vector<256x128xf32> to vector<1x128xf32>
    %205 = tpu.concatenate %203, %204 in 0 : vector<255x128xf32>, vector<1x128xf32> -> vector<256x128xf32>
    %c5_190 = arith.constant 5 : index
    %c0_191 = arith.constant 0 : index
    %c0_192 = arith.constant 0 : index
    %206 = vector.load %arg2[%c5_190, %c0_191, %c0_192] : memref<9x256x1xf32, #tpu.memory_space<vmem>>, vector<1x256x1xf32>
    %207 = vector.shape_cast %206 : vector<1x256x1xf32> to vector<256x1xf32>
    %208 = vector.broadcast %207 : vector<256x1xf32> to vector<256x128xf32>
    %209 = arith.mulf %205, %208 : vector<256x128xf32>
    %c0_193 = arith.constant 0 : index
    %c0_194 = arith.constant 0 : index
    %210 = vector.load %arg10[%c0_193, %c0_194] : memref<256x128xf32, #tpu.memory_space<vmem>>, vector<256x128xf32>
    %c5_195 = arith.constant 5 : index
    %c0_196 = arith.constant 0 : index
    %c0_197 = arith.constant 0 : index
    %211 = vector.load %arg5[%c5_195, %c0_196, %c0_197] : memref<9x128x128xf32, #tpu.memory_space<vmem>>, vector<1x128x128xf32>
    %212 = vector.shape_cast %211 : vector<1x128x128xf32> to vector<128x128xf32>
    %cst_198 = arith.constant dense<0.000000e+00> : vector<256x128xf32>
    %213 = tpu.matmul %209, %212, %cst_198 {dimension_numbers = #tpu.dot_dimension_numbers<[1], [0], [0], [1], [0, 0, 1, 1], [], []>} : vector<256x128xf32>, vector<128x128xf32>, vector<256x128xf32> -> vector<256x128xf32>
    %214 = arith.addf %210, %213 : vector<256x128xf32>
    %c0_199 = arith.constant 0 : index
    %c0_200 = arith.constant 0 : index
    %215 = vector.load %arg10[%c0_199, %c0_200] : memref<256x128xf32, #tpu.memory_space<vmem>>, vector<256x128xf32>
    tpu.vector_store %arg10[%c0_199, %c0_200], %214 {strides = array<i32>} : memref<256x128xf32, #tpu.memory_space<vmem>>, vector<256x128xf32>,
    %c0_201 = arith.constant 0 : index
    %c0_202 = arith.constant 0 : index
    %216 = vector.load %arg9[%c0_201, %c0_202] : memref<256x128xf32, #tpu.memory_space<vmem>>, vector<256x128xf32>
    %217 = vector.extract_strided_slice %216 {offsets = [15, 0], sizes = [241, 128], strides = [1, 1]} : vector<256x128xf32> to vector<241x128xf32>
    %218 = vector.extract_strided_slice %216 {offsets = [0, 0], sizes = [15, 128], strides = [1, 1]} : vector<256x128xf32> to vector<15x128xf32>
    %219 = tpu.concatenate %217, %218 in 0 : vector<241x128xf32>, vector<15x128xf32> -> vector<256x128xf32>
    %c6_203 = arith.constant 6 : index
    %c0_204 = arith.constant 0 : index
    %c0_205 = arith.constant 0 : index
    %220 = vector.load %arg2[%c6_203, %c0_204, %c0_205] : memref<9x256x1xf32, #tpu.memory_space<vmem>>, vector<1x256x1xf32>
    %221 = vector.shape_cast %220 : vector<1x256x1xf32> to vector<256x1xf32>
    %222 = vector.broadcast %221 : vector<256x1xf32> to vector<256x128xf32>
    %223 = arith.mulf %219, %222 : vector<256x128xf32>
    %c0_206 = arith.constant 0 : index
    %c0_207 = arith.constant 0 : index
    %224 = vector.load %arg10[%c0_206, %c0_207] : memref<256x128xf32, #tpu.memory_space<vmem>>, vector<256x128xf32>
    %c6_208 = arith.constant 6 : index
    %c0_209 = arith.constant 0 : index
    %c0_210 = arith.constant 0 : index
    %225 = vector.load %arg5[%c6_208, %c0_209, %c0_210] : memref<9x128x128xf32, #tpu.memory_space<vmem>>, vector<1x128x128xf32>
    %226 = vector.shape_cast %225 : vector<1x128x128xf32> to vector<128x128xf32>
    %cst_211 = arith.constant dense<0.000000e+00> : vector<256x128xf32>
    %227 = tpu.matmul %223, %226, %cst_211 {dimension_numbers = #tpu.dot_dimension_numbers<[1], [0], [0], [1], [0, 0, 1, 1], [], []>} : vector<256x128xf32>, vector<128x128xf32>, vector<256x128xf32> -> vector<256x128xf32>
    %228 = arith.addf %224, %227 : vector<256x128xf32>
    %c0_212 = arith.constant 0 : index
    %c0_213 = arith.constant 0 : index
    %229 = vector.load %arg10[%c0_212, %c0_213] : memref<256x128xf32, #tpu.memory_space<vmem>>, vector<256x128xf32>
    tpu.vector_store %arg10[%c0_212, %c0_213], %228 {strides = array<i32>} : memref<256x128xf32, #tpu.memory_space<vmem>>, vector<256x128xf32>,
    %c0_214 = arith.constant 0 : index
    %c0_215 = arith.constant 0 : index
    %230 = vector.load %arg9[%c0_214, %c0_215] : memref<256x128xf32, #tpu.memory_space<vmem>>, vector<256x128xf32>
    %231 = vector.extract_strided_slice %230 {offsets = [16, 0], sizes = [240, 128], strides = [1, 1]} : vector<256x128xf32> to vector<240x128xf32>
    %232 = vector.extract_strided_slice %230 {offsets = [0, 0], sizes = [16, 128], strides = [1, 1]} : vector<256x128xf32> to vector<16x128xf32>
    %233 = tpu.concatenate %231, %232 in 0 : vector<240x128xf32>, vector<16x128xf32> -> vector<256x128xf32>
    %c7_216 = arith.constant 7 : index
    %c0_217 = arith.constant 0 : index
    %c0_218 = arith.constant 0 : index
    %234 = vector.load %arg2[%c7_216, %c0_217, %c0_218] : memref<9x256x1xf32, #tpu.memory_space<vmem>>, vector<1x256x1xf32>
    %235 = vector.shape_cast %234 : vector<1x256x1xf32> to vector<256x1xf32>
    %236 = vector.broadcast %235 : vector<256x1xf32> to vector<256x128xf32>
    %237 = arith.mulf %233, %236 : vector<256x128xf32>
    %c0_219 = arith.constant 0 : index
    %c0_220 = arith.constant 0 : index
    %238 = vector.load %arg10[%c0_219, %c0_220] : memref<256x128xf32, #tpu.memory_space<vmem>>, vector<256x128xf32>
    %c7_221 = arith.constant 7 : index
    %c0_222 = arith.constant 0 : index
    %c0_223 = arith.constant 0 : index
    %239 = vector.load %arg5[%c7_221, %c0_222, %c0_223] : memref<9x128x128xf32, #tpu.memory_space<vmem>>, vector<1x128x128xf32>
    %240 = vector.shape_cast %239 : vector<1x128x128xf32> to vector<128x128xf32>
    %cst_224 = arith.constant dense<0.000000e+00> : vector<256x128xf32>
    %241 = tpu.matmul %237, %240, %cst_224 {dimension_numbers = #tpu.dot_dimension_numbers<[1], [0], [0], [1], [0, 0, 1, 1], [], []>} : vector<256x128xf32>, vector<128x128xf32>, vector<256x128xf32> -> vector<256x128xf32>
    %242 = arith.addf %238, %241 : vector<256x128xf32>
    %c0_225 = arith.constant 0 : index
    %c0_226 = arith.constant 0 : index
    %243 = vector.load %arg10[%c0_225, %c0_226] : memref<256x128xf32, #tpu.memory_space<vmem>>, vector<256x128xf32>
    tpu.vector_store %arg10[%c0_225, %c0_226], %242 {strides = array<i32>} : memref<256x128xf32, #tpu.memory_space<vmem>>, vector<256x128xf32>,
    %c0_227 = arith.constant 0 : index
    %c0_228 = arith.constant 0 : index
    %244 = vector.load %arg9[%c0_227, %c0_228] : memref<256x128xf32, #tpu.memory_space<vmem>>, vector<256x128xf32>
    %245 = vector.extract_strided_slice %244 {offsets = [17, 0], sizes = [239, 128], strides = [1, 1]} : vector<256x128xf32> to vector<239x128xf32>
    %246 = vector.extract_strided_slice %244 {offsets = [0, 0], sizes = [17, 128], strides = [1, 1]} : vector<256x128xf32> to vector<17x128xf32>
    %247 = tpu.concatenate %245, %246 in 0 : vector<239x128xf32>, vector<17x128xf32> -> vector<256x128xf32>
    %c8_229 = arith.constant 8 : index
    %c0_230 = arith.constant 0 : index
    %c0_231 = arith.constant 0 : index
    %248 = vector.load %arg2[%c8_229, %c0_230, %c0_231] : memref<9x256x1xf32, #tpu.memory_space<vmem>>, vector<1x256x1xf32>
    %249 = vector.shape_cast %248 : vector<1x256x1xf32> to vector<256x1xf32>
    %250 = vector.broadcast %249 : vector<256x1xf32> to vector<256x128xf32>
    %251 = arith.mulf %247, %250 : vector<256x128xf32>
    %c0_232 = arith.constant 0 : index
    %c0_233 = arith.constant 0 : index
    %252 = vector.load %arg10[%c0_232, %c0_233] : memref<256x128xf32, #tpu.memory_space<vmem>>, vector<256x128xf32>
    %c8_234 = arith.constant 8 : index
    %c0_235 = arith.constant 0 : index
    %c0_236 = arith.constant 0 : index
    %253 = vector.load %arg5[%c8_234, %c0_235, %c0_236] : memref<9x128x128xf32, #tpu.memory_space<vmem>>, vector<1x128x128xf32>
    %254 = vector.shape_cast %253 : vector<1x128x128xf32> to vector<128x128xf32>
    %cst_237 = arith.constant dense<0.000000e+00> : vector<256x128xf32>
    %255 = tpu.matmul %251, %254, %cst_237 {dimension_numbers = #tpu.dot_dimension_numbers<[1], [0], [0], [1], [0, 0, 1, 1], [], []>} : vector<256x128xf32>, vector<128x128xf32>, vector<256x128xf32> -> vector<256x128xf32>
    %256 = arith.addf %252, %255 : vector<256x128xf32>
    %c0_238 = arith.constant 0 : index
    %c0_239 = arith.constant 0 : index
    %257 = vector.load %arg10[%c0_238, %c0_239] : memref<256x128xf32, #tpu.memory_space<vmem>>, vector<256x128xf32>
    tpu.vector_store %arg10[%c0_238, %c0_239], %256 {strides = array<i32>} : memref<256x128xf32, #tpu.memory_space<vmem>>, vector<256x128xf32>,
    %c0_240 = arith.constant 0 : index
    %c0_241 = arith.constant 0 : index
    %258 = vector.load %arg10[%c0_240, %c0_241] : memref<256x128xf32, #tpu.memory_space<vmem>>, vector<256x128xf32>
    %c0_242 = arith.constant 0 : index
    %c0_243 = arith.constant 0 : index
    %259 = vector.load %arg6[%c0_242, %c0_243] : memref<1x128xf32, #tpu.memory_space<vmem>>, vector<1x128xf32>
    %260 = vector.broadcast %259 : vector<1x128xf32> to vector<256x128xf32>
    %261 = arith.addf %258, %260 : vector<256x128xf32>
    %cst_244 = arith.constant 0.000000e+00 : f32
    %262 = vector.broadcast %cst_244 : f32 to vector<256x128xf32>
    %263 = arith.maximumf %261, %262 : vector<256x128xf32>
    %c0_245 = arith.constant 0 : index
    %c0_246 = arith.constant 0 : index
    %c0_247 = arith.constant 0 : index
    %264 = vector.load %arg7[%c0_245, %c0_246, %c0_247] : memref<1x256x128xf32, #tpu.memory_space<vmem>>, vector<1x256x128xf32>
    %265 = vector.shape_cast %264 : vector<1x256x128xf32> to vector<256x128xf32>
    %266 = vector.shape_cast %263 : vector<256x128xf32> to vector<1x256x128xf32>
    tpu.vector_store %arg7[%c0_245, %c0_246, %c0_247], %266 {strides = array<i32>} : memref<1x256x128xf32, #tpu.memory_space<vmem>>, vector<1x256x128xf32>,
    return
  }
  func.func @transform_0(%arg0: i32) -> (i32, i32, i32) {
    %c0_i32 = arith.constant 0 : i32
    %c0_i32_0 = arith.constant 0 : i32
    %c0_i32_1 = arith.constant 0 : i32
    return %arg0, %c0_i32, %c0_i32_0 : i32, i32, i32
  }
  func.func @transform_1(%arg0: i32) -> (i32, i32, i32) {
    %c0_i32 = arith.constant 0 : i32
    %c0_i32_0 = arith.constant 0 : i32
    %c0_i32_1 = arith.constant 0 : i32
    %c0_i32_2 = arith.constant 0 : i32
    return %c0_i32, %c0_i32_0, %c0_i32_1 : i32, i32, i32
  }
  func.func @transform_2(%arg0: i32) -> (i32, i32, i32) {
    %c0_i32 = arith.constant 0 : i32
    %c0_i32_0 = arith.constant 0 : i32
    %c0_i32_1 = arith.constant 0 : i32
    %c0_i32_2 = arith.constant 0 : i32
    return %c0_i32, %c0_i32_0, %c0_i32_1 : i32, i32, i32
  }
  func.func @transform_3(%arg0: i32) -> (i32, i32) {
    %c0_i32 = arith.constant 0 : i32
    %c0_i32_0 = arith.constant 0 : i32
    %c0_i32_1 = arith.constant 0 : i32
    return %c0_i32, %c0_i32_0 : i32, i32
  }
  func.func @transform_4(%arg0: i32) -> (i32, i32, i32) {
    %c0_i32 = arith.constant 0 : i32
    %c0_i32_0 = arith.constant 0 : i32
    %c0_i32_1 = arith.constant 0 : i32
    %c0_i32_2 = arith.constant 0 : i32
    return %c0_i32, %c0_i32_0, %c0_i32_1 : i32, i32, i32
  }
  func.func @transform_5(%arg0: i32) -> (i32, i32) {
    %c0_i32 = arith.constant 0 : i32
    %c0_i32_0 = arith.constant 0 : i32
    %c0_i32_1 = arith.constant 0 : i32
    return %c0_i32, %c0_i32_0 : i32, i32
  }
  func.func @transform_6(%arg0: i32) -> (i32, i32, i32) {
    %c0_i32 = arith.constant 0 : i32
    %c0_i32_0 = arith.constant 0 : i32
    %c0_i32_1 = arith.constant 0 : i32
    return %arg0, %c0_i32, %c0_i32_0 : i32, i32, i32
  }
}

</mosaic_0001>

<bundles_post_ra>
// kernel: tpu_custom_call.1
= control target key start
LH: loop header
LB: loop body
LE: loop exit
PB: predicated region body
PF: predicated region fallthrough
CT: control target
= control target key end

     0   :  { %11 = vsyncpa [#allocation6], 0  ;;  %s17932_s0 = inlined_call_operand.hbm [shape: f32[2,256,128], index: 0, kind: input, shape index: {}]   ;;  %s17933_s1 = inlined_call_operand.vmem [shape: f32[9,256,1], index: 1, kind: input, shape index: {}]   ;;  %s17934_s2 = inlined_call_operand.vmem [shape: f32[9,128,128], index: 2, kind: input, shape index: {}]   ;;  %s17935_s3 = inlined_call_operand.vmem [shape: f32[1,128], index: 3, kind: input, shape index: {}]   ;;  %s17936_s4 = inlined_call_operand.vmem [shape: f32[9,128,128], index: 4, kind: input, shape index: {}]   ;;  %s17937_s5 = inlined_call_operand.vmem [shape: f32[1,128], index: 5, kind: input, shape index: {}]   ;;  %s17938_s6 = inlined_call_operand.hbm [shape: f32[2,256,128], index: 6, kind: output, shape index: {}]  }
   0x1   :  { %13 = vsyncpa [#allocation6 + $0x1], 0 }
   0x2   :  { %14 = vsyncpa [#allocation7], 0 }
   0x3   :  { %16 = vsyncpa [#allocation7 + $0x1], 0  ;;  %s11450_s21 = smov 0   ;;  %s11452_s22 = smov 0  }
   0x4   :  { %s11454_s23 = smov 0   ;;  %s11456_s24 = smov 0  }
   0x5 LB: > { %s11471_s25 = sadd.s32 4294967295, %s11408_s24   ;;  %s10472_s26 = sadd.s32 4294967294, %s11408_s24   ;;  %s11408_s24 = sphi %s11456_s24, %s19069_s24   ;;  %s11404_s23 = sphi %s11454_s23, %s19068_s23   ;;  %s11400_s22 = sphi %s11452_s22, %s19067_s22   ;;  %s11396_s21 = sphi %s11450_s21, %s19066_s21  }
   0x6   : > { %s11475_s27 = sadd.s32 1, %s11408_s24   ;;  %s29_s28 = sadd.s32 1, %s11404_s23 }
   0x7   : > { %s26_s29 = ssub.s32 %s11408_s24, %s11475_s27  ;;  %p36_p0 = scmp.ne.s32.totalorder %s11404_s23, %s11400_s22 }
   0x8   : > { %p27_p1 = scmp.eq.s32.totalorder %s26_s29, 0  ;;  %p37_p2 = scmp.eq.s32.totalorder %s11408_s24, 0 }
   0x9   : > { %p42_p3 = scmp.ne.s32.totalorder %s11400_s22, %s11396_s21  ;;  %p43_p4 = scmp.eq.s32.totalorder %s11471_s25, 0 }
   0xa   : > { %s11487_s30 = scalar_select %p27_p1, %s11404_s23, %s29_s28  }
   0xb   : > { %p11489_p5 = por %p37_p2, %p36_p0  ;;  %p11493_p6 = por %p43_p4, %p42_p3 }
   0xc   : > { %p171_p7 = scmp.eq.s32.totalorder %s11471_s25, 1  ;;  %p177_p8 = scmp.eq.s32.totalorder %s10472_s26, 1 }
   0xd   : > { %p11236_p10 = scmp.lt.s32.totalorder %s11408_s24, 2  ;;  %s212_s11 = sand.u32 1, %s11404_s23  }
   0xe   : > { %p11500_p11 = por %p171_p7, %p36_p0  ;;  %p11504_p12 = por %p177_p8, %p42_p3 }
   0xf   : > { %s11190_s12 = sshll.u32 %s11408_s24, 8  ;;  %s10475_s13 = sshll.u32 %s212_s11, 8 }
  0x10   : > { %s221_s16 = scalar_lea.hbm %s17932_s0, %s11190_s12  ;;  %s216_s18 = scalar_lea.vmem [#allocation5], %s10475_s13 }
  0x11   : > { %s222_s17 = sshll.u32 %s221_s16, 4  ;;  %s224_s19 = sshll.u32 %s216_s18, 4  ;;  %s223_s17 = int_to_ptr.hbm [resolvable:$true] %s222_s17  ;;  %s225_s19 = int_to_ptr.vmem [resolvable:$true] %s224_s19 }
  0x12   : > { %p11515_p13 = pnand %p11236_p10, %p11489_p5  ;;  %p10478_p0 = scmp.ge.s32.totalorder %s11408_s24, 1 }
  0x13   : > { %p232_p1 = scmp.lt.s32.totalorder %s11408_s24, 3  ;;  %s213_s26 = scalar_lea.sflag [#allocation6], %s212_s11 }
  0x14   : > { %s11312_s28 = sshra.s32 %s223_s17, 4  ;;  %p11316_p3 = pneg %p11515_p13  ;;  %s11313_s28 = int_to_ptr.hbm [resolvable:$true] %s11312_s28 }
  0x15   : > { %s11314_s29 = scalar_lea.hbm %s11313_s28, 256  ;;  %s11319_s7 = scalar_lea.hbm %s17932_s0, 512 }
  0x16   : > { %p11315_p2 = scmp.ne.s32.totalorder %s11313_s28, %s11314_s29  ;;  %p11320_p5 = scmp.lt.s32.totalorder %s11313_s28, %s17932_s0 }
  0x17   : > { %p11321_p8 = scmp.lt.s32.totalorder %s11319_s7, %s11314_s29 }
  0x18   : > { %p11317_p4 = pnand %p11316_p3, %p11315_p2 }
  0x19   : > { %p11322_p10 = por %p11321_p8, %p11320_p5 }
  0x1a   : > { %p11318_p7 = pneg %p11317_p4 }
  0x1c   : > { %p11323_p9 = pnand %p11322_p10, %p11318_p7 }
  0x1e   : > { %11326 = shalt.err (!%p11323_p9)
}
  0x1f   : > { %s11410_s11 = smov 128   ;;  %s11411_s16 = smov 8  }
  0x20   : > { %11231 = dma.hbm_to_vmem [thread:$0]  (!%p11515_p13), %s223_s17, 4096, %s225_s19, %s213_s26, %s11410_s11, %s11410_s11, %s11411_s16  }
  0x21   : > { %p233_p2 = pnand %p10478_p0, %p232_p1 }
  0x23   : > { %236 = sbr.rel (%p233_p2) target bundleno = 2030 (0x7ee), region = 44 }
  0x28   : > { %s11536_s18 = sand.u32 1, %s11400_s22  }
  0x29   : > { %s10479_s28 = sshll.u32 %s11536_s18, 8  ;;  %s239_s29 = scalar_lea.sflag [#allocation6], %s11536_s18 }
  0x2a   : > { %s11542_s12 = scalar_lea.vmem [#allocation5], %s10479_s28 }
  0x2b   : > { %11387 = dma.done.wait (%p11493_p6), %s239_s29, 4096  }
  0x2c   : > { %11389 = vsyncadd (%p11493_p6), %s239_s29, 4294963200  ;;  %v11412_v0 = vmov 0   ;;  %v470_v1 = vld [vmem:[%s17933_s1 + $0x20] sm:$0xff]  ;;  %v468_v2 = vld [vmem:[%s17933_s1 + $0x10] sm:$0xff]  ;;  %vm339_vm0 = vcmask 1040384   ;;  %vm1432_vm1 = vcmask 1046528  }
  0x2d   : > { %11277 = vset.pattern.permute.xlu2 %v11412_v0  ;;  %11276 = vset.pattern.permute.xlu1 %v11412_v0  ;;  %v466_v3 = vld [vmem:[%s17933_s1] sm:$0xff]  ;;  %v471_v4 = vld [vmem:[%s17933_s1 + $0x28] sm:$0xff]  ;;  %v469_v5 = vld [vmem:[%s17933_s1 + $0x18] sm:$0xff]  ;;  %s17702_s17 = scalar_lea.vmem [#allocation8], %s10479_s28  ;;  %s11191_s28 = sshll.u32 %s11471_s25, 8 }
  0x2e   : > { %11275 = vset.pattern.permute.xlu0 %v11412_v0  ;;  %520 = vperm.xlu2 %11277, %v470_v1   ;;  %v467_v6 = vld [vmem:[%s17933_s1 + $0x8] sm:$0xff]  ;;  %v474_v7 = vld [vmem:[%s17933_s1 + $0x40] sm:$0xff]  ;;  %v473_v8 = vld [vmem:[%s17933_s1 + $0x38] sm:$0xff]  ;;  %s10395_s26 = scalar_lea.hbm %s17938_s6, %s11191_s28  ;;  %s10396_s13 = sshll.u32 %s17702_s17, 4  ;;  %s10397_s13 = int_to_ptr.vmem [resolvable:$true] %s10396_s13 }
  0x2f   : > { %510 = vperm.xlu1 %11276, %v468_v2   ;;  %500 = vperm.xlu0 %11275, %v466_v3   ;;  %v472_v9 = vld [vmem:[%s17933_s1 + $0x30] sm:$0xff]  ;;  %v477_v10 = vld [vmem:[%s17933_s1 + $0x58] sm:$0xff]  ;;  %v475_v12 = vld [vmem:[%s17933_s1 + $0x48] sm:$0xff]  ;;  %s10398_s7 = sshll.u32 %s10395_s26, 4  ;;  %s10384_s25 = scalar_lea.sflag [#allocation7], %s11536_s18  ;;  %s10399_s7 = int_to_ptr.hbm [resolvable:$true] %s10398_s7 }
  0x30   : > { %v476_v11 = vld [vmem:[%s17933_s1 + $0x50] sm:$0xff]  ;;  %v479_v14 = vld [vmem:[%s17933_s1 + $0x68] sm:$0xff]  ;;  %v478_v15 = vld [vmem:[%s17933_s1 + $0x60] sm:$0xff]  ;;  %s11362_s11 = scalar_lea.hbm %s17938_s6, 512 }
  0x31   : > { %v480_v13 = vld [vmem:[%s17933_s1 + $0x70] sm:$0xff]  ;;  %v483_v16 = vld [vmem:[%s17933_s1 + $0x88] sm:$0xff]  ;;  %v482_v17 = vld [vmem:[%s17933_s1 + $0x80] sm:$0xff] }
  0x32   : > { %v481_v18 = vld [vmem:[%s17933_s1 + $0x78] sm:$0xff]  ;;  %v486_v19 = vld [vmem:[%s17933_s1 + $0xa0] sm:$0xff]  ;;  %v484_v21 = vld [vmem:[%s17933_s1 + $0x90] sm:$0xff] }
  0x33   : > { %v485_v20 = vld [vmem:[%s17933_s1 + $0x98] sm:$0xff]  ;;  %v736_v23 = vld [vmem:[%s17934_s2 + $0x70] sm:$0xff]  ;;  %v487_v26 = vld [vmem:[%s17933_s1 + $0xa8] sm:$0xff] }
  0x34   : > { %v737_v22 = vld [vmem:[%s17934_s2 + $0x78] sm:$0xff]  ;;  %v488_v25 = vld [vmem:[%s17933_s1 + $0xb0] sm:$0xff]  ;;  %v735_v27 = vld [vmem:[%s17934_s2 + $0x68] sm:$0xff] }
  0x35   : > { %738 = vmatpush.msra.mxu0 %v737_v22  ;;  %11192 = vmatpush.msra.mxu2 %v737_v22  ;;  %v489_v24 = vld [vmem:[%s17933_s1 + $0xb8] sm:$0xff]  ;;  %v734_v28 = vld [vmem:[%s17934_s2 + $0x60] sm:$0xff]  ;;  %v492_v30 = vld [vmem:[%s17933_s1 + $0xd0] sm:$0xff] }
  0x36   : > { %525 = vperm.xlu2 %11277, %v471_v4   ;;  %v733_v29 = vld [vmem:[%s17934_s2 + $0x58] sm:$0xff]  ;;  %v491_v31 = vld [vmem:[%s17933_s1 + $0xc8] sm:$0xff]  ;;  %v490_v32 = vld [vmem:[%s17933_s1 + $0xc0] sm:$0xff] }
  0x37   : > { %515 = vperm.xlu1 %11276, %v469_v5   ;;  %505 = vperm.xlu0 %11275, %v467_v6   ;;  %v732_v33 = vld [vmem:[%s17934_s2 + $0x50] sm:$0xff]  ;;  %v731_v34 = vld [vmem:[%s17934_s2 + $0x48] sm:$0xff]  ;;  %v730_v35 = vld [vmem:[%s17934_s2 + $0x40] sm:$0xff] }
  0x38   : > { %739 = vmatpush.msra.mxu0 %v736_v23  ;;  %11193 = vmatpush.msra.mxu2 %v736_v23  ;;  %v729_v36 = vld [vmem:[%s17934_s2 + $0x38] sm:$0xff]  ;;  %v495_v37 = vld [vmem:[%s17933_s1 + $0xe8] sm:$0xff]  ;;  %v494_v38 = vld [vmem:[%s17933_s1 + $0xe0] sm:$0xff] }
  0x39   : > { %v493_v39 = vld [vmem:[%s17933_s1 + $0xd8] sm:$0xff]  ;;  %v728_v40 = vld [vmem:[%s17934_s2 + $0x30] sm:$0xff]  ;;  %v727_v41 = vld [vmem:[%s17934_s2 + $0x28] sm:$0xff] }
  0x3a   : > { %740 = vmatpush.msra.mxu0 %v735_v27  ;;  %11194 = vmatpush.msra.mxu2 %v735_v27  ;;  %v726_v42 = vld [vmem:[%s17934_s2 + $0x20] sm:$0xff]  ;;  %v725_v43 = vld [vmem:[%s17934_s2 + $0x18] sm:$0xff]  ;;  %v496_v46 = vld [vmem:[%s17933_s1 + $0xf0] sm:$0xff] }
  0x3b   : > { %v10481_v44 = vld [vmem:[%s17933_s1 + $0x100] sm:$0xff]  ;;  %v497_v45 = vld [vmem:[%s17933_s1 + $0xf8] sm:$0xff]  ;;  %v724_v47 = vld [vmem:[%s17934_s2 + $0x10] sm:$0xff] }
  0x3c   : > { %741 = vmatpush.msra.mxu0 %v734_v28  ;;  %11195 = vmatpush.msra.mxu2 %v734_v28  ;;  %v723_v48 = vld [vmem:[%s17934_s2 + $0x8] sm:$0xff]  ;;  %v722_v49 = vld [vmem:[%s17934_s2] sm:$0xff]  ;;  %v10484_v50 = vld [vmem:[%s17933_s1 + $0x118] sm:$0xff] }
  0x3d   : > { %v10483_v51 = vld [vmem:[%s17933_s1 + $0x110] sm:$0xff]  ;;  %v10482_v52 = vld [vmem:[%s17933_s1 + $0x108] sm:$0xff]  ;;  %v10485_v56 = vld [vmem:[%s17933_s1 + $0x120] sm:$0xff] }
  0x3e   : > { %540 = vperm.xlu2 %11277, %v474_v7   ;;  %742 = vmatpush.msra.mxu0 %v733_v29  ;;  %v10487_v54 = vld [vmem:[%s17933_s1 + $0x130] sm:$0xff]  ;;  %v10486_v55 = vld [vmem:[%s17933_s1 + $0x128] sm:$0xff]  ;;  %v10489_v59 = vld [vmem:[%s17933_s1 + $0x140] sm:$0xff] }
  0x3f   : > { %535 = vperm.xlu1 %11276, %v473_v8   ;;  %530 = vperm.xlu0 %11275, %v472_v9   ;;  %v10490_v58 = vld [vmem:[%s17933_s1 + $0x148] sm:$0xff]  ;;  %v10488_v60 = vld [vmem:[%s17933_s1 + $0x138] sm:$0xff]  ;;  %v11732_v63 = vld [vmem:[%s11542_s12 + $0xf0] sm:$0xff] }
  0x40   : > { %11196 = vmatpush.msra.mxu2 %v733_v29  ;;  %743 = vmatpush.msra.mxu0 %v732_v33  ;;  %v11729_v62 = vld [vmem:[%s11542_s12 + $0xe8] sm:$0xff]  ;;  %v10493_v0 = vld [vmem:[%s17933_s1 + $0x160] sm:$0xff]  ;;  %v10492_v1 = vld [vmem:[%s17933_s1 + $0x158] sm:$0xff]  ;;  %v341_v3 = vrot.slane %v11732_v63, 7 }
  0x41   : > { %v340_v2 = vrot.slane %v11729_v62, 7  ;;  %v10491_v4 = vld [vmem:[%s17933_s1 + $0x150] sm:$0xff]  ;;  %v10528_v5 = vld [vmem:[%s17934_s2 + $0xf8] sm:$0xff]  ;;  %v10526_v8 = vld [vmem:[%s17934_s2 + $0xe8] sm:$0xff] }
  0x42   : > { %11197 = vmatpush.msra.mxu2 %v732_v33  ;;  %744 = vmatpush.msra.mxu0 %v731_v34  ;;  %v10527_v6 = vld [vmem:[%s17934_s2 + $0xf0] sm:$0xff]  ;;  %v10522_v22 = vld [vmem:[%s17934_s2 + $0xc8] sm:$0xff]  ;;  %v10521_v27 = vld [vmem:[%s17934_s2 + $0xc0] sm:$0xff] }
  0x43   : > { %1221 = vmatpush.msra.mxu1 %v10528_v5  ;;  %11208 = vmatpush.msra.mxu3 %v10528_v5  ;;  %v342_v7 = vsel %vm339_vm0, %v340_v2, %v341_v3  ;;  %v10499_v29 = vld [vmem:[%s17933_s1 + $0x190] sm:$0xff]  ;;  %v10520_v33 = vld [vmem:[%s17934_s2 + $0xb8] sm:$0xff] }
  0x44   : > { %11198 = vmatpush.msra.mxu2 %v731_v34  ;;  %745 = vmatpush.msra.mxu0 %v730_v35  ;;  %v10519_v34 = vld [vmem:[%s17934_s2 + $0xb0] sm:$0xff]  ;;  %v10588_v62 = vld [vmem:[%s17933_s1 + $0x358] sm:$0xff] }
  0x45   : > { %1222 = vmatpush.msra.mxu1 %v10527_v6  ;;  %11209 = vmatpush.msra.mxu3 %v10527_v6 }
  0x46   : > { %555 = vperm.xlu2 %11277, %v477_v10   ;;  %11199 = vmatpush.msra.mxu2 %v730_v35 }
  0x47   : > { %550 = vperm.xlu1 %11276, %v476_v11   ;;  %545 = vperm.xlu0 %11275, %v475_v12   ;;  %v11760_v11 = vld [vmem:[%s11542_s12 + $0xf8] sm:$0xff] }
  0x48   : > { %746 = vmatpush.msra.mxu0 %v729_v36  ;;  %11200 = vmatpush.msra.mxu2 %v729_v36  ;;  %v10518_v36 = vld [vmem:[%s17934_s2 + $0xa8] sm:$0xff] }
  0x49   : > { %1223 = vmatpush.msra.mxu1 %v10526_v8  ;;  %11210 = vmatpush.msra.mxu3 %v10526_v8 }
  0x4a   : > { %747 = vmatpush.msra.mxu0 %v728_v40  ;;  %11201 = vmatpush.msra.mxu2 %v728_v40  ;;  %v10517_v40 = vld [vmem:[%s17934_s2 + $0xa0] sm:$0xff] }
  0x4c   : > { %748 = vmatpush.msra.mxu0 %v727_v41  ;;  %11202 = vmatpush.msra.mxu2 %v727_v41 }
  0x4e   : > { %570 = vperm.xlu2 %11277, %v480_v13   ;;  %749 = vmatpush.msra.mxu0 %v726_v42  ;;  %v10525_v13 = vld [vmem:[%s17934_s2 + $0xe0] sm:$0xff] }
  0x4f   : > { %565 = vperm.xlu1 %11276, %v479_v14   ;;  %560 = vperm.xlu0 %11275, %v478_v15   ;;  %v10496_v15 = vld [vmem:[%s17933_s1 + $0x178] sm:$0xff] }
  0x50   : > { %750 = vmatpush.msra.mxu0 %v725_v43  ;;  %11203 = vmatpush.msra.mxu2 %v726_v42  ;;  %v11823_v42 = vld [vmem:[%s11542_s12 + $0x8] sm:$0xff] }
  0x51   : > { %1224 = vmatpush.msra.mxu1 %v10525_v13  ;;  %11211 = vmatpush.msra.mxu3 %v10525_v13 }
  0x52   : > { %751 = vmatpush.msra.mxu0 %v724_v47  ;;  %11204 = vmatpush.msra.mxu2 %v725_v43  ;;  %v10502_v43 = vld [vmem:[%s17933_s1 + $0x1a8] sm:$0xff] }
  0x54   : > { %752 = vmatpush.msra.mxu0 %v723_v48  ;;  %11205 = vmatpush.msra.mxu2 %v724_v47  ;;  %v10515_v47 = vld [vmem:[%s17934_s2 + $0x90] sm:$0xff] }
  0x56   : > { %585 = vperm.xlu2 %11277, %v483_v16   ;;  %753 = vmatpush.msra.mxu0 %v722_v49  ;;  %v10495_v16 = vld [vmem:[%s17933_s1 + $0x170] sm:$0xff] }
  0x57   : > { %580 = vperm.xlu1 %11276, %v482_v17   ;;  %575 = vperm.xlu0 %11275, %v481_v18   ;;  %v343_v17 = vrot.slane %v11760_v11, 7  ;;  %v10494_v18 = vld [vmem:[%s17933_s1 + $0x168] sm:$0xff] }
  0x58   : > { %11206 = vmatpush.msra.mxu2 %v723_v48  ;;  %v378_v48 = vrot.slane %v11823_v42, 7 }
  0x5a   : > { %11207 = vmatpush.msra.mxu2 %v722_v49 }
  0x5e   : > { %600 = vperm.xlu2 %11277, %v486_v19   ;;  %v10524_v19 = vld [vmem:[%s17934_s2 + $0xd8] sm:$0xff] }
  0x5f   : > { %595 = vperm.xlu1 %11276, %v485_v20   ;;  %590 = vperm.xlu0 %11275, %v484_v21   ;;  %v10523_v20 = vld [vmem:[%s17934_s2 + $0xd0] sm:$0xff]  ;;  %v344_v21 = vsel %vm339_vm0, %v341_v3, %v343_v17 }
  0x60   : > { %1225 = vmatpush.msra.mxu1 %v10524_v19  ;;  %11212 = vmatpush.msra.mxu3 %v10524_v19 }
  0x62   : > { %1226 = vmatpush.msra.mxu1 %v10523_v20  ;;  %11213 = vmatpush.msra.mxu3 %v10523_v20  ;;  %v11901_v20 = vld [vmem:[%s11542_s12 + $0x78] sm:$0xff] }
  0x64   : > { %1227 = vmatpush.msra.mxu1 %v10522_v22  ;;  %11214 = vmatpush.msra.mxu3 %v10522_v22 }
  0x66   : > { %615 = vperm.xlu2 %11277, %v489_v24   ;;  %1228 = vmatpush.msra.mxu1 %v10521_v27 }
  0x67   : > { %610 = vperm.xlu1 %11276, %v488_v25   ;;  %605 = vperm.xlu0 %11275, %v487_v26   ;;  %v11788_v25 = vld [vmem:[%s11542_s12] sm:$0xff] }
  0x68   : > { %1229 = vmatpush.msra.mxu1 %v10520_v33  ;;  %11215 = vmatpush.msra.mxu3 %v10521_v27 }
  0x6a   : > { %1230 = vmatpush.msra.mxu1 %v10519_v34  ;;  %11216 = vmatpush.msra.mxu3 %v10520_v33  ;;  %v10509_v33 = vld [vmem:[%s17933_s1 + $0x1e0] sm:$0xff] }
  0x6c   : > { %1231 = vmatpush.msra.mxu1 %v10518_v36  ;;  %11217 = vmatpush.msra.mxu3 %v10519_v34 }
  0x6e   : > { %630 = vperm.xlu2 %11277, %v492_v30   ;;  %v10498_v30 = vld [vmem:[%s17933_s1 + $0x188] sm:$0xff]  ;;  %1232 = vmatpush.msra.mxu1 %v10517_v40 }
  0x6f   : > { %625 = vperm.xlu1 %11276, %v491_v31   ;;  %620 = vperm.xlu0 %11275, %v490_v32   ;;  %v377_v31 = vrot.slane %v11788_v25, 7  ;;  %v10497_v32 = vld [vmem:[%s17933_s1 + $0x180] sm:$0xff] }
  0x70   : > { %11218 = vmatpush.msra.mxu3 %v10518_v36 }
  0x71   : > { %v465_v35 = vsel %vm339_vm0, %v343_v17, %v377_v31  ;;  %v379_v49 = vsel %vm339_vm0, %v377_v31, %v378_v48  ;;  %v10506_v17 = vld [vmem:[%s17933_s1 + $0x1c8] sm:$0xff] }
  0x72   : > { %11219 = vmatpush.msra.mxu3 %v10517_v40  ;;  %v10510_v31 = vld [vmem:[%s17933_s1 + $0x1e8] sm:$0xff] }
  0x76   : > { %645 = vperm.xlu2 %11277, %v495_v37  }
  0x77   : > { %640 = vperm.xlu1 %11276, %v494_v38   ;;  %635 = vperm.xlu0 %11275, %v493_v39  }
  0x7e   : > { %982 = vperm.xlu2 %11277, %v10481_v44   ;;  %v10501_v44 = vld [vmem:[%s17933_s1 + $0x1a0] sm:$0xff] }
  0x7f   : > { %655 = vperm.xlu1 %11276, %v497_v45   ;;  %650 = vperm.xlu0 %11275, %v496_v46   ;;  %v10500_v45 = vld [vmem:[%s17933_s1 + $0x198] sm:$0xff] }
  0x80   : > { %v10516_v46 = vld [vmem:[%s17934_s2 + $0x98] sm:$0xff] }
  0x81   : > { %1233 = vmatpush.msra.mxu1 %v10516_v46  ;;  %11220 = vmatpush.msra.mxu3 %v10516_v46 }
  0x83   : > { %1234 = vmatpush.msra.mxu1 %v10515_v47  ;;  %11221 = vmatpush.msra.mxu3 %v10515_v47  ;;  %v10530_v47 = vld [vmem:[%s17933_s1 + $0x208] sm:$0xff] }
  0x86   : > { %997 = vperm.xlu2 %11277, %v10484_v50   ;;  %v10514_v50 = vld [vmem:[%s17934_s2 + $0x88] sm:$0xff] }
  0x87   : > { %992 = vperm.xlu1 %11276, %v10483_v51   ;;  %987 = vperm.xlu0 %11275, %v10482_v52  }
  0x88   : > { %v11704_v53 = vpop.permute.xlu2 %520  ;;  %1235 = vmatpush.msra.mxu1 %v10514_v50  ;;  %11222 = vmatpush.msra.mxu3 %v10514_v50 }
  0x8e   : > { %1012 = vperm.xlu2 %11277, %v10487_v54   ;;  %v11850_v54 = vld [vmem:[%s11542_s12 + $0x10] sm:$0xff] }
  0x8f   : > { %1007 = vperm.xlu1 %11276, %v10486_v55   ;;  %1002 = vperm.xlu0 %11275, %v10485_v56   ;;  %v10513_v56 = vld [vmem:[%s17934_s2 + $0x80] sm:$0xff] }
  0x90   : > { %v11715_v57 = vpop.permute.xlu2 %525  ;;  %1236 = vmatpush.msra.mxu1 %v10513_v56  ;;  %11223 = vmatpush.msra.mxu3 %v10513_v56 }
  0x96   : > { %1027 = vperm.xlu2 %11277, %v10490_v58  }
  0x97   : > { %1022 = vperm.xlu1 %11276, %v10489_v59   ;;  %1017 = vperm.xlu0 %11275, %v10488_v60   ;;  %v10505_v59 = vld [vmem:[%s17933_s1 + $0x1c0] sm:$0xff]  ;;  %v10504_v60 = vld [vmem:[%s17933_s1 + $0x1b8] sm:$0xff] }
  0x98   : > { %v11726_v61 = vpop.permute.xlu2 %540 }
  0x9e   : > { %1042 = vperm.xlu2 %11277, %v10493_v0   ;;  %v380_v0 = vrot.slane %v11850_v54, 7 }
  0x9f   : > { %1037 = vperm.xlu1 %11276, %v10492_v1   ;;  %1032 = vperm.xlu0 %11275, %v10491_v4   ;;  %v10503_v1 = vld [vmem:[%s17933_s1 + $0x1b0] sm:$0xff]  ;;  %v11869_v4 = vld [vmem:[%s11542_s12 + $0x68] sm:$0xff] }
  0xa0   : > { %v11757_v9 = vpop.permute.xlu2 %555  ;;  %v381_v3 = vsel %vm339_vm0, %v378_v48, %v380_v0  ;;  %v402_v13 = vrot.slane %v11869_v4, 7  ;;  %v10529_v48 = vld [vmem:[%s17933_s1 + $0x200] sm:$0xff] }
  0xa1   : > { %v511_v10 = vpop.permute.xlu1 %510  ;;  %v501_v12 = vpop.permute.xlu0 %500 }
  0xa2   : > { %v658_v14 = vmul.f32 %v501_v12, %v342_v7  ;;  %v660_v41 = vmul.f32 %v511_v10, %v465_v35  ;;  %v11876_v7 = vld [vmem:[%s11542_s12 + $0x18] sm:$0xff]  ;;  %v11881_v10 = vld [vmem:[%s11542_s12 + $0x70] sm:$0xff]  ;;  %v662_v12 = vmul.f32 %v11704_v53, %v381_v3  ;;  %v11925_v35 = vld [vmem:[%s11542_s12 + $0x80] sm:$0xff] }
  0xa3   : > { %v404_v53 = vrot.slane %v11881_v10, 7  ;;  %v408_v46 = vrot.slane %v11925_v35, 7  ;;  %v11954_v3 = vld [vmem:[%s11542_s12 + $0x88] sm:$0xff] }
  0xa4   : > { %754 = vmatmul.f32.vlgmr.msra.gmra.mxu0 %v658_v14  ;;  %v10508_v14 = vld [vmem:[%s17933_s1 + $0x1d8] sm:$0xff] }
  0xa6   : > { %1057 = vperm.xlu2 %11277, %v10496_v15   ;;  %v10507_v15 = vld [vmem:[%s17933_s1 + $0x1d0] sm:$0xff] }
  0xa7   : > { %1052 = vperm.xlu1 %11276, %v10495_v16   ;;  %1047 = vperm.xlu0 %11275, %v10494_v18   ;;  %v382_v16 = vrot.slane %v11876_v7, 7  ;;  %v405_v18 = vsel %vm339_vm0, %v402_v13, %v404_v53 }
  0xa8   : > { %v11785_v23 = vpop.permute.xlu2 %570 }
  0xa9   : > { %v516_v24 = vpop.permute.xlu1 %515  ;;  %v506_v26 = vpop.permute.xlu0 %505  ;;  %v383_v19 = vsel %vm339_vm0, %v380_v0, %v382_v16 }
  0xaa   : > { %v659_v28 = vmul.f32 %v506_v26, %v344_v21  ;;  %v661_v58 = vmul.f32 %v516_v24, %v379_v49  ;;  %v11906_v24 = vld [vmem:[%s11542_s12 + $0x20] sm:$0xff] }
  0xac   : > { %757 = vmatmul.f32.gmra.mxu0 %v659_v28  ;;  %v663_v28 = vmul.f32 %v11715_v57, %v383_v19  ;;  %v11971_v19 = vld [vmem:[%s11542_s12 + $0x90] sm:$0xff] }
  0xae   : > { %1072 = vperm.xlu2 %11277, %v10499_v29   ;;  %v406_v29 = vrot.slane %v11901_v20, 7 }
  0xaf   : > { %1067 = vperm.xlu1 %11276, %v10498_v30   ;;  %1062 = vperm.xlu0 %11275, %v10497_v32   ;;  %v10511_v30 = vld [vmem:[%s17933_s1 + $0x1f0] sm:$0xff]  ;;  %v384_v32 = vrot.slane %v11906_v24, 7 }
  0xb0   : > { %v11813_v37 = vpop.permute.xlu2 %585  ;;  %v407_v57 = vsel %vm339_vm0, %v404_v53, %v406_v29  ;;  %v409_v49 = vsel %vm339_vm0, %v406_v29, %v408_v46 }
  0xb1   : > { %v11815_v38 = vpop.permute.xlu1 %535  ;;  %v11817_v39 = vpop.permute.xlu0 %530  ;;  %v385_v34 = vsel %vm339_vm0, %v382_v16, %v384_v32 }
  0xb4   : > { %760 = vmatmul.f32.gmra.mxu0 %v660_v41 }
  0xb6   : > { %1087 = vperm.xlu2 %11277, %v10502_v43   ;;  %v675_v43 = vmul.f32 %v11813_v37, %v407_v57  ;;  %v10512_v37 = vld [vmem:[%s17933_s1 + $0x1f8] sm:$0xff]  ;;  %v10535_v57 = vld [vmem:[%s17933_s1 + $0x230] sm:$0xff] }
  0xb7   : > { %1082 = vperm.xlu1 %11276, %v10501_v44   ;;  %1077 = vperm.xlu0 %11275, %v10500_v45   ;;  %v664_v44 = vmul.f32 %v11817_v39, %v385_v34  ;;  %v11932_v45 = vld [vmem:[%s11542_s12 + $0x28] sm:$0xff] }
  0xb8   : > { %v11845_v51 = vpop.permute.xlu2 %600  ;;  %v386_v39 = vrot.slane %v11932_v45, 7 }
  0xb9   : > { %v11847_v52 = vpop.permute.xlu1 %550  ;;  %v11852_v55 = vpop.permute.xlu0 %545 }
  0xba   : > { %v387_v50 = vsel %vm339_vm0, %v384_v32, %v386_v39  ;;  %v412_v32 = vrot.slane %v11971_v19, 7 }
  0xbc   : > { %763 = vmatmul.f32.gmra.mxu0 %v661_v58 }
  0xbe   : > { %1102 = vperm.xlu2 %11277, %v10505_v59   ;;  %v11950_v59 = vld [vmem:[%s11542_s12 + $0x30] sm:$0xff] }
  0xbf   : > { %1097 = vperm.xlu1 %11276, %v10504_v60   ;;  %1092 = vperm.xlu0 %11275, %v10503_v1   ;;  %v388_v16 = vrot.slane %v11950_v59, 7 }
  0xc0   : > { %v11871_v5 = vpop.permute.xlu2 %615 }
  0xc1   : > { %v11873_v6 = vpop.permute.xlu1 %565  ;;  %v11878_v8 = vpop.permute.xlu0 %560 }
  0xc4   : > { %766 = vmatmul.f32.gmra.mxu0 %v662_v12  ;;  %v665_v12 = vmul.f32 %v11815_v38, %v387_v50  ;;  %v410_v38 = vrot.slane %v11954_v3, 7  ;;  %v10539_v50 = vld [vmem:[%s17933_s1 + $0x250] sm:$0xff] }
  0xc6   : > { %1117 = vperm.xlu2 %11277, %v10508_v14   ;;  %v10533_v14 = vld [vmem:[%s17933_s1 + $0x220] sm:$0xff]  ;;  %v411_v53 = vsel %vm339_vm0, %v408_v46, %v410_v38 }
  0xc7   : > { %1112 = vperm.xlu1 %11276, %v10507_v15   ;;  %1107 = vperm.xlu0 %11275, %v10506_v17   ;;  %v10532_v15 = vld [vmem:[%s17933_s1 + $0x218] sm:$0xff]  ;;  %v10531_v17 = vld [vmem:[%s17933_s1 + $0x210] sm:$0xff] }
  0xc8   : > { %v11903_v21 = vpop.permute.xlu2 %630 }
  0xc9   : > { %v581_v22 = vpop.permute.xlu1 %580  ;;  %v11908_v26 = vpop.permute.xlu0 %575 }
  0xca   : > { %v674_v27 = vmul.f32 %v581_v22, %v405_v18  ;;  %v389_v18 = vsel %vm339_vm0, %v386_v39, %v388_v16  ;;  %v12008_v39 = vld [vmem:[%s11542_s12 + $0x40] sm:$0xff] }
  0xcc   : > { %802 = vmatmul.f32.vlgmr.msra.gmra.mxu2 %v674_v27  ;;  %769 = vmatmul.f32.gmra.mxu0 %v663_v28  ;;  %v11978_v28 = vld [vmem:[%s11542_s12 + $0x38] sm:$0xff] }
  0xcd   : > { %v390_v34 = vrot.slane %v11978_v28, 7 }
  0xce   : > { %1132 = vperm.xlu2 %11277, %v10511_v30  }
  0xcf   : > { %1127 = vperm.xlu1 %11276, %v10510_v31   ;;  %1122 = vperm.xlu0 %11275, %v10509_v33   ;;  %v666_v31 = vmul.f32 %v11726_v61, %v389_v18  ;;  %v10536_v33 = vld [vmem:[%s17933_s1 + $0x238] sm:$0xff]  ;;  %v413_v61 = vsel %vm339_vm0, %v410_v38, %v412_v32  ;;  %v12033_v38 = vld [vmem:[%s11542_s12 + $0xa0] sm:$0xff]  ;;  %v10542_v18 = vld [vmem:[%s17933_s1 + $0x268] sm:$0xff] }
  0xd0   : > { %v11927_v36 = vpop.permute.xlu2 %645 }
  0xd1   : > { %v596_v40 = vpop.permute.xlu1 %595  ;;  %v591_v41 = vpop.permute.xlu0 %590 }
  0xd2   : > { %v676_v0 = vmul.f32 %v591_v41, %v409_v49  ;;  %v677_v30 = vmul.f32 %v596_v40, %v411_v53  ;;  %v10534_v40 = vld [vmem:[%s17933_s1 + $0x228] sm:$0xff]  ;;  %v391_v41 = vsel %vm339_vm0, %v388_v16, %v390_v34 }
  0xd4   : > { %805 = vmatmul.f32.gmra.mxu2 %v675_v43  ;;  %772 = vmatmul.f32.gmra.mxu0 %v664_v44  ;;  %v11997_v43 = vld [vmem:[%s11542_s12 + $0x98] sm:$0xff] }
  0xd5   : > { %v414_v49 = vrot.slane %v11997_v43, 7 }
  0xd6   : > { %1600 = vperm.xlu2 %11277, %v10530_v47  }
  0xd7   : > { %1595 = vperm.xlu1 %11276, %v10529_v48   ;;  %1137 = vperm.xlu0 %11275, %v10512_v37   ;;  %v678_v48 = vmul.f32 %v11845_v51, %v413_v61  ;;  %v667_v37 = vmul.f32 %v11852_v55, %v391_v41  ;;  %v10537_v51 = vld [vmem:[%s17933_s1 + $0x240] sm:$0xff]  ;;  %v392_v55 = vrot.slane %v12008_v39, 7  ;;  %v12055_v61 = vld [vmem:[%s11542_s12 + $0x50] sm:$0xff] }
  0xd8   : > { %v983_v56 = vpop.permute.xlu2 %982 }
  0xd9   : > { %v11947_v58 = vpop.permute.xlu1 %610  ;;  %v606_v60 = vpop.permute.xlu0 %605  ;;  %v1140_v1 = vmul.f32 %v983_v56, %v11732_v63  ;;  %v10538_v56 = vld [vmem:[%s17933_s1 + $0x248] sm:$0xff] }
  0xdb   : > { %1237 = vmatmul.f32.vlgmr.msra.gmra.mxu1 %v1140_v1  ;;  %v393_v1 = vsel %vm339_vm0, %v390_v34, %v392_v55 }
  0xdc   : > { %808 = vmatmul.f32.gmra.mxu2 %v676_v0  ;;  %775 = vmatmul.f32.gmra.mxu0 %v665_v12  ;;  %v415_v0 = vsel %vm339_vm0, %v412_v32, %v414_v49  ;;  %v668_v53 = vmul.f32 %v11847_v52, %v393_v1  ;;  %v416_v32 = vrot.slane %v12033_v38, 7  ;;  %v12074_v1 = vld [vmem:[%s11542_s12 + $0xb0] sm:$0xff] }
  0xde   : > { %1615 = vperm.xlu2 %11277, %v10533_v14   ;;  %v417_v52 = vsel %vm339_vm0, %v414_v49, %v416_v32 }
  0xdf   : > { %1610 = vperm.xlu1 %11276, %v10532_v15   ;;  %1605 = vperm.xlu0 %11275, %v10531_v17   ;;  %v12028_v15 = vld [vmem:[%s11542_s12 + $0x48] sm:$0xff]  ;;  %v679_v17 = vmul.f32 %v606_v60, %v415_v0  ;;  %v10540_v60 = vld [vmem:[%s17933_s1 + $0x258] sm:$0xff] }
  0xe0   : > { %v11973_v22 = vpop.permute.xlu2 %997 }
  0xe1   : > { %v11975_v27 = vpop.permute.xlu1 %625  ;;  %v11980_v29 = vpop.permute.xlu0 %620 }
  0xe4   : > { %811 = vmatmul.f32.gmra.mxu2 %v677_v30  ;;  %778 = vmatmul.f32.gmra.mxu0 %v666_v31  ;;  %v10541_v30 = vld [vmem:[%s17933_s1 + $0x260] sm:$0xff]  ;;  %v394_v31 = vrot.slane %v12028_v15, 7 }
  0xe6   : > { %1630 = vperm.xlu2 %11277, %v10536_v33   ;;  %v395_v33 = vsel %vm339_vm0, %v392_v55, %v394_v31  ;;  %v396_v55 = vrot.slane %v12055_v61, 7 }
  0xe7   : > { %1625 = vperm.xlu1 %11276, %v10535_v57   ;;  %1620 = vperm.xlu0 %11275, %v10534_v40   ;;  %v12050_v57 = vld [vmem:[%s11542_s12 + $0xa8] sm:$0xff] }
  0xe8   : > { %v11999_v44 = vpop.permute.xlu2 %1012  ;;  %v418_v49 = vrot.slane %v12050_v57, 7  ;;  %v397_v0 = vsel %vm339_vm0, %v394_v31, %v396_v55  ;;  %v10548_v31 = vld [vmem:[%s17933_s1 + $0x298] sm:$0xff] }
  0xe9   : > { %v12001_v46 = vpop.permute.xlu1 %640  ;;  %v12003_v47 = vpop.permute.xlu0 %635 }
  0xec   : > { %814 = vmatmul.f32.gmra.mxu2 %v678_v48  ;;  %781 = vmatmul.f32.gmra.mxu0 %v667_v37  ;;  %v680_v48 = vmul.f32 %v11947_v58, %v417_v52  ;;  %v669_v37 = vmul.f32 %v11757_v9, %v395_v33  ;;  %v10543_v9 = vld [vmem:[%s17933_s1 + $0x270] sm:$0xff]  ;;  %v419_v58 = vsel %vm339_vm0, %v416_v32, %v418_v49  ;;  %v12084_v33 = vld [vmem:[%s11542_s12 + $0x58] sm:$0xff]  ;;  %v420_v32 = vrot.slane %v12074_v1, 7 }
  0xee   : > { %1645 = vperm.xlu2 %11277, %v10539_v50  }
  0xef   : > { %1640 = vperm.xlu1 %11276, %v10538_v56   ;;  %1635 = vperm.xlu0 %11275, %v10537_v51   ;;  %v10545_v56 = vld [vmem:[%s17933_s1 + $0x280] sm:$0xff]  ;;  %v10544_v51 = vld [vmem:[%s17933_s1 + $0x278] sm:$0xff] }
  0xf0   : > { %v12023_v12 = vpop.permute.xlu2 %1027 }
  0xf1   : > { %v12025_v14 = vpop.permute.xlu1 %655  ;;  %v12030_v16 = vpop.permute.xlu0 %650 }
  0xf4   : > { %817 = vmatmul.f32.gmra.mxu2 %v679_v17  ;;  %784 = vmatmul.f32.gmra.mxu0 %v668_v53 }
  0xf6   : > { %1660 = vperm.xlu2 %11277, %v10542_v18  }
  0xf7   : > { %1655 = vperm.xlu1 %11276, %v10541_v30   ;;  %1650 = vperm.xlu0 %11275, %v10540_v60   ;;  %v681_v30 = vmul.f32 %v11871_v5, %v419_v58  ;;  %v670_v60 = vmul.f32 %v11878_v8, %v397_v0  ;;  %v10546_v5 = vld [vmem:[%s17933_s1 + $0x288] sm:$0xff]  ;;  %v398_v8 = vrot.slane %v12084_v33, 7  ;;  %v12110_v58 = vld [vmem:[%s11542_s12 + $0xb8] sm:$0xff] }
  0xf8   : > { %v12052_v34 = vpop.permute.xlu2 %1042 }
  0xf9   : > { %v993_v40 = vpop.permute.xlu1 %992  ;;  %v988_v41 = vpop.permute.xlu0 %987 }
  0xfa   : > { %v1141_v50 = vmul.f32 %v988_v41, %v11760_v11  ;;  %v1142_v52 = vmul.f32 %v993_v40, %v11788_v25  ;;  %v10547_v41 = vld [vmem:[%s17933_s1 + $0x290] sm:$0xff]  ;;  %v421_v40 = vsel %vm339_vm0, %v418_v49, %v420_v32  ;;  %v1143_v49 = vmul.f32 %v11973_v22, %v11823_v42  ;;  %v10576_v22 = vld [vmem:[%s17934_s2 + $0x178] sm:$0xff] }
  0xfb   : > { %v422_v42 = vrot.slane %v12110_v58, 7  ;;  %1834 = vmatpush.msrb.mxu2 %v10576_v22 }
  0xfc   : > { %820 = vmatmul.f32.gmra.mxu2 %v680_v48  ;;  %787 = vmatmul.f32.gmra.mxu0 %v669_v37  ;;  %v399_v48 = vsel %vm339_vm0, %v396_v55, %v398_v8  ;;  %v10551_v55 = vld [vmem:[%s17933_s1 + $0x2b0] sm:$0xff] }
  0xfd   : > { %1240 = vmatmul.f32.gmra.mxu1 %v1141_v50  ;;  %v671_v0 = vmul.f32 %v11873_v6, %v399_v48  ;;  %v10549_v6 = vld [vmem:[%s17933_s1 + $0x2a0] sm:$0xff] }
  0xfe   : > { %1675 = vperm.xlu2 %11277, %v10545_v56   ;;  %v12104_v56 = vld [vmem:[%s11542_s12 + $0x60] sm:$0xff] }
  0xff   : > { %1670 = vperm.xlu1 %11276, %v10544_v51   ;;  %1665 = vperm.xlu0 %11275, %v10543_v9   ;;  %v682_v9 = vmul.f32 %v11980_v29, %v421_v40  ;;  %v10575_v29 = vld [vmem:[%s17934_s2 + $0x170] sm:$0xff] }
 0x100   : > { %v12076_v17 = vpop.permute.xlu2 %1057  ;;  %1835 = vmatpush.msrb.mxu2 %v10575_v29  ;;  %v12173_v29 = vld [vmem:[%s11542_s12 + $0xc8] sm:$0xff] }
 0x101   : > { %v12078_v53 = vpop.permute.xlu1 %1007  ;;  %v1003_v18 = vpop.permute.xlu0 %1002  ;;  %v426_v4 = vrot.slane %v12173_v29, 7 }
 0x104   : > { %823 = vmatmul.f32.gmra.mxu2 %v681_v30  ;;  %790 = vmatmul.f32.gmra.mxu0 %v670_v60  ;;  %v10550_v30 = vld [vmem:[%s17933_s1 + $0x2a8] sm:$0xff]  ;;  %v400_v60 = vrot.slane %v12104_v56, 7 }
 0x105   : > { %1243 = vmatmul.f32.gmra.mxu1 %v1142_v52  ;;  %v423_v52 = vsel %vm339_vm0, %v420_v32, %v422_v42 }
 0x106   : > { %1690 = vperm.xlu2 %11277, %v10548_v31   ;;  %v401_v31 = vsel %vm339_vm0, %v398_v8, %v400_v60  ;;  %v1144_v8 = vmul.f32 %v1003_v18, %v11850_v54  ;;  %v10572_v54 = vld [vmem:[%s17934_s2 + $0x158] sm:$0xff]  ;;  %v403_v22 = vsel %vm339_vm0, %v400_v60, %v402_v13  ;;  %v10570_v13 = vld [vmem:[%s17934_s2 + $0x148] sm:$0xff]  ;;  %v10557_v60 = vld [vmem:[%s17933_s1 + $0x2e0] sm:$0xff] }
 0x107   : > { %1685 = vperm.xlu1 %11276, %v10547_v41   ;;  %1680 = vperm.xlu0 %11275, %v10546_v5   ;;  %v12135_v41 = vld [vmem:[%s11542_s12 + $0xc0] sm:$0xff]  ;;  %v10574_v5 = vld [vmem:[%s17934_s2 + $0x168] sm:$0xff]  ;;  %v672_v32 = vmul.f32 %v11785_v23, %v401_v31  ;;  %v10552_v23 = vld [vmem:[%s17933_s1 + $0x2b8] sm:$0xff] }
 0x108   : > { %v12099_v37 = vpop.permute.xlu2 %1072  ;;  %1836 = vmatpush.msrb.mxu2 %v10574_v5 }
 0x109   : > { %v12101_v50 = vpop.permute.xlu1 %1022  ;;  %v12106_v51 = vpop.permute.xlu0 %1017 }
 0x10c   : > { %826 = vmatmul.f32.gmra.mxu2 %v682_v9  ;;  %793 = vmatmul.f32.gmra.mxu0 %v671_v0  ;;  %v683_v0 = vmul.f32 %v11975_v27, %v423_v52  ;;  %v10553_v27 = vld [vmem:[%s17933_s1 + $0x2c0] sm:$0xff] }
 0x10d   : > { %1246 = vmatmul.f32.gmra.mxu1 %v1143_v49  ;;  %v424_v49 = vrot.slane %v12135_v41, 7 }
 0x10e   : > { %1705 = vperm.xlu2 %11277, %v10551_v55   ;;  %v10573_v55 = vld [vmem:[%s17934_s2 + $0x160] sm:$0xff] }
 0x10f   : > { %1700 = vperm.xlu1 %11276, %v10550_v30   ;;  %1695 = vperm.xlu0 %11275, %v10549_v6   ;;  %v10554_v30 = vld [vmem:[%s17933_s1 + $0x2c8] sm:$0xff]  ;;  %v425_v18 = vsel %vm339_vm0, %v422_v42, %v424_v49  ;;  %v10571_v6 = vld [vmem:[%s17934_s2 + $0x150] sm:$0xff] }
 0x110   : > { %v12140_v40 = vpop.permute.xlu2 %1087  ;;  %1837 = vmatpush.msrb.mxu2 %v10573_v55  ;;  %v684_v42 = vmul.f32 %v11903_v21, %v425_v18  ;;  %v10556_v21 = vld [vmem:[%s17933_s1 + $0x2d8] sm:$0xff]  ;;  %v1146_v18 = vmul.f32 %v11999_v44, %v11906_v24  ;;  %v10566_v44 = vld [vmem:[%s17934_s2 + $0x128] sm:$0xff] }
 0x111   : > { %v12142_v48 = vpop.permute.xlu1 %1037  ;;  %v12144_v9 = vpop.permute.xlu0 %1032 }
 0x112   : > { %1838 = vmatpush.msrb.mxu2 %v10572_v54  ;;  %v12209_v54 = vld [vmem:[%s11542_s12 + $0xd0] sm:$0xff] }
 0x113   : > { %v428_v24 = vrot.slane %v12209_v54, 7 }
 0x114   : > { %829 = vmatmul.f32.gmra.mxu2 %v683_v0  ;;  %796 = vmatmul.f32.gmra.mxu0 %v672_v32  ;;  %v673_v0 = vmul.f32 %v11908_v26, %v403_v22  ;;  %v1145_v32 = vmul.f32 %v12078_v53, %v11876_v7  ;;  %v10555_v7 = vld [vmem:[%s17933_s1 + $0x2d0] sm:$0xff]  ;;  %v10569_v26 = vld [vmem:[%s17934_s2 + $0x140] sm:$0xff]  ;;  %v427_v53 = vsel %vm339_vm0, %v424_v49, %v426_v4  ;;  %v10560_v22 = vld [vmem:[%s17933_s1 + $0x2f8] sm:$0xff] }
 0x115   : > { %1249 = vmatmul.f32.gmra.mxu1 %v1144_v8  ;;  %1839 = vmatpush.msrb.mxu2 %v10571_v6  ;;  %v10568_v8 = vld [vmem:[%s17934_s2 + $0x138] sm:$0xff]  ;;  %v10567_v6 = vld [vmem:[%s17934_s2 + $0x130] sm:$0xff] }
 0x116   : > { %1720 = vperm.xlu2 %11277, %v10554_v30  }
 0x117   : > { %1715 = vperm.xlu1 %11276, %v10553_v27   ;;  %1710 = vperm.xlu0 %11275, %v10552_v23   ;;  %v685_v23 = vmul.f32 %v12003_v47, %v427_v53  ;;  %v10559_v47 = vld [vmem:[%s17933_s1 + $0x2f0] sm:$0xff] }
 0x118   : > { %v12175_v52 = vpop.permute.xlu2 %1102  ;;  %1840 = vmatpush.msrb.mxu2 %v10570_v13 }
 0x119   : > { %v12177_v31 = vpop.permute.xlu1 %1052  ;;  %v12179_v5 = vpop.permute.xlu0 %1047 }
 0x11a   : > { %1841 = vmatpush.msrb.mxu2 %v10569_v26  ;;  %v1147_v26 = vmul.f32 %v12106_v51, %v11932_v45  ;;  %v10563_v45 = vld [vmem:[%s17934_s2 + $0x110] sm:$0xff] }
 0x11c   : > { %832 = vmatmul.f32.gmra.mxu2 %v684_v42  ;;  %799 = vmatmul.f32.gmra.mxu0 %v673_v0  ;;  %v429_v42 = vsel %vm339_vm0, %v426_v4, %v428_v24  ;;  %v10565_v0 = vld [vmem:[%s17934_s2 + $0x120] sm:$0xff] }
 0x11d   : > { %1252 = vmatmul.f32.gmra.mxu1 %v1145_v32  ;;  %1842 = vmatpush.msrb.mxu2 %v10568_v8  ;;  %v12235_v32 = vld [vmem:[%s11542_s12 + $0xd8] sm:$0xff] }
 0x11e   : > { %1735 = vperm.xlu2 %11277, %v10557_v60   ;;  %v430_v53 = vrot.slane %v12235_v32, 7  ;;  %v10564_v8 = vld [vmem:[%s17934_s2 + $0x118] sm:$0xff] }
 0x11f   : > { %1730 = vperm.xlu1 %11276, %v10556_v21   ;;  %1725 = vperm.xlu0 %11275, %v10555_v7   ;;  %v686_v7 = vmul.f32 %v12001_v46, %v429_v42  ;;  %v10578_v46 = vld [vmem:[%s17933_s1 + $0x308] sm:$0xff] }
 0x120   : > { %v12205_v55 = vpop.permute.xlu2 %1117  ;;  %1843 = vmatpush.msrb.mxu2 %v10567_v6  ;;  %v431_v51 = vsel %vm339_vm0, %v428_v24, %v430_v53  ;;  %v10582_v42 = vld [vmem:[%s17933_s1 + $0x328] sm:$0xff] }
 0x121   : > { %v1068_v30 = vpop.permute.xlu1 %1067  ;;  %v1063_v27 = vpop.permute.xlu0 %1062 }
 0x122   : > { %v1156_v49 = vmul.f32 %v1063_v27, %v11881_v10  ;;  %v10558_v10 = vld [vmem:[%s17933_s1 + $0x2e8] sm:$0xff]  ;;  %1844 = vmatpush.msrb.mxu2 %v10566_v44  ;;  %v1157_v4 = vmul.f32 %v1068_v30, %v11901_v20  ;;  %v10579_v27 = vld [vmem:[%s17933_s1 + $0x310] sm:$0xff]  ;;  %v10577_v20 = vld [vmem:[%s17933_s1 + $0x300] sm:$0xff] }
 0x123   : > { %v10562_v30 = vld [vmem:[%s17934_s2 + $0x108] sm:$0xff]  ;;  %v10561_v44 = vld [vmem:[%s17934_s2 + $0x100] sm:$0xff] }
 0x124   : > { %835 = vmatmul.f32.gmra.mxu2 %v685_v23  ;;  %1285 = vmatmul.f32.vlgmr.msra.gmra.mxu3 %v1156_v49  ;;  %v12266_v23 = vld [vmem:[%s11542_s12 + $0xe0] sm:$0xff] }
 0x125   : > { %1255 = vmatmul.f32.gmra.mxu1 %v1146_v18  ;;  %1845 = vmatpush.msrb.mxu2 %v10565_v0  ;;  %v432_v24 = vrot.slane %v12266_v23, 7 }
 0x126   : > { %1750 = vperm.xlu2 %11277, %v10560_v22   ;;  %v687_v22 = vmul.f32 %v11927_v36, %v431_v51  ;;  %v10581_v36 = vld [vmem:[%s17933_s1 + $0x320] sm:$0xff] }
 0x127   : > { %1745 = vperm.xlu1 %11276, %v10559_v47   ;;  %1740 = vperm.xlu0 %11275, %v10558_v10   ;;  %v1148_v47 = vmul.f32 %v12101_v50, %v11950_v59  ;;  %v1158_v10 = vmul.f32 %v12099_v37, %v11925_v35  ;;  %v10580_v35 = vld [vmem:[%s17933_s1 + $0x318] sm:$0xff]  ;;  %v433_v37 = vsel %vm339_vm0, %v430_v53, %v432_v24 }
 0x128   : > { %v12237_v13 = vpop.permute.xlu2 %1132  ;;  %1846 = vmatpush.msrb.mxu2 %v10564_v8  ;;  %v10584_v53 = vld [vmem:[%s17933_s1 + $0x338] sm:$0xff] }
 0x129   : > { %v12239_v60 = vpop.permute.xlu1 %1082  ;;  %v1078_v21 = vpop.permute.xlu0 %1077 }
 0x12a   : > { %1847 = vmatpush.msrb.mxu2 %v10563_v45  ;;  %v1159_v8 = vmul.f32 %v1078_v21, %v11954_v3  ;;  %v434_v3 = vsel %vm339_vm0, %v432_v24, %v340_v2  ;;  %v1150_v45 = vmul.f32 %v12144_v9, %v12008_v39  ;;  %v1160_v51 = vmul.f32 %v12239_v60, %v11971_v19  ;;  %v10587_v2 = vld [vmem:[%s17933_s1 + $0x350] sm:$0xff] }
 0x12b   : > { %v1434_v9 = vrot.slane %v11760_v11, 1  ;;  %v1151_v24 = vmul.f32 %v12142_v48, %v12028_v15  ;;  %v1161_v11 = vmul.f32 %v12140_v40, %v11997_v43  ;;  %v10589_v48 = vld [vmem:[%s17933_s1 + $0x360] sm:$0xff]  ;;  %v10624_v43 = vld [vmem:[%s17934_s2 + $0x1f8] sm:$0xff] }
 0x12c   : > { %838 = vmatmul.f32.gmra.mxu2 %v686_v7  ;;  %1288 = vmatmul.f32.gmra.mxu3 %v1157_v4  ;;  %v1149_v4 = vmul.f32 %v12023_v12, %v11978_v28 }
 0x12d   : > { %1258 = vmatmul.f32.gmra.mxu1 %v1147_v26  ;;  %1848 = vmatpush.msrb.mxu2 %v10562_v30  ;;  %v688_v26 = vmul.f32 %v12030_v16, %v433_v37  ;;  %v10583_v16 = vld [vmem:[%s17933_s1 + $0x330] sm:$0xff]  ;;  %v17939_v30 = vrot.slane %v11732_v63, 1 }
 0x12e   : > { %2217 = vperm.xlu2 %11277, %v10579_v27   ;;  %v10585_v27 = vld [vmem:[%s17933_s1 + $0x340] sm:$0xff]  ;;  %2446 = vmatpush.msrb.mxu3 %v10624_v43 }
 0x12f   : > { %2212 = vperm.xlu1 %11276, %v10578_v46   ;;  %2207 = vperm.xlu0 %11275, %v10577_v20   ;;  %v689_v20 = vmul.f32 %v12025_v14, %v434_v3  ;;  %v10586_v14 = vld [vmem:[%s17933_s1 + $0x348] sm:$0xff]  ;;  %v1435_v19 = vsel %vm1432_vm1, %v17939_v30, %v1434_v9 }
 0x130   : > { %v12268_v18 = vpop.permute.xlu2 %1600  ;;  %1849 = vmatpush.msrb.mxu2 %v10561_v44  ;;  %v1468_v44 = vrot.slane %v11788_v25, 1  ;;  %v10594_v3 = vld [vmem:[%s17933_s1 + $0x388] sm:$0xff] }
 0x131   : > { %v12270_v49 = vpop.permute.xlu1 %1097  ;;  %v12272_v6 = vpop.permute.xlu0 %1092 }
 0x132   : > { %v1559_v40 = vsel %vm1432_vm1, %v1434_v9, %v1468_v44  ;;  %v12400_v9 = vld [vmem:[%s11542_s12 + $0x10] sm:$0xff] }
 0x134   : > { %841 = vmatmul.f32.gmra.mxu2 %v687_v22  ;;  %1291 = vmatmul.f32.gmra.mxu3 %v1158_v10 }
 0x135   : > { %1261 = vmatmul.f32.gmra.mxu1 %v1148_v47 }
 0x136   : > { %2232 = vperm.xlu2 %11277, %v10582_v42   ;;  %v10591_v42 = vld [vmem:[%s17933_s1 + $0x370] sm:$0xff] }
 0x137   : > { %2227 = vperm.xlu1 %11276, %v10581_v36   ;;  %2222 = vperm.xlu0 %11275, %v10580_v35   ;;  %v10590_v36 = vld [vmem:[%s17933_s1 + $0x368] sm:$0xff] }
 0x138   : > { %v12293_v50 = vpop.permute.xlu2 %1615  ;;  %v12365_v35 = vld [vmem:[%s11542_s12 + $0x8] sm:$0xff] }
 0x139   : > { %v12295_v0 = vpop.permute.xlu1 %1112  ;;  %v12297_v7 = vpop.permute.xlu0 %1107 }
 0x13c   : > { %844 = vmatmul.f32.gmra.mxu2 %v688_v26  ;;  %1294 = vmatmul.f32.gmra.mxu3 %v1159_v8  ;;  %v1754_v8 = vmul.f32 %v12268_v18, %v1559_v40  ;;  %v10640_v18 = vld [vmem:[%s17934_s2 + $0x278] sm:$0xff] }
 0x13d   : > { %1264 = vmatmul.f32.gmra.mxu1 %v1149_v4  ;;  %2704 = vmatpush.msrb.mxu0 %v10640_v18 }
 0x13e   : > { %2247 = vperm.xlu2 %11277, %v10585_v27   ;;  %v1152_v27 = vmul.f32 %v12052_v34, %v12055_v61  ;;  %v10592_v34 = vld [vmem:[%s17933_s1 + $0x378] sm:$0xff] }
 0x13f   : > { %2242 = vperm.xlu1 %11276, %v10584_v53   ;;  %2237 = vperm.xlu0 %11275, %v10583_v16   ;;  %v1162_v53 = vmul.f32 %v12272_v6, %v12033_v38  ;;  %v1469_v16 = vrot.slane %v12365_v35, 1  ;;  %v10623_v38 = vld [vmem:[%s17934_s2 + $0x1f0] sm:$0xff] }
 0x140   : > { %v12315_v12 = vpop.permute.xlu2 %1630  ;;  %2447 = vmatpush.msrb.mxu3 %v10623_v38  ;;  %v12461_v38 = vld [vmem:[%s11542_s12 + $0x20] sm:$0xff] }
 0x141   : > { %v12317_v21 = vpop.permute.xlu1 %1127  ;;  %v12319_v46 = vpop.permute.xlu0 %1122 }
 0x144   : > { %847 = vmatmul.f32.gmra.mxu2 %v689_v20  ;;  %1297 = vmatmul.f32.gmra.mxu3 %v1160_v51  ;;  %v10593_v20 = vld [vmem:[%s17933_s1 + $0x380] sm:$0xff] }
 0x145   : > { %1267 = vmatmul.f32.gmra.mxu1 %v1150_v45  ;;  %v1470_v45 = vsel %vm1432_vm1, %v1468_v44, %v1469_v16 }
 0x146   : > { %2262 = vperm.xlu2 %11277, %v10588_v62  }
 0x147   : > { %2257 = vperm.xlu1 %11276, %v10587_v2   ;;  %2252 = vperm.xlu0 %11275, %v10586_v14  }
 0x148   : > { %v12340_v60 = vpop.permute.xlu2 %1645 }
 0x149   : > { %v1596_v22 = vpop.permute.xlu1 %1595  ;;  %v12342_v10 = vpop.permute.xlu0 %1137 }
 0x14a   : > { %v1753_v47 = vmul.f32 %v1596_v22, %v1435_v19  ;;  %v1153_v19 = vmul.f32 %v12179_v5, %v12084_v33  ;;  %v1163_v22 = vmul.f32 %v12270_v49, %v12050_v57  ;;  %v1471_v5 = vrot.slane %v12400_v9, 1  ;;  %v10622_v57 = vld [vmem:[%s17934_s2 + $0x1e8] sm:$0xff]  ;;  %v10639_v49 = vld [vmem:[%s17934_s2 + $0x270] sm:$0xff] }
 0x14b   : > { %2448 = vmatpush.msrb.mxu3 %v10622_v57  ;;  %2705 = vmatpush.msrb.mxu0 %v10639_v49 }
 0x14c   : > { %1850 = vmatmul.f32.vlgmr.msrb.gmra.mxu2 %v1753_v47  ;;  %1300 = vmatmul.f32.gmra.mxu3 %v1161_v11  ;;  %v10597_v47 = vld [vmem:[%s17933_s1 + $0x3a0] sm:$0xff]  ;;  %v10595_v11 = vld [vmem:[%s17933_s1 + $0x390] sm:$0xff] }
 0x14d   : > { %1270 = vmatmul.f32.gmra.mxu1 %v1151_v24  ;;  %v10596_v24 = vld [vmem:[%s17933_s1 + $0x398] sm:$0xff] }
 0x14e   : > { %2277 = vperm.xlu2 %11277, %v10591_v42   ;;  %v1472_v42 = vsel %vm1432_vm1, %v1469_v16, %v1471_v5  ;;  %v10600_v16 = vld [vmem:[%s17933_s1 + $0x3b8] sm:$0xff] }
 0x14f   : > { %2272 = vperm.xlu1 %11276, %v10590_v36   ;;  %v12361_v25 = vpop.f32.mrf.mxu2  ;;  %2267 = vperm.xlu0 %11275, %v10589_v48   ;;  %v12426_v36 = vld [vmem:[%s11542_s12 + $0x18] sm:$0xff] }
 0x150   : > { %18099 = vst [vmem:[#allocation11_spill] sm:$0xff] %v12361_v25  ;;  %v12367_v37 = vpop.permute.xlu2 %1660 }
 0x151   : > { %v1611_v26 = vpop.permute.xlu1 %1610  ;;  %v1606_v4 = vpop.permute.xlu0 %1605 }
 0x152   : > { %v1755_v14 = vmul.f32 %v1606_v4, %v1470_v45  ;;  %v1756_v4 = vmul.f32 %v1611_v26, %v1472_v42  ;;  %v10618_v42 = vld [vmem:[%s17934_s2 + $0x1c8] sm:$0xff] }
 0x154   : > { %1853 = vmatmul.f32.gmra.mxu2 %v1754_v8  ;;  %1303 = vmatmul.f32.gmra.mxu3 %v1162_v53  ;;  %v1154_v8 = vmul.f32 %v12177_v31, %v12104_v56  ;;  %v1473_v53 = vrot.slane %v12426_v36, 1  ;;  %v10598_v31 = vld [vmem:[%s17933_s1 + $0x3a8] sm:$0xff] }
 0x155   : > { %1273 = vmatmul.f32.gmra.mxu1 %v1152_v27  ;;  %v1164_v27 = vmul.f32 %v12175_v52, %v12074_v1  ;;  %v10621_v1 = vld [vmem:[%s17934_s2 + $0x1e0] sm:$0xff]  ;;  %v10638_v52 = vld [vmem:[%s17934_s2 + $0x268] sm:$0xff] }
 0x156   : > { %2292 = vperm.xlu2 %11277, %v10594_v3   ;;  %v10599_v3 = vld [vmem:[%s17933_s1 + $0x3b0] sm:$0xff]  ;;  %2449 = vmatpush.msrb.mxu3 %v10621_v1  ;;  %v10605_v1 = vld [vmem:[%s17933_s1 + $0x3e0] sm:$0xff] }
 0x157   : > { %2287 = vperm.xlu1 %11276, %v10593_v20   ;;  %v12390_v6 = vpop.f32.mrf.mxu2  ;;  %2282 = vperm.xlu0 %11275, %v10592_v34   ;;  %v1474_v20 = vsel %vm1432_vm1, %v1471_v5, %v1473_v53  ;;  %v12458_v34 = vld [vmem:[%s11542_s12 + $0x68] sm:$0xff] }
 0x158   : > { %18100 = vst [vmem:[#allocation12_spill] sm:$0xff] %v12390_v6  ;;  %v12393_v51 = vpop.permute.xlu2 %1675  ;;  %2706 = vmatpush.msrb.mxu0 %v10638_v52  ;;  %v10602_v5 = vld [vmem:[%s17933_s1 + $0x3c8] sm:$0xff]  ;;  %v10617_v52 = vld [vmem:[%s17934_s2 + $0x1c0] sm:$0xff] }
 0x159   : > { %v12395_v62 = vpop.permute.xlu1 %1625  ;;  %v12397_v2 = vpop.permute.xlu0 %1620 }
 0x15c   : > { %1856 = vmatmul.f32.gmra.mxu2 %v1755_v14  ;;  %1306 = vmatmul.f32.gmra.mxu3 %v1163_v22  ;;  %v1155_v22 = vmul.f32 %v12076_v17, %v12458_v34  ;;  %v10620_v17 = vld [vmem:[%s17934_s2 + $0x1d8] sm:$0xff] }
 0x15d   : > { %1276 = vmatmul.f32.gmra.mxu1 %v1153_v19  ;;  %v1757_v19 = vmul.f32 %v12293_v50, %v1474_v20  ;;  %v10601_v50 = vld [vmem:[%s17933_s1 + $0x3c0] sm:$0xff]  ;;  %2450 = vmatpush.msrb.mxu3 %v10620_v17  ;;  %v10616_v20 = vld [vmem:[%s17934_s2 + $0x1b8] sm:$0xff]  ;;  %v10614_v17 = vld [vmem:[%s17934_s2 + $0x1a8] sm:$0xff] }
 0x15e   : > { %2307 = vperm.xlu2 %11277, %v10597_v47   ;;  %v1165_v47 = vmul.f32 %v12297_v7, %v12110_v58  ;;  %v10637_v58 = vld [vmem:[%s17934_s2 + $0x260] sm:$0xff]  ;;  %v10619_v7 = vld [vmem:[%s17934_s2 + $0x1d0] sm:$0xff] }
 0x15f   : > { %2302 = vperm.xlu1 %11276, %v10596_v24   ;;  %v12422_v44 = vpop.f32.mrf.mxu2  ;;  %2297 = vperm.xlu0 %11275, %v10595_v11   ;;  %v1475_v24 = vrot.slane %v12461_v38, 1  ;;  %v10603_v11 = vld [vmem:[%s17933_s1 + $0x3d0] sm:$0xff] }
 0x160   : > { %18101 = vst [vmem:[#allocation13_spill] sm:$0xff] %v12422_v44  ;;  %v12428_v48 = vpop.permute.xlu2 %1690  ;;  %2707 = vmatpush.msrb.mxu0 %v10637_v58  ;;  %2451 = vmatpush.msrb.mxu3 %v10619_v7  ;;  %v1479_v7 = vrot.slane %v11950_v59, 1  ;;  %v10613_v59 = vld [vmem:[%s17934_s2 + $0x1a0] sm:$0xff] }
 0x161   : > { %v12430_v43 = vpop.permute.xlu1 %1640  ;;  %v12432_v40 = vpop.permute.xlu0 %1635  ;;  %v1476_v49 = vsel %vm1432_vm1, %v1473_v53, %v1475_v24  ;;  %v1166_v53 = vmul.f32 %v12295_v0, %v12135_v41  ;;  %v10636_v0 = vld [vmem:[%s17934_s2 + $0x258] sm:$0xff] }
 0x162   : > { %2452 = vmatpush.msrb.mxu3 %v10618_v42  ;;  %2708 = vmatpush.msrb.mxu0 %v10636_v0  ;;  %v1167_v42 = vmul.f32 %v12205_v55, %v12173_v29  ;;  %v10633_v29 = vld [vmem:[%s17934_s2 + $0x240] sm:$0xff]  ;;  %v10607_v55 = vld [vmem:[%s17933_s1 + $0x3f0] sm:$0xff] }
 0x163   : > { %v10611_v0 = vld [vmem:[%s17934_s2 + $0x190] sm:$0xff] }
 0x164   : > { %1859 = vmatmul.f32.gmra.mxu2 %v1756_v4  ;;  %1309 = vmatmul.f32.gmra.mxu3 %v1164_v27 }
 0x165   : > { %1279 = vmatmul.f32.gmra.mxu1 %v1154_v8  ;;  %2453 = vmatpush.msrb.mxu3 %v10617_v52 }
 0x166   : > { %2322 = vperm.xlu2 %11277, %v10600_v16   ;;  %v1758_v16 = vmul.f32 %v12397_v2, %v1476_v49  ;;  %v10604_v2 = vld [vmem:[%s17933_s1 + $0x3d8] sm:$0xff] }
 0x167   : > { %2317 = vperm.xlu1 %11276, %v10599_v3   ;;  %v12454_v26 = vpop.f32.mrf.mxu2  ;;  %2312 = vperm.xlu0 %11275, %v10598_v31   ;;  %v12507_v3 = vld [vmem:[%s11542_s12 + $0x28] sm:$0xff] }
 0x168   : > { %18102 = vst [vmem:[#allocation14_spill] sm:$0xff] %v12454_v26  ;;  %v12463_v18 = vpop.permute.xlu2 %1705  ;;  %v10606_v31 = vld [vmem:[%s17933_s1 + $0x3e8] sm:$0xff]  ;;  %v1477_v41 = vrot.slane %v12507_v3, 1  ;;  %2454 = vmatpush.msrb.mxu3 %v10616_v20  ;;  %v10631_v20 = vld [vmem:[%s17934_s2 + $0x230] sm:$0xff] }
 0x169   : > { %v12465_v45 = vpop.permute.xlu1 %1655  ;;  %v12467_v14 = vpop.permute.xlu0 %1650  ;;  %v12943_v26 = vld [vmem:[%s11542_s12 + $0x8] sm:$0xff] }
 0x16a   : > { %18130 = vst [vmem:[#allocation42_spill] sm:$0xff] %v12943_v26 }
 0x16c   : > { %1862 = vmatmul.f32.gmra.mxu2 %v1757_v19  ;;  %1312 = vmatmul.f32.gmra.mxu3 %v1165_v47  ;;  %v10635_v19 = vld [vmem:[%s17934_s2 + $0x250] sm:$0xff]  ;;  %v1478_v47 = vsel %vm1432_vm1, %v1475_v24, %v1477_v41 }
 0x16d   : > { %1282 = vmatmul.f32.gmra.mxu1 %v1155_v22  ;;  %2709 = vmatpush.msrb.mxu0 %v10635_v19  ;;  %v1759_v24 = vmul.f32 %v12395_v62, %v1478_v47  ;;  %v10608_v62 = vld [vmem:[%s17933_s1 + $0x3f8] sm:$0xff]  ;;  %v10610_v47 = vld [vmem:[%s17934_s2 + $0x188] sm:$0xff] }
 0x16e   : > { %2337 = vperm.xlu2 %11277, %v10603_v11   ;;  %v10615_v11 = vld [vmem:[%s17934_s2 + $0x1b0] sm:$0xff] }
 0x16f   : > { %2332 = vperm.xlu1 %11276, %v10602_v5   ;;  %v12493_v57 = vpop.f32.mrf.mxu2  ;;  %2327 = vperm.xlu0 %11275, %v10601_v50   ;;  %v10634_v5 = vld [vmem:[%s17934_s2 + $0x248] sm:$0xff] }
 0x170   : > { %18103 = vst [vmem:[#allocation15_spill] sm:$0xff] %v12493_v57  ;;  %v12499_v4 = vpop.permute.xlu2 %1720  ;;  %2455 = vmatpush.msrb.mxu3 %v10615_v11  ;;  %2710 = vmatpush.msrb.mxu0 %v10634_v5  ;;  %v10630_v5 = vld [vmem:[%s17934_s2 + $0x228] sm:$0xff] }
 0x171   : > { %v12501_v8 = vpop.permute.xlu1 %1670  ;;  %v12503_v27 = vpop.permute.xlu0 %1665 }
 0x172   : > { %2456 = vmatpush.msrb.mxu3 %v10614_v17  ;;  %2711 = vmatpush.msrb.mxu0 %v10633_v29  ;;  %v1481_v17 = vrot.slane %v11978_v28, 1  ;;  %v10609_v28 = vld [vmem:[%s17934_s2 + $0x180] sm:$0xff] }
 0x174   : > { %1865 = vmatmul.f32.gmra.mxu2 %v1758_v16  ;;  %1315 = vmatmul.f32.gmra.mxu3 %v1166_v53  ;;  %v10641_v16 = vld [vmem:[%s17933_s1 + $0x500] sm:$0xff]  ;;  %v12558_v53 = vpop.f32.mrf.mxu0 }
 0x175   : > { %2457 = vmatpush.msrb.mxu3 %v10613_v59  ;;  %v1482_v59 = vsel %vm1432_vm1, %v1479_v7, %v1481_v17 }
 0x176   : > { %2352 = vperm.xlu2 %11277, %v10606_v31   ;;  %v10612_v31 = vld [vmem:[%s17934_s2 + $0x198] sm:$0xff] }
 0x177   : > { %2347 = vperm.xlu1 %11276, %v10605_v1   ;;  %v12533_v22 = vpop.f32.mrf.mxu2  ;;  %2342 = vperm.xlu0 %11275, %v10604_v2   ;;  %v10632_v1 = vld [vmem:[%s17934_s2 + $0x238] sm:$0xff]  ;;  %v1480_v2 = vsel %vm1432_vm1, %v1477_v41, %v1479_v7 }
 0x178   : > { %18104 = vst [vmem:[#allocation16_spill] sm:$0xff] %v12533_v22  ;;  %v12542_v50 = vpop.permute.xlu2 %1735  ;;  %2458 = vmatpush.msrb.mxu3 %v10612_v31  ;;  %2712 = vmatpush.msrb.mxu0 %v10632_v1  ;;  %v1760_v41 = vmul.f32 %v12315_v12, %v1480_v2  ;;  %v10643_v12 = vld [vmem:[%s17933_s1 + $0x510] sm:$0xff]  ;;  %v1761_v2 = vmul.f32 %v12432_v40, %v1482_v59  ;;  %v10646_v40 = vld [vmem:[%s17933_s1 + $0x528] sm:$0xff] }
 0x179   : > { %v12547_v58 = vpop.permute.xlu1 %1685  ;;  %v12551_v49 = vpop.permute.xlu0 %1680  ;;  %v10627_v1 = vld [vmem:[%s17934_s2 + $0x210] sm:$0xff] }
 0x17a   : > { %2459 = vmatpush.msrb.mxu3 %v10611_v0  ;;  %2713 = vmatpush.msrb.mxu0 %v10631_v20  ;;  %v1169_v20 = vmul.f32 %v12317_v21, %v12235_v32  ;;  %v10645_v32 = vld [vmem:[%s17933_s1 + $0x520] sm:$0xff] }
 0x17b   : > { %v10625_v21 = vld [vmem:[%s17934_s2 + $0x200] sm:$0xff] }
 0x17c   : > { %1868 = vmatmul.f32.gmra.mxu2 %v1759_v24  ;;  %1318 = vmatmul.f32.gmra.mxu3 %v1167_v42  ;;  %v1168_v42 = vmul.f32 %v12319_v46, %v12209_v54  ;;  %v10642_v54 = vld [vmem:[%s17933_s1 + $0x508] sm:$0xff]  ;;  %v10629_v46 = vld [vmem:[%s17934_s2 + $0x220] sm:$0xff] }
 0x17d   : > { %2460 = vmatpush.msrb.mxu3 %v10610_v47  ;;  %2714 = vmatpush.msrb.mxu0 %v10630_v5  ;;  %v10626_v47 = vld [vmem:[%s17934_s2 + $0x208] sm:$0xff]  ;;  %v1483_v5 = vrot.slane %v12008_v39, 1  ;;  %v12660_v39 = vld [vmem:[%s11542_s12] sm:$0xff] }
 0x17e   : > { %3077 = vperm.xlu2 %11277, %v10641_v16   ;;  %v10644_v16 = vld [vmem:[%s17933_s1 + $0x518] sm:$0xff]  ;;  %18108 = vst [vmem:[#allocation20_spill] sm:$0xff] %v12660_v39 }
 0x17f   : > { %2362 = vperm.xlu1 %11276, %v10608_v62   ;;  %v12578_v52 = vpop.f32.mrf.mxu2  ;;  %2357 = vperm.xlu0 %11275, %v10607_v55   ;;  %v12618_v62 = vpop.f32.mrf.mxu0  ;;  %v10628_v55 = vld [vmem:[%s17934_s2 + $0x218] sm:$0xff] }
 0x180   : > { %18105 = vst [vmem:[#allocation17_spill] sm:$0xff] %v12578_v52  ;;  %v12587_v19 = vpop.permute.xlu2 %1750  ;;  %2461 = vmatpush.msrb.mxu3 %v10609_v28  ;;  %2715 = vmatpush.msrb.mxu0 %v10629_v46 }
 0x181   : > { %v12592_v11 = vpop.permute.xlu1 %1700  ;;  %v12599_v24 = vpop.permute.xlu0 %1695 }
 0x182   : > { %2716 = vmatpush.msrb.mxu0 %v10628_v55  ;;  %v1170_v55 = vmul.f32 %v12237_v13, %v12266_v23  ;;  %v1427_v23 = vld [vmem:[%s11542_s12 + $0xe8] sm:$0xff] }
 0x184   : > { %1871 = vmatmul.f32.gmra.mxu2 %v1760_v41  ;;  %1321 = vmatmul.f32.gmra.mxu3 %v1168_v42  ;;  %v10647_v41 = vld [vmem:[%s17933_s1 + $0x530] sm:$0xff]  ;;  %v1484_v42 = vsel %vm1432_vm1, %v1481_v17, %v1483_v5  ;;  %v1485_v17 = vrot.slane %v12028_v15, 1  ;;  %v10648_v15 = vld [vmem:[%s17933_s1 + $0x538] sm:$0xff] }
 0x185   : > { %2717 = vmatpush.msrb.mxu0 %v10627_v1  ;;  %v10650_v1 = vld [vmem:[%s17933_s1 + $0x548] sm:$0xff] }
 0x186   : > { %3092 = vperm.xlu2 %11277, %v10644_v16  }
 0x187   : > { %3087 = vperm.xlu1 %11276, %v10643_v12   ;;  %v12621_v29 = vpop.f32.mrf.mxu2  ;;  %3082 = vperm.xlu0 %11275, %v10642_v54   ;;  %v12657_v12 = vpop.f32.mrf.mxu0  ;;  %v1762_v54 = vmul.f32 %v12430_v43, %v1484_v42  ;;  %v1486_v43 = vsel %vm1432_vm1, %v1483_v5, %v1485_v17  ;;  %v1487_v5 = vrot.slane %v12055_v61, 1  ;;  %v1171_v42 = vmul.f32 %v1427_v23, %v12342_v10  ;;  %v10688_v10 = vld [vmem:[%s17934_s2 + $0x2f8] sm:$0xff] }
 0x188   : > { %18106 = vst [vmem:[#allocation18_spill] sm:$0xff] %v12621_v29  ;;  %v12626_v31 = vpop.permute.xlu2 %2217  ;;  %2718 = vmatpush.msrb.mxu0 %v10626_v47  ;;  %3316 = vmatpush.msrb.mxu1 %v10688_v10  ;;  %v10656_v10 = vld [vmem:[%s17933_s1 + $0x578] sm:$0xff] }
 0x189   : > { %v12632_v0 = vpop.permute.xlu1 %1715  ;;  %v12634_v7 = vpop.permute.xlu0 %1710 }
 0x18a   : > { %2719 = vmatpush.msrb.mxu0 %v10625_v21 }
 0x18b   : > { %2720 = vmatmul.f32.vlgmr.msrb.gmra.mxu0 %v12660_v39 }
 0x18c   : > { %1874 = vmatmul.f32.gmra.mxu2 %v1761_v2  ;;  %1324 = vmatmul.f32.gmra.mxu3 %v1169_v20  ;;  %v10649_v2 = vld [vmem:[%s17933_s1 + $0x540] sm:$0xff] }
 0x18e   : > { %3107 = vperm.xlu2 %11277, %v10647_v41   ;;  %v1763_v41 = vmul.f32 %v12340_v60, %v1486_v43  ;;  %v10651_v60 = vld [vmem:[%s17933_s1 + $0x550] sm:$0xff] }
 0x18f   : > { %3102 = vperm.xlu1 %11276, %v10646_v40   ;;  %v12655_v16 = vpop.f32.mrf.mxu2  ;;  %3097 = vperm.xlu0 %11275, %v10645_v32   ;;  %v12689_v47 = vpop.f32.mrf.mxu0  ;;  %v12695_v32 = vld [vmem:[%s11542_s12 + $0xf8] sm:$0xff]  ;;  %v10687_v43 = vld [vmem:[%s17934_s2 + $0x2f0] sm:$0xff] }
 0x190   : > { %18107 = vst [vmem:[#allocation19_spill] sm:$0xff] %v12655_v16  ;;  %v12662_v28 = vpop.permute.xlu2 %2232  ;;  %v17940_v61 = vrot.slane %v12695_v32, 7  ;;  %3317 = vmatpush.msrb.mxu1 %v10687_v43  ;;  %v10654_v43 = vld [vmem:[%s17933_s1 + $0x568] sm:$0xff]  ;;  %v12867_v16 = vld [vmem:[%s11542_s12 + $0x30] sm:$0xff] }
 0x191   : > { %v12666_v46 = vpop.permute.xlu1 %1730  ;;  %v12669_v59 = vpop.permute.xlu0 %1725  ;;  %18110 = vst [vmem:[#allocation22_spill] sm:$0xff] %v12695_v32  ;;  %v10661_v32 = vld [vmem:[%s17933_s1 + $0x5a0] sm:$0xff] }
 0x193   : > { %2723 = vmatmul.f32.gmra.mxu0 %v12365_v35 }
 0x194   : > { %1877 = vmatmul.f32.gmra.mxu2 %v1762_v54  ;;  %1327 = vmatmul.f32.gmra.mxu3 %v1170_v55  ;;  %v10653_v54 = vld [vmem:[%s17933_s1 + $0x560] sm:$0xff]  ;;  %v10652_v55 = vld [vmem:[%s17933_s1 + $0x558] sm:$0xff] }
 0x196   : > { %3122 = vperm.xlu2 %11277, %v10650_v1   ;;  %v2077_v1 = vrot.slane %v12660_v39, 7 }
 0x197   : > { %3117 = vperm.xlu1 %11276, %v10649_v2   ;;  %v12683_v13 = vpop.f32.mrf.mxu2  ;;  %3112 = vperm.xlu0 %11275, %v10648_v15   ;;  %v1488_v2 = vsel %vm1432_vm1, %v1485_v17, %v1487_v5  ;;  %v10686_v17 = vld [vmem:[%s17934_s2 + $0x2e8] sm:$0xff]  ;;  %v12731_v30 = vpop.f32.mrf.mxu0 }
 0x198   : > { %18109 = vst [vmem:[#allocation21_spill] sm:$0xff] %v12683_v13  ;;  %v12686_v20 = vpop.permute.xlu2 %2247  ;;  %3318 = vmatpush.msrb.mxu1 %v10686_v17 }
 0x199   : > { %v12692_v40 = vpop.permute.xlu1 %1745  ;;  %v12698_v21 = vpop.permute.xlu0 %1740 }
 0x19b   : > { %2726 = vmatmul.f32.gmra.mxu0 %v12400_v9 }
 0x19c   : > { %1880 = vmatmul.f32.gmra.mxu2 %v1763_v41  ;;  %1330 = vmatmul.f32.gmra.mxu3 %v1171_v42  ;;  %v2171_v41 = vsel %vm339_vm0, %v17940_v61, %v2077_v1  ;;  %v1764_v42 = vmul.f32 %v12467_v14, %v1488_v2  ;;  %v10655_v61 = vld [vmem:[%s17933_s1 + $0x570] sm:$0xff]  ;;  %v10685_v14 = vld [vmem:[%s17934_s2 + $0x2e0] sm:$0xff]  ;;  %v1489_v2 = vrot.slane %v12084_v33, 1 }
 0x19d   : > { %3319 = vmatpush.msrb.mxu1 %v10685_v14  ;;  %v10683_v33 = vld [vmem:[%s17934_s2 + $0x2d0] sm:$0xff] }
 0x19e   : > { %3137 = vperm.xlu2 %11277, %v10653_v54  }
 0x19f   : > { %3132 = vperm.xlu1 %11276, %v10652_v55   ;;  %v12716_v15 = vpop.f32.mrf.mxu2  ;;  %3127 = vperm.xlu0 %11275, %v10651_v60  }
 0x1a0   : > { %18111 = vst [vmem:[#allocation23_spill] sm:$0xff] %v12716_v15  ;;  %v12721_v23 = vpop.permute.xlu2 %2262 }
 0x1a1   : > { %v2213_v54 = vpop.permute.xlu1 %2212  ;;  %v2208_v55 = vpop.permute.xlu0 %2207 }
 0x1a2   : > { %v2365_v60 = vmul.f32 %v2208_v55, %v2171_v41  ;;  %v10684_v41 = vld [vmem:[%s17934_s2 + $0x2d8] sm:$0xff]  ;;  %v2078_v55 = vrot.slane %v12365_v35, 7 }
 0x1a3   : > { %3320 = vmatpush.msrb.mxu1 %v10684_v41  ;;  %2729 = vmatmul.f32.gmra.mxu0 %v12426_v36 }
 0x1a4   : > { %1883 = vmatmul.f32.gmra.mxu2 %v1764_v42  ;;  %2462 = vmatmul.f32.vlgmr.msrb.gmra.mxu3 %v2365_v60  ;;  %v1490_v42 = vsel %vm1432_vm1, %v1487_v5, %v1489_v2  ;;  %v2079_v14 = vsel %vm339_vm0, %v2077_v1, %v2078_v55  ;;  %v10682_v5 = vld [vmem:[%s17934_s2 + $0x2c8] sm:$0xff]  ;;  %v10659_v1 = vld [vmem:[%s17933_s1 + $0x590] sm:$0xff] }
 0x1a5   : > { %v1765_v35 = vmul.f32 %v12465_v45, %v1490_v42  ;;  %3321 = vmatpush.msrb.mxu1 %v10683_v33  ;;  %v2366_v41 = vmul.f32 %v2213_v54, %v2079_v14  ;;  %v10681_v45 = vld [vmem:[%s17934_s2 + $0x2c0] sm:$0xff]  ;;  %v2080_v42 = vrot.slane %v12400_v9, 7  ;;  %v12782_v54 = vpop.f32.mrf.mxu0  ;;  %v10680_v33 = vld [vmem:[%s17934_s2 + $0x2b8] sm:$0xff] }
 0x1a6   : > { %3152 = vperm.xlu2 %11277, %v10656_v10   ;;  %v1491_v10 = vrot.slane %v12104_v56, 1  ;;  %v10657_v56 = vld [vmem:[%s17933_s1 + $0x580] sm:$0xff]  ;;  %18114 = vst [vmem:[#allocation26_spill] sm:$0xff] %v12782_v54 }
 0x1a7   : > { %3147 = vperm.xlu1 %11276, %v10655_v61   ;;  %v12750_v17 = vpop.f32.mrf.mxu2  ;;  %3142 = vperm.xlu0 %11275, %v10654_v43   ;;  %v12756_v15 = vpop.f32.mrf.mxu3 }
 0x1a8   : > { %18112 = vst [vmem:[#allocation24_spill] sm:$0xff] %v12750_v17  ;;  %v12758_v60 = vpop.permute.xlu2 %2277  ;;  %v10658_v17 = vld [vmem:[%s17933_s1 + $0x588] sm:$0xff]  ;;  %3322 = vmatpush.msrb.mxu1 %v10682_v5  ;;  %v1492_v14 = vsel %vm1432_vm1, %v1489_v2, %v1491_v10 }
 0x1a9   : > { %18113 = vst [vmem:[#allocation25_spill] sm:$0xff] %v12756_v15  ;;  %v12766_v61 = vpop.permute.xlu1 %2227  ;;  %v2223_v43 = vpop.permute.xlu0 %2222  ;;  %v10678_v2 = vld [vmem:[%s17934_s2 + $0x2a8] sm:$0xff]  ;;  %v13166_v15 = vld [vmem:[%s11542_s12 + $0x70] sm:$0xff] }
 0x1aa   : > { %3323 = vmatpush.msrb.mxu1 %v10681_v45  ;;  %v2081_v45 = vsel %vm339_vm0, %v2078_v55, %v2080_v42  ;;  %v10662_v55 = vld [vmem:[%s17933_s1 + $0x5a8] sm:$0xff]  ;;  %18155 = vst [vmem:[#allocation64_spill] sm:$0xff] %v13166_v15 }
 0x1ab   : > { %2732 = vmatmul.f32.gmra.mxu0 %v12461_v38 }
 0x1ac   : > { %1886 = vmatmul.f32.gmra.mxu2 %v1765_v35  ;;  %2465 = vmatmul.f32.gmra.mxu3 %v2366_v41  ;;  %v10679_v35 = vld [vmem:[%s17934_s2 + $0x2b0] sm:$0xff] }
 0x1ad   : > { %3324 = vmatpush.msrb.mxu1 %v10680_v33  ;;  %v2367_v33 = vmul.f32 %v12626_v31, %v2081_v45  ;;  %v10676_v31 = vld [vmem:[%s17934_s2 + $0x298] sm:$0xff] }
 0x1ae   : > { %3167 = vperm.xlu2 %11277, %v10659_v1  }
 0x1af   : > { %3162 = vperm.xlu1 %11276, %v10658_v17   ;;  %v12788_v5 = vpop.f32.mrf.mxu2  ;;  %3157 = vperm.xlu0 %11275, %v10657_v56   ;;  %v12793_v9 = vpop.f32.mrf.mxu3  ;;  %v1766_v17 = vmul.f32 %v12367_v37, %v1492_v14  ;;  %v1493_v56 = vrot.slane %v12458_v34, 1  ;;  %v10677_v37 = vld [vmem:[%s17934_s2 + $0x2a0] sm:$0xff]  ;;  %v10660_v34 = vld [vmem:[%s17933_s1 + $0x598] sm:$0xff]  ;;  %v2082_v14 = vrot.slane %v12426_v36, 7 }
 0x1b0   : > { %18115 = vst [vmem:[#allocation27_spill] sm:$0xff] %v12788_v5  ;;  %v12795_v41 = vpop.permute.xlu2 %2292  ;;  %3325 = vmatpush.msrb.mxu1 %v10679_v35 }
 0x1b1   : > { %18116 = vst [vmem:[#allocation28_spill] sm:$0xff] %v12793_v9  ;;  %v12803_v1 = vpop.permute.xlu1 %2242  ;;  %v12806_v5 = vpop.permute.xlu0 %2237  ;;  %v1494_v35 = vsel %vm1432_vm1, %v1491_v10, %v1493_v56 }
 0x1b2   : > { %3326 = vmatpush.msrb.mxu1 %v10678_v2  ;;  %v10675_v2 = vld [vmem:[%s17934_s2 + $0x290] sm:$0xff]  ;;  %v1767_v10 = vmul.f32 %v12503_v27, %v1494_v35  ;;  %v10673_v27 = vld [vmem:[%s17934_s2 + $0x280] sm:$0xff] }
 0x1b3   : > { %2735 = vmatmul.f32.gmra.mxu0 %v12507_v3  ;;  %v11280_v35 = vld [vmem:[%s11542_s12 + $0x70] sm:$0xff] }
 0x1b4   : > { %1889 = vmatmul.f32.gmra.mxu2 %v1766_v17  ;;  %2468 = vmatmul.f32.gmra.mxu3 %v2367_v33  ;;  %v12831_v17 = vpop.f32.mrf.mxu0 }
 0x1b5   : > { %3327 = vmatpush.msrb.mxu1 %v10677_v37  ;;  %18118 = vst [vmem:[#allocation30_spill] sm:$0xff] %v12831_v17  ;;  %v2083_v37 = vsel %vm339_vm0, %v2080_v42, %v2082_v14  ;;  %v10664_v42 = vld [vmem:[%s17933_s1 + $0x5b8] sm:$0xff]  ;;  %v18152_v17 = vrot.slane %v12943_v26, 1 }
 0x1b6   : > { %3182 = vperm.xlu2 %11277, %v10662_v55  }
 0x1b7   : > { %3177 = vperm.xlu1 %11276, %v10661_v32   ;;  %v12826_v45 = vpop.f32.mrf.mxu2  ;;  %3172 = vperm.xlu0 %11275, %v10660_v34   ;;  %v12833_v36 = vpop.f32.mrf.mxu3  ;;  %v10674_v32 = vld [vmem:[%s17934_s2 + $0x288] sm:$0xff] }
 0x1b8   : > { %18117 = vst [vmem:[#allocation29_spill] sm:$0xff] %v12826_v45  ;;  %3328 = vmatpush.msrb.mxu1 %v10676_v31  ;;  %v12835_v33 = vpop.permute.xlu2 %2307  ;;  %v2368_v45 = vmul.f32 %v2223_v43, %v2083_v37  ;;  %v10665_v31 = vld [vmem:[%s17933_s1 + $0x5c0] sm:$0xff]  ;;  %v10663_v43 = vld [vmem:[%s17933_s1 + $0x5b0] sm:$0xff] }
 0x1b9   : > { %18119 = vst [vmem:[#allocation31_spill] sm:$0xff] %v12833_v36  ;;  %v12843_v55 = vpop.permute.xlu1 %2257  ;;  %v12845_v34 = vpop.permute.xlu0 %2252  ;;  %v18134_v36 = vrot.slane %v12660_v39, 1  ;;  %v11283_v39 = vld [vmem:[%s11542_s12 + $0x90] sm:$0xff] }
 0x1ba   : > { %3329 = vmatpush.msrb.mxu1 %v10675_v2  ;;  %v1495_v2 = vrot.slane %v11280_v35, 1 }
 0x1bb   : > { %2738 = vmatmul.f32.gmra.mxu0 %v12867_v16 }
 0x1bc   : > { %1892 = vmatmul.f32.gmra.mxu2 %v1767_v10  ;;  %3330 = vmatpush.msrb.mxu1 %v10674_v32  ;;  %v1496_v37 = vsel %vm1432_vm1, %v1493_v56, %v1495_v2  ;;  %v2084_v32 = vrot.slane %v12461_v38, 7  ;;  %v11281_v38 = vld [vmem:[%s11542_s12 + $0x78] sm:$0xff] }
 0x1bd   : > { %2471 = vmatmul.f32.gmra.mxu3 %v2368_v45  ;;  %v12873_v45 = vpop.f32.mrf.mxu0  ;;  %v1768_v56 = vmul.f32 %v12501_v8, %v1496_v37  ;;  %v10666_v8 = vld [vmem:[%s17933_s1 + $0x5c8] sm:$0xff]  ;;  %v2086_v37 = vrot.slane %v12507_v3, 7 }
 0x1be   : > { %3331 = vmatpush.msrb.mxu1 %v10673_v27  ;;  %3197 = vperm.xlu2 %11277, %v10665_v31   ;;  %v2085_v29 = vsel %vm339_vm0, %v2082_v14, %v2084_v32  ;;  %18123 = vst [vmem:[#allocation35_spill] sm:$0xff] %v12873_v45  ;;  %v10668_v14 = vld [vmem:[%s17933_s1 + $0x5d8] sm:$0xff] }
 0x1bf   : > { %3192 = vperm.xlu1 %11276, %v10664_v42   ;;  %v12861_v10 = vpop.f32.mrf.mxu2  ;;  %3187 = vperm.xlu0 %11275, %v10663_v43   ;;  %v12864_v13 = vpop.f32.mrf.mxu3  ;;  %v1497_v42 = vrot.slane %v11281_v38, 1  ;;  %v2369_v43 = vmul.f32 %v12766_v61, %v2085_v29  ;;  %v12896_v61 = vld [vmem:[%s11542_s12 + $0x80] sm:$0xff]  ;;  %v2087_v57 = vsel %vm339_vm0, %v2084_v32, %v2086_v37  ;;  %v10671_v32 = vld [vmem:[%s17933_s1 + $0x5f0] sm:$0xff] }
 0x1c0   : > { %18120 = vst [vmem:[#allocation32_spill] sm:$0xff] %v12861_v10  ;;  %v12869_v35 = vpop.permute.xlu2 %2322  ;;  %v10667_v10 = vld [vmem:[%s17933_s1 + $0x5d0] sm:$0xff] }
 0x1c1   : > { %18121 = vst [vmem:[#allocation33_spill] sm:$0xff] %v12864_v13  ;;  %v12876_v31 = vpop.permute.xlu1 %2272  ;;  %v12879_v27 = vpop.permute.xlu0 %2267  ;;  %v1498_v38 = vsel %vm1432_vm1, %v1495_v2, %v1497_v42 }
 0x1c2   : > { %18122 = vst [vmem:[#allocation34_spill] sm:$0xff] %v12869_v35  ;;  %v1769_v3 = vmul.f32 %v12393_v51, %v1498_v38  ;;  %v10670_v51 = vld [vmem:[%s17933_s1 + $0x5e8] sm:$0xff]  ;;  %v10736_v38 = vld [vmem:[%s17934_s2 + $0x378] sm:$0xff]  ;;  %v1503_v35 = vrot.slane %v11283_v39, 1 }
 0x1c3   : > { %3928 = vmatpush.msra.mxu2 %v10736_v38 }
 0x1c4   : > { %1895 = vmatmul.f32.gmra.mxu2 %v1768_v56  ;;  %v12899_v56 = vld [vmem:[%s11542_s12 + $0x38] sm:$0xff] }
 0x1c5   : > { %2474 = vmatmul.f32.gmra.mxu3 %v2369_v43  ;;  %2741 = vmatmul.f32.gmra.mxu0 %v12899_v56 }
 0x1c6   : > { %3212 = vperm.xlu2 %11277, %v10668_v14   ;;  %v12913_v14 = vpop.f32.mrf.mxu0 }
 0x1c7   : > { %3207 = vperm.xlu1 %11276, %v10667_v10   ;;  %v12893_v29 = vpop.f32.mrf.mxu2  ;;  %3202 = vperm.xlu0 %11275, %v10666_v8   ;;  %v12901_v52 = vpop.f32.mrf.mxu3  ;;  %v1499_v10 = vrot.slane %v12896_v61, 1  ;;  %18127 = vst [vmem:[#allocation39_spill] sm:$0xff] %v12913_v14  ;;  %v2370_v8 = vmul.f32 %v12662_v28, %v2087_v57  ;;  %v10784_v57 = vld [vmem:[%s17934_s2 + $0x3f8] sm:$0xff] }
 0x1c8   : > { %18124 = vst [vmem:[#allocation36_spill] sm:$0xff] %v12893_v29  ;;  %v12903_v22 = vpop.permute.xlu2 %2337  ;;  %v10669_v29 = vld [vmem:[%s17933_s1 + $0x5e0] sm:$0xff]  ;;  %4411 = vmatpush.msra.mxu3 %v10784_v57 }
 0x1c9   : > { %18125 = vst [vmem:[#allocation37_spill] sm:$0xff] %v12901_v52  ;;  %v12908_v2 = vpop.permute.xlu1 %2287  ;;  %v12911_v43 = vpop.permute.xlu0 %2282  ;;  %v1500_v28 = vsel %vm1432_vm1, %v1497_v42, %v1499_v10  ;;  %v12938_v52 = vld [vmem:[%s11542_s12 + $0x40] sm:$0xff] }
 0x1ca   : > { %18126 = vst [vmem:[#allocation38_spill] sm:$0xff] %v12903_v22  ;;  %v1770_v42 = vmul.f32 %v12551_v49, %v1500_v28  ;;  %v10689_v49 = vld [vmem:[%s17933_s1 + $0x600] sm:$0xff]  ;;  %v11282_v28 = vld [vmem:[%s11542_s12 + $0x88] sm:$0xff]  ;;  %v2092_v39 = vrot.slane %v12938_v52, 7 }
 0x1cc   : > { %1898 = vmatmul.f32.gmra.mxu2 %v1769_v3  ;;  %v12929_v3 = vrot.slane %v12867_v16, 7 }
 0x1cd   : > { %2477 = vmatmul.f32.gmra.mxu3 %v2370_v8  ;;  %2744 = vmatmul.f32.gmra.mxu0 %v12938_v52 }
 0x1ce   : > { %18128 = vst [vmem:[#allocation40_spill] sm:$0xff] %v12929_v3  ;;  %3227 = vperm.xlu2 %11277, %v10671_v32   ;;  %v2089_v38 = vsel %vm339_vm0, %v2086_v37, %v12929_v3  ;;  %v10690_v37 = vld [vmem:[%s17933_s1 + $0x608] sm:$0xff]  ;;  %v12968_v14 = vpop.f32.mrf.mxu0 }
 0x1cf   : > { %3222 = vperm.xlu1 %11276, %v10670_v51   ;;  %v12935_v22 = vpop.f32.mrf.mxu2  ;;  %3217 = vperm.xlu0 %11275, %v10669_v29   ;;  %v12940_v13 = vpop.f32.mrf.mxu3  ;;  %v2371_v57 = vmul.f32 %v12806_v5, %v2089_v38  ;;  %v10672_v29 = vld [vmem:[%s17933_s1 + $0x5f8] sm:$0xff]  ;;  %18132 = vst [vmem:[#allocation44_spill] sm:$0xff] %v12968_v14 }
 0x1d0   : > { %18129 = vst [vmem:[#allocation41_spill] sm:$0xff] %v12940_v13  ;;  %v12945_v8 = vpop.permute.xlu2 %2352  ;;  %v10832_v5 = vld [vmem:[%s17934_s2 + $0x478] sm:$0xff] }
 0x1d1   : > { %18131 = vst [vmem:[#allocation43_spill] sm:$0xff] %v12945_v8  ;;  %v12951_v32 = vpop.permute.xlu1 %2302  ;;  %v12953_v51 = vpop.permute.xlu0 %2297  ;;  %v1501_v8 = vrot.slane %v11282_v28, 1  ;;  %v18133_v28 = vrot.slane %v12943_v26, 1  ;;  %5023 = vmatpush.msra.mxu0 %v10832_v5 }
 0x1d3   : > { %v1502_v38 = vsel %vm1432_vm1, %v1499_v10, %v1501_v8  ;;  %v2947_v14 = vsel %vm1432_vm1, %v18134_v36, %v18133_v28  ;;  %v1504_v28 = vsel %vm1432_vm1, %v1501_v8, %v1503_v35 }
 0x1d4   : > { %1901 = vmatmul.f32.gmra.mxu2 %v1770_v42  ;;  %v2090_v42 = vrot.slane %v12899_v56, 7  ;;  %v1772_v8 = vmul.f32 %v12428_v48, %v1504_v28  ;;  %v10694_v28 = vld [vmem:[%s17933_s1 + $0x628] sm:$0xff] }
 0x1d5   : > { %2480 = vmatmul.f32.gmra.mxu3 %v2371_v57  ;;  %v12983_v57 = vld [vmem:[%s11542_s12 + $0x48] sm:$0xff] }
 0x1d6   : > { %3694 = vperm.xlu2 %11277, %v10690_v37   ;;  %v2091_v56 = vsel %vm339_vm0, %v12929_v3, %v2090_v42  ;;  %2747 = vmatmul.f32.gmra.mxu0 %v12983_v57  ;;  %v1771_v37 = vmul.f32 %v12547_v58, %v1502_v38  ;;  %v10693_v58 = vld [vmem:[%s17933_s1 + $0x620] sm:$0xff]  ;;  %v10691_v38 = vld [vmem:[%s17933_s1 + $0x610] sm:$0xff]  ;;  %v2094_v48 = vrot.slane %v12983_v57, 7 }
 0x1d7   : > { %3689 = vperm.xlu1 %11276, %v10689_v49   ;;  %v12975_v13 = vpop.f32.mrf.mxu2  ;;  %3232 = vperm.xlu0 %11275, %v10672_v29   ;;  %v12985_v44 = vpop.f32.mrf.mxu3  ;;  %v10735_v29 = vld [vmem:[%s17934_s2 + $0x370] sm:$0xff]  ;;  %v2372_v5 = vmul.f32 %v12803_v1, %v2091_v56 }
 0x1d8   : > { %18135 = vst [vmem:[#allocation45_spill] sm:$0xff] %v12985_v44  ;;  %v3078_v10 = vpop.permute.xlu2 %3077  ;;  %3929 = vmatpush.msra.mxu2 %v10735_v29  ;;  %v10783_v1 = vld [vmem:[%s17934_s2 + $0x3f0] sm:$0xff]  ;;  %v13016_v56 = vpop.f32.mrf.mxu0  ;;  %v2093_v29 = vsel %vm339_vm0, %v2090_v42, %v2092_v39  ;;  %v10696_v42 = vld [vmem:[%s17933_s1 + $0x638] sm:$0xff] }
 0x1d9   : > { %v3235_v49 = vmul.f32 %v3078_v10, %v2947_v14  ;;  %v12991_v45 = vpop.permute.xlu1 %2317  ;;  %v12994_v36 = vpop.permute.xlu0 %2312  ;;  %v10692_v14 = vld [vmem:[%s17933_s1 + $0x618] sm:$0xff]  ;;  %18137 = vst [vmem:[#allocation47_spill] sm:$0xff] %v13016_v56  ;;  %4412 = vmatpush.msra.mxu3 %v10783_v1  ;;  %v10695_v1 = vld [vmem:[%s17933_s1 + $0x630] sm:$0xff] }
 0x1da   : > { %18136 = vst [vmem:[#allocation46_spill] sm:$0xff] %v12991_v45 }
 0x1db   : > { %3332 = vmatmul.f32.vlgmr.msrb.gmra.mxu1 %v3235_v49 }
 0x1dc   : > { %1904 = vmatmul.f32.gmra.mxu2 %v1771_v37  ;;  %v13019_v37 = vld [vmem:[%s11542_s12 + $0x50] sm:$0xff] }
 0x1dd   : > { %2483 = vmatmul.f32.gmra.mxu3 %v2372_v5 }
 0x1de   : > { %3709 = vperm.xlu2 %11277, %v10693_v58   ;;  %2750 = vmatmul.f32.gmra.mxu0 %v13019_v37 }
 0x1df   : > { %3704 = vperm.xlu1 %11276, %v10692_v14   ;;  %v13014_v10 = vpop.f32.mrf.mxu2  ;;  %3699 = vperm.xlu0 %11275, %v10691_v38   ;;  %v13021_v49 = vpop.f32.mrf.mxu3  ;;  %v11284_v14 = vld [vmem:[%s11542_s12 + $0x98] sm:$0xff]  ;;  %v2373_v38 = vmul.f32 %v12686_v20, %v2093_v29  ;;  %v10831_v20 = vld [vmem:[%s17934_s2 + $0x470] sm:$0xff] }
 0x1e0   : > { %18138 = vst [vmem:[#allocation48_spill] sm:$0xff] %v13021_v49  ;;  %v13024_v5 = vpop.permute.xlu2 %3092  ;;  %v1505_v44 = vrot.slane %v11284_v14, 1  ;;  %v13051_v14 = vld [vmem:[%s11542_s12 + $0x58] sm:$0xff]  ;;  %5024 = vmatpush.msra.mxu0 %v10831_v20  ;;  %v13059_v3 = vpop.f32.mrf.mxu0 }
 0x1e1   : > { %v13028_v58 = vpop.permute.xlu1 %2332  ;;  %v13031_v56 = vpop.permute.xlu0 %2327  ;;  %18142 = vst [vmem:[#allocation52_spill] sm:$0xff] %v13059_v3 }
 0x1e2   : > { %18139 = vst [vmem:[#allocation49_spill] sm:$0xff] %v13028_v58  ;;  %v1506_v29 = vsel %vm1432_vm1, %v1503_v35, %v1505_v44  ;;  %v2095_v58 = vsel %vm339_vm0, %v2092_v39, %v2094_v48  ;;  %v10699_v39 = vld [vmem:[%s17933_s1 + $0x650] sm:$0xff] }
 0x1e3   : > { %18140 = vst [vmem:[#allocation50_spill] sm:$0xff] %v13031_v56  ;;  %v1773_v35 = vmul.f32 %v12599_v24, %v1506_v29  ;;  %v2374_v20 = vmul.f32 %v12845_v34, %v2095_v58  ;;  %v10698_v24 = vld [vmem:[%s17933_s1 + $0x648] sm:$0xff]  ;;  %v11285_v29 = vld [vmem:[%s11542_s12 + $0xa0] sm:$0xff] }
 0x1e4   : > { %1907 = vmatmul.f32.gmra.mxu2 %v1772_v8  ;;  %v10782_v34 = vld [vmem:[%s17934_s2 + $0x3e8] sm:$0xff] }
 0x1e5   : > { %2486 = vmatmul.f32.gmra.mxu3 %v2373_v38 }
 0x1e6   : > { %3724 = vperm.xlu2 %11277, %v10696_v42   ;;  %2753 = vmatmul.f32.gmra.mxu0 %v13051_v14 }
 0x1e7   : > { %3719 = vperm.xlu1 %11276, %v10695_v1   ;;  %v13048_v8 = vpop.f32.mrf.mxu2  ;;  %3714 = vperm.xlu0 %11275, %v10694_v28   ;;  %v13053_v49 = vpop.f32.mrf.mxu3  ;;  %v10734_v28 = vld [vmem:[%s17934_s2 + $0x368] sm:$0xff] }
 0x1e8   : > { %18141 = vst [vmem:[#allocation51_spill] sm:$0xff] %v13053_v49  ;;  %v13056_v38 = vpop.permute.xlu2 %3107  ;;  %v1507_v49 = vrot.slane %v11285_v29, 1  ;;  %3930 = vmatpush.msra.mxu2 %v10734_v28  ;;  %v13088_v29 = vld [vmem:[%s11542_s12 + $0x60] sm:$0xff]  ;;  %4413 = vmatpush.msra.mxu3 %v10782_v34 }
 0x1e9   : > { %v13062_v42 = vpop.permute.xlu1 %2347  ;;  %v13064_v1 = vpop.permute.xlu0 %2342 }
 0x1ea   : > { %18143 = vst [vmem:[#allocation53_spill] sm:$0xff] %v13062_v42  ;;  %v10697_v42 = vld [vmem:[%s17933_s1 + $0x640] sm:$0xff]  ;;  %v1508_v58 = vsel %vm1432_vm1, %v1505_v44, %v1507_v49 }
 0x1eb   : > { %18144 = vst [vmem:[#allocation54_spill] sm:$0xff] %v13064_v1  ;;  %v1774_v44 = vmul.f32 %v12592_v11, %v1508_v58  ;;  %v10701_v11 = vld [vmem:[%s17933_s1 + $0x660] sm:$0xff]  ;;  %v2098_v58 = vrot.slane %v13051_v14, 7 }
 0x1ec   : > { %1910 = vmatmul.f32.gmra.mxu2 %v1773_v35  ;;  %v2096_v35 = vrot.slane %v13019_v37, 7 }
 0x1ed   : > { %2489 = vmatmul.f32.gmra.mxu3 %v2374_v20 }
 0x1ee   : > { %3739 = vperm.xlu2 %11277, %v10699_v39   ;;  %v2097_v28 = vsel %vm339_vm0, %v2094_v48, %v2096_v35  ;;  %2756 = vmatmul.f32.gmra.mxu0 %v13088_v29  ;;  %v13100_v39 = vld [vmem:[%s11542_s12 + $0x10] sm:$0xff]  ;;  %v10702_v48 = vld [vmem:[%s17933_s1 + $0x668] sm:$0xff] }
 0x1ef   : > { %3734 = vperm.xlu1 %11276, %v10698_v24   ;;  %v13085_v3 = vpop.f32.mrf.mxu2  ;;  %3729 = vperm.xlu0 %11275, %v10697_v42   ;;  %v13090_v1 = vpop.f32.mrf.mxu3  ;;  %v11286_v24 = vld [vmem:[%s11542_s12 + $0xa8] sm:$0xff]  ;;  %v2375_v34 = vmul.f32 %v12843_v55, %v2097_v28 }
 0x1f0   : > { %18145 = vst [vmem:[#allocation55_spill] sm:$0xff] %v13090_v1  ;;  %v13093_v20 = vpop.permute.xlu2 %3122  ;;  %v1509_v9 = vrot.slane %v11286_v24, 1  ;;  %v13105_v42 = vpop.f32.mrf.mxu0  ;;  %v10700_v24 = vld [vmem:[%s17933_s1 + $0x658] sm:$0xff]  ;;  %v10830_v55 = vld [vmem:[%s17934_s2 + $0x468] sm:$0xff] }
 0x1f1   : > { %v13097_v56 = vpop.permute.xlu1 %2362  ;;  %v13103_v6 = vpop.permute.xlu0 %2357  ;;  %18148 = vst [vmem:[#allocation58_spill] sm:$0xff] %v13105_v42  ;;  %5025 = vmatpush.msra.mxu0 %v10830_v55 }
 0x1f2   : > { %18146 = vst [vmem:[#allocation56_spill] sm:$0xff] %v13097_v56  ;;  %v2948_v56 = vrot.slane %v13100_v39, 1  ;;  %v1510_v28 = vsel %vm1432_vm1, %v1507_v49, %v1509_v9 }
 0x1f3   : > { %18147 = vst [vmem:[#allocation57_spill] sm:$0xff] %v13103_v6  ;;  %v13128_v6 = vld [vmem:[%s11542_s12 + $0x68] sm:$0xff]  ;;  %v1775_v49 = vmul.f32 %v12463_v18, %v1510_v28  ;;  %v10733_v18 = vld [vmem:[%s17934_s2 + $0x360] sm:$0xff]  ;;  %v2100_v28 = vrot.slane %v13088_v29, 7 }
 0x1f4   : > { %1913 = vmatmul.f32.gmra.mxu2 %v1774_v44  ;;  %v2949_v45 = vsel %vm1432_vm1, %v18152_v17, %v2948_v56  ;;  %v10704_v17 = vld [vmem:[%s17933_s1 + $0x678] sm:$0xff] }
 0x1f5   : > { %2492 = vmatmul.f32.gmra.mxu3 %v2375_v34  ;;  %v2099_v34 = vsel %vm339_vm0, %v2096_v35, %v2098_v58  ;;  %3931 = vmatpush.msra.mxu2 %v10733_v18 }
 0x1f6   : > { %3754 = vperm.xlu2 %11277, %v10702_v48   ;;  %2759 = vmatmul.f32.gmra.mxu0 %v13128_v6  ;;  %v2376_v55 = vmul.f32 %v12721_v23, %v2099_v34  ;;  %v10703_v23 = vld [vmem:[%s17933_s1 + $0x670] sm:$0xff] }
 0x1f7   : > { %3749 = vperm.xlu1 %11276, %v10701_v11   ;;  %v13123_v44 = vpop.f32.mrf.mxu2  ;;  %3744 = vperm.xlu0 %11275, %v10700_v24   ;;  %v13125_v1 = vpop.f32.mrf.mxu3  ;;  %v11287_v11 = vld [vmem:[%s11542_s12 + $0xb0] sm:$0xff] }
 0x1f8   : > { %18149 = vst [vmem:[#allocation59_spill] sm:$0xff] %v13123_v44  ;;  %v13131_v42 = vpop.permute.xlu2 %3137  ;;  %v1511_v24 = vrot.slane %v11287_v11, 1 }
 0x1f9   : > { %18150 = vst [vmem:[#allocation60_spill] sm:$0xff] %v13125_v1  ;;  %v3088_v48 = vpop.permute.xlu1 %3087  ;;  %v3083_v44 = vpop.permute.xlu0 %3082  ;;  %v13140_v1 = vld [vmem:[%s11542_s12 + $0x18] sm:$0xff] }
 0x1fa   : > { %18151 = vst [vmem:[#allocation61_spill] sm:$0xff] %v13131_v42  ;;  %v3236_v35 = vmul.f32 %v3083_v44, %v2949_v45  ;;  %v10705_v42 = vld [vmem:[%s17933_s1 + $0x680] sm:$0xff]  ;;  %v13156_v45 = vpop.f32.mrf.mxu0  ;;  %v1512_v34 = vsel %vm1432_vm1, %v1509_v9, %v1511_v24  ;;  %v2950_v11 = vrot.slane %v13140_v1, 1 }
 0x1fb   : > { %18153 = vst [vmem:[#allocation62_spill] sm:$0xff] %v13156_v45  ;;  %v10781_v44 = vld [vmem:[%s17934_s2 + $0x3e0] sm:$0xff]  ;;  %v1776_v9 = vmul.f32 %v12634_v7, %v1512_v34  ;;  %v11288_v7 = vld [vmem:[%s11542_s12 + $0xb8] sm:$0xff] }
 0x1fc   : > { %1916 = vmatmul.f32.gmra.mxu2 %v1775_v49  ;;  %3335 = vmatmul.f32.gmra.mxu1 %v3236_v35  ;;  %v2951_v45 = vsel %vm1432_vm1, %v2948_v56, %v2950_v11  ;;  %v10707_v56 = vld [vmem:[%s17933_s1 + $0x690] sm:$0xff]  ;;  %v1513_v34 = vrot.slane %v11288_v7, 1 }
 0x1fd   : > { %2495 = vmatmul.f32.gmra.mxu3 %v2376_v55  ;;  %v2101_v55 = vsel %vm339_vm0, %v2098_v58, %v2100_v28  ;;  %v10708_v58 = vld [vmem:[%s17933_s1 + $0x698] sm:$0xff] }
 0x1fe   : > { %3769 = vperm.xlu2 %11277, %v10705_v42   ;;  %4414 = vmatpush.msra.mxu3 %v10781_v44  ;;  %v3237_v44 = vmul.f32 %v3088_v48, %v2951_v45  ;;  %v10829_v48 = vld [vmem:[%s17934_s2 + $0x460] sm:$0xff]  ;;  %v1514_v45 = vsel %vm1432_vm1, %v1511_v24, %v1513_v34 }
 0x1ff   : > { %3764 = vperm.xlu1 %11276, %v10704_v17   ;;  %v13162_v49 = vpop.f32.mrf.mxu2  ;;  %3759 = vperm.xlu0 %11275, %v10703_v23   ;;  %v13168_v18 = vpop.f32.mrf.mxu3  ;;  %v13179_v17 = vld [vmem:[%s11542_s12 + $0x20] sm:$0xff] }
 0x200   : > { %18154 = vst [vmem:[#allocation63_spill] sm:$0xff] %v13162_v49  ;;  %v13171_v35 = vpop.permute.xlu2 %3152  ;;  %2762 = vmatmul.f32.gmra.mxu0 %v13166_v15  ;;  %v2952_v49 = vrot.slane %v13179_v17, 1 }
 0x201   : > { %18156 = vst [vmem:[#allocation65_spill] sm:$0xff] %v13168_v18  ;;  %v13176_v42 = vpop.permute.xlu1 %3102  ;;  %v13181_v23 = vpop.permute.xlu0 %3097  ;;  %v2377_v18 = vmul.f32 %v12879_v27, %v2101_v55  ;;  %v11289_v55 = vld [vmem:[%s11542_s12 + $0x68] sm:$0xff]  ;;  %5026 = vmatpush.msra.mxu0 %v10829_v48 }
 0x202   : > { %18157 = vst [vmem:[#allocation66_spill] sm:$0xff] %v13171_v35  ;;  %v10706_v35 = vld [vmem:[%s17933_s1 + $0x688] sm:$0xff]  ;;  %v13195_v27 = vpop.f32.mrf.mxu1  ;;  %v13204_v25 = vpop.f32.mrf.mxu0  ;;  %v2953_v24 = vsel %vm1432_vm1, %v2950_v11, %v2952_v49  ;;  %v10711_v11 = vld [vmem:[%s17933_s1 + $0x6b0] sm:$0xff] }
 0x203   : > { %18158 = vst [vmem:[#allocation67_spill] sm:$0xff] %v13179_v17  ;;  %v13207_v17 = vld [vmem:[%s11542_s12 + $0x78] sm:$0xff] }
 0x204   : > { %1919 = vmatmul.f32.gmra.mxu2 %v1776_v9  ;;  %3338 = vmatmul.f32.gmra.mxu1 %v3237_v44  ;;  %v2102_v9 = vrot.slane %v11289_v55, 7  ;;  %18160 = vst [vmem:[#allocation69_spill] sm:$0xff] %v13204_v25  ;;  %v13220_v55 = vld [vmem:[%s11542_s12 + $0x28] sm:$0xff]  ;;  %v11290_v25 = vld [vmem:[%s11542_s12 + $0xc0] sm:$0xff] }
 0x205   : > { %2498 = vmatmul.f32.gmra.mxu3 %v2377_v18  ;;  %18163 = vst [vmem:[#allocation72_spill] sm:$0xff] %v13220_v55 }
 0x206   : > { %3784 = vperm.xlu2 %11277, %v10708_v58   ;;  %v2103_v44 = vsel %vm339_vm0, %v2100_v28, %v2102_v9  ;;  %v1777_v58 = vmul.f32 %v12632_v0, %v1514_v45  ;;  %v3238_v28 = vmul.f32 %v13024_v5, %v2953_v24  ;;  %v10710_v0 = vld [vmem:[%s17933_s1 + $0x6a8] sm:$0xff]  ;;  %v2104_v45 = vrot.slane %v13166_v15, 7  ;;  %v10780_v24 = vld [vmem:[%s17934_s2 + $0x3d8] sm:$0xff] }
 0x207   : > { %3779 = vperm.xlu1 %11276, %v10707_v56   ;;  %v13202_v7 = vpop.f32.mrf.mxu2  ;;  %3774 = vperm.xlu0 %11275, %v10706_v35   ;;  %v13209_v18 = vpop.f32.mrf.mxu3  ;;  %v2378_v48 = vmul.f32 %v12876_v31, %v2103_v44  ;;  %v10709_v31 = vld [vmem:[%s17933_s1 + $0x6a0] sm:$0xff]  ;;  %v2954_v5 = vrot.slane %v13220_v55, 1 }
 0x208   : > { %18159 = vst [vmem:[#allocation68_spill] sm:$0xff] %v13202_v7  ;;  %v13212_v54 = vpop.permute.xlu2 %3167  ;;  %2765 = vmatmul.f32.gmra.mxu0 %v13207_v17  ;;  %v1515_v7 = vrot.slane %v11290_v25, 1  ;;  %v10732_v25 = vld [vmem:[%s17934_s2 + $0x358] sm:$0xff]  ;;  %4415 = vmatpush.msra.mxu3 %v10780_v24 }
 0x209   : > { %18161 = vst [vmem:[#allocation70_spill] sm:$0xff] %v13209_v18  ;;  %v13217_v56 = vpop.permute.xlu1 %3117  ;;  %v13223_v35 = vpop.permute.xlu0 %3112  ;;  %3932 = vmatpush.msra.mxu2 %v10732_v25  ;;  %v2955_v25 = vsel %vm1432_vm1, %v2952_v49, %v2954_v5  ;;  %v10714_v49 = vld [vmem:[%s17933_s1 + $0x6c8] sm:$0xff] }
 0x20a   : > { %18162 = vst [vmem:[#allocation71_spill] sm:$0xff] %v13212_v54  ;;  %v13241_v44 = vpop.f32.mrf.mxu1  ;;  %v13250_v54 = vld [vmem:[%s11542_s12 + $0x80] sm:$0xff] }
 0x20c   : > { %1922 = vmatmul.f32.gmra.mxu2 %v1777_v58  ;;  %3341 = vmatmul.f32.gmra.mxu1 %v3238_v28  ;;  %v1516_v58 = vsel %vm1432_vm1, %v1513_v34, %v1515_v7 }
 0x20d   : > { %2501 = vmatmul.f32.gmra.mxu3 %v2378_v48  ;;  %v2105_v48 = vsel %vm339_vm0, %v2102_v9, %v2104_v45  ;;  %v1778_v34 = vmul.f32 %v12499_v4, %v1516_v58  ;;  %v3239_v9 = vmul.f32 %v13181_v23, %v2955_v25  ;;  %v10713_v4 = vld [vmem:[%s17933_s1 + $0x6c0] sm:$0xff]  ;;  %v2106_v58 = vrot.slane %v13207_v17, 7  ;;  %v10828_v23 = vld [vmem:[%s17934_s2 + $0x458] sm:$0xff] }
 0x20e   : > { %3799 = vperm.xlu2 %11277, %v10711_v11   ;;  %v13260_v11 = vpop.f32.mrf.mxu0  ;;  %v2379_v24 = vmul.f32 %v12758_v60, %v2105_v48  ;;  %v2640_v60 = vld [vmem:[%s11542_s12 + $0x88] sm:$0xff]  ;;  %5027 = vmatpush.msra.mxu0 %v10828_v23 }
 0x20f   : > { %3794 = vperm.xlu1 %11276, %v10710_v0   ;;  %v13247_v18 = vpop.f32.mrf.mxu2  ;;  %3789 = vperm.xlu0 %11275, %v10709_v31   ;;  %v13252_v55 = vpop.f32.mrf.mxu3  ;;  %18167 = vst [vmem:[#allocation76_spill] sm:$0xff] %v13260_v11 }
 0x210   : > { %18164 = vst [vmem:[#allocation73_spill] sm:$0xff] %v13247_v18  ;;  %v13255_v28 = vpop.permute.xlu2 %3182  ;;  %2768 = vmatmul.f32.gmra.mxu0 %v13250_v54  ;;  %v11291_v18 = vld [vmem:[%s11542_s12 + $0xc8] sm:$0xff] }
 0x211   : > { %18165 = vst [vmem:[#allocation74_spill] sm:$0xff] %v13252_v55  ;;  %v13262_v0 = vpop.permute.xlu1 %3132  ;;  %v1517_v31 = vrot.slane %v11291_v18, 1  ;;  %v13265_v15 = vpop.permute.xlu0 %3127  ;;  %v10712_v18 = vld [vmem:[%s17933_s1 + $0x6b8] sm:$0xff] }
 0x212   : > { %18166 = vst [vmem:[#allocation75_spill] sm:$0xff] %v13255_v28  ;;  %v13287_v55 = vpop.f32.mrf.mxu1 }
 0x213   : > { %v1518_v48 = vsel %vm1432_vm1, %v1515_v7, %v1517_v31 }
 0x214   : > { %1925 = vmatmul.f32.gmra.mxu2 %v1778_v34  ;;  %3344 = vmatmul.f32.gmra.mxu1 %v3239_v9  ;;  %v2956_v34 = vrot.slane %v12867_v16, 1  ;;  %v2107_v9 = vsel %vm339_vm0, %v2104_v45, %v2106_v58  ;;  %v1779_v16 = vmul.f32 %v12669_v59, %v1518_v48  ;;  %v10717_v59 = vld [vmem:[%s17933_s1 + $0x6e0] sm:$0xff]  ;;  %v10716_v48 = vld [vmem:[%s17933_s1 + $0x6d8] sm:$0xff] }
 0x215   : > { %2504 = vmatmul.f32.gmra.mxu3 %v2379_v24  ;;  %v10731_v24 = vld [vmem:[%s17934_s2 + $0x350] sm:$0xff] }
 0x216   : > { %3814 = vperm.xlu2 %11277, %v10714_v49   ;;  %v2957_v49 = vsel %vm1432_vm1, %v2954_v5, %v2956_v34  ;;  %3933 = vmatpush.msra.mxu2 %v10731_v24  ;;  %v13304_v23 = vpop.f32.mrf.mxu0  ;;  %v2380_v5 = vmul.f32 %v12911_v43, %v2107_v9  ;;  %v10729_v24 = vld [vmem:[%s17934_s2 + $0x340] sm:$0xff]  ;;  %v10715_v43 = vld [vmem:[%s17933_s1 + $0x6d0] sm:$0xff] }
 0x217   : > { %3809 = vperm.xlu1 %11276, %v10713_v4   ;;  %v13284_v25 = vpop.f32.mrf.mxu2  ;;  %3804 = vperm.xlu0 %11275, %v10712_v18   ;;  %v13289_v11 = vpop.f32.mrf.mxu3  ;;  %v13302_v18 = vld [vmem:[%s11542_s12 + $0x38] sm:$0xff]  ;;  %v10779_v9 = vld [vmem:[%s17934_s2 + $0x3d0] sm:$0xff] }
 0x218   : > { %18168 = vst [vmem:[#allocation77_spill] sm:$0xff] %v13284_v25  ;;  %v13295_v7 = vpop.permute.xlu2 %3197  ;;  %2771 = vmatmul.f32.gmra.mxu0 %v2640_v60  ;;  %v3240_v60 = vmul.f32 %v13176_v42, %v2957_v49  ;;  %v2958_v42 = vrot.slane %v13302_v18, 1  ;;  %v10728_v49 = vld [vmem:[%s17934_s2 + $0x338] sm:$0xff]  ;;  %4416 = vmatpush.msra.mxu3 %v10779_v9 }
 0x219   : > { %18169 = vst [vmem:[#allocation78_spill] sm:$0xff] %v13289_v11  ;;  %v13299_v4 = vpop.permute.xlu1 %3147  ;;  %v10730_v11 = vld [vmem:[%s17934_s2 + $0x348] sm:$0xff]  ;;  %v13309_v45 = vpop.permute.xlu0 %3142 }
 0x21a   : > { %18170 = vst [vmem:[#allocation79_spill] sm:$0xff] %v13295_v7  ;;  %3934 = vmatpush.msra.mxu2 %v10730_v11  ;;  %v11292_v7 = vld [vmem:[%s11542_s12 + $0xd0] sm:$0xff] }
 0x21b   : > { %v1519_v11 = vrot.slane %v11292_v7, 1  ;;  %v2108_v7 = vrot.slane %v12896_v61, 7  ;;  %v2959_v61 = vsel %vm1432_vm1, %v2956_v34, %v2958_v42 }
 0x21c   : > { %1928 = vmatmul.f32.gmra.mxu2 %v1779_v16  ;;  %3347 = vmatmul.f32.gmra.mxu1 %v3240_v60 }
 0x21d   : > { %3935 = vmatpush.msra.mxu2 %v10729_v24  ;;  %2507 = vmatmul.f32.gmra.mxu3 %v2380_v5  ;;  %v1520_v16 = vsel %vm1432_vm1, %v1517_v31, %v1519_v11  ;;  %v13338_v5 = vld [vmem:[%s11542_s12 + $0x90] sm:$0xff]  ;;  %v2109_v31 = vsel %vm339_vm0, %v2106_v58, %v2108_v7  ;;  %v11293_v58 = vld [vmem:[%s11542_s12 + $0xd8] sm:$0xff] }
 0x21e   : > { %3829 = vperm.xlu2 %11277, %v10717_v59   ;;  %v10727_v24 = vld [vmem:[%s17934_s2 + $0x330] sm:$0xff]  ;;  %v13350_v59 = vpop.f32.mrf.mxu1  ;;  %v2381_v34 = vmul.f32 %v12908_v2, %v2109_v31  ;;  %v10718_v2 = vld [vmem:[%s17933_s1 + $0x6e8] sm:$0xff]  ;;  %v2642_v31 = vld [vmem:[%s11542_s12 + $0x98] sm:$0xff] }
 0x21f   : > { %3824 = vperm.xlu1 %11276, %v10716_v48   ;;  %v13335_v28 = vpop.f32.mrf.mxu2  ;;  %3819 = vperm.xlu0 %11275, %v10715_v43   ;;  %v13340_v60 = vpop.f32.mrf.mxu3  ;;  %v1780_v48 = vmul.f32 %v12666_v46, %v1520_v16  ;;  %v13354_v43 = vld [vmem:[%s11542_s12 + $0x88] sm:$0xff]  ;;  %v10720_v46 = vld [vmem:[%s17933_s1 + $0x6f8] sm:$0xff]  ;;  %v10719_v16 = vld [vmem:[%s17933_s1 + $0x6f0] sm:$0xff] }
 0x220   : > { %18171 = vst [vmem:[#allocation80_spill] sm:$0xff] %v13335_v28  ;;  %v13346_v25 = vpop.permute.xlu2 %3212  ;;  %2774 = vmatmul.f32.gmra.mxu0 %v13338_v5  ;;  %3936 = vmatpush.msra.mxu2 %v10728_v49  ;;  %v1521_v28 = vrot.slane %v11293_v58, 1  ;;  %v3241_v49 = vmul.f32 %v13056_v38, %v2959_v61  ;;  %v2110_v58 = vrot.slane %v13354_v43, 7  ;;  %v10725_v38 = vld [vmem:[%s17934_s2 + $0x320] sm:$0xff] }
 0x221   : > { %18172 = vst [vmem:[#allocation81_spill] sm:$0xff] %v13340_v60  ;;  %v13356_v9 = vpop.permute.xlu1 %3162  ;;  %v10726_v60 = vld [vmem:[%s17934_s2 + $0x328] sm:$0xff] }
 0x222   : > { %18173 = vst [vmem:[#allocation82_spill] sm:$0xff] %v13346_v25  ;;  %v13362_v25 = vpop.permute.xlu0 %3157  ;;  %3937 = vmatpush.msra.mxu2 %v10727_v24  ;;  %v1334_v24 = vadd.f32 %v13195_v27, %v12558_v53  ;;  %v1522_v61 = vsel %vm1432_vm1, %v1519_v11, %v1521_v28  ;;  %v2111_v27 = vsel %vm339_vm0, %v2108_v7, %v2110_v58 }
 0x223   : > { %18174 = vst [vmem:[#allocation83_spill] sm:$0xff] %v13356_v9  ;;  %v13372_v9 = vpop.f32.mrf.mxu0 }
 0x224   : > { %18175 = vst [vmem:[#allocation84_spill] sm:$0xff] %v13362_v25  ;;  %1931 = vmatmul.f32.gmra.mxu2 %v1780_v48  ;;  %v2960_v25 = vrot.slane %v12938_v52, 1  ;;  %3350 = vmatmul.f32.gmra.mxu1 %v3241_v49  ;;  %v10724_v48 = vld [vmem:[%s17934_s2 + $0x318] sm:$0xff]  ;;  %v1947_v53 = vadd.f32 %v12935_v22, %v1334_v24  ;;  %v10723_v22 = vld [vmem:[%s17934_s2 + $0x310] sm:$0xff] }
 0x225   : > { %3938 = vmatpush.msra.mxu2 %v10726_v60  ;;  %2510 = vmatmul.f32.gmra.mxu3 %v2381_v34  ;;  %v10827_v60 = vld [vmem:[%s17934_s2 + $0x450] sm:$0xff] }
 0x226   : > { %3844 = vperm.xlu2 %11277, %v10720_v46   ;;  %v2961_v49 = vsel %vm1432_vm1, %v2958_v42, %v2960_v25  ;;  %v1781_v46 = vmul.f32 %v12542_v50, %v1522_v61  ;;  %5028 = vmatpush.msra.mxu0 %v10827_v60  ;;  %v13408_v24 = vpop.f32.mrf.mxu1  ;;  %v2382_v42 = vmul.f32 %v12795_v41, %v2111_v27  ;;  %v10739_v61 = vld [vmem:[%s17933_s1 + $0x710] sm:$0xff]  ;;  %v10738_v60 = vld [vmem:[%s17933_s1 + $0x708] sm:$0xff]  ;;  %v10737_v41 = vld [vmem:[%s17933_s1 + $0x700] sm:$0xff] }
 0x227   : > { %3839 = vperm.xlu1 %11276, %v10719_v16   ;;  %v13386_v52 = vpop.f32.mrf.mxu2  ;;  %3834 = vperm.xlu0 %11275, %v10718_v2   ;;  %v2463_v11 = vpop.f32.mrf.mxu3  ;;  %v11294_v2 = vld [vmem:[%s11542_s12 + $0xe0] sm:$0xff] }
 0x228   : > { %18176 = vst [vmem:[#allocation85_spill] sm:$0xff] %v13386_v52  ;;  %3939 = vmatpush.msra.mxu2 %v10725_v38  ;;  %v13396_v34 = vpop.permute.xlu2 %3227  ;;  %2777 = vmatmul.f32.gmra.mxu0 %v2642_v31  ;;  %v2559_v16 = vadd.f32 %v2463_v11, %v1947_v53  ;;  %v1523_v38 = vrot.slane %v11294_v2, 1  ;;  %v3242_v31 = vmul.f32 %v13223_v35, %v2961_v49  ;;  %v2643_v27 = vld [vmem:[%s11542_s12 + $0xa0] sm:$0xff]  ;;  %v10778_v11 = vld [vmem:[%s17934_s2 + $0x3c8] sm:$0xff] }
 0x229   : > { %18177 = vst [vmem:[#allocation86_spill] sm:$0xff] %v13396_v34  ;;  %v13400_v52 = vpop.permute.xlu1 %3177  ;;  %v1335_v35 = vadd.f32 %v13241_v44, %v12618_v62  ;;  %v10721_v62 = vld [vmem:[%s17934_s2 + $0x300] sm:$0xff]  ;;  %4417 = vmatpush.msra.mxu3 %v10778_v11 }
 0x22a   : > { %3940 = vmatpush.msra.mxu2 %v10724_v48  ;;  %v13406_v7 = vpop.permute.xlu0 %3172  ;;  %v13412_v50 = vadd.f32 %v13304_v23, %v2559_v16  ;;  %v2112_v48 = vrot.slane %v13338_v5, 7  ;;  %v10722_v23 = vld [vmem:[%s17934_s2 + $0x308] sm:$0xff]  ;;  %v1524_v49 = vsel %vm1432_vm1, %v1521_v28, %v1523_v38 }
 0x22b   : > { %v2727_v53 = vpop.f32.mrf.mxu0  ;;  %v1948_v44 = vadd.f32 %v12975_v13, %v1335_v35  ;;  %v13452_v13 = vld [vmem:[%s11542_s12 + $0x98] sm:$0xff]  ;;  %v13466_v35 = vld [vmem:[%s11542_s12 + $0xe8] sm:$0xff] }
 0x22c   : > { %1934 = vmatmul.f32.gmra.mxu2 %v1781_v46  ;;  %3353 = vmatmul.f32.gmra.mxu1 %v3242_v31  ;;  %v2962_v46 = vrot.slane %v12983_v57, 1 }
 0x22d   : > { %3941 = vmatpush.msra.mxu2 %v10723_v22  ;;  %2513 = vmatmul.f32.gmra.mxu3 %v2382_v42  ;;  %v2113_v22 = vsel %vm339_vm0, %v2110_v58, %v2112_v48  ;;  %v1782_v42 = vmul.f32 %v12698_v21, %v1524_v49  ;;  %v10742_v21 = vld [vmem:[%s17933_s1 + $0x728] sm:$0xff] }
 0x22e   : > { %4182 = vperm.xlu2 %11277, %v10739_v61   ;;  %v2963_v2 = vsel %vm1432_vm1, %v2960_v25, %v2962_v46  ;;  %v2383_v58 = vmul.f32 %v12953_v51, %v2113_v22  ;;  %v2964_v51 = vrot.slane %v13019_v37, 1  ;;  %v13475_v11 = vpop.f32.mrf.mxu1  ;;  %v2644_v49 = vld [vmem:[%s11542_s12 + $0xa8] sm:$0xff]  ;;  %v2114_v37 = vrot.slane %v13452_v13, 7 }
 0x22f   : > { %4177 = vperm.xlu1 %11276, %v10738_v60   ;;  %v13436_v16 = vpop.f32.mrf.mxu2  ;;  %4172 = vperm.xlu0 %11275, %v10737_v41   ;;  %v2466_v28 = vpop.f32.mrf.mxu3  ;;  %v3243_v25 = vmul.f32 %v13217_v56, %v2963_v2  ;;  %v10740_v56 = vld [vmem:[%s17933_s1 + $0x718] sm:$0xff] }
 0x230   : > { %3942 = vmatpush.msra.mxu2 %v10722_v23  ;;  %v13444_v57 = vpop.permute.xlu2 %3694  ;;  %2780 = vmatmul.f32.gmra.mxu0 %v2643_v27  ;;  %v2560_v31 = vadd.f32 %v2466_v28, %v1948_v44  ;;  %v10741_v23 = vld [vmem:[%s17933_s1 + $0x720] sm:$0xff]  ;;  %v1525_v27 = vrot.slane %v13466_v35, 1  ;;  %v2115_v2 = vsel %vm339_vm0, %v2112_v48, %v2114_v37  ;;  %v2965_v28 = vsel %vm1432_vm1, %v2962_v46, %v2964_v51 }
 0x231   : > { %v13447_v61 = vpop.permute.xlu1 %3192  ;;  %v3244_v48 = vmul.f32 %v13093_v20, %v2965_v28  ;;  %v10745_v46 = vld [vmem:[%s17933_s1 + $0x740] sm:$0xff]  ;;  %v1337_v20 = vadd.f32 %v13350_v59, %v12689_v47 }
 0x232   : > { %3943 = vmatpush.msra.mxu2 %v10721_v62  ;;  %v13449_v60 = vpop.permute.xlu0 %3187  ;;  %v13457_v41 = vadd.f32 %v13372_v9, %v2560_v31  ;;  %v1336_v9 = vadd.f32 %v13287_v55, %v12657_v12  ;;  %v10826_v62 = vld [vmem:[%s17934_s2 + $0x448] sm:$0xff]  ;;  %v1526_v44 = vsel %vm1432_vm1, %v1523_v38, %v1525_v27 }
 0x233   : > { %v2730_v55 = vpop.f32.mrf.mxu0  ;;  %5029 = vmatpush.msra.mxu0 %v10826_v62  ;;  %v1783_v38 = vmul.f32 %v12692_v40, %v1526_v44  ;;  %v10744_v40 = vld [vmem:[%s17933_s1 + $0x738] sm:$0xff]  ;;  %v10777_v62 = vld [vmem:[%s17934_s2 + $0x3c0] sm:$0xff]  ;;  %v18180_v44 = vrot.slane %v11732_v63, 1  ;;  %v1950_v47 = vadd.f32 %v13048_v8, %v1337_v20 }
 0x234   : > { %18178 = vst [vmem:[#allocation87_spill] sm:$0xff] %v13457_v41  ;;  %1937 = vmatmul.f32.gmra.mxu2 %v1782_v42  ;;  %3356 = vmatmul.f32.gmra.mxu1 %v3243_v25  ;;  %v1949_v12 = vadd.f32 %v13014_v10, %v1336_v9 }
 0x235   : > { %2516 = vmatmul.f32.gmra.mxu3 %v2383_v58  ;;  %v13492_v58 = vld [vmem:[%s11542_s12 + $0xa0] sm:$0xff] }
 0x236   : > { %4197 = vperm.xlu2 %11277, %v10742_v21   ;;  %v2116_v9 = vrot.slane %v13492_v58, 7  ;;  %4418 = vmatpush.msra.mxu3 %v10777_v62  ;;  %v10825_v62 = vld [vmem:[%s17934_s2 + $0x440] sm:$0xff] }
 0x237   : > { %4192 = vperm.xlu1 %11276, %v10741_v23   ;;  %v13483_v22 = vpop.f32.mrf.mxu2  ;;  %4187 = vperm.xlu0 %11275, %v10740_v56   ;;  %v2469_v42 = vpop.f32.mrf.mxu3  ;;  %v2384_v23 = vmul.f32 %v12951_v32, %v2115_v2  ;;  %v10743_v32 = vld [vmem:[%s17933_s1 + $0x730] sm:$0xff] }
 0x238   : > { %v13488_v31 = vpop.permute.xlu2 %3709  ;;  %2783 = vmatmul.f32.gmra.mxu0 %v2644_v49  ;;  %v2561_v25 = vadd.f32 %v2469_v42, %v1949_v12  ;;  %v2966_v49 = vrot.slane %v13051_v14, 1  ;;  %v1527_v12 = vsel %vm1432_vm1, %v1525_v27, %v18180_v44  ;;  %v13524_v2 = vpop.f32.mrf.mxu1  ;;  %v2117_v59 = vsel %vm339_vm0, %v2114_v37, %v2116_v9  ;;  %v13533_v27 = vld [vmem:[%s11542_s12 + $0xa8] sm:$0xff] }
 0x239   : > { %v13494_v21 = vpop.permute.xlu1 %3207  ;;  %v1784_v63 = vmul.f32 %v12587_v19, %v1527_v12  ;;  %v10748_v19 = vld [vmem:[%s17933_s1 + $0x758] sm:$0xff]  ;;  %v2118_v20 = vrot.slane %v13533_v27, 7  ;;  %v2968_v44 = vrot.slane %v13088_v29, 1  ;;  %5030 = vmatpush.msra.mxu0 %v10825_v62  ;;  %v18187_v62 = vld [vmem:[#allocation25_spill] sm:$0xff] }
 0x23a   : > { %v13496_v10 = vpop.permute.xlu0 %3202  ;;  %v13500_v56 = vadd.f32 %v2727_v53, %v2561_v25  ;;  %v2645_v53 = vld [vmem:[%s11542_s12 + $0xb0] sm:$0xff]  ;;  %v2967_v28 = vsel %vm1432_vm1, %v2964_v51, %v2966_v49 }
 0x23b   : > { %v3245_v37 = vmul.f32 %v13265_v15, %v2967_v28  ;;  %v1338_v15 = vadd.f32 %v13408_v24, %v12731_v30  ;;  %v2969_v24 = vsel %vm1432_vm1, %v2966_v49, %v2968_v44 }
 0x23c   : > { %18179 = vst [vmem:[#allocation88_spill] sm:$0xff] %v13500_v56  ;;  %1940 = vmatmul.f32.gmra.mxu2 %v1783_v38  ;;  %3359 = vmatmul.f32.gmra.mxu1 %v3244_v48  ;;  %v2733_v48 = vpop.f32.mrf.mxu0  ;;  %v13816_v56 = vld [vmem:[%s11542_s12 + $0x48] sm:$0xff] }
 0x23d   : > { %2519 = vmatmul.f32.gmra.mxu3 %v2384_v23 }
 0x23e   : > { %4212 = vperm.xlu2 %11277, %v10745_v46   ;;  %v2385_v46 = vmul.f32 %v12835_v33, %v2117_v59  ;;  %v10746_v33 = vld [vmem:[%s17933_s1 + $0x748] sm:$0xff] }
 0x23f   : > { %4207 = vperm.xlu1 %11276, %v10744_v40   ;;  %v13522_v14 = vpop.f32.mrf.mxu2  ;;  %4202 = vperm.xlu0 %11275, %v10743_v32   ;;  %v10747_v40 = vld [vmem:[%s17933_s1 + $0x750] sm:$0xff]  ;;  %v17948_v32 = vrot.slane %v12943_v26, 7  ;;  %v18197_v26 = vld [vmem:[#allocation63_spill] sm:$0xff] }
 0x240   : > { %v2472_v42 = vpop.f32.mrf.mxu3  ;;  %v13529_v38 = vpop.permute.xlu2 %3724  ;;  %2786 = vmatmul.f32.gmra.mxu0 %v2645_v53  ;;  %v2646_v53 = vld [vmem:[%s11542_s12 + $0xb8] sm:$0xff] }
 0x241   : > { %v2562_v25 = vadd.f32 %v2472_v42, %v1950_v47  ;;  %v13535_v23 = vpop.permute.xlu1 %3222  ;;  %v1951_v47 = vadd.f32 %v13085_v3, %v1338_v15  ;;  %v13572_v29 = vpop.f32.mrf.mxu1 }
 0x242   : > { %18181 = vst [vmem:[#allocation89_spill] sm:$0xff] %v13535_v23  ;;  %v13537_v8 = vpop.permute.xlu0 %3217  ;;  %v3571_v23 = vrot.slane %v13816_v56, 7 }
 0x243   : > { %v13541_v51 = vadd.f32 %v2730_v55, %v2562_v25  ;;  %v3557_v55 = vrot.slane %v13100_v39, 7  ;;  %v2119_v39 = vsel %vm339_vm0, %v2116_v9, %v2118_v20  ;;  %v3559_v9 = vrot.slane %v13140_v1, 7  ;;  %v18185_v1 = vld [vmem:[#allocation26_spill] sm:$0xff] }
 0x244   : > { %1943 = vmatmul.f32.gmra.mxu2 %v1784_v63  ;;  %3362 = vmatmul.f32.gmra.mxu1 %v3245_v37  ;;  %v2386_v37 = vmul.f32 %v12994_v36, %v2119_v39  ;;  %v2736_v15 = vpop.f32.mrf.mxu0  ;;  %v10749_v36 = vld [vmem:[%s17933_s1 + $0x760] sm:$0xff] }
 0x245   : > { %18182 = vst [vmem:[#allocation90_spill] sm:$0xff] %v13541_v51  ;;  %2522 = vmatmul.f32.gmra.mxu3 %v2385_v46  ;;  %v3558_v30 = vsel %vm339_vm0, %v17948_v32, %v3557_v55  ;;  %v13577_v46 = vld [vmem:[%s11542_s12 + $0xb0] sm:$0xff]  ;;  %v2648_v32 = vld [vmem:[%s11542_s12 + $0xc8] sm:$0xff] }
 0x246   : > { %4227 = vperm.xlu2 %11277, %v10748_v19   ;;  %v3246_v19 = vmul.f32 %v13262_v0, %v2969_v24  ;;  %v1339_v0 = vadd.f32 %v13475_v11, %v18185_v1  ;;  %v18188_v24 = vld [vmem:[#allocation59_spill] sm:$0xff] }
 0x247   : > { %4222 = vperm.xlu1 %11276, %v10747_v40   ;;  %v13562_v12 = vpop.f32.mrf.mxu2  ;;  %4217 = vperm.xlu0 %11275, %v10746_v33   ;;  %v10751_v40 = vld [vmem:[%s17933_s1 + $0x770] sm:$0xff]  ;;  %v10750_v33 = vld [vmem:[%s17933_s1 + $0x768] sm:$0xff] }
 0x248   : > { %v2475_v59 = vpop.f32.mrf.mxu3  ;;  %v13570_v28 = vpop.permute.xlu2 %3739  ;;  %2789 = vmatmul.f32.gmra.mxu0 %v2646_v53  ;;  %v2970_v53 = vrot.slane %v13128_v6, 1  ;;  %v2120_v6 = vrot.slane %v13577_v46, 7 }
 0x249   : > { %v2563_v42 = vadd.f32 %v2475_v59, %v1951_v47  ;;  %v3690_v63 = vpop.permute.xlu1 %3689  ;;  %v1952_v59 = vadd.f32 %v18188_v24, %v1339_v0  ;;  %v13617_v0 = vpop.f32.mrf.mxu1 }
 0x24a   : > { %v3847_v25 = vmul.f32 %v3690_v63, %v3558_v30  ;;  %v13574_v3 = vpop.permute.xlu0 %3232  ;;  %v10776_v30 = vld [vmem:[%s17934_s2 + $0x3b8] sm:$0xff]  ;;  %v3517_v63 = vld [vmem:[%s11542_s12 + $0xc0] sm:$0xff] }
 0x24b   : > { %18183 = vst [vmem:[#allocation91_spill] sm:$0xff] %v13574_v3  ;;  %v13582_v49 = vadd.f32 %v2733_v48, %v2563_v42  ;;  %v18186_v48 = vld [vmem:[#allocation11_spill] sm:$0xff]  ;;  %v3560_v42 = vsel %vm339_vm0, %v3557_v55, %v3559_v9  ;;  %4419 = vmatpush.msra.mxu3 %v10776_v30 }
 0x24c   : > { %3944 = vmatmul.f32.vlgmr.msra.gmra.mxu2 %v3847_v25  ;;  %v1350_v47 = vadd.f32 %v18187_v62, %v18186_v48  ;;  %3365 = vmatmul.f32.gmra.mxu1 %v3246_v19  ;;  %v2121_v25 = vsel %vm339_vm0, %v2118_v20, %v2120_v6  ;;  %v3848_v55 = vmul.f32 %v13444_v57, %v3560_v42  ;;  %v18189_v62 = vld [vmem:[#allocation46_spill] sm:$0xff]  ;;  %v18190_v20 = vld [vmem:[#allocation61_spill] sm:$0xff]  ;;  %v10753_v57 = vld [vmem:[%s17933_s1 + $0x780] sm:$0xff] }
 0x24d   : > { %18184 = vst [vmem:[#allocation92_spill] sm:$0xff] %v13582_v49  ;;  %2525 = vmatmul.f32.gmra.mxu3 %v2386_v37  ;;  %v2971_v37 = vsel %vm1432_vm1, %v2968_v44, %v2970_v53  ;;  %v18191_v44 = vld [vmem:[#allocation67_spill] sm:$0xff] }
 0x24e   : > { %4242 = vperm.xlu2 %11277, %v10751_v40   ;;  %v13612_v40 = vld [vmem:[%s11542_s12 + $0xb8] sm:$0xff]  ;;  %v3247_v30 = vmul.f32 %v18190_v20, %v2971_v37 }
 0x24f   : > { %4237 = vperm.xlu1 %11276, %v10750_v33   ;;  %v1899_v39 = vpop.f32.mrf.mxu2  ;;  %4232 = vperm.xlu0 %11275, %v10749_v36   ;;  %v2122_v42 = vrot.slane %v13612_v40, 7  ;;  %v18194_v37 = vld [vmem:[#allocation30_spill] sm:$0xff] }
 0x250   : > { %v13604_v11 = vadd.f32 %v1899_v39, %v1350_v47  ;;  %v2478_v19 = vpop.f32.mrf.mxu3  ;;  %v13609_v1 = vpop.permute.xlu2 %3754  ;;  %2792 = vmatmul.f32.gmra.mxu0 %v3517_v63  ;;  %v2387_v47 = vmul.f32 %v18189_v62, %v2121_v25  ;;  %v3561_v39 = vrot.slane %v18191_v44, 7  ;;  %v18193_v63 = vld [vmem:[#allocation64_spill] sm:$0xff]  ;;  %v10752_v25 = vld [vmem:[%s17933_s1 + $0x778] sm:$0xff] }
 0x251   : > { %v2564_v33 = vadd.f32 %v2478_v19, %v1952_v59  ;;  %v13614_v48 = vpop.permute.xlu1 %3704  ;;  %v10754_v59 = vld [vmem:[%s17933_s1 + $0x788] sm:$0xff]  ;;  %v2972_v19 = vrot.slane %v18193_v63, 1  ;;  %v2739_v44 = vpop.f32.mrf.mxu0  ;;  %v10824_v63 = vld [vmem:[%s17934_s2 + $0x438] sm:$0xff] }
 0x252   : > { %v3700_v36 = vpop.permute.xlu0 %3699  ;;  %v18196_v62 = vld [vmem:[#allocation28_spill] sm:$0xff]  ;;  %v3562_v49 = vsel %vm339_vm0, %v3559_v9, %v3561_v39  ;;  %5031 = vmatpush.msra.mxu0 %v10824_v63  ;;  %v18198_v9 = vld [vmem:[#allocation34_spill] sm:$0xff] }
 0x253   : > { %v13622_v24 = vadd.f32 %v2736_v15, %v2564_v33  ;;  %v1340_v15 = vadd.f32 %v13524_v2, %v18194_v37  ;;  %v18195_v33 = vld [vmem:[#allocation12_spill] sm:$0xff] }
 0x254   : > { %3947 = vmatmul.f32.gmra.mxu2 %v3848_v55  ;;  %v1351_v20 = vadd.f32 %v18196_v62, %v18195_v33  ;;  %3368 = vmatmul.f32.gmra.mxu1 %v3247_v30  ;;  %v2973_v30 = vsel %vm1432_vm1, %v2970_v53, %v2972_v19  ;;  %v13652_v62 = vld [vmem:[%s11542_s12 + $0xc0] sm:$0xff]  ;;  %18230 = vst [vmem:[#allocation12_spill] sm:$0xff] %v13816_v56  ;;  %v10772_v56 = vld [vmem:[%s17934_s2 + $0x398] sm:$0xff] }
 0x255   : > { %18192 = vst [vmem:[#allocation26_spill] sm:$0xff] %v13622_v24  ;;  %2528 = vmatmul.f32.gmra.mxu3 %v2387_v47  ;;  %v1953_v24 = vadd.f32 %v18197_v26, %v1340_v15  ;;  %v2123_v47 = vsel %vm339_vm0, %v2120_v6, %v2122_v42  ;;  %v3849_v26 = vmul.f32 %v3700_v36, %v3562_v49  ;;  %v10757_v53 = vld [vmem:[%s17933_s1 + $0x7a0] sm:$0xff]  ;;  %v2124_v6 = vrot.slane %v13652_v62, 7  ;;  %v10755_v49 = vld [vmem:[%s17933_s1 + $0x790] sm:$0xff] }
 0x256   : > { %4257 = vperm.xlu2 %11277, %v10754_v59   ;;  %v18200_v36 = vld [vmem:[#allocation35_spill] sm:$0xff] }
 0x257   : > { %4252 = vperm.xlu1 %11276, %v10753_v57   ;;  %v1902_v55 = vpop.f32.mrf.mxu2  ;;  %4247 = vperm.xlu0 %11275, %v10752_v25   ;;  %v2388_v25 = vmul.f32 %v18198_v9, %v2123_v47  ;;  %v13676_v47 = vpop.f32.mrf.mxu1 }
 0x258   : > { %v13645_v2 = vadd.f32 %v1902_v55, %v1351_v20  ;;  %v2481_v37 = vpop.f32.mrf.mxu3  ;;  %v13649_v33 = vpop.permute.xlu2 %3769  ;;  %2795 = vmatmul.f32.gmra.mxu0 %v2648_v32  ;;  %v3248_v20 = vmul.f32 %v13309_v45, %v2973_v30  ;;  %v10756_v32 = vld [vmem:[%s17933_s1 + $0x798] sm:$0xff]  ;;  %v1341_v45 = vadd.f32 %v13572_v29, %v18200_v36  ;;  %v18203_v30 = vld [vmem:[#allocation72_spill] sm:$0xff] }
 0x259   : > { %v2565_v59 = vadd.f32 %v2481_v37, %v1953_v24  ;;  %v13654_v57 = vpop.permute.xlu1 %3719  ;;  %v18201_v24 = vld [vmem:[#allocation13_spill] sm:$0xff]  ;;  %v3563_v37 = vrot.slane %v18203_v30, 7  ;;  %v18204_v29 = vld [vmem:[#allocation68_spill] sm:$0xff]  ;;  %v2742_v30 = vpop.f32.mrf.mxu0 }
 0x25a   : > { %v13656_v15 = vpop.permute.xlu0 %3714  ;;  %v1954_v36 = vadd.f32 %v18204_v29, %v1341_v45  ;;  %v10758_v29 = vld [vmem:[%s17933_s1 + $0x7a8] sm:$0xff] }
 0x25b   : > { %v13660_v63 = vadd.f32 %v2739_v44, %v2565_v59  ;;  %v18202_v44 = vld [vmem:[#allocation31_spill] sm:$0xff]  ;;  %v10775_v59 = vld [vmem:[%s17934_s2 + $0x3b0] sm:$0xff] }
 0x25c   : > { %3950 = vmatmul.f32.gmra.mxu2 %v3849_v26  ;;  %v1352_v55 = vadd.f32 %v18202_v44, %v18201_v24  ;;  %3371 = vmatmul.f32.gmra.mxu1 %v3248_v20  ;;  %v2974_v26 = vrot.slane %v13207_v17, 1  ;;  %v3564_v24 = vsel %vm339_vm0, %v3561_v39, %v3563_v37  ;;  %v2125_v20 = vsel %vm339_vm0, %v2122_v42, %v2124_v6 }
 0x25d   : > { %18199 = vst [vmem:[#allocation11_spill] sm:$0xff] %v13660_v63  ;;  %2531 = vmatmul.f32.gmra.mxu3 %v2388_v25  ;;  %v3519_v25 = vld [vmem:[%s11542_s12 + $0xd0] sm:$0xff]  ;;  %v3850_v45 = vmul.f32 %v13614_v48, %v3564_v24  ;;  %v2976_v48 = vrot.slane %v13250_v54, 1 }
 0x25e   : > { %4272 = vperm.xlu2 %11277, %v10757_v53   ;;  %4420 = vmatpush.msra.mxu3 %v10775_v59  ;;  %v2975_v63 = vsel %vm1432_vm1, %v2972_v19, %v2974_v26  ;;  %v10760_v19 = vld [vmem:[%s17933_s1 + $0x7b8] sm:$0xff]  ;;  %v18210_v24 = vld [vmem:[#allocation33_spill] sm:$0xff] }
 0x25f   : > { %4267 = vperm.xlu1 %11276, %v10756_v32   ;;  %v1905_v9 = vpop.f32.mrf.mxu2  ;;  %4262 = vperm.xlu0 %11275, %v10755_v49   ;;  %v13698_v49 = vld [vmem:[%s11542_s12 + $0xc8] sm:$0xff]  ;;  %v3249_v59 = vmul.f32 %v13299_v4, %v2975_v63  ;;  %v18209_v63 = vld [vmem:[#allocation14_spill] sm:$0xff] }
 0x260   : > { %v13685_v44 = vadd.f32 %v1905_v9, %v1352_v55  ;;  %v2484_v3 = vpop.f32.mrf.mxu3  ;;  %v13690_v17 = vpop.permute.xlu2 %3784  ;;  %2798 = vmatmul.f32.gmra.mxu0 %v3519_v25  ;;  %v18206_v55 = vld [vmem:[#allocation50_spill] sm:$0xff]  ;;  %v10823_v25 = vld [vmem:[%s17934_s2 + $0x430] sm:$0xff]  ;;  %v2126_v54 = vrot.slane %v13698_v49, 7 }
 0x261   : > { %18205 = vst [vmem:[#allocation25_spill] sm:$0xff] %v13690_v17  ;;  %v2566_v53 = vadd.f32 %v2484_v3, %v1954_v36  ;;  %v13692_v32 = vpop.permute.xlu1 %3734  ;;  %v2389_v9 = vmul.f32 %v18206_v55, %v2125_v20  ;;  %v10759_v3 = vld [vmem:[%s17933_s1 + $0x7b0] sm:$0xff]  ;;  %v18208_v36 = vld [vmem:[#allocation39_spill] sm:$0xff]  ;;  %5032 = vmatpush.msra.mxu0 %v10823_v25  ;;  %v18229_v17 = vld [vmem:[#allocation80_spill] sm:$0xff] }
 0x262   : > { %v13695_v39 = vpop.permute.xlu0 %3729  ;;  %v1342_v4 = vadd.f32 %v13617_v0, %v18208_v36 }
 0x263   : > { %v13702_v42 = vadd.f32 %v2742_v30, %v2566_v53  ;;  %v1353_v30 = vadd.f32 %v18210_v24, %v18209_v63  ;;  %v1268_v53 = vpop.f32.mrf.mxu1  ;;  %v2977_v63 = vsel %vm1432_vm1, %v2974_v26, %v2976_v48  ;;  %v3567_v26 = vrot.slane %v13302_v18, 7 }
 0x264   : > { %3953 = vmatmul.f32.gmra.mxu2 %v3850_v45  ;;  %3374 = vmatmul.f32.gmra.mxu1 %v3249_v59  ;;  %v18211_v45 = vld [vmem:[#allocation73_spill] sm:$0xff]  ;;  %v2127_v59 = vsel %vm339_vm0, %v2124_v6, %v2126_v54  ;;  %v18216_v6 = vld [vmem:[#allocation66_spill] sm:$0xff] }
 0x265   : > { %18207 = vst [vmem:[#allocation59_spill] sm:$0xff] %v13702_v42  ;;  %2534 = vmatmul.f32.gmra.mxu3 %v2389_v9  ;;  %v1955_v55 = vadd.f32 %v18211_v45, %v1342_v4  ;;  %v18212_v42 = vld [vmem:[#allocation40_spill] sm:$0xff]  ;;  %v3520_v9 = vld [vmem:[%s11542_s12 + $0xd8] sm:$0xff]  ;;  %v10763_v45 = vld [vmem:[%s17933_s1 + $0x7d0] sm:$0xff] }
 0x266   : > { %4287 = vperm.xlu2 %11277, %v10760_v19   ;;  %v3566_v0 = vsel %vm339_vm0, %v3563_v37, %v18212_v42  ;;  %v13733_v19 = vld [vmem:[%s11542_s12 + $0xd0] sm:$0xff] }
 0x267   : > { %4282 = vperm.xlu1 %11276, %v10759_v3   ;;  %v1908_v20 = vpop.f32.mrf.mxu2  ;;  %4277 = vperm.xlu0 %11275, %v10758_v29   ;;  %v3851_v37 = vmul.f32 %v13488_v31, %v3566_v0  ;;  %v2978_v31 = vrot.slane %v13354_v43, 1  ;;  %v10761_v0 = vld [vmem:[%s17933_s1 + $0x7c0] sm:$0xff] }
 0x268   : > { %v13725_v36 = vadd.f32 %v1908_v20, %v1353_v30  ;;  %v2487_v24 = vpop.f32.mrf.mxu3  ;;  %v13730_v51 = vpop.permute.xlu2 %3799  ;;  %2801 = vmatmul.f32.gmra.mxu0 %v3520_v9  ;;  %v18215_v30 = vld [vmem:[#allocation49_spill] sm:$0xff]  ;;  %v3250_v20 = vmul.f32 %v18216_v6, %v2977_v63  ;;  %v2128_v9 = vrot.slane %v13733_v19, 7  ;;  %v18218_v63 = vld [vmem:[#allocation15_spill] sm:$0xff] }
 0x269   : > { %18213 = vst [vmem:[#allocation46_spill] sm:$0xff] %v13730_v51  ;;  %v13735_v3 = vadd.f32 %v2487_v24, %v1955_v55  ;;  %v13737_v4 = vpop.permute.xlu1 %3749  ;;  %v2390_v25 = vmul.f32 %v18215_v30, %v2127_v59  ;;  %v10762_v55 = vld [vmem:[%s17933_s1 + $0x7c8] sm:$0xff]  ;;  %v18219_v24 = vld [vmem:[#allocation37_spill] sm:$0xff]  ;;  %v2651_v6 = vld [vmem:[%s11542_s12 + $0xe0] sm:$0xff] }
 0x26a   : > { %v13740_v29 = vpop.permute.xlu0 %3744  ;;  %v18217_v59 = vld [vmem:[#allocation44_spill] sm:$0xff]  ;;  %v1354_v30 = vadd.f32 %v18219_v24, %v18218_v63 }
 0x26b   : > { %18214 = vst [vmem:[#allocation61_spill] sm:$0xff] %v13735_v3  ;;  %v1343_v18 = vadd.f32 %v13676_v47, %v18217_v59  ;;  %v10774_v3 = vld [vmem:[%s17934_s2 + $0x3a8] sm:$0xff]  ;;  %v3568_v47 = vsel %vm339_vm0, %v18212_v42, %v3567_v26  ;;  %v13781_v42 = vld [vmem:[%s11542_s12 + $0x40] sm:$0xff] }
 0x26c   : > { %3956 = vmatmul.f32.gmra.mxu2 %v3851_v37  ;;  %3377 = vmatmul.f32.gmra.mxu1 %v3250_v20  ;;  %v18220_v37 = vld [vmem:[#allocation77_spill] sm:$0xff]  ;;  %v2979_v20 = vsel %vm1432_vm1, %v2976_v48, %v2978_v31  ;;  %18223 = vst [vmem:[#allocation30_spill] sm:$0xff] %v13781_v42  ;;  %v18225_v48 = vld [vmem:[#allocation84_spill] sm:$0xff] }
 0x26d   : > { %2537 = vmatmul.f32.gmra.mxu3 %v2390_v25  ;;  %v1956_v51 = vadd.f32 %v18220_v37, %v1343_v18  ;;  %v2129_v25 = vsel %vm339_vm0, %v2126_v54, %v2128_v9  ;;  %v18224_v54 = vld [vmem:[#allocation38_spill] sm:$0xff] }
 0x26e   : > { %4302 = vperm.xlu2 %11277, %v10763_v45   ;;  %4421 = vmatpush.msra.mxu3 %v10774_v3  ;;  %v1271_v45 = vpop.f32.mrf.mxu1 }
 0x26f   : > { %4297 = vperm.xlu1 %11276, %v10762_v55   ;;  %v1911_v43 = vpop.f32.mrf.mxu2  ;;  %4292 = vperm.xlu0 %11275, %v10761_v0   ;;  %v13774_v55 = vld [vmem:[%s11542_s12 + $0xd8] sm:$0xff]  ;;  %v3852_v0 = vmul.f32 %v13656_v15, %v3568_v47  ;;  %v18226_v47 = vld [vmem:[#allocation47_spill] sm:$0xff] }
 0x270   : > { %v13767_v59 = vadd.f32 %v1911_v43, %v1354_v30  ;;  %v2490_v63 = vpop.f32.mrf.mxu3  ;;  %v13771_v24 = vpop.permute.xlu2 %3814  ;;  %2804 = vmatmul.f32.gmra.mxu0 %v2651_v6  ;;  %v2391_v30 = vmul.f32 %v18224_v54, %v2129_v25  ;;  %v3251_v43 = vmul.f32 %v18225_v48, %v2979_v20  ;;  %v10766_v6 = vld [vmem:[%s17933_s1 + $0x7e8] sm:$0xff]  ;;  %v2130_v37 = vrot.slane %v13774_v55, 7  ;;  %v10764_v15 = vld [vmem:[%s17933_s1 + $0x7d8] sm:$0xff]  ;;  %v18228_v20 = vld [vmem:[#allocation41_spill] sm:$0xff] }
 0x271   : > { %18221 = vst [vmem:[#allocation67_spill] sm:$0xff] %v13771_v24  ;;  %v13776_v34 = vadd.f32 %v2490_v63, %v1956_v51  ;;  %v13778_v18 = vpop.permute.xlu1 %3764  ;;  %v10765_v51 = vld [vmem:[%s17933_s1 + $0x7e0] sm:$0xff]  ;;  %v1344_v25 = vadd.f32 %v1268_v53, %v18226_v47  ;;  %v18227_v63 = vld [vmem:[#allocation16_spill] sm:$0xff]  ;;  %v3569_v48 = vrot.slane %v13781_v42, 7 }
 0x272   : > { %v13784_v3 = vpop.permute.xlu0 %3759  ;;  %v1355_v54 = vadd.f32 %v18228_v20, %v18227_v63  ;;  %v13808_v47 = vld [vmem:[%s11542_s12 + $0xe8] sm:$0xff] }
 0x273   : > { %18222 = vst [vmem:[#allocation64_spill] sm:$0xff] %v13776_v34  ;;  %v10822_v34 = vld [vmem:[%s17934_s2 + $0x428] sm:$0xff]  ;;  %v1957_v53 = vadd.f32 %v18229_v17, %v1344_v25  ;;  %v3570_v63 = vsel %vm339_vm0, %v3567_v26, %v3569_v48  ;;  %v13826_v26 = vld [vmem:[%s11542_s12 + $0xe0] sm:$0xff] }
 0x274   : > { %3959 = vmatmul.f32.gmra.mxu2 %v3852_v0  ;;  %3380 = vmatmul.f32.gmra.mxu1 %v3251_v43  ;;  %v2980_v0 = vrot.slane %v13338_v5, 1  ;;  %v18235_v25 = vld [vmem:[#allocation83_spill] sm:$0xff] }
 0x275   : > { %2540 = vmatmul.f32.gmra.mxu3 %v2391_v30  ;;  %5033 = vmatpush.msra.mxu0 %v10822_v34  ;;  %v2131_v30 = vsel %vm339_vm0, %v2128_v9, %v2130_v37 }
 0x276   : > { %4317 = vperm.xlu2 %11277, %v10766_v6   ;;  %v2981_v43 = vsel %vm1432_vm1, %v2978_v31, %v2980_v0  ;;  %v1274_v9 = vpop.f32.mrf.mxu1 }
 0x277   : > { %4312 = vperm.xlu1 %11276, %v10765_v51   ;;  %v1914_v24 = vpop.f32.mrf.mxu2  ;;  %4307 = vperm.xlu0 %11275, %v10764_v15   ;;  %v18234_v15 = vld [vmem:[#allocation54_spill] sm:$0xff] }
 0x278   : > { %v13811_v20 = vadd.f32 %v1914_v24, %v1355_v54  ;;  %v2493_v5 = vpop.f32.mrf.mxu3  ;;  %v13818_v6 = vpop.permute.xlu2 %3829  ;;  %2807 = vmatmul.f32.gmra.mxu0 %v13808_v47  ;;  %v3853_v24 = vmul.f32 %v13654_v57, %v3570_v63  ;;  %v2392_v31 = vmul.f32 %v18234_v15, %v2131_v30  ;;  %v3252_v54 = vmul.f32 %v18235_v25, %v2981_v43  ;;  %v10773_v57 = vld [vmem:[%s17934_s2 + $0x3a0] sm:$0xff]  ;;  %v10767_v30 = vld [vmem:[%s17933_s1 + $0x7f0] sm:$0xff]  ;;  %v18236_v43 = vld [vmem:[#allocation52_spill] sm:$0xff] }
 0x279   : > { %18231 = vst [vmem:[#allocation28_spill] sm:$0xff] %v13818_v6  ;;  %v13821_v17 = vadd.f32 %v2493_v5, %v1957_v53  ;;  %v13823_v51 = vpop.permute.xlu1 %3779  ;;  %v10785_v53 = vld [vmem:[%s17933_s1 + $0x800] sm:$0xff]  ;;  %v10768_v5 = vld [vmem:[%s17933_s1 + $0x7f8] sm:$0xff]  ;;  %v2982_v63 = vrot.slane %v13452_v13, 1  ;;  %4422 = vmatpush.msra.mxu3 %v10773_v57  ;;  %v1345_v15 = vadd.f32 %v1271_v45, %v18236_v43  ;;  %v18237_v25 = vld [vmem:[#allocation17_spill] sm:$0xff]  ;;  %v2132_v13 = vrot.slane %v13826_v26, 7 }
 0x27a   : > { %18233 = vst [vmem:[#allocation34_spill] sm:$0xff] %v13823_v51  ;;  %v13829_v34 = vpop.permute.xlu0 %3774  ;;  %v10771_v57 = vld [vmem:[%s17934_s2 + $0x390] sm:$0xff] }
 0x27b   : > { %18232 = vst [vmem:[#allocation63_spill] sm:$0xff] %v13821_v17  ;;  %v18238_v17 = vld [vmem:[#allocation45_spill] sm:$0xff]  ;;  %4423 = vmatpush.msra.mxu3 %v10772_v56  ;;  %v2983_v51 = vsel %vm1432_vm1, %v2980_v0, %v2982_v63 }
 0x27c   : > { %3962 = vmatmul.f32.gmra.mxu2 %v3853_v24  ;;  %v1356_v6 = vadd.f32 %v18238_v17, %v18237_v25  ;;  %3383 = vmatmul.f32.gmra.mxu1 %v3252_v54  ;;  %v18239_v45 = vld [vmem:[#allocation85_spill] sm:$0xff]  ;;  %v3572_v17 = vsel %vm339_vm0, %v3569_v48, %v3571_v23  ;;  %v2133_v25 = vsel %vm339_vm0, %v2130_v37, %v2132_v13  ;;  %v10770_v48 = vld [vmem:[%s17934_s2 + $0x388] sm:$0xff] }
 0x27d   : > { %2543 = vmatmul.f32.gmra.mxu3 %v2392_v31  ;;  %v1958_v43 = vadd.f32 %v18239_v45, %v1345_v15  ;;  %v3523_v31 = vld [vmem:[%s11542_s12 + $0xf0] sm:$0xff]  ;;  %v3854_v56 = vmul.f32 %v13529_v38, %v3572_v17  ;;  %v2134_v38 = vrot.slane %v13466_v35, 7  ;;  %v2984_v17 = vrot.slane %v13492_v58, 1  ;;  %v2654_v35 = vld [vmem:[%s11542_s12 + $0xf8] sm:$0xff] }
 0x27e   : > { %4784 = vperm.xlu2 %11277, %v10785_v53   ;;  %v13865_v53 = vld [vmem:[%s11542_s12 + $0x50] sm:$0xff]  ;;  %4424 = vmatpush.msra.mxu3 %v10771_v57  ;;  %v10788_v57 = vld [vmem:[%s17933_s1 + $0x818] sm:$0xff] }
 0x27f   : > { %4327 = vperm.xlu1 %11276, %v10768_v5   ;;  %v1917_v24 = vpop.f32.mrf.mxu2  ;;  %4322 = vperm.xlu0 %11275, %v10767_v30   ;;  %v18243_v0 = vld [vmem:[#allocation53_spill] sm:$0xff]  ;;  %v18244_v30 = vld [vmem:[#allocation71_spill] sm:$0xff]  ;;  %v3573_v45 = vrot.slane %v13865_v53, 7 }
 0x280   : > { %v13860_v54 = vadd.f32 %v1917_v24, %v1356_v6  ;;  %v2496_v5 = vpop.f32.mrf.mxu3  ;;  %v13867_v41 = vpop.permute.xlu2 %3844  ;;  %2810 = vmatmul.f32.gmra.mxu0 %v3523_v31  ;;  %v2393_v6 = vmul.f32 %v18243_v0, %v2133_v25  ;;  %v3253_v24 = vmul.f32 %v18244_v30, %v2983_v51  ;;  %v10787_v31 = vld [vmem:[%s17933_s1 + $0x810] sm:$0xff]  ;;  %4425 = vmatpush.msra.mxu3 %v10770_v48  ;;  %v10786_v51 = vld [vmem:[%s17933_s1 + $0x808] sm:$0xff]  ;;  %v10769_v25 = vld [vmem:[%s17934_s2 + $0x380] sm:$0xff] }
 0x281   : > { %18240 = vst [vmem:[#allocation35_spill] sm:$0xff] %v13867_v41  ;;  %v13869_v42 = vadd.f32 %v2496_v5, %v1958_v43  ;;  %v13871_v15 = vpop.permute.xlu1 %3794  ;;  %v13882_v43 = vpop.f32.mrf.mxu0  ;;  %v18246_v5 = vld [vmem:[#allocation58_spill] sm:$0xff]  ;;  %v10821_v48 = vld [vmem:[%s17934_s2 + $0x420] sm:$0xff] }
 0x282   : > { %18242 = vst [vmem:[#allocation31_spill] sm:$0xff] %v13871_v15  ;;  %v13877_v37 = vpop.permute.xlu0 %3789  ;;  %v1346_v0 = vadd.f32 %v1274_v9, %v18246_v5  ;;  %v1277_v30 = vpop.f32.mrf.mxu1  ;;  %v3574_v9 = vsel %vm339_vm0, %v3571_v23, %v3573_v45  ;;  %4426 = vmatpush.msra.mxu3 %v10769_v25  ;;  %5034 = vmatpush.msra.mxu0 %v10821_v48  ;;  %v10791_v25 = vld [vmem:[%s17933_s1 + $0x830] sm:$0xff] }
 0x283   : > { %18241 = vst [vmem:[#allocation13_spill] sm:$0xff] %v13869_v42  ;;  %v18247_v42 = vld [vmem:[#allocation18_spill] sm:$0xff] }
 0x284   : > { %18245 = vst [vmem:[#allocation72_spill] sm:$0xff] %v13882_v43  ;;  %3965 = vmatmul.f32.gmra.mxu2 %v3854_v56  ;;  %v18248_v43 = vld [vmem:[#allocation48_spill] sm:$0xff]  ;;  %3386 = vmatmul.f32.gmra.mxu1 %v3253_v24  ;;  %v1959_v56 = vadd.f32 %v13436_v16, %v1346_v0  ;;  %v13921_v16 = vld [vmem:[%s11542_s12 + $0x58] sm:$0xff] }
 0x285   : > { %v1357_v41 = vadd.f32 %v18248_v43, %v18247_v42  ;;  %2546 = vmatmul.f32.gmra.mxu3 %v2393_v6  ;;  %v2135_v42 = vsel %vm339_vm0, %v2132_v13, %v2134_v38  ;;  %v2985_v6 = vsel %vm1432_vm1, %v2982_v63, %v2984_v17  ;;  %v18250_v13 = vld [vmem:[#allocation43_spill] sm:$0xff]  ;;  %v10790_v0 = vld [vmem:[%s17933_s1 + $0x828] sm:$0xff] }
 0x286   : > { %4799 = vperm.xlu2 %11277, %v10788_v57   ;;  %v13914_v57 = vld [vmem:[%s11542_s12 + $0xf0] sm:$0xff]  ;;  %v3254_v63 = vmul.f32 %v13406_v7, %v2985_v6 }
 0x287   : > { %4794 = vperm.xlu1 %11276, %v10787_v31   ;;  %v1920_v58 = vpop.f32.mrf.mxu2  ;;  %4789 = vperm.xlu0 %11275, %v10786_v51   ;;  %v2394_v51 = vmul.f32 %v18250_v13, %v2135_v42  ;;  %v3575_v42 = vrot.slane %v13921_v16, 7 }
 0x288   : > { %v13907_v5 = vadd.f32 %v1920_v58, %v1357_v41  ;;  %v2499_v24 = vpop.f32.mrf.mxu3  ;;  %v13911_v43 = vpop.permute.xlu2 %4182  ;;  %2813 = vmatmul.f32.gmra.mxu0 %v2654_v35  ;;  %v3855_v41 = vmul.f32 %v13695_v39, %v3574_v9  ;;  %v2136_v35 = vrot.slane %v13914_v57, 7  ;;  %v10789_v39 = vld [vmem:[%s17933_s1 + $0x820] sm:$0xff]  ;;  %v18251_v58 = vld [vmem:[#allocation62_spill] sm:$0xff] }
 0x289   : > { %v13916_v31 = vadd.f32 %v2499_v24, %v1959_v56  ;;  %v13918_v15 = vpop.permute.xlu1 %3809  ;;  %v1347_v48 = vadd.f32 %v1277_v30, %v18251_v58  ;;  %v18252_v56 = vld [vmem:[#allocation19_spill] sm:$0xff]  ;;  %v13942_v6 = vpop.f32.mrf.mxu0  ;;  %v2986_v24 = vrot.slane %v13533_v27, 1  ;;  %v3576_v30 = vsel %vm339_vm0, %v3573_v45, %v3575_v42  ;;  %v18258_v45 = vld [vmem:[#allocation57_spill] sm:$0xff] }
 0x28a   : > { %v13924_v23 = vpop.permute.xlu0 %3804  ;;  %v18253_v9 = vld [vmem:[#allocation51_spill] sm:$0xff]  ;;  %18254 = vst [vmem:[#allocation50_spill] sm:$0xff] %v13942_v6  ;;  %v1280_v13 = vpop.f32.mrf.mxu1 }
 0x28b   : > { %18249 = vst [vmem:[#allocation68_spill] sm:$0xff] %v13916_v31  ;;  %v1358_v7 = vadd.f32 %v18253_v9, %v18252_v56  ;;  %v1960_v31 = vadd.f32 %v13483_v22, %v1347_v48  ;;  %v2137_v56 = vsel %vm339_vm0, %v2134_v38, %v2136_v35  ;;  %v2987_v9 = vsel %vm1432_vm1, %v2984_v17, %v2986_v24  ;;  %v13952_v6 = vld [vmem:[%s11542_s12 + $0x60] sm:$0xff]  ;;  %v10794_v17 = vld [vmem:[%s17933_s1 + $0x848] sm:$0xff] }
 0x28c   : > { %3968 = vmatmul.f32.gmra.mxu2 %v3855_v41  ;;  %3389 = vmatmul.f32.gmra.mxu1 %v3254_v63  ;;  %v3856_v22 = vmul.f32 %v13692_v32, %v3576_v30  ;;  %v3255_v48 = vmul.f32 %v13400_v52, %v2987_v9  ;;  %v3577_v38 = vrot.slane %v13952_v6, 7  ;;  %v10792_v32 = vld [vmem:[%s17933_s1 + $0x838] sm:$0xff]  ;;  %v18260_v52 = vld [vmem:[#allocation21_spill] sm:$0xff] }
 0x28d   : > { %2549 = vmatmul.f32.gmra.mxu3 %v2394_v51 }
 0x28e   : > { %4814 = vperm.xlu2 %11277, %v10791_v25  }
 0x28f   : > { %4809 = vperm.xlu1 %11276, %v10790_v0   ;;  %v1923_v41 = vpop.f32.mrf.mxu2  ;;  %4804 = vperm.xlu0 %11275, %v10789_v39   ;;  %v2395_v39 = vmul.f32 %v18258_v45, %v2137_v56  ;;  %v18261_v56 = vld [vmem:[#allocation55_spill] sm:$0xff]  ;;  %v3578_v45 = vsel %vm339_vm0, %v3575_v42, %v3577_v38 }
 0x290   : > { %v13947_v58 = vadd.f32 %v1923_v41, %v1358_v7  ;;  %v2502_v51 = vpop.f32.mrf.mxu3  ;;  %v13954_v63 = vpop.permute.xlu2 %4197  ;;  %v2988_v7 = vrot.slane %v13577_v46, 1  ;;  %v18259_v41 = vld [vmem:[#allocation69_spill] sm:$0xff]  ;;  %v1359_v9 = vadd.f32 %v18261_v56, %v18260_v52  ;;  %v13993_v56 = vld [vmem:[%s11542_s12 + $0x68] sm:$0xff] }
 0x291   : > { %v13956_v27 = vadd.f32 %v2502_v51, %v1960_v31  ;;  %v13958_v25 = vpop.permute.xlu1 %3824  ;;  %v10793_v31 = vld [vmem:[%s17933_s1 + $0x840] sm:$0xff]  ;;  %v1348_v30 = vadd.f32 %v1280_v13, %v18259_v41  ;;  %v10820_v51 = vld [vmem:[%s17934_s2 + $0x418] sm:$0xff] }
 0x292   : > { %18256 = vst [vmem:[#allocation14_spill] sm:$0xff] %v13958_v25  ;;  %v13961_v0 = vpop.permute.xlu0 %3819  ;;  %5035 = vmatpush.msra.mxu0 %v10820_v51  ;;  %v18263_v41 = vld [vmem:[#allocation22_spill] sm:$0xff]  ;;  %v2989_v52 = vsel %vm1432_vm1, %v2986_v24, %v2988_v7  ;;  %v18268_v51 = vld [vmem:[#allocation56_spill] sm:$0xff]  ;;  %v3579_v24 = vrot.slane %v13993_v56, 7 }
 0x293   : > { %18255 = vst [vmem:[#allocation39_spill] sm:$0xff] %v13956_v27  ;;  %v13984_v27 = vpop.f32.mrf.mxu0 }
 0x294   : > { %18257 = vst [vmem:[#allocation33_spill] sm:$0xff] %v13961_v0  ;;  %3971 = vmatmul.f32.gmra.mxu2 %v3856_v22  ;;  %3392 = vmatmul.f32.gmra.mxu1 %v3255_v48  ;;  %v1961_v22 = vadd.f32 %v13522_v14, %v1348_v30  ;;  %v1283_v30 = vpop.f32.mrf.mxu1 }
 0x295   : > { %2552 = vmatmul.f32.gmra.mxu3 %v2395_v39  ;;  %18262 = vst [vmem:[#allocation73_spill] sm:$0xff] %v13984_v27  ;;  %v18264_v39 = vrot.slane %v18263_v41, 7  ;;  %v18269_v41 = vld [vmem:[#allocation75_spill] sm:$0xff] }
 0x296   : > { %4829 = vperm.xlu2 %11277, %v10794_v17  }
 0x297   : > { %4824 = vperm.xlu1 %11276, %v10793_v31   ;;  %v1926_v46 = vpop.f32.mrf.mxu2  ;;  %4819 = vperm.xlu0 %11275, %v10792_v32   ;;  %v2138_v48 = vsel %vm339_vm0, %v2136_v35, %v18264_v39  ;;  %v3857_v32 = vmul.f32 %v13570_v28, %v3578_v45  ;;  %v3256_v35 = vmul.f32 %v18269_v41, %v2989_v52  ;;  %v10797_v39 = vld [vmem:[%s17933_s1 + $0x860] sm:$0xff]  ;;  %v10795_v28 = vld [vmem:[%s17933_s1 + $0x850] sm:$0xff]  ;;  %v18270_v45 = vld [vmem:[#allocation76_spill] sm:$0xff] }
 0x298   : > { %v13986_v13 = vadd.f32 %v1926_v46, %v1359_v9  ;;  %v2505_v17 = vpop.f32.mrf.mxu3  ;;  %v13995_v31 = vpop.permute.xlu2 %4212  ;;  %v2396_v46 = vmul.f32 %v18268_v51, %v2138_v48  ;;  %v1349_v48 = vadd.f32 %v1283_v30, %v18270_v45  ;;  %v18271_v52 = vld [vmem:[#allocation23_spill] sm:$0xff]  ;;  %v18272_v51 = vld [vmem:[#allocation60_spill] sm:$0xff]  ;;  %v14028_v45 = vld [vmem:[%s11542_s12 + $0x10] sm:$0xff] }
 0x299   : > { %v13997_v14 = vadd.f32 %v2505_v17, %v1961_v22  ;;  %v13999_v42 = vpop.permute.xlu1 %3839  ;;  %v10796_v22 = vld [vmem:[%s17933_s1 + $0x858] sm:$0xff]  ;;  %v2990_v17 = vrot.slane %v13612_v40, 1  ;;  %v1360_v41 = vadd.f32 %v18272_v51, %v18271_v52  ;;  %v3580_v40 = vsel %vm339_vm0, %v3577_v38, %v3579_v24  ;;  %18273 = vst [vmem:[#allocation44_spill] sm:$0xff] %v14028_v45  ;;  %v10819_v52 = vld [vmem:[%s17934_s2 + $0x410] sm:$0xff] }
 0x29a   : > { %18266 = vst [vmem:[#allocation49_spill] sm:$0xff] %v13999_v42  ;;  %v14002_v9 = vpop.permute.xlu0 %3834  ;;  %v1962_v27 = vadd.f32 %v13562_v12, %v1349_v48  ;;  %v3858_v12 = vmul.f32 %v13740_v29, %v3580_v40  ;;  %v10799_v48 = vld [vmem:[%s17933_s1 + $0x870] sm:$0xff]  ;;  %v18276_v29 = vld [vmem:[#allocation24_spill] sm:$0xff]  ;;  %v2992_v51 = vrot.slane %v13652_v62, 1  ;;  %5036 = vmatpush.msra.mxu0 %v10819_v52 }
 0x29b   : > { %18265 = vst [vmem:[#allocation40_spill] sm:$0xff] %v13997_v14  ;;  %v2991_v42 = vsel %vm1432_vm1, %v2988_v7, %v2990_v17  ;;  %v10800_v7 = vld [vmem:[%s17933_s1 + $0x878] sm:$0xff] }
 0x29c   : > { %18267 = vst [vmem:[#allocation66_spill] sm:$0xff] %v14002_v9  ;;  %3974 = vmatmul.f32.gmra.mxu2 %v3857_v32  ;;  %3395 = vmatmul.f32.gmra.mxu1 %v3256_v35 }
 0x29d   : > { %2555 = vmatmul.f32.gmra.mxu3 %v2396_v46  ;;  %v14030_v46 = vpop.f32.mrf.mxu0 }
 0x29e   : > { %4844 = vperm.xlu2 %11277, %v10797_v39   ;;  %18274 = vst [vmem:[#allocation15_spill] sm:$0xff] %v14030_v46  ;;  %v14101_v46 = vld [vmem:[%s11542_s12 + $0x20] sm:$0xff] }
 0x29f   : > { %4839 = vperm.xlu1 %11276, %v10796_v22   ;;  %v1929_v14 = vpop.f32.mrf.mxu2  ;;  %4834 = vperm.xlu0 %11275, %v10795_v28   ;;  %v14035_v22 = vld [vmem:[%s11542_s12 + $0x70] sm:$0xff] }
 0x2a0   : > { %v14022_v32 = vadd.f32 %v1929_v14, %v1360_v41  ;;  %v2508_v9 = vpop.f32.mrf.mxu3  ;;  %v14025_v30 = vpop.permute.xlu2 %4227  ;;  %v3257_v14 = vmul.f32 %v13449_v60, %v2991_v42  ;;  %v3581_v42 = vrot.slane %v14035_v22, 7 }
 0x2a1   : > { %v14032_v35 = vadd.f32 %v2508_v9, %v1962_v27  ;;  %v4178_v39 = vpop.permute.xlu1 %4177  ;;  %v10798_v27 = vld [vmem:[%s17933_s1 + $0x868] sm:$0xff]  ;;  %v18277_v9 = vld [vmem:[#allocation65_spill] sm:$0xff] }
 0x2a2   : > { %v4173_v38 = vpop.permute.xlu0 %4172  ;;  %v1361_v60 = vadd.f32 %v18277_v9, %v18276_v29  ;;  %v3582_v40 = vsel %vm339_vm0, %v3579_v24, %v3581_v42  ;;  %v14061_v29 = vld [vmem:[%s11542_s12 + $0x78] sm:$0xff] }
 0x2a3   : > { %18275 = vst [vmem:[#allocation37_spill] sm:$0xff] %v14032_v35  ;;  %v4330_v28 = vmul.f32 %v4173_v38, %v14028_v45  ;;  %v2993_v38 = vsel %vm1432_vm1, %v2990_v17, %v2992_v51  ;;  %v14068_v35 = vpop.f32.mrf.mxu1  ;;  %v3859_v24 = vmul.f32 %v13737_v4, %v3582_v40  ;;  %v3583_v17 = vrot.slane %v14061_v29, 7  ;;  %v18281_v40 = vld [vmem:[#allocation27_spill] sm:$0xff] }
 0x2a4   : > { %3977 = vmatmul.f32.gmra.mxu2 %v3858_v12  ;;  %3398 = vmatmul.f32.gmra.mxu1 %v3257_v14  ;;  %v14064_v14 = vld [vmem:[%s11542_s12 + $0x18] sm:$0xff]  ;;  %v2994_v4 = vrot.slane %v13698_v49, 1 }
 0x2a5   : > { %4427 = vmatmul.f32.vlgmr.msra.gmra.mxu3 %v4330_v28  ;;  %v4331_v52 = vmul.f32 %v4178_v39, %v14064_v14 }
 0x2a6   : > { %4859 = vperm.xlu2 %11277, %v10800_v7   ;;  %v2995_v49 = vsel %vm1432_vm1, %v2992_v51, %v2994_v4 }
 0x2a7   : > { %4854 = vperm.xlu1 %11276, %v10799_v48   ;;  %v1932_v41 = vpop.f32.mrf.mxu2  ;;  %4849 = vperm.xlu0 %11275, %v10798_v27   ;;  %v3258_v27 = vmul.f32 %v13447_v61, %v2993_v38  ;;  %v10801_v61 = vld [vmem:[%s17933_s1 + $0x880] sm:$0xff]  ;;  %v18282_v38 = vld [vmem:[#allocation70_spill] sm:$0xff] }
 0x2a8   : > { %v14057_v12 = vadd.f32 %v1932_v41, %v1361_v60  ;;  %v2511_v28 = vpop.f32.mrf.mxu3  ;;  %v14066_v9 = vpop.permute.xlu2 %4242  ;;  %v10803_v41 = vld [vmem:[%s17933_s1 + $0x890] sm:$0xff]  ;;  %v1362_v39 = vadd.f32 %v18282_v38, %v18281_v40  ;;  %v4332_v38 = vmul.f32 %v13911_v43, %v14101_v46 }
 0x2a9   : > { %18278 = vst [vmem:[#allocation77_spill] sm:$0xff] %v14066_v9  ;;  %v14071_v62 = vadd.f32 %v2511_v28, %v13604_v11  ;;  %v14073_v7 = vpop.permute.xlu1 %4192  ;;  %v14078_v60 = vpop.f32.mrf.mxu0  ;;  %v10802_v11 = vld [vmem:[%s17933_s1 + $0x888] sm:$0xff]  ;;  %v14177_v9 = vld [vmem:[%s11542_s12 + $0x30] sm:$0xff] }
 0x2aa   : > { %v4188_v48 = vpop.permute.xlu0 %4187  ;;  %18280 = vst [vmem:[#allocation84_spill] sm:$0xff] %v14078_v60 }
 0x2ab   : > { %18279 = vst [vmem:[#allocation38_spill] sm:$0xff] %v14071_v62  ;;  %v3584_v62 = vsel %vm339_vm0, %v3581_v42, %v3583_v17  ;;  %v14105_v40 = vpop.f32.mrf.mxu1 }
 0x2ac   : > { %3980 = vmatmul.f32.gmra.mxu2 %v3859_v24  ;;  %3401 = vmatmul.f32.gmra.mxu1 %v3258_v27  ;;  %v14098_v24 = vld [vmem:[%s11542_s12 + $0x80] sm:$0xff]  ;;  %v3860_v42 = vmul.f32 %v13609_v1, %v3584_v62  ;;  %v10804_v1 = vld [vmem:[%s17933_s1 + $0x898] sm:$0xff]  ;;  %v18286_v62 = vld [vmem:[#allocation29_spill] sm:$0xff] }
 0x2ad   : > { %4430 = vmatmul.f32.gmra.mxu3 %v4331_v52 }
 0x2ae   : > { %4874 = vperm.xlu2 %11277, %v10803_v41  }
 0x2af   : > { %4869 = vperm.xlu1 %11276, %v10802_v11   ;;  %v1935_v28 = vpop.f32.mrf.mxu2  ;;  %4864 = vperm.xlu0 %11275, %v10801_v61   ;;  %v18285_v11 = vld [vmem:[#allocation79_spill] sm:$0xff]  ;;  %v3585_v61 = vrot.slane %v14098_v24, 7 }
 0x2b0   : > { %v14094_v60 = vadd.f32 %v1935_v28, %v1362_v39  ;;  %v2514_v25 = vpop.f32.mrf.mxu3  ;;  %v14103_v0 = vpop.permute.xlu2 %4257  ;;  %v3259_v51 = vmul.f32 %v18285_v11, %v2995_v49  ;;  %v10806_v39 = vld [vmem:[%s17933_s1 + $0x8a8] sm:$0xff]  ;;  %v18287_v28 = vld [vmem:[#allocation74_spill] sm:$0xff] }
 0x2b1   : > { %18283 = vst [vmem:[#allocation47_spill] sm:$0xff] %v14103_v0  ;;  %v14108_v27 = vadd.f32 %v2514_v25, %v13645_v2  ;;  %v14110_v52 = vpop.permute.xlu1 %4207  ;;  %v10805_v2 = vld [vmem:[%s17933_s1 + $0x8a0] sm:$0xff]  ;;  %v2996_v25 = vrot.slane %v13733_v19, 1  ;;  %v1363_v49 = vadd.f32 %v18287_v28, %v18286_v62  ;;  %v14131_v43 = vpop.f32.mrf.mxu0  ;;  %v10818_v11 = vld [vmem:[%s17934_s2 + $0x408] sm:$0xff] }
 0x2b2   : > { %v14113_v41 = vpop.permute.xlu0 %4202  ;;  %18288 = vst [vmem:[#allocation41_spill] sm:$0xff] %v14131_v43  ;;  %5037 = vmatpush.msra.mxu0 %v10818_v11  ;;  %v14141_v62 = vld [vmem:[%s11542_s12 + $0x28] sm:$0xff]  ;;  %v10809_v11 = vld [vmem:[%s17933_s1 + $0x8c0] sm:$0xff] }
 0x2b3   : > { %18284 = vst [vmem:[#allocation16_spill] sm:$0xff] %v14108_v27  ;;  %v2997_v0 = vsel %vm1432_vm1, %v2994_v4, %v2996_v25  ;;  %v4333_v4 = vmul.f32 %v4188_v48, %v14141_v62  ;;  %v18292_v48 = vld [vmem:[#allocation78_spill] sm:$0xff] }
 0x2b4   : > { %3983 = vmatmul.f32.gmra.mxu2 %v3860_v42  ;;  %3404 = vmatmul.f32.gmra.mxu1 %v3259_v51  ;;  %v3586_v42 = vsel %vm339_vm0, %v3583_v17, %v3585_v61 }
 0x2b5   : > { %4433 = vmatmul.f32.gmra.mxu3 %v4332_v38 }
 0x2b6   : > { %4889 = vperm.xlu2 %11277, %v10806_v39  }
 0x2b7   : > { %4884 = vperm.xlu1 %11276, %v10805_v2   ;;  %v1938_v19 = vpop.f32.mrf.mxu2  ;;  %4879 = vperm.xlu0 %11275, %v10804_v1   ;;  %v3861_v2 = vmul.f32 %v13784_v3, %v3586_v42  ;;  %v3260_v1 = vmul.f32 %v13496_v10, %v2997_v0  ;;  %v10817_v3 = vld [vmem:[%s17934_s2 + $0x400] sm:$0xff]  ;;  %v10807_v10 = vld [vmem:[%s17933_s1 + $0x8b0] sm:$0xff]  ;;  %v18291_v0 = vld [vmem:[#allocation32_spill] sm:$0xff] }
 0x2b8   : > { %v14137_v27 = vadd.f32 %v1938_v19, %v1363_v49  ;;  %v2517_v28 = vpop.f32.mrf.mxu3  ;;  %v14143_v51 = vpop.permute.xlu2 %4272  ;;  %5038 = vmatpush.msra.mxu0 %v10817_v3  ;;  %v1364_v19 = vadd.f32 %v18292_v48, %v18291_v0  ;;  %v11296_v42 = vld [vmem:[%s11542_s12 + $0x88] sm:$0xff]  ;;  %v14183_v48 = vld [vmem:[%s11542_s12 + $0x90] sm:$0xff] }
 0x2b9   : > { %18289 = vst [vmem:[#allocation80_spill] sm:$0xff] %v14143_v51  ;;  %v14146_v38 = vadd.f32 %v2517_v28, %v13685_v44  ;;  %v14148_v39 = vpop.permute.xlu1 %4222  ;;  %v14154_v49 = vpop.f32.mrf.mxu1  ;;  %v10808_v44 = vld [vmem:[%s17933_s1 + $0x8b8] sm:$0xff]  ;;  %v3587_v28 = vrot.slane %v11296_v42, 7  ;;  %v3589_v42 = vrot.slane %v14183_v48, 7 }
 0x2ba   : > { %v14151_v17 = vpop.permute.xlu0 %4217  ;;  %v14174_v51 = vpop.f32.mrf.mxu0  ;;  %18294 = vst [vmem:[#allocation52_spill] sm:$0xff] %v14183_v48 }
 0x2bb   : > { %18290 = vst [vmem:[#allocation54_spill] sm:$0xff] %v14146_v38  ;;  %v2998_v38 = vrot.slane %v13774_v55, 1  ;;  %v17953_v55 = vrot.slane %v14141_v62, 1 }
 0x2bc   : > { %3986 = vmatmul.f32.gmra.mxu2 %v3861_v2  ;;  %3407 = vmatmul.f32.gmra.mxu1 %v3260_v1  ;;  %v3588_v2 = vsel %vm339_vm0, %v3585_v61, %v3587_v28  ;;  %18293 = vst [vmem:[#allocation83_spill] sm:$0xff] %v14174_v51  ;;  %v3590_v51 = vsel %vm339_vm0, %v3587_v28, %v3589_v42  ;;  %v18302_v28 = vld [vmem:[#allocation82_spill] sm:$0xff] }
 0x2bd   : > { %4436 = vmatmul.f32.gmra.mxu3 %v4333_v4  ;;  %v2999_v0 = vsel %vm1432_vm1, %v2996_v25, %v2998_v38 }
 0x2be   : > { %4904 = vperm.xlu2 %11277, %v10809_v11   ;;  %v17952_v11 = vrot.slane %v14177_v9, 1 }
 0x2bf   : > { %4899 = vperm.xlu1 %11276, %v10808_v44   ;;  %v1941_v43 = vpop.f32.mrf.mxu2  ;;  %4894 = vperm.xlu0 %11275, %v10807_v10   ;;  %v3862_v10 = vmul.f32 %v13778_v18, %v3588_v2  ;;  %v10812_v18 = vld [vmem:[%s17933_s1 + $0x8d8] sm:$0xff]  ;;  %v10811_v2 = vld [vmem:[%s17933_s1 + $0x8d0] sm:$0xff] }
 0x2c0   : > { %v14179_v3 = vadd.f32 %v1941_v43, %v1364_v19  ;;  %v2520_v1 = vpop.f32.mrf.mxu3  ;;  %v14185_v4 = vpop.permute.xlu2 %4287  ;;  %v14202_v25 = vsel %vm1432_vm1, %v17953_v55, %v17952_v11  ;;  %v3261_v19 = vmul.f32 %v13494_v21, %v2999_v0  ;;  %v10810_v21 = vld [vmem:[%s17933_s1 + $0x8c8] sm:$0xff]  ;;  %v18298_v11 = vld [vmem:[#allocation81_spill] sm:$0xff] }
 0x2c1   : > { %18295 = vst [vmem:[#allocation17_spill] sm:$0xff] %v14185_v4  ;;  %v14190_v61 = vadd.f32 %v2520_v1, %v13725_v36  ;;  %v14192_v44 = vpop.permute.xlu1 %4237  ;;  %v4334_v36 = vmul.f32 %v14073_v7, %v14177_v9  ;;  %v3000_v1 = vrot.slane %v13826_v26, 1  ;;  %v18297_v0 = vld [vmem:[#allocation36_spill] sm:$0xff] }
 0x2c2   : > { %v14195_v43 = vpop.permute.xlu0 %4232  ;;  %v1365_v55 = vadd.f32 %v18298_v11, %v18297_v0  ;;  %v14228_v11 = vpop.f32.mrf.mxu0  ;;  %v11298_v0 = vld [vmem:[%s11542_s12 + $0x38] sm:$0xff] }
 0x2c3   : > { %18296 = vst [vmem:[#allocation45_spill] sm:$0xff] %v14190_v61  ;;  %v14220_v61 = vpop.f32.mrf.mxu1 }
 0x2c4   : > { %3989 = vmatmul.f32.gmra.mxu2 %v3862_v10  ;;  %3410 = vmatmul.f32.gmra.mxu1 %v3261_v19  ;;  %v3001_v10 = vsel %vm1432_vm1, %v2998_v38, %v3000_v1  ;;  %18300 = vst [vmem:[#allocation53_spill] sm:$0xff] %v14228_v11 }
 0x2c5   : > { %4439 = vmatmul.f32.gmra.mxu3 %v4334_v36 }
 0x2c6   : > { %4919 = vperm.xlu2 %11277, %v10812_v18   ;;  %v3863_v18 = vmul.f32 %v13649_v33, %v3590_v51  ;;  %v3002_v33 = vrot.slane %v13808_v47, 1  ;;  %v10813_v51 = vld [vmem:[%s17933_s1 + $0x8e0] sm:$0xff] }
 0x2c7   : > { %4914 = vperm.xlu1 %11276, %v10811_v2   ;;  %v1944_v7 = vpop.f32.mrf.mxu2  ;;  %4909 = vperm.xlu0 %11275, %v10810_v21   ;;  %v3262_v21 = vmul.f32 %v18302_v28, %v3001_v10 }
 0x2c8   : > { %v14223_v26 = vadd.f32 %v1944_v7, %v1365_v55  ;;  %v2523_v4 = vpop.f32.mrf.mxu3  ;;  %v14226_v48 = vpop.permute.xlu2 %4302  ;;  %v14240_v55 = vld [vmem:[%s11542_s12 + $0x98] sm:$0xff]  ;;  %v4335_v7 = vmul.f32 %v11298_v0, %v13954_v63  ;;  %v3429_v63 = vadd.f32 %v14068_v35, %v13412_v50  ;;  %v3003_v47 = vsel %vm1432_vm1, %v3000_v1, %v3002_v33 }
 0x2c9   : > { %18299 = vst [vmem:[#allocation85_spill] sm:$0xff] %v14226_v48  ;;  %v14231_v19 = vadd.f32 %v2523_v4, %v13767_v59  ;;  %v14233_v36 = vpop.permute.xlu1 %4252  ;;  %v3591_v38 = vrot.slane %v14240_v55, 7  ;;  %v10815_v59 = vld [vmem:[%s17933_s1 + $0x8f0] sm:$0xff]  ;;  %v10814_v4 = vld [vmem:[%s17933_s1 + $0x8e8] sm:$0xff]  ;;  %v3263_v1 = vmul.f32 %v13537_v8, %v3003_v47  ;;  %v18307_v47 = vld [vmem:[#allocation87_spill] sm:$0xff] }
 0x2ca   : > { %v14236_v2 = vpop.permute.xlu0 %4247 }
 0x2cb   : > { %18301 = vst [vmem:[#allocation71_spill] sm:$0xff] %v14231_v19  ;;  %v3592_v10 = vsel %vm339_vm0, %v3589_v42, %v3591_v38  ;;  %v14258_v28 = vpop.f32.mrf.mxu1 }
 0x2cc   : > { %3992 = vmatmul.f32.gmra.mxu2 %v3863_v18  ;;  %3413 = vmatmul.f32.gmra.mxu1 %v3262_v21  ;;  %v3864_v35 = vmul.f32 %v13829_v34, %v3592_v10  ;;  %v5525_v34 = vld [vmem:[%s17933_s1] sm:$0xff]  ;;  %v10816_v10 = vld [vmem:[%s17933_s1 + $0x8f8] sm:$0xff] }
 0x2cd   : > { %4442 = vmatmul.f32.gmra.mxu3 %v4335_v7  ;;  %v17955_v7 = vrot.slane %v14028_v45, 1  ;;  %v14317_v45 = vld [vmem:[%s11542_s12 + $0xa8] sm:$0xff] }
 0x2ce   : > { %4934 = vperm.xlu2 %11277, %v10815_v59   ;;  %v17956_v59 = vrot.slane %v14064_v14, 1 }
 0x2cf   : > { %4929 = vperm.xlu1 %11276, %v10814_v4   ;;  %4924 = vperm.xlu0 %11275, %v10813_v51   ;;  %v3945_v0 = vpop.f32.mrf.mxu2  ;;  %v14276_v4 = vpop.f32.mrf.mxu0  ;;  %v18306_v51 = vld [vmem:[#allocation30_spill] sm:$0xff] }
 0x2d0   : > { %v2526_v18 = vpop.f32.mrf.mxu3  ;;  %v14261_v19 = vadd.f32 %v3945_v0, %v3429_v63  ;;  %v14263_v11 = vpop.permute.xlu2 %4317  ;;  %18305 = vst [vmem:[#allocation48_spill] sm:$0xff] %v14276_v4  ;;  %v4336_v63 = vmul.f32 %v14113_v41, %v18306_v51  ;;  %v11299_v0 = vld [vmem:[%s11542_s12 + $0xa0] sm:$0xff]  ;;  %v3004_v41 = vrot.slane %v13914_v57, 1  ;;  %v18310_v4 = vld [vmem:[#allocation89_spill] sm:$0xff] }
 0x2d1   : > { %18303 = vst [vmem:[#allocation58_spill] sm:$0xff] %v14263_v11  ;;  %v14266_v21 = vadd.f32 %v2526_v18, %v13811_v20  ;;  %v14268_v50 = vpop.permute.xlu1 %4267  ;;  %v5526_v20 = vld [vmem:[%s17933_s1 + $0x8] sm:$0xff]  ;;  %v3593_v8 = vrot.slane %v11299_v0, 7  ;;  %v3430_v18 = vadd.f32 %v14105_v40, %v18307_v47  ;;  %v14303_v40 = vld [vmem:[%s11542_s12 + $0xf8] sm:$0xff] }
 0x2d2   : > { %v14271_v42 = vpop.permute.xlu0 %4262 }
 0x2d3   : > { %18304 = vst [vmem:[#allocation18_spill] sm:$0xff] %v14266_v21  ;;  %v3594_v51 = vsel %vm339_vm0, %v3591_v38, %v3593_v8 }
 0x2d4   : > { %3995 = vmatmul.f32.gmra.mxu2 %v3864_v35  ;;  %3416 = vmatmul.f32.gmra.mxu1 %v3263_v1  ;;  %v4652_v35 = vsel %vm1432_vm1, %v17955_v7, %v17956_v59  ;;  %v3005_v1 = vsel %vm1432_vm1, %v3002_v33, %v3004_v41  ;;  %v18309_v59 = vld [vmem:[#allocation34_spill] sm:$0xff] }
 0x2d5   : > { %4445 = vmatmul.f32.gmra.mxu3 %v4336_v63  ;;  %v3865_v38 = vmul.f32 %v18309_v59, %v3594_v51  ;;  %v3264_v33 = vmul.f32 %v18310_v4, %v3005_v1  ;;  %v3006_v59 = vrot.slane %v14303_v40, 1  ;;  %v5527_v4 = vld [vmem:[%s17933_s1 + $0x10] sm:$0xff] }
 0x2d6   : > { %5564 = vperm.xlu2 %11277, %v5526_v20   ;;  %v14305_v20 = vpop.f32.mrf.mxu1 }
 0x2d7   : > { %5559 = vperm.xlu1 %11276, %v5525_v34   ;;  %4939 = vperm.xlu0 %11275, %v10816_v10   ;;  %v3948_v0 = vpop.f32.mrf.mxu2 }
 0x2d8   : > { %v2529_v63 = vpop.f32.mrf.mxu3  ;;  %v14300_v57 = vadd.f32 %v3948_v0, %v3430_v18  ;;  %v4785_v21 = vpop.permute.xlu2 %4784  ;;  %v3595_v18 = vrot.slane %v14317_v45, 7  ;;  %v18311_v0 = vld [vmem:[#allocation12_spill] sm:$0xff] }
 0x2d9   : > { %v14308_v34 = vadd.f32 %v2529_v63, %v13860_v54  ;;  %v4942_v47 = vmul.f32 %v4785_v21, %v4652_v35  ;;  %v14310_v7 = vpop.permute.xlu1 %4282  ;;  %v4337_v11 = vmul.f32 %v14110_v52, %v18311_v0  ;;  %v5529_v54 = vld [vmem:[%s17933_s1 + $0x20] sm:$0xff]  ;;  %v5528_v21 = vld [vmem:[%s17933_s1 + $0x18] sm:$0xff]  ;;  %v14332_v35 = vpop.f32.mrf.mxu0  ;;  %v18313_v52 = vld [vmem:[#allocation88_spill] sm:$0xff] }
 0x2da   : > { %v14313_v10 = vpop.permute.xlu0 %4277  ;;  %18312 = vst [vmem:[#allocation62_spill] sm:$0xff] %v14332_v35  ;;  %v3431_v51 = vadd.f32 %v14154_v49, %v18313_v52  ;;  %v3596_v1 = vsel %vm339_vm0, %v3593_v8, %v3595_v18  ;;  %v18316_v35 = vld [vmem:[#allocation25_spill] sm:$0xff]  ;;  %v4338_v52 = vmul.f32 %v13995_v31, %v13865_v53 }
 0x2db   : > { %18308 = vst [vmem:[#allocation43_spill] sm:$0xff] %v14308_v34  ;;  %5039 = vmatmul.f32.vlgmr.msra.gmra.mxu0 %v4942_v47  ;;  %v3007_v47 = vsel %vm1432_vm1, %v3004_v41, %v3006_v59  ;;  %v3866_v49 = vmul.f32 %v18316_v35, %v3596_v1  ;;  %v5531_v35 = vld [vmem:[%s17933_s1 + $0x30] sm:$0xff]  ;;  %v5530_v1 = vld [vmem:[%s17933_s1 + $0x28] sm:$0xff] }
 0x2dc   : > { %3998 = vmatmul.f32.gmra.mxu2 %v3865_v38  ;;  %3419 = vmatmul.f32.gmra.mxu1 %v3264_v33 }
 0x2dd   : > { %4448 = vmatmul.f32.gmra.mxu3 %v4337_v11 }
 0x2de   : > { %5579 = vperm.xlu2 %11277, %v5529_v54  }
 0x2df   : > { %5574 = vperm.xlu1 %11276, %v5528_v21   ;;  %5569 = vperm.xlu0 %11275, %v5527_v4   ;;  %v3951_v63 = vpop.f32.mrf.mxu2  ;;  %v18317_v21 = vld [vmem:[#allocation86_spill] sm:$0xff]  ;;  %v14352_v4 = vld [vmem:[%s11542_s12 + $0xb0] sm:$0xff] }
 0x2e0   : > { %v2532_v38 = vpop.f32.mrf.mxu3  ;;  %v14338_v0 = vadd.f32 %v3951_v63, %v3431_v51  ;;  %v14340_v34 = vpop.permute.xlu2 %4799  ;;  %v3265_v8 = vmul.f32 %v18317_v21, %v3007_v47  ;;  %v3597_v41 = vrot.slane %v14352_v4, 7  ;;  %v18318_v63 = vld [vmem:[#allocation90_spill] sm:$0xff]  ;;  %v18320_v21 = vld [vmem:[#allocation20_spill] sm:$0xff] }
 0x2e1   : > { %v14343_v33 = vadd.f32 %v2532_v38, %v13907_v5  ;;  %v14345_v11 = vpop.permute.xlu1 %4297  ;;  %v14357_v51 = vpop.f32.mrf.mxu1  ;;  %v5532_v5 = vld [vmem:[%s17933_s1 + $0x38] sm:$0xff]  ;;  %v3432_v53 = vadd.f32 %v14220_v61, %v18318_v63  ;;  %v4339_v63 = vmul.f32 %v14151_v17, %v13921_v16  ;;  %v18324_v16 = vld [vmem:[#allocation92_spill] sm:$0xff] }
 0x2e2   : > { %18315 = vst [vmem:[#allocation51_spill] sm:$0xff] %v14345_v11  ;;  %v14348_v54 = vpop.permute.xlu0 %4292  ;;  %v3598_v31 = vsel %vm339_vm0, %v3595_v18, %v3597_v41  ;;  %v14371_v47 = vpop.f32.mrf.mxu0  ;;  %v3433_v17 = vadd.f32 %v14258_v28, %v18324_v16  ;;  %v5538_v16 = vld [vmem:[%s17933_s1 + $0x68] sm:$0xff] }
 0x2e3   : > { %18314 = vst [vmem:[#allocation19_spill] sm:$0xff] %v14343_v33  ;;  %v3867_v18 = vmul.f32 %v13877_v37, %v3598_v31  ;;  %v5533_v37 = vld [vmem:[%s17933_s1 + $0x40] sm:$0xff] }
 0x2e4   : > { %4001 = vmatmul.f32.gmra.mxu2 %v3866_v49  ;;  %3422 = vmatmul.f32.gmra.mxu1 %v3265_v8  ;;  %18319 = vst [vmem:[#allocation57_spill] sm:$0xff] %v14371_v47  ;;  %v18321_v49 = vrot.slane %v18320_v21, 1 }
 0x2e5   : > { %4451 = vmatmul.f32.gmra.mxu3 %v4338_v52 }
 0x2e6   : > { %5594 = vperm.xlu2 %11277, %v5532_v5   ;;  %v3041_v33 = vsel %vm1432_vm1, %v3006_v59, %v18321_v49  ;;  %v5535_v59 = vld [vmem:[%s17933_s1 + $0x50] sm:$0xff] }
 0x2e7   : > { %5589 = vperm.xlu1 %11276, %v5531_v35   ;;  %5584 = vperm.xlu0 %11275, %v5530_v1   ;;  %v3954_v38 = vpop.f32.mrf.mxu2  ;;  %v18323_v35 = vld [vmem:[#allocation91_spill] sm:$0xff] }
 0x2e8   : > { %v2535_v48 = vpop.f32.mrf.mxu3  ;;  %v14376_v11 = vadd.f32 %v3954_v38, %v3432_v53  ;;  %v14378_v8 = vpop.permute.xlu2 %4814  ;;  %v3266_v1 = vmul.f32 %v18323_v35, %v3041_v33 }
 0x2e9   : > { %v14381_v61 = vadd.f32 %v2535_v48, %v13947_v58  ;;  %v14383_v52 = vpop.permute.xlu1 %4312  ;;  %v5534_v58 = vld [vmem:[%s17933_s1 + $0x48] sm:$0xff]  ;;  %v14401_v48 = vld [vmem:[%s11542_s12 + $0xb8] sm:$0xff]  ;;  %v14404_v53 = vpop.f32.mrf.mxu1 }
 0x2ea   : > { %v14386_v5 = vpop.permute.xlu0 %4307  ;;  %v3599_v33 = vrot.slane %v14401_v48, 7  ;;  %v14413_v35 = vpop.f32.mrf.mxu0 }
 0x2eb   : > { %18322 = vst [vmem:[#allocation69_spill] sm:$0xff] %v14381_v61  ;;  %v18327_v61 = vld [vmem:[#allocation31_spill] sm:$0xff] }
 0x2ec   : > { %4004 = vmatmul.f32.gmra.mxu2 %v3867_v18  ;;  %3425 = vmatmul.f32.gmra.mxu1 %v3266_v1  ;;  %v3600_v31 = vsel %vm339_vm0, %v3597_v41, %v3599_v33  ;;  %18325 = vst [vmem:[#allocation21_spill] sm:$0xff] %v14413_v35  ;;  %v18329_v35 = vrot.slane %v14064_v14, 1  ;;  %v5541_v14 = vld [vmem:[%s17933_s1 + $0x80] sm:$0xff] }
 0x2ed   : > { %4454 = vmatmul.f32.gmra.mxu3 %v4339_v63  ;;  %v3868_v28 = vmul.f32 %v18327_v61, %v3600_v31  ;;  %v5536_v61 = vld [vmem:[%s17933_s1 + $0x58] sm:$0xff] }
 0x2ee   : > { %5609 = vperm.xlu2 %11277, %v5535_v59   ;;  %v18328_v31 = vld [vmem:[#allocation26_spill] sm:$0xff] }
 0x2ef   : > { %5604 = vperm.xlu1 %11276, %v5534_v58   ;;  %5599 = vperm.xlu0 %11275, %v5533_v37   ;;  %v3957_v38 = vpop.f32.mrf.mxu2  ;;  %v14424_v58 = vld [vmem:[%s11542_s12 + $0xc0] sm:$0xff]  ;;  %v4340_v37 = vmul.f32 %v14148_v39, %v13952_v6  ;;  %v3434_v6 = vadd.f32 %v14305_v20, %v18328_v31  ;;  %v18331_v20 = vld [vmem:[#allocation46_spill] sm:$0xff]  ;;  %v14454_v31 = vld [vmem:[%s11542_s12 + $0xc8] sm:$0xff] }
 0x2f0   : > { %v2538_v21 = vpop.f32.mrf.mxu3  ;;  %v14409_v49 = vadd.f32 %v3957_v38, %v3433_v17  ;;  %v14411_v18 = vpop.permute.xlu2 %4829  ;;  %v3601_v41 = vrot.slane %v14424_v58, 7  ;;  %v4653_v17 = vrot.slane %v14101_v46, 1 }
 0x2f1   : > { %v14416_v1 = vadd.f32 %v2538_v21, %v13986_v13  ;;  %v14418_v63 = vpop.permute.xlu1 %4327  ;;  %v5537_v13 = vld [vmem:[%s17933_s1 + $0x60] sm:$0xff] }
 0x2f2   : > { %v14421_v59 = vpop.permute.xlu0 %4322  ;;  %v3602_v39 = vsel %vm339_vm0, %v3599_v33, %v3601_v41  ;;  %v4654_v46 = vsel %vm1432_vm1, %v18329_v35, %v4653_v17  ;;  %v3603_v33 = vrot.slane %v14454_v31, 7  ;;  %v5539_v35 = vld [vmem:[%s17933_s1 + $0x70] sm:$0xff] }
 0x2f3   : > { %18326 = vst [vmem:[#allocation55_spill] sm:$0xff] %v14416_v1 }
 0x2f4   : > { %4007 = vmatmul.f32.gmra.mxu2 %v3868_v28 }
 0x2f5   : > { %4457 = vmatmul.f32.gmra.mxu3 %v4340_v37 }
 0x2f6   : > { %5624 = vperm.xlu2 %11277, %v5538_v16   ;;  %v3869_v16 = vmul.f32 %v18331_v20, %v3602_v39  ;;  %v18333_v39 = vld [vmem:[#allocation11_spill] sm:$0xff] }
 0x2f7   : > { %5619 = vperm.xlu1 %11276, %v5537_v13   ;;  %5614 = vperm.xlu0 %11275, %v5536_v61   ;;  %v3960_v38 = vpop.f32.mrf.mxu2  ;;  %v4341_v61 = vmul.f32 %v14025_v30, %v13993_v56  ;;  %v3435_v56 = vadd.f32 %v14357_v51, %v18333_v39  ;;  %v3604_v30 = vsel %vm339_vm0, %v3601_v41, %v3603_v33 }
 0x2f8   : > { %v2541_v21 = vpop.f32.mrf.mxu3  ;;  %v14442_v1 = vadd.f32 %v3960_v38, %v3434_v6  ;;  %v14444_v28 = vpop.permute.xlu2 %4844 }
 0x2f9   : > { %v14450_v37 = vadd.f32 %v2541_v21, %v14022_v32  ;;  %v4795_v47 = vpop.permute.xlu1 %4794  ;;  %v14459_v6 = vpop.f32.mrf.mxu0  ;;  %v5540_v32 = vld [vmem:[%s17933_s1 + $0x78] sm:$0xff] }
 0x2fa   : > { %v4790_v13 = vpop.permute.xlu0 %4789  ;;  %18332 = vst [vmem:[#allocation56_spill] sm:$0xff] %v14459_v6 }
 0x2fb   : > { %18330 = vst [vmem:[#allocation22_spill] sm:$0xff] %v14450_v37  ;;  %v4943_v38 = vmul.f32 %v4790_v13, %v4654_v46  ;;  %v18334_v46 = vrot.slane %v14141_v62, 1  ;;  %v5544_v62 = vld [vmem:[%s17933_s1 + $0x98] sm:$0xff] }
 0x2fc   : > { %4010 = vmatmul.f32.gmra.mxu2 %v3869_v16 }
 0x2fd   : > { %4460 = vmatmul.f32.gmra.mxu3 %v4341_v61  ;;  %5042 = vmatmul.f32.gmra.mxu0 %v4943_v38  ;;  %v4656_v20 = vsel %vm1432_vm1, %v4653_v17, %v18334_v46  ;;  %v3870_v38 = vmul.f32 %v13924_v23, %v3604_v30  ;;  %v5543_v17 = vld [vmem:[%s17933_s1 + $0x90] sm:$0xff] }
 0x2fe   : > { %5639 = vperm.xlu2 %11277, %v5541_v14   ;;  %v4342_v14 = vmul.f32 %v14195_v43, %v14035_v22  ;;  %v14498_v23 = vld [vmem:[%s11542_s12 + $0xd0] sm:$0xff]  ;;  %v18337_v43 = vld [vmem:[#allocation59_spill] sm:$0xff] }
 0x2ff   : > { %5634 = vperm.xlu1 %11276, %v5540_v32   ;;  %5629 = vperm.xlu0 %11275, %v5539_v35   ;;  %v3963_v21 = vpop.f32.mrf.mxu2  ;;  %v4944_v32 = vmul.f32 %v4795_v47, %v4656_v20  ;;  %v3605_v35 = vrot.slane %v14498_v23, 7  ;;  %v3436_v47 = vadd.f32 %v14404_v53, %v18337_v43  ;;  %v4595_v20 = vld [vmem:[%s11542_s12 + $0x38] sm:$0xff]  ;;  %v5545_v43 = vld [vmem:[%s17933_s1 + $0xa0] sm:$0xff] }
 0x300   : > { %v2544_v16 = vpop.f32.mrf.mxu3  ;;  %v14476_v13 = vadd.f32 %v3963_v21, %v3435_v56  ;;  %v14478_v37 = vpop.permute.xlu2 %4859 }
 0x301   : > { %v14481_v61 = vadd.f32 %v2544_v16, %v14057_v12  ;;  %v14483_v51 = vpop.permute.xlu1 %4809  ;;  %v5542_v12 = vld [vmem:[%s17933_s1 + $0x88] sm:$0xff]  ;;  %v14501_v22 = vpop.f32.mrf.mxu0  ;;  %v3606_v39 = vsel %vm339_vm0, %v3603_v33, %v3605_v35 }
 0x302   : > { %v4805_v41 = vpop.permute.xlu0 %4804  ;;  %18336 = vst [vmem:[#allocation76_spill] sm:$0xff] %v14501_v22  ;;  %v18346_v22 = vld [vmem:[#allocation14_spill] sm:$0xff] }
 0x303   : > { %18335 = vst [vmem:[#allocation75_spill] sm:$0xff] %v14481_v61 }
 0x304   : > { %4013 = vmatmul.f32.gmra.mxu2 %v3870_v38 }
 0x305   : > { %4463 = vmatmul.f32.gmra.mxu3 %v4342_v14  ;;  %5045 = vmatmul.f32.gmra.mxu0 %v4944_v32  ;;  %v3871_v14 = vmul.f32 %v13918_v15, %v3606_v39  ;;  %v14520_v32 = vld [vmem:[%s11542_s12 + $0xd8] sm:$0xff]  ;;  %v5546_v15 = vld [vmem:[%s17933_s1 + $0xa8] sm:$0xff] }
 0x306   : > { %5654 = vperm.xlu2 %11277, %v5544_v62   ;;  %v3607_v33 = vrot.slane %v14520_v32, 7  ;;  %v4343_v62 = vmul.f32 %v14192_v44, %v14061_v29 }
 0x307   : > { %5649 = vperm.xlu1 %11276, %v5543_v17   ;;  %5644 = vperm.xlu0 %11275, %v5542_v12   ;;  %v3966_v56 = vpop.f32.mrf.mxu2  ;;  %v4945_v17 = vmul.f32 %v14340_v34, %v14202_v25  ;;  %v4659_v12 = vrot.slane %v4595_v20, 1  ;;  %v18340_v25 = vrot.slane %v14177_v9, 1  ;;  %v18341_v20 = vld [vmem:[#allocation67_spill] sm:$0xff]  ;;  %v18342_v9 = vld [vmem:[#allocation77_spill] sm:$0xff] }
 0x308   : > { %v2547_v30 = vpop.f32.mrf.mxu3  ;;  %v14506_v21 = vadd.f32 %v3966_v56, %v3436_v47  ;;  %v14508_v46 = vpop.permute.xlu2 %4874  ;;  %v3608_v29 = vsel %vm339_vm0, %v3605_v35, %v3607_v33  ;;  %v14553_v35 = vld [vmem:[%s11542_s12 + $0xe0] sm:$0xff] }
 0x309   : > { %v14512_v16 = vadd.f32 %v2547_v30, %v14094_v60  ;;  %v14514_v38 = vpop.permute.xlu1 %4824  ;;  %v5547_v60 = vld [vmem:[%s17933_s1 + $0xb0] sm:$0xff]  ;;  %v14537_v44 = vpop.f32.mrf.mxu0  ;;  %v4660_v34 = vsel %vm1432_vm1, %v18340_v25, %v4659_v12  ;;  %v5548_v25 = vld [vmem:[%s17933_s1 + $0xb8] sm:$0xff] }
 0x30a   : > { %v14517_v53 = vpop.permute.xlu0 %4819  ;;  %18339 = vst [vmem:[#allocation60_spill] sm:$0xff] %v14537_v44 }
 0x30b   : > { %18338 = vst [vmem:[#allocation23_spill] sm:$0xff] %v14512_v16  ;;  %v4597_v16 = vld [vmem:[%s11542_s12 + $0x48] sm:$0xff] }
 0x30c   : > { %4016 = vmatmul.f32.gmra.mxu2 %v3871_v14  ;;  %v3872_v14 = vmul.f32 %v18341_v20, %v3608_v29  ;;  %v5549_v29 = vld [vmem:[%s17933_s1 + $0xc0] sm:$0xff] }
 0x30d   : > { %4466 = vmatmul.f32.gmra.mxu3 %v4343_v62  ;;  %5048 = vmatmul.f32.gmra.mxu0 %v4945_v17  ;;  %v3609_v17 = vrot.slane %v14553_v35, 7 }
 0x30e   : > { %5669 = vperm.xlu2 %11277, %v5547_v60   ;;  %v4344_v60 = vmul.f32 %v18342_v9, %v14098_v24 }
 0x30f   : > { %5664 = vperm.xlu1 %11276, %v5546_v15   ;;  %5659 = vperm.xlu0 %11275, %v5545_v43   ;;  %v4596_v15 = vld [vmem:[%s11542_s12 + $0x40] sm:$0xff]  ;;  %v4946_v43 = vmul.f32 %v4805_v41, %v4660_v34  ;;  %v3610_v24 = vsel %vm339_vm0, %v3607_v33, %v3609_v17  ;;  %v14570_v41 = vld [vmem:[%s11542_s12 + $0x88] sm:$0xff] }
 0x310   : > { %v2550_v47 = vpop.f32.mrf.mxu3  ;;  %v14542_v39 = vpop.permute.xlu2 %4889 }
 0x311   : > { %v14545_v56 = vadd.f32 %v2550_v47, %v14137_v27  ;;  %v14547_v30 = vpop.permute.xlu1 %4839  ;;  %v5550_v27 = vld [vmem:[%s17933_s1 + $0xc8] sm:$0xff]  ;;  %v4661_v47 = vrot.slane %v4596_v15, 1 }
 0x312   : > { %v14550_v62 = vpop.permute.xlu0 %4834 }
 0x313   : > { %v4662_v34 = vsel %vm1432_vm1, %v4659_v12, %v4661_v47 }
 0x314   : > { %4019 = vmatmul.f32.gmra.mxu2 %v3872_v14  ;;  %v14575_v14 = vpop.f32.mrf.mxu0  ;;  %v4947_v12 = vmul.f32 %v14483_v51, %v4662_v34 }
 0x315   : > { %4469 = vmatmul.f32.gmra.mxu3 %v4344_v60  ;;  %5051 = vmatmul.f32.gmra.mxu0 %v4946_v43  ;;  %18343 = vst [vmem:[#allocation24_spill] sm:$0xff] %v14575_v14  ;;  %v18344_v43 = vld [vmem:[#allocation33_spill] sm:$0xff] }
 0x316   : > { %5684 = vperm.xlu2 %11277, %v5550_v27   ;;  %v3873_v27 = vmul.f32 %v18344_v43, %v3610_v24  ;;  %v5551_v24 = vld [vmem:[%s17933_s1 + $0xd0] sm:$0xff]  ;;  %v11308_v43 = vld [vmem:[%s11542_s12 + $0xe8] sm:$0xff] }
 0x317   : > { %5679 = vperm.xlu1 %11276, %v5549_v29   ;;  %5674 = vperm.xlu0 %11275, %v5548_v25   ;;  %v4345_v29 = vmul.f32 %v14236_v2, %v14570_v41  ;;  %v5553_v25 = vld [vmem:[%s17933_s1 + $0xe0] sm:$0xff]  ;;  %v3611_v2 = vrot.slane %v11308_v43, 7 }
 0x318   : > { %v2553_v20 = vpop.f32.mrf.mxu3  ;;  %v14573_v9 = vpop.permute.xlu2 %4904 }
 0x319   : > { %v14579_v60 = vadd.f32 %v2553_v20, %v14179_v3  ;;  %v14581_v15 = vpop.permute.xlu1 %4854  ;;  %v5552_v3 = vld [vmem:[%s17933_s1 + $0xd8] sm:$0xff]  ;;  %v4663_v20 = vrot.slane %v4597_v16, 1  ;;  %v3612_v51 = vsel %vm339_vm0, %v3609_v17, %v3611_v2  ;;  %v4598_v16 = vld [vmem:[%s11542_s12 + $0x50] sm:$0xff] }
 0x31a   : > { %v14584_v33 = vpop.permute.xlu0 %4849  ;;  %v3874_v43 = vmul.f32 %v18346_v22, %v3612_v51  ;;  %v4665_v22 = vrot.slane %v4598_v16, 1  ;;  %v5554_v51 = vld [vmem:[%s17933_s1 + $0xe8] sm:$0xff] }
 0x31b   : > { %v4664_v34 = vsel %vm1432_vm1, %v4661_v47, %v4663_v20 }
 0x31c   : > { %4022 = vmatmul.f32.gmra.mxu2 %v3873_v27 }
 0x31d   : > { %4472 = vmatmul.f32.gmra.mxu3 %v4345_v29  ;;  %5054 = vmatmul.f32.gmra.mxu0 %v4947_v12  ;;  %v14613_v12 = vld [vmem:[%s11542_s12 + $0xf0] sm:$0xff] }
 0x31e   : > { %5699 = vperm.xlu2 %11277, %v5553_v25   ;;  %v3613_v17 = vrot.slane %v14613_v12, 7  ;;  %v18347_v25 = vld [vmem:[#allocation52_spill] sm:$0xff] }
 0x31f   : > { %5694 = vperm.xlu1 %11276, %v5552_v3   ;;  %5689 = vperm.xlu0 %11275, %v5551_v24   ;;  %v4346_v47 = vmul.f32 %v14233_v36, %v18347_v25  ;;  %v4948_v3 = vmul.f32 %v14378_v8, %v4664_v34  ;;  %v14619_v24 = vpop.f32.mrf.mxu0  ;;  %v4666_v8 = vsel %vm1432_vm1, %v4663_v20, %v4665_v22 }
 0x320   : > { %v2556_v61 = vpop.f32.mrf.mxu3  ;;  %v14601_v14 = vpop.permute.xlu2 %4919  ;;  %18348 = vst [vmem:[#allocation27_spill] sm:$0xff] %v14619_v24  ;;  %v3614_v36 = vsel %vm339_vm0, %v3611_v2, %v3613_v17  ;;  %v18349_v24 = vld [vmem:[#allocation28_spill] sm:$0xff]  ;;  %v4949_v20 = vmul.f32 %v14517_v53, %v4666_v8 }
 0x321   : > { %v14605_v27 = vadd.f32 %v2556_v61, %v14223_v26  ;;  %v14607_v44 = vpop.permute.xlu1 %4869  ;;  %v5556_v26 = vld [vmem:[%s17933_s1 + $0xf8] sm:$0xff]  ;;  %v5555_v61 = vld [vmem:[%s17933_s1 + $0xf0] sm:$0xff]  ;;  %v3875_v6 = vmul.f32 %v18349_v24, %v3614_v36  ;;  %v10834_v24 = vld [vmem:[%s17933_s1 + $0x108] sm:$0xff] }
 0x322   : > { %v14610_v29 = vpop.permute.xlu0 %4864 }
 0x323   : > { %18345 = vst [vmem:[#allocation65_spill] sm:$0xff] %v14605_v27 }
 0x324   : > { %4025 = vmatmul.f32.gmra.mxu2 %v3874_v43 }
 0x325   : > { %4475 = vmatmul.f32.gmra.mxu3 %v4346_v47  ;;  %5057 = vmatmul.f32.gmra.mxu0 %v4948_v3  ;;  %v3615_v47 = vrot.slane %v14303_v40, 7  ;;  %v18350_v3 = vld [vmem:[#allocation47_spill] sm:$0xff] }
 0x326   : > { %5714 = vperm.xlu2 %11277, %v5556_v26   ;;  %v4347_v2 = vmul.f32 %v14240_v55, %v18350_v3  ;;  %v4599_v26 = vld [vmem:[%s11542_s12 + $0x58] sm:$0xff]  ;;  %v10833_v40 = vld [vmem:[%s17933_s1 + $0x100] sm:$0xff] }
 0x327   : > { %5709 = vperm.xlu1 %11276, %v5555_v61   ;;  %5704 = vperm.xlu0 %11275, %v5554_v51   ;;  %v14656_v61 = vpop.f32.mrf.mxu0  ;;  %v4667_v55 = vrot.slane %v4599_v26, 1  ;;  %v3616_v53 = vsel %vm339_vm0, %v3613_v17, %v3615_v47  ;;  %v14660_v51 = vld [vmem:[%s11542_s12 + $0xa0] sm:$0xff]  ;;  %v18354_v26 = vld [vmem:[#allocation66_spill] sm:$0xff] }
 0x328   : > { %v4428_v34 = vpop.f32.mrf.mxu3  ;;  %v14632_v25 = vpop.permute.xlu2 %4934  ;;  %18351 = vst [vmem:[#allocation70_spill] sm:$0xff] %v14656_v61  ;;  %v4348_v17 = vmul.f32 %v14271_v42, %v14660_v51 }
 0x329   : > { %v14635_v16 = vadd.f32 %v4428_v34, %v14261_v19  ;;  %v14637_v43 = vpop.permute.xlu1 %4884  ;;  %v10835_v19 = vld [vmem:[%s17933_s1 + $0x110] sm:$0xff]  ;;  %v4668_v36 = vsel %vm1432_vm1, %v4665_v22, %v4667_v55  ;;  %v4600_v34 = vld [vmem:[%s11542_s12 + $0x60] sm:$0xff] }
 0x32a   : > { %v14640_v27 = vpop.permute.xlu0 %4879  ;;  %v4950_v22 = vmul.f32 %v14514_v38, %v4668_v36 }
 0x32c   : > { %4028 = vmatmul.f32.gmra.mxu2 %v3875_v6 }
 0x32d   : > { %4478 = vmatmul.f32.gmra.mxu3 %v4347_v2  ;;  %5060 = vmatmul.f32.gmra.mxu0 %v4949_v20  ;;  %v14672_v2 = vld [vmem:[%s11542_s12] sm:$0xff]  ;;  %v3876_v20 = vmul.f32 %v18354_v26, %v3616_v53  ;;  %v10836_v53 = vld [vmem:[%s17933_s1 + $0x118] sm:$0xff] }
 0x32e   : > { %6050 = vperm.xlu2 %11277, %v10835_v19  }
 0x32f   : > { %6045 = vperm.xlu1 %11276, %v10834_v24   ;;  %6040 = vperm.xlu0 %11275, %v10833_v40   ;;  %v10838_v24 = vld [vmem:[%s17933_s1 + $0x128] sm:$0xff]  ;;  %v4669_v40 = vrot.slane %v4600_v34, 1  ;;  %v14691_v38 = vpop.f32.mrf.mxu0 }
 0x330   : > { %v4431_v6 = vpop.f32.mrf.mxu3  ;;  %v14663_v8 = vpop.permute.xlu2 %5564  ;;  %18355 = vst [vmem:[#allocation74_spill] sm:$0xff] %v14691_v38 }
 0x331   : > { %18352 = vst [vmem:[#allocation79_spill] sm:$0xff] %v14663_v8  ;;  %v14667_v3 = vadd.f32 %v4431_v6, %v14300_v57  ;;  %v14669_v61 = vpop.permute.xlu1 %4899  ;;  %v10837_v57 = vld [vmem:[%s17933_s1 + $0x120] sm:$0xff]  ;;  %v3649_v6 = vrot.slane %v14672_v2, 7  ;;  %v4670_v36 = vsel %vm1432_vm1, %v4667_v55, %v4669_v40 }
 0x332   : > { %v14675_v19 = vpop.permute.xlu0 %4894  ;;  %v10841_v55 = vld [vmem:[%s17933_s1 + $0x140] sm:$0xff] }
 0x333   : > { %18353 = vst [vmem:[#allocation29_spill] sm:$0xff] %v14667_v3  ;;  %v3653_v42 = vsel %vm339_vm0, %v3615_v47, %v3649_v6  ;;  %v4349_v47 = vmul.f32 %v14317_v45, %v14268_v50  ;;  %v18357_v45 = vld [vmem:[#allocation42_spill] sm:$0xff] }
 0x334   : > { %4031 = vmatmul.f32.gmra.mxu2 %v3876_v20  ;;  %v4601_v20 = vld [vmem:[%s11542_s12 + $0x68] sm:$0xff]  ;;  %v18358_v50 = vrot.slane %v18357_v45, 7  ;;  %v10844_v45 = vld [vmem:[%s17933_s1 + $0x158] sm:$0xff] }
 0x335   : > { %4481 = vmatmul.f32.gmra.mxu3 %v4348_v17  ;;  %5063 = vmatmul.f32.gmra.mxu0 %v4950_v22  ;;  %v18356_v17 = vld [vmem:[#allocation49_spill] sm:$0xff] }
 0x336   : > { %6065 = vperm.xlu2 %11277, %v10838_v24   ;;  %v3877_v22 = vmul.f32 %v18356_v17, %v3653_v42  ;;  %v10839_v42 = vld [vmem:[%s17933_s1 + $0x130] sm:$0xff] }
 0x337   : > { %6060 = vperm.xlu1 %11276, %v10837_v57   ;;  %6055 = vperm.xlu0 %11275, %v10836_v53   ;;  %v4951_v57 = vmul.f32 %v14411_v18, %v4670_v36  ;;  %v4671_v53 = vrot.slane %v4601_v20, 1  ;;  %v3650_v18 = vsel %vm339_vm0, %v3649_v6, %v18358_v50  ;;  %v14723_v20 = vpop.f32.mrf.mxu0  ;;  %v10842_v50 = vld [vmem:[%s17933_s1 + $0x148] sm:$0xff] }
 0x338   : > { %v4434_v26 = vpop.f32.mrf.mxu3  ;;  %v14694_v34 = vpop.permute.xlu2 %5579  ;;  %18359 = vst [vmem:[#allocation32_spill] sm:$0xff] %v14723_v20 }
 0x339   : > { %v14698_v8 = vadd.f32 %v4434_v26, %v14338_v0  ;;  %v14700_v3 = vpop.permute.xlu1 %4914  ;;  %v10840_v0 = vld [vmem:[%s17933_s1 + $0x138] sm:$0xff]  ;;  %v4672_v36 = vsel %vm1432_vm1, %v4669_v40, %v4671_v53 }
 0x33a   : > { %v14703_v24 = vpop.permute.xlu0 %4909  ;;  %v4952_v40 = vmul.f32 %v14550_v62, %v4672_v36 }
 0x33c   : > { %4034 = vmatmul.f32.gmra.mxu2 %v3877_v22 }
 0x33d   : > { %4484 = vmatmul.f32.gmra.mxu3 %v4349_v47  ;;  %5066 = vmatmul.f32.gmra.mxu0 %v4951_v57  ;;  %v18360_v47 = vld [vmem:[#allocation35_spill] sm:$0xff] }
 0x33e   : > { %6080 = vperm.xlu2 %11277, %v10841_v55   ;;  %v3878_v57 = vmul.f32 %v18360_v47, %v3650_v18 }
 0x33f   : > { %6075 = vperm.xlu1 %11276, %v10840_v0   ;;  %6070 = vperm.xlu0 %11275, %v10839_v42   ;;  %v18361_v0 = vld [vmem:[#allocation80_spill] sm:$0xff]  ;;  %v4602_v42 = vld [vmem:[%s11542_s12 + $0x70] sm:$0xff] }
 0x340   : > { %v4437_v26 = vpop.f32.mrf.mxu3  ;;  %v14721_v17 = vpop.permute.xlu2 %5594  ;;  %v4350_v6 = vmul.f32 %v14352_v4, %v18361_v0  ;;  %v4673_v4 = vrot.slane %v4602_v42, 1 }
 0x341   : > { %v14726_v22 = vadd.f32 %v4437_v26, %v14376_v11  ;;  %v14728_v38 = vpop.permute.xlu1 %4929  ;;  %v10843_v11 = vld [vmem:[%s17933_s1 + $0x150] sm:$0xff]  ;;  %v4603_v26 = vld [vmem:[%s11542_s12 + $0x78] sm:$0xff]  ;;  %v14759_v42 = vpop.f32.mrf.mxu0 }
 0x342   : > { %v14731_v55 = vpop.permute.xlu0 %4924  ;;  %v4674_v62 = vsel %vm1432_vm1, %v4671_v53, %v4673_v4  ;;  %18363 = vst [vmem:[#allocation36_spill] sm:$0xff] %v14759_v42  ;;  %v10847_v53 = vld [vmem:[%s17933_s1 + $0x170] sm:$0xff] }
 0x343   : > { %v18366_v42 = vld [vmem:[#allocation17_spill] sm:$0xff] }
 0x344   : > { %4037 = vmatmul.f32.gmra.mxu2 %v3878_v57  ;;  %v4353_v20 = vmul.f32 %v14454_v31, %v18366_v42 }
 0x345   : > { %4487 = vmatmul.f32.gmra.mxu3 %v4350_v6  ;;  %5069 = vmatmul.f32.gmra.mxu0 %v4952_v40  ;;  %v4351_v6 = vmul.f32 %v14401_v48, %v14313_v10  ;;  %v4953_v40 = vmul.f32 %v14547_v30, %v4674_v62  ;;  %v5796_v10 = vld [vmem:[%s17936_s4 + $0x78] sm:$0xff]  ;;  %v4604_v62 = vld [vmem:[%s11542_s12 + $0x80] sm:$0xff] }
 0x346   : > { %6095 = vperm.xlu2 %11277, %v10844_v45   ;;  %v4675_v45 = vrot.slane %v4603_v26, 1  ;;  %5797 = vmatpush.msra.mxu1 %v5796_v10 }
 0x347   : > { %6090 = vperm.xlu1 %11276, %v10843_v11   ;;  %6085 = vperm.xlu0 %11275, %v10842_v50   ;;  %v10845_v11 = vld [vmem:[%s17933_s1 + $0x160] sm:$0xff] }
 0x348   : > { %v4440_v18 = vpop.f32.mrf.mxu3  ;;  %v14747_v36 = vpop.permute.xlu2 %5609  ;;  %v4676_v48 = vsel %vm1432_vm1, %v4673_v4, %v4675_v45  ;;  %v10850_v4 = vld [vmem:[%s17933_s1 + $0x188] sm:$0xff] }
 0x349   : > { %18362 = vst [vmem:[#allocation78_spill] sm:$0xff] %v14747_v36  ;;  %v14751_v47 = vadd.f32 %v4440_v18, %v14409_v49  ;;  %v14753_v57 = vpop.permute.xlu1 %5559  ;;  %v10846_v49 = vld [vmem:[%s17933_s1 + $0x168] sm:$0xff]  ;;  %v14797_v10 = vpop.f32.mrf.mxu0 }
 0x34a   : > { %v14755_v0 = vpop.permute.xlu0 %4939 }
 0x34d   : > { %4490 = vmatmul.f32.gmra.mxu3 %v4351_v6  ;;  %5072 = vmatmul.f32.gmra.mxu0 %v4953_v40  ;;  %v4352_v40 = vmul.f32 %v14424_v58, %v14310_v7 }
 0x34e   : > { %6110 = vperm.xlu2 %11277, %v10847_v53   ;;  %v4954_v53 = vmul.f32 %v14444_v28, %v4676_v48 }
 0x34f   : > { %6105 = vperm.xlu1 %11276, %v10846_v49   ;;  %6100 = vperm.xlu0 %11275, %v10845_v11   ;;  %v10849_v49 = vld [vmem:[%s17933_s1 + $0x180] sm:$0xff]  ;;  %v4677_v11 = vrot.slane %v4604_v62, 1 }
 0x350   : > { %v4443_v30 = vpop.f32.mrf.mxu3  ;;  %v14775_v50 = vpop.permute.xlu2 %5624 }
 0x351   : > { %18364 = vst [vmem:[#allocation81_spill] sm:$0xff] %v14775_v50  ;;  %v14779_v18 = vadd.f32 %v4443_v30, %v14442_v1  ;;  %v14781_v26 = vpop.permute.xlu1 %5574  ;;  %v10848_v1 = vld [vmem:[%s17933_s1 + $0x178] sm:$0xff]  ;;  %v4678_v7 = vsel %vm1432_vm1, %v4675_v45, %v4677_v11  ;;  %v10853_v45 = vld [vmem:[%s17933_s1 + $0x1a0] sm:$0xff]  ;;  %v14822_v31 = vpop.f32.mrf.mxu0 }
 0x352   : > { %v14783_v6 = vpop.permute.xlu0 %5569  ;;  %v4612_v50 = vld [vmem:[%s11542_s12 + $0xc0] sm:$0xff] }
 0x355   : > { %4493 = vmatmul.f32.gmra.mxu3 %v4352_v40  ;;  %5075 = vmatmul.f32.gmra.mxu0 %v4954_v53  ;;  %v4955_v40 = vmul.f32 %v14584_v33, %v4678_v7  ;;  %v10852_v53 = vld [vmem:[%s17933_s1 + $0x198] sm:$0xff]  ;;  %v5795_v33 = vld [vmem:[%s17936_s4 + $0x70] sm:$0xff] }
 0x356   : > { %6125 = vperm.xlu2 %11277, %v10850_v4   ;;  %v4679_v4 = vrot.slane %v14570_v41, 1  ;;  %5798 = vmatpush.msra.mxu1 %v5795_v33  ;;  %v4606_v7 = vld [vmem:[%s11542_s12 + $0x90] sm:$0xff] }
 0x357   : > { %6120 = vperm.xlu1 %11276, %v10849_v49   ;;  %6115 = vperm.xlu0 %11275, %v10848_v1  }
 0x358   : > { %v4446_v58 = vpop.f32.mrf.mxu3  ;;  %v14800_v28 = vpop.permute.xlu2 %5639  ;;  %v4680_v42 = vsel %vm1432_vm1, %v4677_v11, %v4679_v4  ;;  %v10856_v11 = vld [vmem:[%s17933_s1 + $0x1b8] sm:$0xff] }
 0x359   : > { %18365 = vst [vmem:[#allocation82_spill] sm:$0xff] %v14800_v28  ;;  %v14803_v48 = vadd.f32 %v4446_v58, %v14476_v13  ;;  %v14805_v30 = vpop.permute.xlu1 %5589  ;;  %v10851_v13 = vld [vmem:[%s17933_s1 + $0x190] sm:$0xff] }
 0x35a   : > { %v14807_v62 = vpop.permute.xlu0 %5584 }
 0x35d   : > { %4496 = vmatmul.f32.gmra.mxu3 %v4353_v20  ;;  %5078 = vmatmul.f32.gmra.mxu0 %v4955_v40  ;;  %v4354_v40 = vmul.f32 %v14498_v23, %v14348_v54 }
 0x35e   : > { %6140 = vperm.xlu2 %11277, %v10853_v45   ;;  %v4956_v45 = vmul.f32 %v14581_v15, %v4680_v42  ;;  %v4607_v15 = vld [vmem:[%s11542_s12 + $0x98] sm:$0xff]  ;;  %v14856_v42 = vpop.f32.mrf.mxu0 }
 0x35f   : > { %6135 = vperm.xlu1 %11276, %v10852_v53   ;;  %6130 = vperm.xlu0 %11275, %v10851_v13   ;;  %v10855_v53 = vld [vmem:[%s17933_s1 + $0x1b0] sm:$0xff]  ;;  %v10854_v13 = vld [vmem:[%s17933_s1 + $0x1a8] sm:$0xff] }
 0x360   : > { %v4449_v49 = vpop.f32.mrf.mxu3  ;;  %v14828_v1 = vpop.permute.xlu2 %5654 }
 0x361   : > { %18367 = vst [vmem:[#allocation30_spill] sm:$0xff] %v14828_v1  ;;  %v14832_v20 = vadd.f32 %v4449_v49, %v14506_v21  ;;  %v14834_v41 = vpop.permute.xlu1 %5604  ;;  %v4681_v21 = vrot.slane %v4606_v7, 1  ;;  %v18373_v7 = vld [vmem:[#allocation51_spill] sm:$0xff] }
 0x362   : > { %18368 = vst [vmem:[#allocation87_spill] sm:$0xff] %v14834_v41  ;;  %v14836_v58 = vpop.permute.xlu0 %5599  ;;  %v4355_v1 = vmul.f32 %v14520_v32, %v18373_v7  ;;  %v18377_v7 = vld [vmem:[#allocation85_spill] sm:$0xff] }
 0x363   : > { %18369 = vst [vmem:[#allocation34_spill] sm:$0xff] %v14836_v58  ;;  %v4682_v54 = vsel %vm1432_vm1, %v4679_v4, %v4681_v21  ;;  %v10858_v4 = vld [vmem:[%s17933_s1 + $0x1c8] sm:$0xff] }
 0x365   : > { %4499 = vmatmul.f32.gmra.mxu3 %v4354_v40  ;;  %5081 = vmatmul.f32.gmra.mxu0 %v4956_v45  ;;  %v4957_v40 = vmul.f32 %v14478_v37, %v4682_v54  ;;  %v10859_v45 = vld [vmem:[%s17933_s1 + $0x1d0] sm:$0xff]  ;;  %v5794_v37 = vld [vmem:[%s17936_s4 + $0x68] sm:$0xff] }
 0x366   : > { %6155 = vperm.xlu2 %11277, %v10856_v11   ;;  %v4683_v11 = vrot.slane %v4607_v15, 1  ;;  %5799 = vmatpush.msra.mxu1 %v5794_v37  ;;  %v14880_v15 = vpop.f32.mrf.mxu0  ;;  %v4685_v37 = vrot.slane %v14660_v51, 1 }
 0x367   : > { %6150 = vperm.xlu1 %11276, %v10855_v53   ;;  %6145 = vperm.xlu0 %11275, %v10854_v13   ;;  %v10857_v53 = vld [vmem:[%s17933_s1 + $0x1c0] sm:$0xff] }
 0x368   : > { %v14851_v23 = vpop.permute.xlu2 %5669  ;;  %v4684_v32 = vsel %vm1432_vm1, %v4681_v21, %v4683_v11  ;;  %v10862_v21 = vld [vmem:[%s17933_s1 + $0x1e8] sm:$0xff] }
 0x369   : > { %18370 = vst [vmem:[#allocation89_spill] sm:$0xff] %v14851_v23  ;;  %v14854_v33 = vpop.permute.xlu1 %5619 }
 0x36a   : > { %18371 = vst [vmem:[#allocation12_spill] sm:$0xff] %v14854_v33  ;;  %v14858_v49 = vpop.permute.xlu0 %5614 }
 0x36b   : > { %18372 = vst [vmem:[#allocation88_spill] sm:$0xff] %v14858_v49  ;;  %v4613_v49 = vld [vmem:[%s11542_s12 + $0xc8] sm:$0xff] }
 0x36d   : > { %4502 = vmatmul.f32.gmra.mxu3 %v4355_v1  ;;  %5084 = vmatmul.f32.gmra.mxu0 %v4957_v40  ;;  %v4356_v40 = vmul.f32 %v14553_v35, %v18377_v7  ;;  %v14898_v35 = vld [vmem:[%s11542_s12 + $0xe8] sm:$0xff] }
 0x36e   : > { %6170 = vperm.xlu2 %11277, %v10859_v45   ;;  %v4958_v45 = vmul.f32 %v14610_v29, %v4684_v32  ;;  %v4686_v29 = vsel %vm1432_vm1, %v4683_v11, %v4685_v37  ;;  %v4609_v7 = vld [vmem:[%s11542_s12 + $0xa8] sm:$0xff]  ;;  %v4357_v51 = vmul.f32 %v14386_v5, %v14898_v35  ;;  %v10881_v11 = vld [vmem:[%s17933_s1 + $0x200] sm:$0xff]  ;;  %v14926_v5 = vpop.f32.mrf.mxu3 }
 0x36f   : > { %6165 = vperm.xlu1 %11276, %v10858_v4   ;;  %6160 = vperm.xlu0 %11275, %v10857_v53   ;;  %v10861_v4 = vld [vmem:[%s17933_s1 + $0x1e0] sm:$0xff]  ;;  %v10860_v53 = vld [vmem:[%s17933_s1 + $0x1d8] sm:$0xff] }
 0x370   : > { %v14876_v13 = vpop.permute.xlu2 %5684 }
 0x371   : > { %18374 = vst [vmem:[#allocation25_spill] sm:$0xff] %v14876_v13  ;;  %v14878_v54 = vpop.permute.xlu1 %5634 }
 0x372   : > { %18375 = vst [vmem:[#allocation86_spill] sm:$0xff] %v14878_v54  ;;  %v14882_v1 = vpop.permute.xlu0 %5629 }
 0x373   : > { %18376 = vst [vmem:[#allocation90_spill] sm:$0xff] %v14882_v1  ;;  %v11310_v1 = vld [vmem:[%s11542_s12 + $0xf8] sm:$0xff] }
 0x375   : > { %4505 = vmatmul.f32.gmra.mxu3 %v4356_v40  ;;  %5087 = vmatmul.f32.gmra.mxu0 %v4958_v45  ;;  %v14910_v40 = vpop.f32.mrf.mxu1  ;;  %v4959_v45 = vmul.f32 %v14607_v44, %v4686_v29  ;;  %v5793_v44 = vld [vmem:[%s17936_s4 + $0x60] sm:$0xff] }
 0x376   : > { %6185 = vperm.xlu2 %11277, %v10862_v21   ;;  %v10864_v21 = vld [vmem:[%s17933_s1 + $0x1f8] sm:$0xff]  ;;  %5800 = vmatpush.msra.mxu1 %v5793_v44  ;;  %v10882_v44 = vld [vmem:[%s17933_s1 + $0x208] sm:$0xff] }
 0x377   : > { %6180 = vperm.xlu1 %11276, %v10861_v4   ;;  %6175 = vperm.xlu0 %11275, %v10860_v53   ;;  %v4687_v4 = vrot.slane %v4609_v7, 1  ;;  %v10863_v53 = vld [vmem:[%s17933_s1 + $0x1f0] sm:$0xff] }
 0x378   : > { %v14901_v32 = vpop.permute.xlu2 %5699 }
 0x379   : > { %18378 = vst [vmem:[#allocation20_spill] sm:$0xff] %v14901_v32  ;;  %v14904_v13 = vpop.permute.xlu1 %5649  ;;  %v14924_v32 = vpop.f32.mrf.mxu2  ;;  %v4688_v29 = vsel %vm1432_vm1, %v4685_v37, %v4687_v4  ;;  %v10883_v37 = vld [vmem:[%s17933_s1 + $0x210] sm:$0xff] }
 0x37a   : > { %18379 = vst [vmem:[#allocation91_spill] sm:$0xff] %v14904_v13  ;;  %v14906_v23 = vpop.permute.xlu0 %5644  ;;  %v14908_v28 = vpop.f32.mrf.mxu0  ;;  %v4610_v13 = vld [vmem:[%s11542_s12 + $0xb0] sm:$0xff] }
 0x37b   : > { %18380 = vst [vmem:[#allocation92_spill] sm:$0xff] %v14906_v23 }
 0x37d   : > { %4508 = vmatmul.f32.gmra.mxu3 %v4357_v51  ;;  %5090 = vmatmul.f32.gmra.mxu0 %v4959_v45  ;;  %v4358_v45 = vmul.f32 %v14613_v12, %v14383_v52 }
 0x37e   : > { %6651 = vperm.xlu2 %11277, %v10881_v11   ;;  %v4960_v11 = vmul.f32 %v14508_v46, %v4688_v29  ;;  %v14960_v29 = vpop.f32.mrf.mxu3 }
 0x37f   : > { %6195 = vperm.xlu1 %11276, %v10864_v21   ;;  %6190 = vperm.xlu0 %11275, %v10863_v53   ;;  %v10884_v21 = vld [vmem:[%s17933_s1 + $0x218] sm:$0xff]  ;;  %v4689_v53 = vrot.slane %v4610_v13, 1  ;;  %18386 = vst [vmem:[#allocation67_spill] sm:$0xff] %v14960_v29 }
 0x380   : > { %v14932_v7 = vpop.permute.xlu2 %5714 }
 0x381   : > { %18381 = vst [vmem:[#allocation31_spill] sm:$0xff] %v14932_v7  ;;  %v14935_v23 = vpop.permute.xlu1 %5664  ;;  %v14953_v7 = vpop.f32.mrf.mxu1  ;;  %v4690_v46 = vsel %vm1432_vm1, %v4687_v4, %v4689_v53  ;;  %v10887_v4 = vld [vmem:[%s17933_s1 + $0x230] sm:$0xff] }
 0x382   : > { %18382 = vst [vmem:[#allocation26_spill] sm:$0xff] %v14935_v23  ;;  %v14937_v54 = vpop.permute.xlu0 %5659  ;;  %v14939_v51 = vpop.f32.mrf.mxu0 }
 0x383   : > { %18383 = vst [vmem:[#allocation46_spill] sm:$0xff] %v14937_v54  ;;  %v14955_v52 = vpop.f32.mrf.mxu2 }
 0x384   : > { %18384 = vst [vmem:[#allocation11_spill] sm:$0xff] %v14953_v7 }
 0x385   : > { %4511 = vmatmul.f32.gmra.mxu3 %v4358_v45  ;;  %5093 = vmatmul.f32.gmra.mxu0 %v4960_v11  ;;  %18385 = vst [vmem:[#allocation59_spill] sm:$0xff] %v14955_v52  ;;  %v18389_v45 = vld [vmem:[#allocation58_spill] sm:$0xff] }
 0x386   : > { %6666 = vperm.xlu2 %11277, %v10884_v21   ;;  %v4359_v11 = vmul.f32 %v11310_v1, %v18389_v45  ;;  %v4611_v21 = vld [vmem:[%s11542_s12 + $0xb8] sm:$0xff] }
 0x387   : > { %6661 = vperm.xlu1 %11276, %v10883_v37   ;;  %6656 = vperm.xlu0 %11275, %v10882_v44   ;;  %v4961_v37 = vmul.f32 %v14640_v27, %v4690_v46  ;;  %v10886_v44 = vld [vmem:[%s17933_s1 + $0x228] sm:$0xff]  ;;  %v5792_v27 = vld [vmem:[%s17936_s4 + $0x58] sm:$0xff] }
 0x388   : > { %v14958_v12 = vpop.permute.xlu2 %6050  ;;  %5801 = vmatpush.msra.mxu1 %v5792_v27  ;;  %v10889_v27 = vld [vmem:[%s17933_s1 + $0x240] sm:$0xff] }
 0x389   : > { %v14962_v13 = vpop.permute.xlu1 %5679  ;;  %v14981_v1 = vpop.f32.mrf.mxu1 }
 0x38a   : > { %18387 = vst [vmem:[#allocation77_spill] sm:$0xff] %v14962_v13  ;;  %v14964_v23 = vpop.permute.xlu0 %5674  ;;  %v14966_v54 = vpop.f32.mrf.mxu0  ;;  %v10885_v13 = vld [vmem:[%s17933_s1 + $0x220] sm:$0xff] }
 0x38b   : > { %18388 = vst [vmem:[#allocation33_spill] sm:$0xff] %v14964_v23  ;;  %v4691_v23 = vrot.slane %v4611_v21, 1  ;;  %v14990_v33 = vpop.f32.mrf.mxu2 }
 0x38c   : > { %18390 = vst [vmem:[#allocation14_spill] sm:$0xff] %v14981_v1 }
 0x38d   : > { %4514 = vmatmul.f32.gmra.mxu3 %v4359_v11  ;;  %5096 = vmatmul.f32.gmra.mxu0 %v4961_v37  ;;  %v4692_v46 = vsel %vm1432_vm1, %v4689_v53, %v4691_v23  ;;  %18391 = vst [vmem:[#allocation52_spill] sm:$0xff] %v14990_v33  ;;  %v15001_v53 = vpop.f32.mrf.mxu3 }
 0x38e   : > { %6681 = vperm.xlu2 %11277, %v10887_v4   ;;  %v4962_v4 = vmul.f32 %v14637_v43, %v4692_v46  ;;  %18394 = vst [vmem:[#allocation66_spill] sm:$0xff] %v15001_v53 }
 0x38f   : > { %6676 = vperm.xlu1 %11276, %v10886_v44   ;;  %6671 = vperm.xlu0 %11275, %v10885_v13   ;;  %v4360_v13 = vmul.f32 %v14421_v59, %v14672_v2  ;;  %v10890_v44 = vld [vmem:[%s17933_s1 + $0x248] sm:$0xff] }
 0x390   : > { %v14987_v45 = vpop.permute.xlu2 %6065  ;;  %v15013_v59 = vld [vmem:[%s11542_s12 + $0x8] sm:$0xff] }
 0x391   : > { %v14992_v11 = vpop.permute.xlu1 %5694  ;;  %v15018_v46 = vpop.f32.mrf.mxu1 }
 0x392   : > { %18392 = vst [vmem:[#allocation28_spill] sm:$0xff] %v14992_v11  ;;  %v14994_v21 = vpop.permute.xlu0 %5689  ;;  %v14996_v37 = vpop.f32.mrf.mxu0  ;;  %v4693_v11 = vrot.slane %v4612_v50, 1 }
 0x393   : > { %18393 = vst [vmem:[#allocation47_spill] sm:$0xff] %v14994_v21  ;;  %v10888_v21 = vld [vmem:[%s17933_s1 + $0x238] sm:$0xff] }
 0x394   : > { %v4694_v43 = vsel %vm1432_vm1, %v4691_v23, %v4693_v11  ;;  %18396 = vst [vmem:[#allocation42_spill] sm:$0xff] %v15018_v46  ;;  %v10893_v23 = vld [vmem:[%s17933_s1 + $0x260] sm:$0xff] }
 0x395   : > { %4517 = vmatmul.f32.gmra.mxu3 %v4360_v13  ;;  %5099 = vmatmul.f32.gmra.mxu0 %v4962_v4  ;;  %v4361_v13 = vmul.f32 %v14418_v63, %v15013_v59  ;;  %v15030_v4 = vpop.f32.mrf.mxu2  ;;  %v5791_v63 = vld [vmem:[%s17936_s4 + $0x50] sm:$0xff] }
 0x396   : > { %6696 = vperm.xlu2 %11277, %v10890_v44   ;;  %18399 = vst [vmem:[#allocation17_spill] sm:$0xff] %v15030_v4  ;;  %v10892_v44 = vld [vmem:[%s17933_s1 + $0x258] sm:$0xff]  ;;  %5802 = vmatpush.msra.mxu1 %v5791_v63 }
 0x397   : > { %6691 = vperm.xlu1 %11276, %v10889_v27   ;;  %6686 = vperm.xlu0 %11275, %v10888_v21   ;;  %v4963_v21 = vmul.f32 %v14542_v39, %v4694_v43  ;;  %v4695_v27 = vrot.slane %v4613_v49, 1 }
 0x398   : > { %v15016_v2 = vpop.permute.xlu2 %6080 }
 0x399   : > { %18395 = vst [vmem:[#allocation49_spill] sm:$0xff] %v15016_v2  ;;  %v15021_v36 = vpop.permute.xlu1 %5709  ;;  %v4696_v39 = vsel %vm1432_vm1, %v4693_v11, %v4695_v27  ;;  %v10895_v11 = vld [vmem:[%s17933_s1 + $0x270] sm:$0xff]  ;;  %v11008_v2 = vld [vmem:[%s17933_s1 + $0x578] sm:$0xff] }
 0x39a   : > { %18397 = vst [vmem:[#allocation35_spill] sm:$0xff] %v15021_v36  ;;  %v15023_v50 = vpop.permute.xlu0 %5704  ;;  %v15025_v41 = vpop.f32.mrf.mxu0  ;;  %v10891_v36 = vld [vmem:[%s17933_s1 + $0x250] sm:$0xff] }
 0x39b   : > { %18398 = vst [vmem:[#allocation80_spill] sm:$0xff] %v15023_v50  ;;  %v15041_v50 = vpop.f32.mrf.mxu3 }
 0x39c   : > { %18400 = vst [vmem:[#allocation51_spill] sm:$0xff] %v15041_v50  ;;  %v4615_v50 = vld [vmem:[%s11542_s12 + $0xd8] sm:$0xff] }
 0x39d   : > { %4520 = vmatmul.f32.gmra.mxu3 %v4361_v13  ;;  %5102 = vmatmul.f32.gmra.mxu0 %v4963_v21  ;;  %v15055_v13 = vpop.f32.mrf.mxu1  ;;  %v4614_v21 = vld [vmem:[%s11542_s12 + $0xd0] sm:$0xff]  ;;  %v15068_v63 = vpop.f32.mrf.mxu2 }
 0x39e   : > { %6711 = vperm.xlu2 %11277, %v10893_v23   ;;  %18402 = vst [vmem:[#allocation58_spill] sm:$0xff] %v15055_v13  ;;  %v10896_v23 = vld [vmem:[%s17933_s1 + $0x278] sm:$0xff] }
 0x39f   : > { %6706 = vperm.xlu1 %11276, %v10892_v44   ;;  %6701 = vperm.xlu0 %11275, %v10891_v36   ;;  %v4964_v36 = vmul.f32 %v14675_v19, %v4696_v39  ;;  %v10894_v44 = vld [vmem:[%s17933_s1 + $0x268] sm:$0xff]  ;;  %18403 = vst [vmem:[#allocation93_spill] sm:$0xff] %v15068_v63 }
 0x3a0   : > { %v15047_v43 = vpop.permute.xlu2 %6095 }
 0x3a1   : > { %18401 = vst [vmem:[#allocation85_spill] sm:$0xff] %v15047_v43  ;;  %v15049_v49 = vpop.permute.xlu1 %6045  ;;  %v4697_v43 = vrot.slane %v4614_v21, 1  ;;  %v10899_v21 = vld [vmem:[%s17933_s1 + $0x290] sm:$0xff] }
 0x3a2   : > { %v15051_v4 = vpop.permute.xlu0 %6040  ;;  %v15053_v46 = vpop.f32.mrf.mxu0 }
 0x3a3   : > { %v15070_v13 = vpop.f32.mrf.mxu3  ;;  %v4698_v19 = vsel %vm1432_vm1, %v4695_v27, %v4697_v43  ;;  %v10898_v27 = vld [vmem:[%s17933_s1 + $0x288] sm:$0xff] }
 0x3a4   : > { %18404 = vst [vmem:[#allocation94_spill] sm:$0xff] %v15070_v13 }
 0x3a5   : > { %5105 = vmatmul.f32.gmra.mxu0 %v4964_v36  ;;  %v4965_v36 = vmul.f32 %v14669_v61, %v4698_v19  ;;  %v5790_v61 = vld [vmem:[%s17936_s4 + $0x48] sm:$0xff] }
 0x3a6   : > { %6726 = vperm.xlu2 %11277, %v10896_v23   ;;  %v4699_v23 = vrot.slane %v4615_v50, 1  ;;  %5803 = vmatpush.msra.mxu1 %v5790_v61  ;;  %v4616_v50 = vld [vmem:[%s11542_s12 + $0xe0] sm:$0xff] }
 0x3a7   : > { %6721 = vperm.xlu1 %11276, %v10895_v11   ;;  %6716 = vperm.xlu0 %11275, %v10894_v44   ;;  %v10897_v11 = vld [vmem:[%s17933_s1 + $0x280] sm:$0xff]  ;;  %v15092_v44 = vpop.f32.mrf.mxu1  ;;  %v4701_v61 = vrot.slane %v4616_v50, 1 }
 0x3a8   : > { %v15073_v39 = vpop.permute.xlu2 %6110  ;;  %18406 = vst [vmem:[#allocation96_spill] sm:$0xff] %v15092_v44  ;;  %v4700_v19 = vsel %vm1432_vm1, %v4697_v43, %v4699_v23  ;;  %v10901_v43 = vld [vmem:[%s17933_s1 + $0x2a0] sm:$0xff] }
 0x3a9   : > { %18405 = vst [vmem:[#allocation95_spill] sm:$0xff] %v15073_v39  ;;  %v15076_v53 = vpop.permute.xlu1 %6060  ;;  %v15094_v39 = vpop.f32.mrf.mxu2 }
 0x3aa   : > { %v15078_v33 = vpop.permute.xlu0 %6055  ;;  %v15080_v1 = vpop.f32.mrf.mxu0  ;;  %18407 = vst [vmem:[#allocation97_spill] sm:$0xff] %v15094_v39 }
 0x3ab   : > { %v15103_v63 = vpop.f32.mrf.mxu3 }
 0x3ac   : > { %18409 = vst [vmem:[#allocation99_spill] sm:$0xff] %v15103_v63 }
 0x3ad   : > { %5108 = vmatmul.f32.gmra.mxu0 %v4965_v36 }
 0x3ae   : > { %6741 = vperm.xlu2 %11277, %v10899_v21  }
 0x3af   : > { %6736 = vperm.xlu1 %11276, %v10898_v27   ;;  %6731 = vperm.xlu0 %11275, %v10897_v11   ;;  %v4966_v27 = vmul.f32 %v14573_v9, %v4700_v19  ;;  %v10902_v11 = vld [vmem:[%s17933_s1 + $0x2a8] sm:$0xff]  ;;  %v15121_v63 = vpop.f32.mrf.mxu1  ;;  %v4702_v9 = vsel %vm1432_vm1, %v4699_v23, %v4701_v61  ;;  %v10904_v23 = vld [vmem:[%s17933_s1 + $0x2b8] sm:$0xff] }
 0x3b0   : > { %v15100_v13 = vpop.permute.xlu2 %6125  ;;  %18410 = vst [vmem:[#allocation100_spill] sm:$0xff] %v15121_v63  ;;  %v4618_v63 = vld [vmem:[%s11542_s12 + $0xf0] sm:$0xff] }
 0x3b1   : > { %18408 = vst [vmem:[#allocation98_spill] sm:$0xff] %v15100_v13  ;;  %v15105_v58 = vpop.permute.xlu1 %6075  ;;  %v10900_v13 = vld [vmem:[%s17933_s1 + $0x298] sm:$0xff]  ;;  %v15126_v39 = vpop.f32.mrf.mxu2 }
 0x3b2   : > { %v15107_v36 = vpop.permute.xlu0 %6070  ;;  %v15109_v21 = vpop.f32.mrf.mxu0  ;;  %18412 = vst [vmem:[#allocation102_spill] sm:$0xff] %v15126_v39 }
 0x3b5   : > { %5111 = vmatmul.f32.gmra.mxu0 %v4966_v27  ;;  %v4967_v27 = vmul.f32 %v14703_v24, %v4702_v9  ;;  %v5789_v24 = vld [vmem:[%s17936_s4 + $0x40] sm:$0xff] }
 0x3b6   : > { %6756 = vperm.xlu2 %11277, %v10902_v11   ;;  %v15135_v11 = vpop.f32.mrf.mxu3  ;;  %5804 = vmatpush.msra.mxu1 %v5789_v24  ;;  %v4705_v24 = vrot.slane %v4618_v63, 1 }
 0x3b7   : > { %6751 = vperm.xlu1 %11276, %v10901_v43   ;;  %6746 = vperm.xlu0 %11275, %v10900_v13   ;;  %18416 = vst [vmem:[#allocation106_spill] sm:$0xff] %v15135_v11  ;;  %v10905_v13 = vld [vmem:[%s17933_s1 + $0x2c0] sm:$0xff]  ;;  %v10903_v43 = vld [vmem:[%s17933_s1 + $0x2b0] sm:$0xff]  ;;  %v15153_v39 = vpop.f32.mrf.mxu1 }
 0x3b8   : > { %v15124_v19 = vpop.permute.xlu2 %6140  ;;  %18418 = vst [vmem:[#allocation108_spill] sm:$0xff] %v15153_v39 }
 0x3b9   : > { %18411 = vst [vmem:[#allocation101_spill] sm:$0xff] %v15124_v19  ;;  %v15128_v44 = vpop.permute.xlu1 %6090  ;;  %v4703_v19 = vrot.slane %v14898_v35, 1 }
 0x3ba   : > { %18413 = vst [vmem:[#allocation103_spill] sm:$0xff] %v15128_v44  ;;  %v15130_v29 = vpop.permute.xlu0 %6085  ;;  %v15132_v50 = vpop.f32.mrf.mxu0 }
 0x3bb   : > { %18414 = vst [vmem:[#allocation104_spill] sm:$0xff] %v15130_v29  ;;  %v4704_v9 = vsel %vm1432_vm1, %v4701_v61, %v4703_v19  ;;  %v10908_v61 = vld [vmem:[%s17933_s1 + $0x2d8] sm:$0xff] }
 0x3bc   : > { %18415 = vst [vmem:[#allocation105_spill] sm:$0xff] %v15132_v50 }
 0x3bd   : > { %5114 = vmatmul.f32.gmra.mxu0 %v4967_v27 }
 0x3be   : > { %6771 = vperm.xlu2 %11277, %v10905_v13   ;;  %v4968_v13 = vmul.f32 %v14700_v3, %v4704_v9  ;;  %v15174_v39 = vpop.f32.mrf.mxu3  ;;  %v4706_v3 = vsel %vm1432_vm1, %v4703_v19, %v4705_v24  ;;  %v4619_v9 = vld [vmem:[%s11542_s12 + $0xf8] sm:$0xff]  ;;  %v10910_v19 = vld [vmem:[%s17933_s1 + $0x2e8] sm:$0xff] }
 0x3bf   : > { %6766 = vperm.xlu1 %11276, %v10904_v23   ;;  %6761 = vperm.xlu0 %11275, %v10903_v43   ;;  %v15163_v23 = vpop.f32.mrf.mxu2  ;;  %v10907_v43 = vld [vmem:[%s17933_s1 + $0x2d0] sm:$0xff]  ;;  %18423 = vst [vmem:[#allocation113_spill] sm:$0xff] %v15174_v39  ;;  %v4969_v29 = vmul.f32 %v14601_v14, %v4706_v3  ;;  %v5788_v3 = vld [vmem:[%s17936_s4 + $0x38] sm:$0xff] }
 0x3c0   : > { %v15151_v11 = vpop.permute.xlu2 %6155  ;;  %18422 = vst [vmem:[#allocation112_spill] sm:$0xff] %v15163_v23  ;;  %5805 = vmatpush.msra.mxu1 %v5788_v3 }
 0x3c1   : > { %18417 = vst [vmem:[#allocation107_spill] sm:$0xff] %v15151_v11  ;;  %v15156_v44 = vpop.permute.xlu1 %6105  ;;  %v10906_v11 = vld [vmem:[%s17933_s1 + $0x2c8] sm:$0xff] }
 0x3c2   : > { %18419 = vst [vmem:[#allocation109_spill] sm:$0xff] %v15156_v44  ;;  %v15158_v27 = vpop.permute.xlu0 %6100  ;;  %v15160_v35 = vpop.f32.mrf.mxu0 }
 0x3c3   : > { %18420 = vst [vmem:[#allocation110_spill] sm:$0xff] %v15158_v27 }
 0x3c4   : > { %18421 = vst [vmem:[#allocation111_spill] sm:$0xff] %v15160_v35  ;;  %v15186_v35 = vpop.f32.mrf.mxu1 }
 0x3c5   : > { %5117 = vmatmul.f32.gmra.mxu0 %v4968_v13  ;;  %18428 = vst [vmem:[#allocation118_spill] sm:$0xff] %v15186_v35  ;;  %v10911_v13 = vld [vmem:[%s17933_s1 + $0x2f0] sm:$0xff] }
 0x3c6   : > { %6786 = vperm.xlu2 %11277, %v10908_v61   ;;  %v10909_v61 = vld [vmem:[%s17933_s1 + $0x2e0] sm:$0xff]  ;;  %v15200_v14 = vpop.f32.mrf.mxu3 }
 0x3c7   : > { %6781 = vperm.xlu1 %11276, %v10907_v43   ;;  %6776 = vperm.xlu0 %11275, %v10906_v11   ;;  %v4707_v11 = vrot.slane %v4619_v9, 1  ;;  %v15198_v43 = vpop.f32.mrf.mxu2  ;;  %18430 = vst [vmem:[#allocation120_spill] sm:$0xff] %v15200_v14 }
 0x3c8   : > { %v15178_v23 = vpop.permute.xlu2 %6170  ;;  %18429 = vst [vmem:[#allocation119_spill] sm:$0xff] %v15198_v43  ;;  %v4588_v43 = vld [vmem:[%s11542_s12] sm:$0xff]  ;;  %s11356_s12 = sshra.s32 %s10399_s7, 4  ;;  %s11357_s12 = int_to_ptr.hbm [resolvable:$true] %s11356_s12 }
 0x3c9   : > { %18424 = vst [vmem:[#allocation114_spill] sm:$0xff] %v15178_v23  ;;  %v15180_v44 = vpop.permute.xlu1 %6120  ;;  %v4708_v23 = vsel %vm1432_vm1, %v4705_v24, %v4707_v11  ;;  %v10929_v24 = vld [vmem:[%s17933_s1 + $0x300] sm:$0xff]  ;;  %s11358_s8 = scalar_lea.hbm %s11357_s12, 256  ;;  %p11363_p0 = scmp.lt.s32.totalorder %s11357_s12, %s17938_s6 }
 0x3ca   : > { %18425 = vst [vmem:[#allocation115_spill] sm:$0xff] %v15180_v44  ;;  %v15182_v27 = vpop.permute.xlu0 %6115  ;;  %v15184_v63 = vpop.f32.mrf.mxu0  ;;  %p11359_p6 = scmp.ne.s32.totalorder %s11357_s12, %s11358_s8  ;;  %p11364_p1 = scmp.lt.s32.totalorder %s11362_s11, %s11358_s8 }
 0x3cb   : > { %18426 = vst [vmem:[#allocation116_spill] sm:$0xff] %v15182_v27 }
 0x3cc   : > { %18427 = vst [vmem:[#allocation117_spill] sm:$0xff] %v15184_v63  ;;  %v15225_v3 = vpop.f32.mrf.mxu1  ;;  %p11360_p9 = pnand %p11359_p6, %p11500_p11  ;;  %p11365_p3 = por %p11364_p1, %p11363_p0 }
 0x3cd   : > { %5120 = vmatmul.f32.gmra.mxu0 %v4969_v29  ;;  %v4970_v29 = vmul.f32 %v14731_v55, %v4708_v23  ;;  %18435 = vst [vmem:[#allocation125_spill] sm:$0xff] %v15225_v3 }
 0x3ce   : > { %6801 = vperm.xlu2 %11277, %v10911_v13   ;;  %p11361_p13 = pneg %p11360_p9 }
 0x3cf   : > { %6796 = vperm.xlu1 %11276, %v10910_v19   ;;  %6791 = vperm.xlu0 %11275, %v10909_v61   ;;  %v10930_v19 = vld [vmem:[%s17933_s1 + $0x308] sm:$0xff]  ;;  %v10912_v61 = vld [vmem:[%s17933_s1 + $0x2f8] sm:$0xff]  ;;  %v15227_v55 = vpop.f32.mrf.mxu2 }
 0x3d0   : > { %v15214_v13 = vpop.permute.xlu2 %6185  ;;  %18436 = vst [vmem:[#allocation126_spill] sm:$0xff] %v15227_v55  ;;  %p11366_p4 = pnand %p11365_p3, %p11361_p13 }
 0x3d1   : > { %v15206_v9 = vpop.permute.xlu1 %6135  ;;  %18434 = vst [vmem:[#allocation124_spill] sm:$0xff] %v15214_v13  ;;  %v15230_v13 = vpop.f32.mrf.mxu3 }
 0x3d2   : > { %18431 = vst [vmem:[#allocation121_spill] sm:$0xff] %v15206_v9  ;;  %v15208_v44 = vpop.permute.xlu0 %6130  ;;  %v15210_v27 = vpop.f32.mrf.mxu0  ;;  %v4741_v9 = vrot.slane %v4588_v43, 1  ;;  %v10933_v43 = vld [vmem:[%s17933_s1 + $0x320] sm:$0xff] }
 0x3d3   : > { %18432 = vst [vmem:[#allocation122_spill] sm:$0xff] %v15208_v44 }
 0x3d4   : > { %18433 = vst [vmem:[#allocation123_spill] sm:$0xff] %v15210_v27  ;;  %v4748_v23 = vsel %vm1432_vm1, %v4707_v11, %v4741_v9  ;;  %v4742_v11 = vrot.slane %v15013_v59, 1 }
 0x3d5   : > { %5123 = vmatmul.f32.gmra.mxu0 %v4970_v29  ;;  %18437 = vst [vmem:[#allocation127_spill] sm:$0xff] %v15230_v13  ;;  %v4971_v39 = vmul.f32 %v14728_v38, %v4748_v23  ;;  %v10932_v29 = vld [vmem:[%s17933_s1 + $0x318] sm:$0xff]  ;;  %v15251_v38 = vpop.f32.mrf.mxu1 }
 0x3d6   : > { %7267 = vperm.xlu2 %11277, %v10930_v19   ;;  %v10931_v19 = vld [vmem:[%s17933_s1 + $0x310] sm:$0xff]  ;;  %18441 = vst [vmem:[#allocation131_spill] sm:$0xff] %v15251_v38  ;;  %v4743_v23 = vsel %vm1432_vm1, %v4741_v9, %v4742_v11 }
 0x3d7   : > { %7262 = vperm.xlu1 %11276, %v10929_v24   ;;  %6806 = vperm.xlu0 %11275, %v10912_v61   ;;  %v5787_v61 = vld [vmem:[%s17936_s4 + $0x30] sm:$0xff]  ;;  %v15257_v59 = vpop.f32.mrf.mxu2 }
 0x3d8   : > { %v15249_v24 = vpop.permute.xlu2 %6651  ;;  %5806 = vmatpush.msra.mxu1 %v5787_v61  ;;  %18442 = vst [vmem:[#allocation132_spill] sm:$0xff] %v15257_v59  ;;  %v10935_v9 = vld [vmem:[%s17933_s1 + $0x330] sm:$0xff] }
 0x3d9   : > { %v15232_v44 = vpop.permute.xlu1 %6150 }
 0x3da   : > { %18438 = vst [vmem:[#allocation128_spill] sm:$0xff] %v15232_v44  ;;  %v15234_v14 = vpop.permute.xlu0 %6145  ;;  %v15236_v35 = vpop.f32.mrf.mxu0 }
 0x3db   : > { %18439 = vst [vmem:[#allocation129_spill] sm:$0xff] %v15234_v14 }
 0x3dc   : > { %18440 = vst [vmem:[#allocation130_spill] sm:$0xff] %v15236_v35  ;;  %v10951_v35 = vld [vmem:[%s17933_s1 + $0x3b0] sm:$0xff] }
 0x3dd   : > { %5126 = vmatmul.f32.gmra.mxu0 %v4971_v39  ;;  %v4972_v39 = vmul.f32 %v14632_v25, %v4743_v23  ;;  %v18447_v25 = vld [vmem:[#allocation44_spill] sm:$0xff] }
 0x3de   : > { %7282 = vperm.xlu2 %11277, %v10933_v43   ;;  %v15266_v43 = vpop.f32.mrf.mxu3  ;;  %v18448_v23 = vrot.slane %v18447_v25, 1 }
 0x3df   : > { %7277 = vperm.xlu1 %11276, %v10932_v29   ;;  %7272 = vperm.xlu0 %11275, %v10931_v19   ;;  %18446 = vst [vmem:[#allocation136_spill] sm:$0xff] %v15266_v43  ;;  %v10936_v29 = vld [vmem:[%s17933_s1 + $0x338] sm:$0xff]  ;;  %v10934_v19 = vld [vmem:[%s17933_s1 + $0x328] sm:$0xff] }
 0x3e0   : > { %v15277_v61 = vpop.permute.xlu2 %6666 }
 0x3e1   : > { %v15259_v44 = vpop.permute.xlu1 %6165 }
 0x3e2   : > { %18443 = vst [vmem:[#allocation133_spill] sm:$0xff] %v15259_v44  ;;  %v15261_v14 = vpop.permute.xlu0 %6160  ;;  %v15263_v13 = vpop.f32.mrf.mxu0  ;;  %v4744_v44 = vsel %vm1432_vm1, %v4742_v11, %v18448_v23  ;;  %v10938_v11 = vld [vmem:[%s17933_s1 + $0x348] sm:$0xff] }
 0x3e3   : > { %18444 = vst [vmem:[#allocation134_spill] sm:$0xff] %v15261_v14  ;;  %v15282_v14 = vpop.f32.mrf.mxu1  ;;  %v4973_v55 = vmul.f32 %v14755_v0, %v4744_v44  ;;  %v5786_v0 = vld [vmem:[%s17936_s4 + $0x28] sm:$0xff] }
 0x3e4   : > { %18445 = vst [vmem:[#allocation135_spill] sm:$0xff] %v15263_v13  ;;  %5807 = vmatpush.msra.mxu1 %v5786_v0 }
 0x3e5   : > { %5129 = vmatmul.f32.gmra.mxu0 %v4972_v39  ;;  %18449 = vst [vmem:[#allocation44_spill] sm:$0xff] %v15282_v14  ;;  %v15291_v39 = vpop.f32.mrf.mxu2 }
 0x3e6   : > { %7297 = vperm.xlu2 %11277, %v10936_v29   ;;  %18453 = vst [vmem:[#allocation140_spill] sm:$0xff] %v15291_v39  ;;  %v10939_v29 = vld [vmem:[%s17933_s1 + $0x350] sm:$0xff]  ;;  %v10945_v39 = vld [vmem:[%s17933_s1 + $0x380] sm:$0xff] }
 0x3e7   : > { %7292 = vperm.xlu1 %11276, %v10935_v9   ;;  %7287 = vperm.xlu0 %11275, %v10934_v19   ;;  %v10937_v9 = vld [vmem:[%s17933_s1 + $0x340] sm:$0xff]  ;;  %v15302_v19 = vpop.f32.mrf.mxu3 }
 0x3e8   : > { %18454 = vst [vmem:[#allocation141_spill] sm:$0xff] %v15302_v19  ;;  %v15307_v44 = vpop.permute.xlu2 %6681 }
 0x3e9   : > { %v15284_v43 = vpop.permute.xlu1 %6180  ;;  %18455 = vst [vmem:[#allocation142_spill] sm:$0xff] %v15307_v44 }
 0x3ea   : > { %18450 = vst [vmem:[#allocation137_spill] sm:$0xff] %v15284_v43  ;;  %v15286_v59 = vpop.permute.xlu0 %6175  ;;  %v15288_v38 = vpop.f32.mrf.mxu0 }
 0x3eb   : > { %18451 = vst [vmem:[#allocation138_spill] sm:$0xff] %v15286_v59  ;;  %v15315_v59 = vpop.f32.mrf.mxu1 }
 0x3ec   : > { %18452 = vst [vmem:[#allocation139_spill] sm:$0xff] %v15288_v38 }
 0x3ed   : > { %5132 = vmatmul.f32.gmra.mxu0 %v4973_v55  ;;  %18459 = vst [vmem:[#allocation146_spill] sm:$0xff] %v15315_v59  ;;  %v10942_v55 = vld [vmem:[%s17933_s1 + $0x368] sm:$0xff] }
 0x3ee   : > { %7312 = vperm.xlu2 %11277, %v10939_v29   ;;  %v10941_v29 = vld [vmem:[%s17933_s1 + $0x360] sm:$0xff] }
 0x3ef   : > { %7307 = vperm.xlu1 %11276, %v10938_v11   ;;  %7302 = vperm.xlu0 %11275, %v10937_v9   ;;  %v10940_v11 = vld [vmem:[%s17933_s1 + $0x358] sm:$0xff]  ;;  %v15326_v9 = vpop.f32.mrf.mxu2  ;;  %v15328_v0 = vpop.f32.mrf.mxu3 }
 0x3f0   : > { %18460 = vst [vmem:[#allocation147_spill] sm:$0xff] %v15326_v9  ;;  %v15336_v19 = vpop.permute.xlu2 %6696  ;;  %v5785_v9 = vld [vmem:[%s17936_s4 + $0x20] sm:$0xff] }
 0x3f1   : > { %v15309_v25 = vpop.permute.xlu1 %6195  ;;  %18461 = vst [vmem:[#allocation148_spill] sm:$0xff] %v15328_v0  ;;  %5808 = vmatpush.msra.mxu1 %v5785_v9  ;;  %v10946_v9 = vld [vmem:[%s17933_s1 + $0x388] sm:$0xff] }
 0x3f2   : > { %18456 = vst [vmem:[#allocation143_spill] sm:$0xff] %v15309_v25  ;;  %v15311_v23 = vpop.permute.xlu0 %6190  ;;  %v15313_v43 = vpop.f32.mrf.mxu0 }
 0x3f3   : > { %18457 = vst [vmem:[#allocation144_spill] sm:$0xff] %v15311_v23 }
 0x3f4   : > { %18458 = vst [vmem:[#allocation145_spill] sm:$0xff] %v15313_v43 }
 0x3f5   : > { %18463 = vst [vmem:[#allocation150_spill] sm:$0xff] %v15336_v19 }
 0x3f6   : > { %7327 = vperm.xlu2 %11277, %v10942_v55   ;;  %v10944_v55 = vld [vmem:[%s17933_s1 + $0x378] sm:$0xff] }
 0x3f7   : > { %7322 = vperm.xlu1 %11276, %v10941_v29   ;;  %7317 = vperm.xlu0 %11275, %v10940_v11   ;;  %v10943_v29 = vld [vmem:[%s17933_s1 + $0x370] sm:$0xff]  ;;  %v15347_v11 = vpop.f32.mrf.mxu1  ;;  %v15349_v0 = vpop.f32.mrf.mxu2 }
 0x3f8   : > { %18464 = vst [vmem:[#allocation151_spill] sm:$0xff] %v15347_v11  ;;  %v15354_v14 = vpop.f32.mrf.mxu3 }
 0x3f9   : > { %v15330_v25 = vpop.permute.xlu1 %6661  ;;  %18465 = vst [vmem:[#allocation152_spill] sm:$0xff] %v15349_v0 }
 0x3fa   : > { %v15332_v23 = vpop.permute.xlu0 %6656  ;;  %v15334_v59 = vpop.f32.mrf.mxu0  ;;  %18466 = vst [vmem:[#allocation153_spill] sm:$0xff] %v15354_v14 }
 0x3fb   : > { %18462 = vst [vmem:[#allocation149_spill] sm:$0xff] %v15334_v59 }
 0x3fe   : > { %7342 = vperm.xlu2 %11277, %v10945_v39   ;;  %v10948_v39 = vld [vmem:[%s17933_s1 + $0x398] sm:$0xff] }
 0x3ff   : > { %7337 = vperm.xlu1 %11276, %v10944_v55   ;;  %7332 = vperm.xlu0 %11275, %v10943_v29   ;;  %v10947_v55 = vld [vmem:[%s17933_s1 + $0x390] sm:$0xff]  ;;  %v15371_v29 = vpop.permute.xlu2 %6711  ;;  %v15373_v14 = vpop.f32.mrf.mxu1 }
 0x400   : > { %18468 = vst [vmem:[#allocation155_spill] sm:$0xff] %v15371_v29  ;;  %v15375_v0 = vpop.f32.mrf.mxu2  ;;  %v15383_v13 = vpop.f32.mrf.mxu3 }
 0x401   : > { %v15356_v59 = vpop.permute.xlu1 %6676  ;;  %18469 = vst [vmem:[#allocation156_spill] sm:$0xff] %v15373_v14 }
 0x402   : > { %v15358_v3 = vpop.permute.xlu0 %6671  ;;  %v15360_v43 = vpop.f32.mrf.mxu0  ;;  %18470 = vst [vmem:[#allocation157_spill] sm:$0xff] %v15375_v0 }
 0x403   : > { %18467 = vst [vmem:[#allocation154_spill] sm:$0xff] %v15360_v43 }
 0x404   : > { %18474 = vst [vmem:[#allocation161_spill] sm:$0xff] %v15383_v13  ;;  %v5784_v13 = vld [vmem:[%s17936_s4 + $0x18] sm:$0xff] }
 0x405   : > { %5809 = vmatpush.msra.mxu1 %v5784_v13  ;;  %v10952_v13 = vld [vmem:[%s17933_s1 + $0x3b8] sm:$0xff] }
 0x406   : > { %7357 = vperm.xlu2 %11277, %v10948_v39   ;;  %v10950_v39 = vld [vmem:[%s17933_s1 + $0x3a8] sm:$0xff] }
 0x407   : > { %7352 = vperm.xlu1 %11276, %v10947_v55   ;;  %7347 = vperm.xlu0 %11275, %v10946_v9   ;;  %v10949_v55 = vld [vmem:[%s17933_s1 + $0x3a0] sm:$0xff]  ;;  %v15394_v9 = vpop.permute.xlu2 %6726  ;;  %v15399_v0 = vpop.f32.mrf.mxu1 }
 0x408   : > { %18475 = vst [vmem:[#allocation162_spill] sm:$0xff] %v15394_v9  ;;  %v15407_v27 = vpop.f32.mrf.mxu2 }
 0x409   : > { %v15377_v11 = vpop.permute.xlu1 %6691  ;;  %18476 = vst [vmem:[#allocation163_spill] sm:$0xff] %v15399_v0 }
 0x40a   : > { %18471 = vst [vmem:[#allocation158_spill] sm:$0xff] %v15377_v11  ;;  %v15379_v43 = vpop.permute.xlu0 %6686  ;;  %v15381_v38 = vpop.f32.mrf.mxu0 }
 0x40b   : > { %18472 = vst [vmem:[#allocation159_spill] sm:$0xff] %v15379_v43 }
 0x40c   : > { %18473 = vst [vmem:[#allocation160_spill] sm:$0xff] %v15381_v38 }
 0x40d   : > { %18480 = vst [vmem:[#allocation167_spill] sm:$0xff] %v15407_v27 }
 0x40e   : > { %7372 = vperm.xlu2 %11277, %v10951_v35   ;;  %v10954_v35 = vld [vmem:[%s17933_s1 + $0x3c8] sm:$0xff] }
 0x40f   : > { %7367 = vperm.xlu1 %11276, %v10950_v39   ;;  %7362 = vperm.xlu0 %11275, %v10949_v55   ;;  %v10953_v39 = vld [vmem:[%s17933_s1 + $0x3c0] sm:$0xff]  ;;  %v15418_v55 = vpop.f32.mrf.mxu3  ;;  %v15420_v0 = vpop.permute.xlu2 %6741 }
 0x410   : > { %18481 = vst [vmem:[#allocation168_spill] sm:$0xff] %v15418_v55 }
 0x411   : > { %v15401_v14 = vpop.permute.xlu1 %6706  ;;  %18482 = vst [vmem:[#allocation169_spill] sm:$0xff] %v15420_v0 }
 0x412   : > { %18477 = vst [vmem:[#allocation164_spill] sm:$0xff] %v15401_v14  ;;  %v15403_v38 = vpop.permute.xlu0 %6701  ;;  %v15405_v29 = vpop.f32.mrf.mxu0 }
 0x413   : > { %18478 = vst [vmem:[#allocation165_spill] sm:$0xff] %v15403_v38  ;;  %v15428_v14 = vpop.f32.mrf.mxu1  ;;  %v10957_v38 = vld [vmem:[%s17933_s1 + $0x3e0] sm:$0xff] }
 0x414   : > { %18479 = vst [vmem:[#allocation166_spill] sm:$0xff] %v15405_v29 }
 0x415   : > { %18486 = vst [vmem:[#allocation173_spill] sm:$0xff] %v15428_v14  ;;  %v5783_v14 = vld [vmem:[%s17936_s4 + $0x10] sm:$0xff] }
 0x416   : > { %7387 = vperm.xlu2 %11277, %v10954_v35   ;;  %v10956_v35 = vld [vmem:[%s17933_s1 + $0x3d8] sm:$0xff]  ;;  %5810 = vmatpush.msra.mxu1 %v5783_v14  ;;  %v10958_v14 = vld [vmem:[%s17933_s1 + $0x3e8] sm:$0xff] }
 0x417   : > { %7382 = vperm.xlu1 %11276, %v10953_v39   ;;  %7377 = vperm.xlu0 %11275, %v10952_v13   ;;  %v10955_v39 = vld [vmem:[%s17933_s1 + $0x3d0] sm:$0xff]  ;;  %v15439_v13 = vpop.f32.mrf.mxu2  ;;  %v15441_v55 = vpop.f32.mrf.mxu3 }
 0x418   : > { %18487 = vst [vmem:[#allocation174_spill] sm:$0xff] %v15439_v13 }
 0x419   : > { %v15422_v27 = vpop.permute.xlu1 %6721  ;;  %18488 = vst [vmem:[#allocation175_spill] sm:$0xff] %v15441_v55 }
 0x41a   : > { %18483 = vst [vmem:[#allocation170_spill] sm:$0xff] %v15422_v27  ;;  %v15424_v29 = vpop.permute.xlu0 %6716  ;;  %v15426_v9 = vpop.f32.mrf.mxu0 }
 0x41b   : > { %18484 = vst [vmem:[#allocation171_spill] sm:$0xff] %v15424_v29  ;;  %v15452_v29 = vpop.permute.xlu2 %6756 }
 0x41c   : > { %18485 = vst [vmem:[#allocation172_spill] sm:$0xff] %v15426_v9 }
 0x41d   : > { %18492 = vst [vmem:[#allocation179_spill] sm:$0xff] %v15452_v29 }
 0x41e   : > { %7402 = vperm.xlu2 %11277, %v10957_v38   ;;  %v10960_v38 = vld [vmem:[%s17933_s1 + $0x3f8] sm:$0xff] }
 0x41f   : > { %7397 = vperm.xlu1 %11276, %v10956_v35   ;;  %7392 = vperm.xlu0 %11275, %v10955_v39   ;;  %v10959_v35 = vld [vmem:[%s17933_s1 + $0x3f0] sm:$0xff]  ;;  %v15463_v39 = vpop.f32.mrf.mxu1  ;;  %v15465_v55 = vpop.f32.mrf.mxu2 }
 0x420   : > { %18493 = vst [vmem:[#allocation180_spill] sm:$0xff] %v15463_v39  ;;  %v15467_v13 = vpop.f32.mrf.mxu3 }
 0x421   : > { %v15446_v9 = vpop.permute.xlu1 %6736  ;;  %18494 = vst [vmem:[#allocation181_spill] sm:$0xff] %v15465_v55  ;;  %v10879_v55 = vld [vmem:[%s17936_s4 + $0xf0] sm:$0xff] }
 0x422   : > { %18489 = vst [vmem:[#allocation176_spill] sm:$0xff] %v15446_v9  ;;  %v15448_v0 = vpop.permute.xlu0 %6731  ;;  %v15450_v27 = vpop.f32.mrf.mxu0 }
 0x423   : > { %18490 = vst [vmem:[#allocation177_spill] sm:$0xff] %v15448_v0  ;;  %v10995_v0 = vld [vmem:[%s17933_s1 + $0x510] sm:$0xff] }
 0x424   : > { %18491 = vst [vmem:[#allocation178_spill] sm:$0xff] %v15450_v27 }
 0x425   : > { %18495 = vst [vmem:[#allocation182_spill] sm:$0xff] %v15467_v13  ;;  %v15487_v13 = vpop.permute.xlu2 %6771 }
 0x426   : > { %7417 = vperm.xlu2 %11277, %v10960_v38   ;;  %v10994_v38 = vld [vmem:[%s17933_s1 + $0x508] sm:$0xff]  ;;  %18499 = vst [vmem:[#allocation186_spill] sm:$0xff] %v15487_v13 }
 0x427   : > { %7412 = vperm.xlu1 %11276, %v10959_v35   ;;  %7407 = vperm.xlu0 %11275, %v10958_v14   ;;  %v10880_v35 = vld [vmem:[%s17936_s4 + $0xf8] sm:$0xff]  ;;  %v10993_v14 = vld [vmem:[%s17933_s1 + $0x500] sm:$0xff]  ;;  %v15492_v39 = vpop.f32.mrf.mxu1  ;;  %v15500_v13 = vpop.f32.mrf.mxu2 }
 0x428   : > { %6279 = vmatpush.msrb.mxu2 %v10880_v35  ;;  %18500 = vst [vmem:[#allocation187_spill] sm:$0xff] %v15492_v39  ;;  %v10878_v35 = vld [vmem:[%s17936_s4 + $0xe8] sm:$0xff]  ;;  %v15511_v39 = vpop.f32.mrf.mxu3 }
 0x429   : > { %v15469_v29 = vpop.permute.xlu1 %6751  ;;  %18501 = vst [vmem:[#allocation188_spill] sm:$0xff] %v15500_v13  ;;  %v10996_v13 = vld [vmem:[%s17933_s1 + $0x518] sm:$0xff] }
 0x42a   : > { %18496 = vst [vmem:[#allocation183_spill] sm:$0xff] %v15469_v29  ;;  %v15471_v27 = vpop.permute.xlu0 %6746  ;;  %v15473_v9 = vpop.f32.mrf.mxu0  ;;  %6280 = vmatpush.msrb.mxu2 %v10879_v55  ;;  %v10997_v55 = vld [vmem:[%s17933_s1 + $0x520] sm:$0xff] }
 0x42b   : > { %18497 = vst [vmem:[#allocation184_spill] sm:$0xff] %v15471_v27 }
 0x42c   : > { %18498 = vst [vmem:[#allocation185_spill] sm:$0xff] %v15473_v9  ;;  %v5782_v9 = vld [vmem:[%s17936_s4 + $0x8] sm:$0xff]  ;;  %6281 = vmatpush.msrb.mxu2 %v10878_v35  ;;  %v10876_v35 = vld [vmem:[%s17936_s4 + $0xd8] sm:$0xff] }
 0x42d   : > { %5811 = vmatpush.msra.mxu1 %v5782_v9  ;;  %18505 = vst [vmem:[#allocation192_spill] sm:$0xff] %v15511_v39  ;;  %v10998_v9 = vld [vmem:[%s17933_s1 + $0x528] sm:$0xff]  ;;  %v10875_v39 = vld [vmem:[%s17936_s4 + $0xd0] sm:$0xff] }
 0x42e   : > { %8141 = vperm.xlu2 %11277, %v10995_v0   ;;  %v10877_v0 = vld [vmem:[%s17936_s4 + $0xe0] sm:$0xff] }
 0x42f   : > { %8136 = vperm.xlu1 %11276, %v10994_v38   ;;  %8131 = vperm.xlu0 %11275, %v10993_v14  }
 0x430   : > { %6282 = vmatpush.msrb.mxu2 %v10877_v0  ;;  %v10976_v0 = vld [vmem:[%s17936_s4 + $0x1f8] sm:$0xff] }
 0x431   : > { %v15502_v29 = vpop.permute.xlu1 %6766  ;;  %7501 = vmatpush.msrb.mxu0 %v10976_v0  ;;  %v10926_v0 = vld [vmem:[%s17936_s4 + $0x168] sm:$0xff] }
 0x432   : > { %18502 = vst [vmem:[#allocation189_spill] sm:$0xff] %v15502_v29  ;;  %v15507_v38 = vpop.permute.xlu0 %6761  ;;  %v15509_v14 = vpop.f32.mrf.mxu0  ;;  %6283 = vmatpush.msrb.mxu2 %v10876_v35  ;;  %v10928_v29 = vld [vmem:[%s17936_s4 + $0x178] sm:$0xff]  ;;  %v10874_v35 = vld [vmem:[%s17936_s4 + $0xc8] sm:$0xff] }
 0x433   : > { %18503 = vst [vmem:[#allocation190_spill] sm:$0xff] %v15507_v38  ;;  %6890 = vmatpush.msrb.mxu3 %v10928_v29  ;;  %v15545_v38 = vpop.f32.mrf.mxu1  ;;  %v10873_v29 = vld [vmem:[%s17936_s4 + $0xc0] sm:$0xff] }
 0x434   : > { %18504 = vst [vmem:[#allocation191_spill] sm:$0xff] %v15509_v14  ;;  %v15534_v14 = vpop.permute.xlu2 %6786  ;;  %6284 = vmatpush.msrb.mxu2 %v10875_v39 }
 0x435   : > { %18506 = vst [vmem:[#allocation193_spill] sm:$0xff] %v15534_v14  ;;  %v10974_v14 = vld [vmem:[%s17936_s4 + $0x1e8] sm:$0xff] }
 0x436   : > { %8156 = vperm.xlu2 %11277, %v10998_v9   ;;  %v10927_v9 = vld [vmem:[%s17936_s4 + $0x170] sm:$0xff]  ;;  %18507 = vst [vmem:[#allocation194_spill] sm:$0xff] %v15545_v38  ;;  %6285 = vmatpush.msrb.mxu2 %v10874_v35  ;;  %v11001_v35 = vld [vmem:[%s17933_s1 + $0x540] sm:$0xff]  ;;  %v15579_v38 = vpop.f32.mrf.mxu3 }
 0x437   : > { %8151 = vperm.xlu1 %11276, %v10997_v55   ;;  %8146 = vperm.xlu0 %11275, %v10996_v13   ;;  %v10975_v55 = vld [vmem:[%s17936_s4 + $0x1f0] sm:$0xff]  ;;  %18512 = vst [vmem:[#allocation199_spill] sm:$0xff] %v15579_v38 }
 0x438   : > { %6891 = vmatpush.msrb.mxu3 %v10927_v9  ;;  %7502 = vmatpush.msrb.mxu0 %v10975_v55  ;;  %v10872_v9 = vld [vmem:[%s17936_s4 + $0xb8] sm:$0xff]  ;;  %v10999_v55 = vld [vmem:[%s17933_s1 + $0x530] sm:$0xff] }
 0x439   : > { %v15547_v27 = vpop.permute.xlu1 %6781  ;;  %6286 = vmatpush.msrb.mxu2 %v10873_v29  ;;  %v10973_v29 = vld [vmem:[%s17936_s4 + $0x1e0] sm:$0xff] }
 0x43a   : > { %18508 = vst [vmem:[#allocation195_spill] sm:$0xff] %v15547_v27  ;;  %v15552_v13 = vpop.permute.xlu0 %6776  ;;  %v15554_v39 = vpop.f32.mrf.mxu0  ;;  %6892 = vmatpush.msrb.mxu3 %v10926_v0  ;;  %7503 = vmatpush.msrb.mxu0 %v10974_v14  ;;  %v10924_v14 = vld [vmem:[%s17936_s4 + $0x158] sm:$0xff] }
 0x43b   : > { %18509 = vst [vmem:[#allocation196_spill] sm:$0xff] %v15552_v13  ;;  %v15562_v27 = vpop.f32.mrf.mxu2  ;;  %v11000_v13 = vld [vmem:[%s17933_s1 + $0x538] sm:$0xff]  ;;  %6287 = vmatpush.msrb.mxu2 %v10872_v9  ;;  %v10870_v9 = vld [vmem:[%s17936_s4 + $0xa8] sm:$0xff]  ;;  %v15619_v19 = vpop.f32.mrf.mxu1 }
 0x43c   : > { %18510 = vst [vmem:[#allocation197_spill] sm:$0xff] %v15554_v39  ;;  %v10871_v39 = vld [vmem:[%s17936_s4 + $0xb0] sm:$0xff]  ;;  %v10972_v0 = vld [vmem:[%s17936_s4 + $0x1d8] sm:$0xff]  ;;  %7504 = vmatpush.msrb.mxu0 %v10973_v29 }
 0x43d   : > { %18511 = vst [vmem:[#allocation198_spill] sm:$0xff] %v15562_v27  ;;  %v10925_v27 = vld [vmem:[%s17936_s4 + $0x160] sm:$0xff]  ;;  %6288 = vmatpush.msrb.mxu2 %v10871_v39  ;;  %v10971_v39 = vld [vmem:[%s17936_s4 + $0x1d0] sm:$0xff] }
 0x43e   : > { %8171 = vperm.xlu2 %11277, %v11001_v35   ;;  %6893 = vmatpush.msrb.mxu3 %v10925_v27  ;;  %v15599_v35 = vpop.permute.xlu2 %6801  ;;  %v5781_v27 = vld [vmem:[%s17936_s4] sm:$0xff]  ;;  %18517 = vst [vmem:[#allocation204_spill] sm:$0xff] %v15619_v19 }
 0x43f   : > { %8166 = vperm.xlu1 %11276, %v11000_v13   ;;  %8161 = vperm.xlu0 %11275, %v10999_v55   ;;  %v10923_v13 = vld [vmem:[%s17936_s4 + $0x150] sm:$0xff]  ;;  %18513 = vst [vmem:[#allocation200_spill] sm:$0xff] %v15599_v35  ;;  %v10869_v35 = vld [vmem:[%s17936_s4 + $0xa0] sm:$0xff] }
 0x440   : > { %6894 = vmatpush.msrb.mxu3 %v10924_v14  ;;  %5812 = vmatpush.msra.mxu1 %v5781_v27  ;;  %v11004_v14 = vld [vmem:[%s17933_s1 + $0x558] sm:$0xff]  ;;  %v10970_v27 = vld [vmem:[%s17936_s4 + $0x1c8] sm:$0xff] }
 0x441   : > { %v15601_v38 = vpop.permute.xlu1 %6796  ;;  %7505 = vmatpush.msrb.mxu0 %v10972_v0  ;;  %6289 = vmatpush.msrb.mxu2 %v10870_v9  ;;  %v11002_v0 = vld [vmem:[%s17933_s1 + $0x548] sm:$0xff]  ;;  %v10921_v9 = vld [vmem:[%s17936_s4 + $0x140] sm:$0xff] }
 0x442   : > { %18514 = vst [vmem:[#allocation201_spill] sm:$0xff] %v15601_v38  ;;  %v15609_v55 = vpop.permute.xlu0 %6791  ;;  %v15611_v29 = vpop.f32.mrf.mxu0  ;;  %v10922_v38 = vld [vmem:[%s17936_s4 + $0x148] sm:$0xff]  ;;  %6895 = vmatpush.msrb.mxu3 %v10923_v13  ;;  %v10969_v13 = vld [vmem:[%s17936_s4 + $0x1c0] sm:$0xff] }
 0x443   : > { %18515 = vst [vmem:[#allocation202_spill] sm:$0xff] %v15609_v55  ;;  %v11003_v55 = vld [vmem:[%s17933_s1 + $0x550] sm:$0xff]  ;;  %7506 = vmatpush.msrb.mxu0 %v10971_v39  ;;  %v15633_v19 = vpop.f32.mrf.mxu2  ;;  %6290 = vmatpush.msrb.mxu2 %v10869_v35  ;;  %v15644_v39 = vpop.f32.mrf.mxu3  ;;  %v10920_v35 = vld [vmem:[%s17936_s4 + $0x138] sm:$0xff] }
 0x444   : > { %18516 = vst [vmem:[#allocation203_spill] sm:$0xff] %v15611_v29  ;;  %6896 = vmatpush.msrb.mxu3 %v10922_v38  ;;  %v10868_v29 = vld [vmem:[%s17936_s4 + $0x98] sm:$0xff]  ;;  %v10867_v38 = vld [vmem:[%s17936_s4 + $0x90] sm:$0xff] }
 0x445   : > { %18518 = vst [vmem:[#allocation205_spill] sm:$0xff] %v15633_v19  ;;  %7507 = vmatpush.msrb.mxu0 %v10970_v27  ;;  %6291 = vmatpush.msrb.mxu2 %v10868_v29  ;;  %v10919_v27 = vld [vmem:[%s17936_s4 + $0x130] sm:$0xff] }
 0x446   : > { %8186 = vperm.xlu2 %11277, %v11004_v14   ;;  %18519 = vst [vmem:[#allocation206_spill] sm:$0xff] %v15644_v39  ;;  %6897 = vmatpush.msrb.mxu3 %v10921_v9  ;;  %v10967_v29 = vld [vmem:[%s17936_s4 + $0x1b0] sm:$0xff]  ;;  %v15676_v63 = vpop.permute.xlu2 %7267 }
 0x447   : > { %8181 = vperm.xlu1 %11276, %v11003_v55   ;;  %8176 = vperm.xlu0 %11275, %v11002_v0   ;;  %v10968_v55 = vld [vmem:[%s17936_s4 + $0x1b8] sm:$0xff]  ;;  %v10866_v0 = vld [vmem:[%s17936_s4 + $0x88] sm:$0xff]  ;;  %v11007_v9 = vld [vmem:[%s17933_s1 + $0x570] sm:$0xff] }
 0x448   : > { %7508 = vmatpush.msrb.mxu0 %v10969_v13  ;;  %6292 = vmatpush.msrb.mxu2 %v10867_v38  ;;  %v11006_v13 = vld [vmem:[%s17933_s1 + $0x568] sm:$0xff]  ;;  %v11005_v38 = vld [vmem:[%s17933_s1 + $0x560] sm:$0xff] }
 0x449   : > { %v15655_v14 = vpop.permute.xlu1 %7262  ;;  %6898 = vmatpush.msrb.mxu3 %v10920_v35  ;;  %v10865_v35 = vld [vmem:[%s17936_s4 + $0x80] sm:$0xff] }
 0x44a   : > { %v15663_v39 = vpop.permute.xlu0 %6806  ;;  %v15665_v19 = vpop.f32.mrf.mxu0  ;;  %7509 = vmatpush.msrb.mxu0 %v10968_v55  ;;  %6293 = vmatpush.msrb.mxu2 %v10866_v0  ;;  %v10966_v55 = vld [vmem:[%s17936_s4 + $0x1a8] sm:$0xff]  ;;  %v10917_v0 = vld [vmem:[%s17936_s4 + $0x120] sm:$0xff] }
 0x44b   : > { %18520 = vst [vmem:[#allocation207_spill] sm:$0xff] %v15663_v39  ;;  %6899 = vmatpush.msrb.mxu3 %v10919_v27  ;;  %v3420_v39 = vpop.f32.mrf.mxu1  ;;  %v4032_v11 = vpop.f32.mrf.mxu2  ;;  %v10965_v27 = vld [vmem:[%s17936_s4 + $0x1a0] sm:$0xff] }
 0x44c   : > { %18521 = vst [vmem:[#allocation208_spill] sm:$0xff] %v15665_v19  ;;  %7510 = vmatpush.msrb.mxu0 %v10967_v29  ;;  %v10918_v19 = vld [vmem:[%s17936_s4 + $0x128] sm:$0xff]  ;;  %6294 = vmatpush.msrb.mxu2 %v10865_v35  ;;  %v4515_v29 = vpop.f32.mrf.mxu3 }
 0x44d   : > { %6900 = vmatpush.msrb.mxu3 %v10918_v19  ;;  %v11010_v19 = vld [vmem:[%s17933_s1 + $0x588] sm:$0xff] }
 0x44e   : > { %8201 = vperm.xlu2 %11277, %v11007_v9   ;;  %7511 = vmatpush.msrb.mxu0 %v10966_v55  ;;  %v10992_v9 = vld [vmem:[%s17936_s4 + $0x278] sm:$0xff]  ;;  %v11009_v55 = vld [vmem:[%s17933_s1 + $0x580] sm:$0xff]  ;;  %v15728_v52 = vpop.permute.xlu2 %7282 }
 0x44f   : > { %8196 = vperm.xlu1 %11276, %v11006_v13   ;;  %8191 = vperm.xlu0 %11275, %v11005_v38   ;;  %v10916_v13 = vld [vmem:[%s17936_s4 + $0x118] sm:$0xff] }
 0x450   : > { %v10964_v38 = vld [vmem:[%s17936_s4 + $0x198] sm:$0xff]  ;;  %6901 = vmatpush.msrb.mxu3 %v10917_v0  ;;  %7512 = vmatpush.msrb.mxu0 %v10965_v27  ;;  %v10915_v0 = vld [vmem:[%s17936_s4 + $0x110] sm:$0xff]  ;;  %v2846_v27 = vadd.f32 %v14797_v10, %v14545_v56  ;;  %v10962_v56 = vld [vmem:[%s17936_s4 + $0x188] sm:$0xff] }
 0x451   : > { %v15696_v43 = vpop.permute.xlu1 %7277  ;;  %7759 = vmatpush.msrb.mxu1 %v10992_v9  ;;  %v10914_v9 = vld [vmem:[%s17936_s4 + $0x108] sm:$0xff]  ;;  %v10913_v10 = vld [vmem:[%s17936_s4 + $0x100] sm:$0xff] }
 0x452   : > { %v15707_v35 = vpop.permute.xlu0 %7272  ;;  %v15709_v50 = vpop.f32.mrf.mxu0  ;;  %6902 = vmatpush.msrb.mxu3 %v10916_v13  ;;  %7513 = vmatpush.msrb.mxu0 %v10964_v38  ;;  %v3458_v13 = vadd.f32 %v3420_v39, %v2846_v27  ;;  %v10961_v39 = vld [vmem:[%s17936_s4 + $0x180] sm:$0xff] }
 0x453   : > { %18522 = vst [vmem:[#allocation209_spill] sm:$0xff] %v15709_v50  ;;  %v10963_v50 = vld [vmem:[%s17936_s4 + $0x190] sm:$0xff]  ;;  %v3423_v38 = vpop.f32.mrf.mxu1 }
 0x454   : > { %6903 = vmatpush.msrb.mxu3 %v10915_v0  ;;  %7514 = vmatpush.msrb.mxu0 %v10963_v50  ;;  %v4070_v7 = vadd.f32 %v4032_v11, %v3458_v13  ;;  %v2847_v50 = vadd.f32 %v14822_v31, %v14579_v60  ;;  %v11013_v11 = vld [vmem:[%s17933_s1 + $0x5a0] sm:$0xff]  ;;  %v4518_v13 = vpop.f32.mrf.mxu3 }
 0x455   : > { %v15760_v60 = vld [vmem:[%s17935_s3] ss:$0 sm:$0xff] }
 0x456   : > { %8216 = vperm.xlu2 %11277, %v11010_v19   ;;  %v4035_v19 = vpop.f32.mrf.mxu2  ;;  %6904 = vmatpush.msrb.mxu3 %v10914_v9  ;;  %v4553_v27 = vadd.f32 %v4515_v29, %v4070_v7  ;;  %v11012_v9 = vld [vmem:[%s17933_s1 + $0x598] sm:$0xff]  ;;  %v10991_v7 = vld [vmem:[%s17936_s4 + $0x270] sm:$0xff]  ;;  %v15765_v29 = vpop.permute.xlu2 %7297 }
 0x457   : > { %8211 = vperm.xlu1 %11276, %v11009_v55   ;;  %8206 = vperm.xlu0 %11275, %v11008_v2   ;;  %18524 = vst [vmem:[#allocation211_spill] sm:$0xff] %v15765_v29 }
 0x458   : > { %7515 = vmatpush.msrb.mxu0 %v10962_v56  ;;  %6905 = vmatpush.msrb.mxu3 %v10913_v10  ;;  %v3459_v56 = vadd.f32 %v3423_v38, %v2847_v50 }
 0x459   : > { %v15739_v55 = vpop.permute.xlu1 %7292  ;;  %7760 = vmatpush.msrb.mxu1 %v10991_v7 }
 0x45a   : > { %18523 = vst [vmem:[#allocation210_spill] sm:$0xff] %v15739_v55  ;;  %v15744_v2 = vpop.permute.xlu0 %7287  ;;  %v5127_v0 = vpop.f32.mrf.mxu0  ;;  %v11011_v55 = vld [vmem:[%s17933_s1 + $0x590] sm:$0xff]  ;;  %7516 = vmatpush.msrb.mxu0 %v10961_v39  ;;  %v4071_v31 = vadd.f32 %v4035_v19, %v3459_v56  ;;  %v11016_v19 = vld [vmem:[%s17933_s1 + $0x5b8] sm:$0xff] }
 0x45b   : > { %v5165_v44 = vadd.f32 %v5127_v0, %v4553_v27  ;;  %v3426_v10 = vpop.f32.mrf.mxu1  ;;  %v18526_v27 = vld [vmem:[#allocation65_spill] sm:$0xff] }
 0x45c   : > { %v4554_v39 = vadd.f32 %v4518_v13, %v4071_v31  ;;  %v5136_v13 = vadd.f32 %v14880_v15, %v14635_v16  ;;  %v11014_v31 = vld [vmem:[%s17933_s1 + $0x5a8] sm:$0xff] }
 0x45d   : > { %v5265_v38 = vadd.f32 %v15760_v60, %v5165_v44 }
 0x45e   : > { %8231 = vperm.xlu2 %11277, %v11013_v11   ;;  %v2848_v11 = vadd.f32 %v14856_v42, %v18526_v27  ;;  %v4038_v56 = vpop.f32.mrf.mxu2  ;;  %v5236_v16 = vadd.f32 %v15760_v60, %v5136_v13 }
 0x45f   : > { %8226 = vperm.xlu1 %11276, %v11012_v9   ;;  %8221 = vperm.xlu0 %11275, %v11011_v55   ;;  %v11015_v55 = vld [vmem:[%s17933_s1 + $0x5b0] sm:$0xff]  ;;  %v15785_v7 = vmax.f32 %v5265_v38, 0.0  ;;  %v15795_v38 = vpop.permute.xlu2 %7312 }
 0x460   : > { %v3460_v42 = vadd.f32 %v3426_v10, %v2848_v11 }
 0x461   : > { %v15780_v44 = vpop.permute.xlu1 %7307  ;;  %18528 = vst [vmem:[#allocation213_spill] sm:$0xff] %v15785_v7 }
 0x462   : > { %v15768_v0 = vpop.permute.xlu0 %7302  ;;  %v5130_v50 = vpop.f32.mrf.mxu0  ;;  %18527 = vst [vmem:[#allocation65_spill] sm:$0xff] %v15780_v44  ;;  %v4072_v27 = vadd.f32 %v4038_v56, %v3460_v42  ;;  %v17959_v44 = vrot.slane %v15785_v7, 7  ;;  %v11019_v56 = vld [vmem:[%s17933_s1 + $0x5d0] sm:$0xff] }
 0x463   : > { %18525 = vst [vmem:[#allocation212_spill] sm:$0xff] %v15768_v0  ;;  %v5166_v9 = vadd.f32 %v5130_v50, %v4554_v39  ;;  %v4521_v50 = vpop.f32.mrf.mxu3 }
 0x464   : > { %v4555_v15 = vadd.f32 %v4521_v50, %v4072_v27 }
 0x465   : > { %v5266_v39 = vadd.f32 %v15760_v60, %v5166_v9  ;;  %v18529_v9 = vld [vmem:[#allocation29_spill] sm:$0xff] }
 0x466   : > { %8246 = vperm.xlu2 %11277, %v11016_v19   ;;  %v5137_v19 = vadd.f32 %v14908_v28, %v18529_v9  ;;  %v11018_v28 = vld [vmem:[%s17933_s1 + $0x5c8] sm:$0xff] }
 0x467   : > { %8241 = vperm.xlu1 %11276, %v11015_v55   ;;  %v15788_v0 = vmax.f32 %v5266_v39, 0.0  ;;  %8236 = vperm.xlu0 %11275, %v11014_v31   ;;  %v15807_v31 = vmax.f32 %v5236_v16, 0.0  ;;  %v11017_v39 = vld [vmem:[%s17933_s1 + $0x5c0] sm:$0xff] }
 0x468   : > { %v5237_v16 = vadd.f32 %v15760_v60, %v5137_v19 }
 0x469   : > { %v5400_v29 = vrot.slane %v15788_v0, 7  ;;  %v6198_v10 = vmul.f32 %v15051_v4, %v15788_v0  ;;  %v15820_v27 = vpop.permute.xlu1 %7322 }
 0x46a   : > { %v5133_v11 = vpop.f32.mrf.mxu0  ;;  %v15809_v4 = vpop.permute.xlu0 %7317 }
 0x46b   : > { %v5167_v55 = vadd.f32 %v5133_v11, %v4555_v15  ;;  %6295 = vmatmul.f32.vlgmr.msrb.gmra.mxu2 %v6198_v10  ;;  %v15802_v13 = vsel %vm339_vm0, %v17959_v44, %v5400_v29  ;;  %v5436_v10 = vrot.slane %v15807_v31, 7  ;;  %v17958_v11 = vrot.slane %v15788_v0, 1 }
 0x46c   : > { %v5717_v42 = vmul.f32 %v14753_v57, %v15802_v13  ;;  %v10990_v57 = vld [vmem:[%s17936_s4 + $0x268] sm:$0xff] }
 0x46d   : > { %v5267_v50 = vadd.f32 %v15760_v60, %v5167_v55  ;;  %7761 = vmatpush.msrb.mxu1 %v10990_v57 }
 0x46e   : > { %5813 = vmatmul.f32.vlgmr.msra.gmra.mxu1 %v5717_v42  ;;  %8261 = vperm.xlu2 %11277, %v11019_v56   ;;  %v15834_v56 = vmax.f32 %v5237_v16, 0.0  ;;  %v18533_v16 = vld [vmem:[#allocation79_spill] sm:$0xff] }
 0x46f   : > { %v15823_v15 = vmax.f32 %v5267_v50, 0.0  ;;  %8256 = vperm.xlu1 %11276, %v11018_v28   ;;  %8251 = vperm.xlu0 %11275, %v11017_v39   ;;  %v5138_v50 = vadd.f32 %v14939_v51, %v14698_v8  ;;  %v11020_v8 = vld [vmem:[%s17933_s1 + $0x5d8] sm:$0xff] }
 0x471   : > { %18530 = vst [vmem:[#allocation29_spill] sm:$0xff] %v15823_v15  ;;  %v6491_v9 = vrot.slane %v15823_v15, 1  ;;  %v6199_v55 = vmul.f32 %v15049_v49, %v15823_v15  ;;  %v5402_v19 = vrot.slane %v15823_v15, 7  ;;  %v15849_v49 = vpop.permute.xlu2 %7327  ;;  %v15871_v44 = vpop.permute.xlu1 %7337  ;;  %v6200_v15 = vmul.f32 %v14958_v12, %v15807_v31  ;;  %v11041_v12 = vld [vmem:[%s17933_s1 + $0x600] sm:$0xff] }
 0x472   : > { %v15866_v51 = vpop.permute.xlu0 %7332 }
 0x473   : > { %6298 = vmatmul.f32.gmra.mxu2 %v6199_v55  ;;  %v15837_v42 = vsel %vm339_vm0, %v5400_v29, %v5402_v19  ;;  %v15842_v28 = vsel %vm1432_vm1, %v17958_v11, %v6491_v9  ;;  %v15845_v39 = vsel %vm339_vm0, %v5402_v19, %v5436_v10  ;;  %v11022_v11 = vld [vmem:[%s17933_s1 + $0x5e8] sm:$0xff]  ;;  %v11021_v19 = vld [vmem:[%s17933_s1 + $0x5e0] sm:$0xff] }
 0x474   : > { %18531 = vst [vmem:[#allocation214_spill] sm:$0xff] %v15842_v28  ;;  %v5718_v57 = vmul.f32 %v18533_v16, %v15837_v42  ;;  %v6809_v29 = vmul.f32 %v15249_v24, %v15842_v28  ;;  %v7420_v55 = vmul.f32 %v15655_v14, %v15845_v39  ;;  %v6525_v24 = vrot.slane %v15807_v31, 1 }
 0x475   : > { %18532 = vst [vmem:[#allocation215_spill] sm:$0xff] %v15845_v39  ;;  %v5437_v14 = vrot.slane %v15834_v56, 7  ;;  %v5238_v16 = vadd.f32 %v15760_v60, %v5138_v50  ;;  %v5719_v50 = vmul.f32 %v14783_v6, %v15845_v39  ;;  %v6526_v6 = vrot.slane %v15834_v56, 1 }
 0x476   : > { %5816 = vmatmul.f32.gmra.mxu1 %v5718_v57  ;;  %6906 = vmatmul.f32.vlgmr.msrb.gmra.mxu3 %v6809_v29  ;;  %v15876_v28 = vsel %vm1432_vm1, %v6491_v9, %v6525_v24 }
 0x477   : > { %7517 = vmatmul.f32.vlgmr.msrb.gmra.mxu0 %v7420_v55  ;;  %8276 = vperm.xlu2 %11277, %v11022_v11   ;;  %18534 = vst [vmem:[#allocation79_spill] sm:$0xff] %v15876_v28  ;;  %v15879_v57 = vsel %vm339_vm0, %v5436_v10, %v5437_v14  ;;  %v15881_v29 = vmax.f32 %v5238_v16, 0.0  ;;  %v5139_v11 = vadd.f32 %v14966_v54, %v14726_v22  ;;  %v11023_v22 = vld [vmem:[%s17933_s1 + $0x5f0] sm:$0xff] }
 0x478   : > { %8271 = vperm.xlu1 %11276, %v11021_v19   ;;  %8266 = vperm.xlu0 %11275, %v11020_v8   ;;  %18535 = vst [vmem:[#allocation216_spill] sm:$0xff] %v15879_v57  ;;  %v6810_v55 = vmul.f32 %v15332_v23, %v15876_v28  ;;  %v7421_v10 = vmul.f32 %v15676_v63, %v15879_v57  ;;  %v10989_v63 = vld [vmem:[%s17936_s4 + $0x260] sm:$0xff] }
 0x479   : > { %v15900_v54 = vpop.permute.xlu2 %7342  ;;  %v5239_v23 = vadd.f32 %v15760_v60, %v5139_v11  ;;  %v5439_v9 = vrot.slane %v15881_v29, 7  ;;  %v6201_v8 = vmul.f32 %v15078_v33, %v15834_v56  ;;  %7762 = vmatpush.msrb.mxu1 %v10989_v63  ;;  %v15912_v16 = vpop.permute.xlu1 %7352 }
 0x47a   : > { %v15908_v19 = vpop.permute.xlu0 %7347 }
 0x47b   : > { %6301 = vmatmul.f32.gmra.mxu2 %v6200_v15  ;;  %v11024_v15 = vld [vmem:[%s17933_s1 + $0x5f8] sm:$0xff]  ;;  %v15919_v11 = vmax.f32 %v5239_v23, 0.0  ;;  %v15926_v33 = vsel %vm339_vm0, %v5437_v14, %v5439_v9 }
 0x47d   : > { %v5441_v14 = vrot.slane %v15919_v11, 7 }
 0x47e   : > { %5819 = vmatmul.f32.gmra.mxu1 %v5719_v50  ;;  %6909 = vmatmul.f32.gmra.mxu3 %v6810_v55  ;;  %v15915_v50 = vsel %vm1432_vm1, %v6525_v24, %v6526_v6  ;;  %v5720_v55 = vmul.f32 %v14781_v26, %v15879_v57  ;;  %v11044_v24 = vld [vmem:[%s17933_s1 + $0x618] sm:$0xff]  ;;  %v11043_v26 = vld [vmem:[%s17933_s1 + $0x610] sm:$0xff]  ;;  %v18556_v57 = vld [vmem:[#allocation63_spill] sm:$0xff] }
 0x47f   : > { %7520 = vmatmul.f32.gmra.mxu0 %v7421_v10  ;;  %8742 = vperm.xlu2 %11277, %v11041_v12   ;;  %18536 = vst [vmem:[#allocation217_spill] sm:$0xff] %v15915_v50  ;;  %v5140_v12 = vadd.f32 %v14996_v37, %v14751_v47  ;;  %v6811_v10 = vmul.f32 %v15330_v25, %v15915_v50  ;;  %v11042_v47 = vld [vmem:[%s17933_s1 + $0x608] sm:$0xff]  ;;  %v6528_v37 = vrot.slane %v15881_v29, 1 }
 0x480   : > { %8286 = vperm.xlu1 %11276, %v11024_v15   ;;  %8281 = vperm.xlu0 %11275, %v11023_v22   ;;  %v7422_v15 = vmul.f32 %v15707_v35, %v15926_v33  ;;  %v6202_v35 = vmul.f32 %v15076_v53, %v15881_v29 }
 0x481   : > { %v5240_v25 = vadd.f32 %v15760_v60, %v5140_v12  ;;  %v15942_v22 = vpop.permute.xlu2 %7357  ;;  %v15949_v23 = vsel %vm1432_vm1, %v6526_v6, %v6528_v37  ;;  %v5141_v12 = vadd.f32 %v15025_v41, %v14779_v18  ;;  %v15962_v53 = vpop.permute.xlu1 %7367  ;;  %v11047_v6 = vld [vmem:[%s17933_s1 + $0x630] sm:$0xff]  ;;  %v11045_v18 = vld [vmem:[%s17933_s1 + $0x620] sm:$0xff]  ;;  %v6530_v41 = vrot.slane %v15919_v11, 1 }
 0x482   : > { %v15946_v63 = vpop.permute.xlu0 %7362  ;;  %18537 = vst [vmem:[#allocation218_spill] sm:$0xff] %v15949_v23 }
 0x483   : > { %6304 = vmatmul.f32.gmra.mxu2 %v6201_v8  ;;  %v5721_v8 = vmul.f32 %v14694_v34, %v15926_v33 }
 0x486   : > { %5822 = vmatmul.f32.gmra.mxu1 %v5720_v55  ;;  %6912 = vmatmul.f32.gmra.mxu3 %v6811_v10  ;;  %v15953_v55 = vmax.f32 %v5240_v25, 0.0  ;;  %v6812_v10 = vmul.f32 %v15277_v61, %v15949_v23  ;;  %v10988_v61 = vld [vmem:[%s17936_s4 + $0x258] sm:$0xff]  ;;  %v15986_v25 = vsel %vm1432_vm1, %v6528_v37, %v6530_v41  ;;  %v11050_v37 = vld [vmem:[%s17933_s1 + $0x648] sm:$0xff] }
 0x487   : > { %7523 = vmatmul.f32.gmra.mxu0 %v7422_v15  ;;  %8757 = vperm.xlu2 %11277, %v11044_v24   ;;  %v15960_v24 = vsel %vm339_vm0, %v5439_v9, %v5441_v14  ;;  %v11046_v15 = vld [vmem:[%s17933_s1 + $0x628] sm:$0xff] }
 0x488   : > { %8752 = vperm.xlu1 %11276, %v11043_v26   ;;  %8747 = vperm.xlu0 %11275, %v11042_v47   ;;  %18538 = vst [vmem:[#allocation219_spill] sm:$0xff] %v15953_v55  ;;  %v7423_v34 = vmul.f32 %v15696_v43, %v15960_v24  ;;  %v5241_v43 = vadd.f32 %v15760_v60, %v5141_v12  ;;  %v5443_v9 = vrot.slane %v15953_v55, 7 }
 0x489   : > { %v6203_v26 = vmul.f32 %v14987_v45, %v15919_v11  ;;  %7763 = vmatpush.msrb.mxu1 %v10988_v61  ;;  %v15983_v47 = vpop.permute.xlu2 %7372  ;;  %v5142_v12 = vadd.f32 %v15053_v46, %v14803_v48  ;;  %v11048_v48 = vld [vmem:[%s17933_s1 + $0x638] sm:$0xff]  ;;  %v16012_v46 = vpop.permute.xlu1 %7382  ;;  %v18542_v61 = vld [vmem:[#allocation72_spill] sm:$0xff] }
 0x48a   : > { %v15997_v45 = vsel %vm339_vm0, %v5441_v14, %v5443_v9 }
 0x48b   : > { %6307 = vmatmul.f32.gmra.mxu2 %v6202_v35  ;;  %v5722_v35 = vmul.f32 %v14807_v62, %v15960_v24  ;;  %18540 = vst [vmem:[#allocation221_spill] sm:$0xff] %v15997_v45  ;;  %v7424_v62 = vmul.f32 %v15728_v52, %v15997_v45  ;;  %v5242_v14 = vadd.f32 %v15760_v60, %v5142_v12 }
 0x48c   : > { %v5143_v12 = vadd.f32 %v15080_v1, %v14832_v20  ;;  %v11051_v20 = vld [vmem:[%s17933_s1 + $0x650] sm:$0xff] }
 0x48e   : > { %5825 = vmatmul.f32.gmra.mxu1 %v5721_v8  ;;  %6915 = vmatmul.f32.gmra.mxu3 %v6812_v10  ;;  %v15990_v8 = vmax.f32 %v5241_v43, 0.0  ;;  %v6813_v10 = vmul.f32 %v15358_v3, %v15986_v25  ;;  %v6532_v3 = vrot.slane %v15953_v55, 1 }
 0x48f   : > { %7526 = vmatmul.f32.gmra.mxu0 %v7423_v34  ;;  %8772 = vperm.xlu2 %11277, %v11047_v6   ;;  %v15999_v6 = vpop.permute.xlu0 %7377  ;;  %v11049_v34 = vld [vmem:[%s17933_s1 + $0x640] sm:$0xff] }
 0x490   : > { %8767 = vperm.xlu1 %11276, %v11046_v15   ;;  %8762 = vperm.xlu0 %11275, %v11045_v18   ;;  %18539 = vst [vmem:[#allocation220_spill] sm:$0xff] %v15990_v8  ;;  %v5445_v52 = vrot.slane %v15990_v8, 7  ;;  %v6204_v15 = vmul.f32 %v15107_v36, %v15953_v55  ;;  %v18541_v18 = vld [vmem:[#allocation61_spill] sm:$0xff] }
 0x491   : > { %v2825_v43 = vadd.f32 %v18542_v61, %v18541_v18  ;;  %v16058_v18 = vpop.permute.xlu1 %7397 }
 0x492   : > { %v16033_v36 = vsel %vm339_vm0, %v5443_v9, %v5445_v52  ;;  %v6534_v9 = vrot.slane %v15990_v8, 1 }
 0x493   : > { %6310 = vmatmul.f32.gmra.mxu2 %v6203_v26  ;;  %v16022_v26 = vsel %vm1432_vm1, %v6530_v41, %v6532_v3  ;;  %18544 = vst [vmem:[#allocation72_spill] sm:$0xff] %v16033_v36  ;;  %v11053_v41 = vld [vmem:[%s17933_s1 + $0x660] sm:$0xff]  ;;  %v3437_v1 = vadd.f32 %v14910_v40, %v2825_v43  ;;  %v6205_v40 = vmul.f32 %v15105_v58, %v15990_v8  ;;  %v18545_v43 = vld [vmem:[#allocation64_spill] sm:$0xff] }
 0x496   : > { %5828 = vmatmul.f32.gmra.mxu1 %v5722_v35  ;;  %6918 = vmatmul.f32.gmra.mxu3 %v6813_v10  ;;  %v5723_v35 = vmul.f32 %v14805_v30, %v15997_v45  ;;  %v16026_v10 = vmax.f32 %v5242_v14, 0.0  ;;  %v7425_v30 = vmul.f32 %v15744_v2, %v16033_v36  ;;  %v10987_v2 = vld [vmem:[%s17936_s4 + $0x250] sm:$0xff]  ;;  %v5243_v14 = vadd.f32 %v15760_v60, %v5143_v12 }
 0x497   : > { %7529 = vmatmul.f32.gmra.mxu0 %v7424_v62  ;;  %8787 = vperm.xlu2 %11277, %v11050_v37   ;;  %v6814_v37 = vmul.f32 %v15356_v59, %v16022_v26  ;;  %v16035_v62 = vpop.permute.xlu2 %7387  ;;  %v16049_v59 = vpop.permute.xlu0 %7392 }
 0x498   : > { %8782 = vperm.xlu1 %11276, %v11049_v34   ;;  %8777 = vperm.xlu0 %11275, %v11048_v48   ;;  %18543 = vst [vmem:[#allocation61_spill] sm:$0xff] %v16026_v10  ;;  %v11052_v34 = vld [vmem:[%s17933_s1 + $0x658] sm:$0xff]  ;;  %v4049_v48 = vadd.f32 %v14924_v32, %v3437_v1  ;;  %v5724_v32 = vmul.f32 %v14721_v17, %v16033_v36  ;;  %v16070_v12 = vmax.f32 %v5243_v14, 0.0  ;;  %v11055_v17 = vld [vmem:[%s17933_s1 + $0x670] sm:$0xff] }
 0x499   : > { %7764 = vmatpush.msrb.mxu1 %v10987_v2  ;;  %v18552_v2 = vld [vmem:[#allocation11_spill] sm:$0xff] }
 0x49a   : > { %v4532_v61 = vadd.f32 %v14926_v5, %v4049_v48  ;;  %v11056_v5 = vld [vmem:[%s17933_s1 + $0x678] sm:$0xff] }
 0x49b   : > { %6313 = vmatmul.f32.gmra.mxu2 %v6204_v15  ;;  %v5447_v15 = vrot.slane %v16026_v10, 7 }
 0x49e   : > { %5831 = vmatmul.f32.gmra.mxu1 %v5723_v35  ;;  %6921 = vmatmul.f32.gmra.mxu3 %v6814_v37  ;;  %v18546_v35 = vld [vmem:[#allocation50_spill] sm:$0xff] }
 0x49f   : > { %7532 = vmatmul.f32.gmra.mxu0 %v7425_v30  ;;  %8802 = vperm.xlu2 %11277, %v11053_v41   ;;  %v2826_v37 = vadd.f32 %v18546_v35, %v18545_v43  ;;  %v16066_v41 = vsel %vm1432_vm1, %v6532_v3, %v6534_v9  ;;  %18548 = vst [vmem:[#allocation50_spill] sm:$0xff] %v16070_v12  ;;  %v18551_v3 = vld [vmem:[#allocation210_spill] sm:$0xff]  ;;  %v16090_v14 = vpop.permute.xlu2 %7402  ;;  %v5449_v35 = vrot.slane %v16070_v12, 7 }
 0x4a0   : > { %8797 = vperm.xlu1 %11276, %v11052_v34   ;;  %8792 = vperm.xlu0 %11275, %v11051_v20   ;;  %18547 = vst [vmem:[#allocation64_spill] sm:$0xff] %v16066_v41  ;;  %v5144_v30 = vadd.f32 %v15109_v21, %v4532_v61  ;;  %v18549_v34 = vld [vmem:[#allocation142_spill] sm:$0xff]  ;;  %v16076_v20 = vsel %vm339_vm0, %v5445_v52, %v5447_v15  ;;  %v11054_v21 = vld [vmem:[%s17933_s1 + $0x668] sm:$0xff]  ;;  %v6536_v52 = vrot.slane %v16026_v10, 1 }
 0x4a1   : > { %v6815_v58 = vmul.f32 %v18549_v34, %v16066_v41  ;;  %18550 = vst [vmem:[#allocation142_spill] sm:$0xff] %v16076_v20  ;;  %v7426_v1 = vmul.f32 %v18551_v3, %v16076_v20  ;;  %v3438_v48 = vadd.f32 %v18552_v2, %v2826_v37  ;;  %v16096_v34 = vpop.permute.xlu0 %7407  ;;  %v18554_v37 = vld [vmem:[#allocation49_spill] sm:$0xff]  ;;  %v18555_v2 = vld [vmem:[#allocation67_spill] sm:$0xff] }
 0x4a2   : > { %v5244_v43 = vadd.f32 %v15760_v60, %v5144_v30  ;;  %v6206_v3 = vmul.f32 %v18554_v37, %v16026_v10  ;;  %v18559_v30 = vld [vmem:[#allocation34_spill] sm:$0xff]  ;;  %v18562_v37 = vld [vmem:[#allocation159_spill] sm:$0xff] }
 0x4a3   : > { %6316 = vmatmul.f32.gmra.mxu2 %v6205_v40  ;;  %v18553_v40 = vld [vmem:[#allocation59_spill] sm:$0xff] }
 0x4a4   : > { %v4050_v61 = vadd.f32 %v18553_v40, %v3438_v48  ;;  %v16106_v48 = vsel %vm1432_vm1, %v6534_v9, %v6536_v52  ;;  %v5725_v40 = vmul.f32 %v18559_v30, %v16076_v20  ;;  %v16110_v39 = vmax.f32 %v5244_v43, 0.0  ;;  %v18564_v9 = vld [vmem:[#allocation211_spill] sm:$0xff]  ;;  %v11058_v43 = vld [vmem:[%s17933_s1 + $0x688] sm:$0xff] }
 0x4a5   : > { %18558 = vst [vmem:[#allocation210_spill] sm:$0xff] %v16106_v48  ;;  %v6816_v28 = vmul.f32 %v18562_v37, %v16106_v48  ;;  %v10986_v30 = vld [vmem:[%s17936_s4 + $0x248] sm:$0xff]  ;;  %v18570_v48 = vld [vmem:[#allocation15_spill] sm:$0xff] }
 0x4a6   : > { %5834 = vmatmul.f32.gmra.mxu1 %v5724_v32  ;;  %6924 = vmatmul.f32.gmra.mxu3 %v6815_v58  ;;  %v4533_v32 = vadd.f32 %v18555_v2, %v4050_v61  ;;  %v16101_v58 = vpop.permute.xlu1 %7412  ;;  %18560 = vst [vmem:[#allocation11_spill] sm:$0xff] %v16110_v39  ;;  %v16116_v61 = vsel %vm339_vm0, %v5447_v15, %v5449_v35  ;;  %v11057_v2 = vld [vmem:[%s17933_s1 + $0x680] sm:$0xff]  ;;  %v6538_v15 = vrot.slane %v16070_v12, 1  ;;  %v5451_v10 = vrot.slane %v16110_v39, 7 }
 0x4a7   : > { %7535 = vmatmul.f32.gmra.mxu0 %v7426_v1  ;;  %8817 = vperm.xlu2 %11277, %v11056_v5   ;;  %v18557_v1 = vld [vmem:[#allocation73_spill] sm:$0xff]  ;;  %18563 = vst [vmem:[#allocation59_spill] sm:$0xff] %v16116_v61  ;;  %v16137_v20 = vpop.permute.xlu2 %7417  ;;  %v18581_v41 = vld [vmem:[#allocation51_spill] sm:$0xff] }
 0x4a8   : > { %8812 = vperm.xlu1 %11276, %v11055_v17   ;;  %8807 = vperm.xlu0 %11275, %v11054_v21   ;;  %v2827_v5 = vadd.f32 %v18557_v1, %v18556_v57  ;;  %v18561_v17 = vld [vmem:[#allocation105_spill] sm:$0xff] }
 0x4a9   : > { %v5145_v21 = vadd.f32 %v18561_v17, %v4533_v32  ;;  %v11059_v57 = vld [vmem:[%s17933_s1 + $0x690] sm:$0xff]  ;;  %v18565_v32 = vld [vmem:[#allocation14_spill] sm:$0xff]  ;;  %v18566_v17 = vld [vmem:[#allocation52_spill] sm:$0xff]  ;;  %7765 = vmatpush.msrb.mxu1 %v10986_v30 }
 0x4aa   : > { %v3439_v1 = vadd.f32 %v18565_v32, %v2827_v5  ;;  %v18569_v32 = vld [vmem:[#allocation13_spill] sm:$0xff]  ;;  %v18575_v30 = vld [vmem:[#allocation158_spill] sm:$0xff] }
 0x4ab   : > { %6319 = vmatmul.f32.gmra.mxu2 %v6206_v3  ;;  %v7427_v3 = vmul.f32 %v18564_v9, %v16116_v61  ;;  %v5245_v9 = vadd.f32 %v15760_v60, %v5145_v21  ;;  %v2828_v8 = vadd.f32 %v18570_v48, %v18569_v32  ;;  %v18572_v21 = vld [vmem:[#allocation87_spill] sm:$0xff]  ;;  %v18577_v48 = vld [vmem:[#allocation212_spill] sm:$0xff]  ;;  %v18578_v32 = vld [vmem:[#allocation42_spill] sm:$0xff] }
 0x4ac   : > { %v4051_v37 = vadd.f32 %v18566_v17, %v3439_v1  ;;  %v16147_v1 = vsel %vm1432_vm1, %v6536_v52, %v6538_v15  ;;  %v5726_v17 = vmul.f32 %v18572_v21, %v16116_v61  ;;  %v11062_v52 = vld [vmem:[%s17933_s1 + $0x6a8] sm:$0xff]  ;;  %v6540_v21 = vrot.slane %v16110_v39, 1  ;;  %v18580_v61 = vld [vmem:[#allocation103_spill] sm:$0xff] }
 0x4ad   : > { %18571 = vst [vmem:[#allocation49_spill] sm:$0xff] %v16147_v1 }
 0x4ae   : > { %5837 = vmatmul.f32.gmra.mxu1 %v5725_v40  ;;  %6927 = vmatmul.f32.gmra.mxu3 %v6816_v28  ;;  %v18567_v28 = vld [vmem:[#allocation104_spill] sm:$0xff]  ;;  %v18568_v40 = vld [vmem:[#allocation66_spill] sm:$0xff] }
 0x4af   : > { %7538 = vmatmul.f32.gmra.mxu0 %v7427_v3  ;;  %8832 = vperm.xlu2 %11277, %v11059_v57   ;;  %v6207_v5 = vmul.f32 %v18567_v28, %v16070_v12  ;;  %v4534_v57 = vadd.f32 %v18568_v40, %v4051_v37  ;;  %v16142_v3 = vpop.permute.xlu0 %8131  ;;  %v6817_v28 = vmul.f32 %v18575_v30, %v16147_v1  ;;  %v16159_v40 = vpop.permute.xlu1 %8136 }
 0x4b0   : > { %8827 = vperm.xlu1 %11276, %v11058_v43   ;;  %8822 = vperm.xlu0 %11275, %v11057_v2   ;;  %v16151_v43 = vmax.f32 %v5245_v9, 0.0  ;;  %v18574_v2 = vld [vmem:[#allocation111_spill] sm:$0xff]  ;;  %v16157_v37 = vsel %vm339_vm0, %v5449_v35, %v5451_v10  ;;  %v3440_v35 = vadd.f32 %v18578_v32, %v2828_v8  ;;  %v6208_v1 = vmul.f32 %v18580_v61, %v16110_v39  ;;  %v16180_v8 = vpop.permute.xlu2 %8141  ;;  %v18588_v61 = vld [vmem:[#allocation150_spill] sm:$0xff] }
 0x4b1   : > { %v5146_v36 = vadd.f32 %v18574_v2, %v4534_v57  ;;  %18576 = vst [vmem:[#allocation63_spill] sm:$0xff] %v16157_v37  ;;  %v11061_v9 = vld [vmem:[%s17933_s1 + $0x6a0] sm:$0xff]  ;;  %v11060_v57 = vld [vmem:[%s17933_s1 + $0x698] sm:$0xff]  ;;  %v18579_v2 = vld [vmem:[#allocation17_spill] sm:$0xff] }
 0x4b2   : > { %18573 = vst [vmem:[#allocation67_spill] sm:$0xff] %v16151_v43  ;;  %v4052_v30 = vadd.f32 %v18579_v2, %v3440_v35  ;;  %v5453_v12 = vrot.slane %v16151_v43, 7 }
 0x4b3   : > { %6322 = vmatmul.f32.gmra.mxu2 %v6207_v5  ;;  %v7428_v5 = vmul.f32 %v18577_v48, %v16157_v37  ;;  %v5246_v48 = vadd.f32 %v15760_v60, %v5146_v36  ;;  %v18585_v36 = vld [vmem:[#allocation78_spill] sm:$0xff] }
 0x4b4   : > { %v4535_v55 = vadd.f32 %v18581_v41, %v4052_v30  ;;  %v16195_v41 = vsel %vm339_vm0, %v5451_v10, %v5453_v12 }
 0x4b5   : > { %v16189_v35 = vmax.f32 %v5246_v48, 0.0  ;;  %18589 = vst [vmem:[#allocation105_spill] sm:$0xff] %v16195_v41  ;;  %v11064_v48 = vld [vmem:[%s17933_s1 + $0x6b8] sm:$0xff] }
 0x4b6   : > { %5840 = vmatmul.f32.gmra.mxu1 %v5726_v17  ;;  %6930 = vmatmul.f32.gmra.mxu3 %v6817_v28  ;;  %v18582_v17 = vld [vmem:[#allocation68_spill] sm:$0xff] }
 0x4b7   : > { %7541 = vmatmul.f32.gmra.mxu0 %v7428_v5  ;;  %8847 = vperm.xlu2 %11277, %v11062_v52   ;;  %v18583_v28 = vld [vmem:[#allocation84_spill] sm:$0xff]  ;;  %v16185_v52 = vsel %vm1432_vm1, %v6538_v15, %v6540_v21  ;;  %v5727_v5 = vmul.f32 %v18585_v36, %v16157_v37  ;;  %18586 = vst [vmem:[#allocation34_spill] sm:$0xff] %v16189_v35  ;;  %v16197_v30 = vpop.permute.xlu0 %8146  ;;  %v11065_v15 = vld [vmem:[%s17933_s1 + $0x6c0] sm:$0xff]  ;;  %v16211_v36 = vpop.permute.xlu1 %8151 }
 0x4b8   : > { %8842 = vperm.xlu1 %11276, %v11061_v9   ;;  %8837 = vperm.xlu0 %11275, %v11060_v57   ;;  %v2829_v32 = vadd.f32 %v18583_v28, %v18582_v17  ;;  %18584 = vst [vmem:[#allocation73_spill] sm:$0xff] %v16185_v52  ;;  %v18587_v9 = vld [vmem:[#allocation117_spill] sm:$0xff]  ;;  %v6818_v2 = vmul.f32 %v18588_v61, %v16185_v52  ;;  %v18592_v28 = vld [vmem:[#allocation58_spill] sm:$0xff]  ;;  %v10985_v61 = vld [vmem:[%s17936_s4 + $0x240] sm:$0xff]  ;;  %v5455_v52 = vrot.slane %v16189_v35, 7 }
 0x4b9   : > { %v5147_v57 = vadd.f32 %v18587_v9, %v4535_v55  ;;  %18590 = vst [vmem:[#allocation159_spill] sm:$0xff] %v16197_v30  ;;  %v11063_v55 = vld [vmem:[%s17933_s1 + $0x6b0] sm:$0xff]  ;;  %v6542_v9 = vrot.slane %v16151_v43, 1  ;;  %7766 = vmatpush.msrb.mxu1 %v10985_v61 }
 0x4ba   : > { %v3441_v10 = vadd.f32 %v18592_v28, %v2829_v32  ;;  %18593 = vst [vmem:[#allocation211_spill] sm:$0xff] %v16211_v36  ;;  %v18595_v32 = vld [vmem:[#allocation85_spill] sm:$0xff]  ;;  %v16236_v61 = vsel %vm339_vm0, %v5453_v12, %v5455_v52 }
 0x4bb   : > { %6325 = vmatmul.f32.gmra.mxu2 %v6208_v1  ;;  %v18591_v1 = vld [vmem:[#allocation65_spill] sm:$0xff]  ;;  %v5247_v37 = vadd.f32 %v15760_v60, %v5147_v57  ;;  %v16226_v45 = vsel %vm1432_vm1, %v6540_v21, %v6542_v9  ;;  %18604 = vst [vmem:[#allocation104_spill] sm:$0xff] %v16236_v61  ;;  %v11137_v21 = vld [vmem:[%s17933_s1 + $0x800] sm:$0xff] }
 0x4bc   : > { %v7429_v17 = vmul.f32 %v18591_v1, %v16195_v41  ;;  %v18594_v1 = vld [vmem:[#allocation93_spill] sm:$0xff]  ;;  %18599 = vst [vmem:[#allocation14_spill] sm:$0xff] %v16226_v45 }
 0x4bd   : > { %v4053_v39 = vadd.f32 %v18594_v1, %v3441_v10  ;;  %v18600_v10 = vld [vmem:[#allocation88_spill] sm:$0xff]  ;;  %v16230_v1 = vmax.f32 %v5247_v37, 0.0  ;;  %v18603_v30 = vld [vmem:[#allocation165_spill] sm:$0xff]  ;;  %v11089_v37 = vld [vmem:[%s17933_s1 + $0x700] sm:$0xff] }
 0x4be   : > { %5843 = vmatmul.f32.gmra.mxu1 %v5727_v5  ;;  %6933 = vmatmul.f32.gmra.mxu3 %v6818_v2  ;;  %v6209_v5 = vmul.f32 %v18595_v32, %v16151_v43  ;;  %v18596_v2 = vld [vmem:[#allocation94_spill] sm:$0xff]  ;;  %v5728_v57 = vmul.f32 %v18600_v10, %v16195_v41  ;;  %v6819_v32 = vmul.f32 %v18603_v30, %v16226_v45  ;;  %v11066_v30 = vld [vmem:[%s17933_s1 + $0x6c8] sm:$0xff]  ;;  %v18610_v41 = vld [vmem:[#allocation99_spill] sm:$0xff] }
 0x4bf   : > { %7544 = vmatmul.f32.gmra.mxu0 %v7429_v17  ;;  %8862 = vperm.xlu2 %11277, %v11065_v15   ;;  %v4536_v28 = vadd.f32 %v18596_v2, %v4053_v39  ;;  %v18597_v17 = vld [vmem:[#allocation39_spill] sm:$0xff]  ;;  %v18598_v15 = vld [vmem:[#allocation41_spill] sm:$0xff]  ;;  %18601 = vst [vmem:[#allocation52_spill] sm:$0xff] %v16230_v1  ;;  %v16238_v39 = vpop.permute.xlu2 %8156  ;;  %v18605_v2 = vld [vmem:[#allocation96_spill] sm:$0xff]  ;;  %v16258_v43 = vpop.permute.xlu1 %8166 }
 0x4c0   : > { %8857 = vperm.xlu1 %11276, %v11064_v48   ;;  %8852 = vperm.xlu0 %11275, %v11063_v55   ;;  %v2830_v36 = vadd.f32 %v18598_v15, %v18597_v17  ;;  %v18602_v48 = vld [vmem:[#allocation123_spill] sm:$0xff]  ;;  %v6544_v17 = vrot.slane %v16189_v35, 1  ;;  %v18607_v15 = vld [vmem:[#allocation97_spill] sm:$0xff]  ;;  %18608 = vst [vmem:[#allocation13_spill] sm:$0xff] %v16258_v43 }
 0x4c1   : > { %v5148_v55 = vadd.f32 %v18602_v48, %v4536_v28  ;;  %v16252_v28 = vpop.permute.xlu0 %8161  ;;  %v5457_v48 = vrot.slane %v16230_v1, 7  ;;  %v18612_v45 = vld [vmem:[#allocation83_spill] sm:$0xff] }
 0x4c2   : > { %v3442_v12 = vadd.f32 %v18605_v2, %v2830_v36  ;;  %18606 = vst [vmem:[#allocation66_spill] sm:$0xff] %v16252_v28  ;;  %v18609_v36 = vld [vmem:[#allocation110_spill] sm:$0xff] }
 0x4c3   : > { %6328 = vmatmul.f32.gmra.mxu2 %v6209_v5  ;;  %v7430_v5 = vmul.f32 %v15795_v38, %v16236_v61  ;;  %v5248_v10 = vadd.f32 %v15760_v60, %v5148_v55  ;;  %v6210_v2 = vmul.f32 %v18609_v36, %v16189_v35  ;;  %v18614_v55 = vld [vmem:[#allocation12_spill] sm:$0xff]  ;;  %v16276_v36 = vsel %vm339_vm0, %v5455_v52, %v5457_v48 }
 0x4c4   : > { %v4054_v38 = vadd.f32 %v18607_v15, %v3442_v12  ;;  %v18616_v15 = vld [vmem:[#allocation130_spill] sm:$0xff]  ;;  %18618 = vst [vmem:[#allocation111_spill] sm:$0xff] %v16276_v36  ;;  %v6546_v52 = vrot.slane %v16230_v1, 1 }
 0x4c5   : > { %v16270_v12 = vmax.f32 %v5248_v10, 0.0  ;;  %v18619_v10 = vld [vmem:[#allocation100_spill] sm:$0xff] }
 0x4c6   : > { %5846 = vmatmul.f32.gmra.mxu1 %v5728_v57  ;;  %6936 = vmatmul.f32.gmra.mxu3 %v6819_v32  ;;  %v4537_v57 = vadd.f32 %v18610_v41, %v4054_v38  ;;  %v18611_v32 = vld [vmem:[#allocation40_spill] sm:$0xff]  ;;  %v7431_v41 = vmul.f32 %v15809_v4, %v16276_v36  ;;  %v10984_v4 = vld [vmem:[%s17936_s4 + $0x238] sm:$0xff] }
 0x4c7   : > { %7547 = vmatmul.f32.gmra.mxu0 %v7430_v5  ;;  %9835 = vperm.xlu2 %11277, %v11137_v21   ;;  %v2831_v28 = vadd.f32 %v18612_v45, %v18611_v32  ;;  %v16266_v21 = vsel %vm1432_vm1, %v6542_v9, %v6544_v17  ;;  %v5729_v5 = vmul.f32 %v18614_v55, %v16236_v61  ;;  %v11091_v45 = vld [vmem:[%s17933_s1 + $0x710] sm:$0xff]  ;;  %v11138_v9 = vld [vmem:[%s17933_s1 + $0x808] sm:$0xff]  ;;  %v18620_v32 = vld [vmem:[#allocation102_spill] sm:$0xff] }
 0x4c8   : > { %9224 = vperm.xlu1 %11276, %v11089_v37   ;;  %8867 = vperm.xlu0 %11275, %v11066_v30   ;;  %18613 = vst [vmem:[#allocation15_spill] sm:$0xff] %v16266_v21  ;;  %v5149_v37 = vadd.f32 %v18616_v15, %v4537_v57  ;;  %v18617_v30 = vld [vmem:[#allocation164_spill] sm:$0xff]  ;;  %v16290_v57 = vpop.permute.xlu2 %8171  ;;  %v18626_v61 = vld [vmem:[#allocation53_spill] sm:$0xff] }
 0x4c9   : > { %18615 = vst [vmem:[#allocation87_spill] sm:$0xff] %v16270_v12  ;;  %v6820_v43 = vmul.f32 %v18617_v30, %v16266_v21  ;;  %v11090_v38 = vld [vmem:[%s17933_s1 + $0x708] sm:$0xff]  ;;  %v5459_v30 = vrot.slane %v16270_v12, 7  ;;  %v16299_v35 = vpop.permute.xlu0 %8176  ;;  %7767 = vmatpush.msrb.mxu1 %v10984_v4  ;;  %v18630_v4 = vld [vmem:[#allocation155_spill] sm:$0xff] }
 0x4ca   : > { %v5249_v15 = vadd.f32 %v15760_v60, %v5149_v37  ;;  %18621 = vst [vmem:[#allocation158_spill] sm:$0xff] %v16299_v35  ;;  %v18627_v37 = vld [vmem:[#allocation81_spill] sm:$0xff] }
 0x4cb   : > { %6331 = vmatmul.f32.gmra.mxu2 %v6210_v2  ;;  %v3443_v2 = vadd.f32 %v18619_v10, %v2831_v28  ;;  %v18625_v10 = vld [vmem:[#allocation37_spill] sm:$0xff] }
 0x4cc   : > { %v2832_v21 = vadd.f32 %v18626_v61, %v18625_v10  ;;  %v11140_v61 = vld [vmem:[%s17933_s1 + $0x818] sm:$0xff]  ;;  %v18633_v10 = vld [vmem:[#allocation112_spill] sm:$0xff] }
 0x4cd   : > { %v4055_v55 = vadd.f32 %v18620_v32, %v3443_v2  ;;  %v16309_v2 = vsel %vm1432_vm1, %v6544_v17, %v6546_v52  ;;  %v5730_v32 = vmul.f32 %v18627_v37, %v16276_v36 }
 0x4ce   : > { %5849 = vmatmul.f32.gmra.mxu1 %v5729_v5  ;;  %6939 = vmatmul.f32.gmra.mxu3 %v6820_v43  ;;  %v18622_v43 = vld [vmem:[#allocation109_spill] sm:$0xff]  ;;  %v18623_v5 = vld [vmem:[#allocation106_spill] sm:$0xff] }
 0x4cf   : > { %7550 = vmatmul.f32.gmra.mxu0 %v7431_v41  ;;  %9234 = vperm.xlu2 %11277, %v11091_v45   ;;  %v6211_v28 = vmul.f32 %v18622_v43, %v16230_v1  ;;  %v4538_v45 = vadd.f32 %v18623_v5, %v4055_v55  ;;  %v16304_v41 = vpop.permute.xlu1 %8181  ;;  %v6821_v43 = vmul.f32 %v18630_v4, %v16309_v2  ;;  %v18632_v5 = vld [vmem:[#allocation108_spill] sm:$0xff]  ;;  %v18635_v1 = vld [vmem:[#allocation95_spill] sm:$0xff] }
 0x4d0   : > { %9840 = vperm.xlu1 %11276, %v11138_v9   ;;  %9229 = vperm.xlu0 %11275, %v11090_v38   ;;  %18624 = vst [vmem:[#allocation212_spill] sm:$0xff] %v16304_v41  ;;  %v16313_v9 = vmax.f32 %v5249_v15, 0.0  ;;  %v18629_v38 = vld [vmem:[#allocation135_spill] sm:$0xff]  ;;  %v16319_v55 = vsel %vm339_vm0, %v5457_v48, %v5459_v30  ;;  %v11092_v15 = vld [vmem:[%s17933_s1 + $0x718] sm:$0xff]  ;;  %v6548_v48 = vrot.slane %v16270_v12, 1  ;;  %v16337_v4 = vpop.permute.xlu2 %8186  ;;  %v6212_v36 = vmul.f32 %v18635_v1, %v16270_v12 }
 0x4d1   : > { %v5150_v35 = vadd.f32 %v18629_v38, %v4538_v45  ;;  %18631 = vst [vmem:[#allocation17_spill] sm:$0xff] %v16319_v55  ;;  %v7432_v17 = vmul.f32 %v15820_v27, %v16319_v55  ;;  %v3444_v45 = vadd.f32 %v18632_v5, %v2832_v21  ;;  %v18636_v21 = vld [vmem:[#allocation113_spill] sm:$0xff]  ;;  %v18638_v5 = vld [vmem:[#allocation38_spill] sm:$0xff]  ;;  %v18644_v1 = vld [vmem:[#allocation171_spill] sm:$0xff] }
 0x4d2   : > { %18628 = vst [vmem:[#allocation42_spill] sm:$0xff] %v16313_v9  ;;  %v5461_v38 = vrot.slane %v16313_v9, 7 }
 0x4d3   : > { %6334 = vmatmul.f32.gmra.mxu2 %v6211_v28  ;;  %v11139_v28 = vld [vmem:[%s17933_s1 + $0x810] sm:$0xff]  ;;  %v4056_v37 = vadd.f32 %v18633_v10, %v3444_v45  ;;  %v5250_v27 = vadd.f32 %v15760_v60, %v5150_v35  ;;  %18634 = vst [vmem:[#allocation103_spill] sm:$0xff] %v16337_v4  ;;  %v16347_v45 = vsel %vm1432_vm1, %v6546_v52, %v6548_v48  ;;  %v18641_v35 = vld [vmem:[#allocation90_spill] sm:$0xff]  ;;  %v11094_v52 = vld [vmem:[%s17933_s1 + $0x728] sm:$0xff] }
 0x4d4   : > { %18640 = vst [vmem:[#allocation68_spill] sm:$0xff] %v16347_v45  ;;  %v5731_v10 = vmul.f32 %v18641_v35, %v16319_v55  ;;  %v6822_v12 = vmul.f32 %v18644_v1, %v16347_v45  ;;  %v18648_v35 = vld [vmem:[#allocation119_spill] sm:$0xff] }
 0x4d5   : > { %v16351_v4 = vmax.f32 %v5250_v27, 0.0  ;;  %v11141_v27 = vld [vmem:[%s17933_s1 + $0x820] sm:$0xff] }
 0x4d6   : > { %5852 = vmatmul.f32.gmra.mxu1 %v5730_v32  ;;  %6942 = vmatmul.f32.gmra.mxu3 %v6821_v43  ;;  %v4539_v32 = vadd.f32 %v18636_v21, %v4056_v37  ;;  %v16342_v43 = vpop.permute.xlu0 %8191  ;;  %v16357_v37 = vsel %vm339_vm0, %v5459_v30, %v5461_v38 }
 0x4d7   : > { %7553 = vmatmul.f32.gmra.mxu0 %v7432_v17  ;;  %9850 = vperm.xlu2 %11277, %v11140_v61   ;;  %18637 = vst [vmem:[#allocation51_spill] sm:$0xff] %v16342_v43  ;;  %v18639_v17 = vld [vmem:[#allocation48_spill] sm:$0xff]  ;;  %v16359_v21 = vpop.permute.xlu1 %8196  ;;  %v18653_v43 = vld [vmem:[#allocation62_spill] sm:$0xff] }
 0x4d8   : > { %9239 = vperm.xlu1 %11276, %v11092_v15   ;;  %9845 = vperm.xlu0 %11275, %v11139_v28   ;;  %v2833_v61 = vadd.f32 %v18639_v17, %v18638_v5  ;;  %18642 = vst [vmem:[#allocation84_spill] sm:$0xff] %v16351_v4  ;;  %v18643_v15 = vld [vmem:[#allocation139_spill] sm:$0xff]  ;;  %v18647_v5 = vld [vmem:[#allocation118_spill] sm:$0xff]  ;;  %v6550_v17 = vrot.slane %v16313_v9, 1 }
 0x4d9   : > { %v5151_v28 = vadd.f32 %v18643_v15, %v4539_v32  ;;  %18645 = vst [vmem:[#allocation78_spill] sm:$0xff] %v16357_v37  ;;  %v11093_v32 = vld [vmem:[%s17933_s1 + $0x720] sm:$0xff] }
 0x4da   : > { %18646 = vst [vmem:[#allocation117_spill] sm:$0xff] %v16359_v21  ;;  %v3445_v30 = vadd.f32 %v18647_v5, %v2833_v61  ;;  %v5463_v21 = vrot.slane %v16351_v4, 7  ;;  %v18649_v61 = vld [vmem:[#allocation116_spill] sm:$0xff]  ;;  %v16388_v45 = vsel %vm1432_vm1, %v6548_v48, %v6550_v17  ;;  %v11143_v48 = vld [vmem:[%s17933_s1 + $0x830] sm:$0xff] }
 0x4db   : > { %6337 = vmatmul.f32.gmra.mxu2 %v6212_v36  ;;  %v7433_v36 = vmul.f32 %v15849_v49, %v16357_v37  ;;  %v10983_v49 = vld [vmem:[%s17936_s4 + $0x230] sm:$0xff]  ;;  %v5251_v1 = vadd.f32 %v15760_v60, %v5151_v28  ;;  %18654 = vst [vmem:[#allocation65_spill] sm:$0xff] %v16388_v45  ;;  %v18655_v28 = vld [vmem:[#allocation86_spill] sm:$0xff] }
 0x4dc   : > { %v4057_v15 = vadd.f32 %v18648_v35, %v3445_v30  ;;  %7768 = vmatpush.msrb.mxu1 %v10983_v49  ;;  %v5732_v30 = vmul.f32 %v18655_v28, %v16357_v37  ;;  %v18658_v49 = vld [vmem:[#allocation170_spill] sm:$0xff]  ;;  %v6552_v28 = vrot.slane %v16351_v4, 1 }
 0x4de   : > { %5855 = vmatmul.f32.gmra.mxu1 %v5731_v10  ;;  %6945 = vmatmul.f32.gmra.mxu3 %v6822_v12  ;;  %v6213_v10 = vmul.f32 %v18649_v61, %v16313_v9  ;;  %v18650_v12 = vld [vmem:[#allocation120_spill] sm:$0xff]  ;;  %v6823_v61 = vmul.f32 %v18658_v49, %v16388_v45  ;;  %v16426_v37 = vsel %vm1432_vm1, %v6550_v17, %v6552_v28  ;;  %v11097_v17 = vld [vmem:[%s17933_s1 + $0x740] sm:$0xff] }
 0x4df   : > { %7556 = vmatmul.f32.gmra.mxu0 %v7433_v36  ;;  %9249 = vperm.xlu2 %11277, %v11094_v52   ;;  %v4540_v5 = vadd.f32 %v18650_v12, %v4057_v15  ;;  %v16383_v36 = vpop.permute.xlu2 %8201  ;;  %v18652_v52 = vld [vmem:[#allocation16_spill] sm:$0xff]  ;;  %v16398_v15 = vsel %vm339_vm0, %v5461_v38, %v5463_v21  ;;  %v16400_v12 = vpop.permute.xlu0 %8206  ;;  %18668 = vst [vmem:[#allocation39_spill] sm:$0xff] %v16426_v37 }
 0x4e0   : > { %9855 = vperm.xlu1 %11276, %v11141_v27   ;;  %9244 = vperm.xlu0 %11275, %v11093_v32   ;;  %18651 = vst [vmem:[#allocation150_spill] sm:$0xff] %v16383_v36  ;;  %v2834_v55 = vadd.f32 %v18653_v43, %v18652_v52  ;;  %v16392_v27 = vmax.f32 %v5251_v1, 0.0  ;;  %v18657_v32 = vld [vmem:[#allocation145_spill] sm:$0xff]  ;;  %v7434_v43 = vmul.f32 %v15866_v51, %v16398_v15  ;;  %v16414_v52 = vpop.permute.xlu1 %8211  ;;  %v18664_v36 = vld [vmem:[#allocation115_spill] sm:$0xff]  ;;  %v18698_v45 = vld [vmem:[#allocation160_spill] sm:$0xff] }
 0x4e1   : > { %v5152_v35 = vadd.f32 %v18657_v32, %v4540_v5  ;;  %18659 = vst [vmem:[#allocation93_spill] sm:$0xff] %v16398_v15  ;;  %v11095_v1 = vld [vmem:[%s17933_s1 + $0x730] sm:$0xff]  ;;  %v18663_v32 = vld [vmem:[#allocation126_spill] sm:$0xff]  ;;  %v6214_v9 = vmul.f32 %v18664_v36, %v16351_v4 }
 0x4e2   : > { %18656 = vst [vmem:[#allocation58_spill] sm:$0xff] %v16392_v27  ;;  %v18661_v5 = vld [vmem:[#allocation125_spill] sm:$0xff] }
 0x4e3   : > { %6340 = vmatmul.f32.gmra.mxu2 %v6213_v10  ;;  %18660 = vst [vmem:[#allocation85_spill] sm:$0xff] %v16400_v12  ;;  %v11142_v10 = vld [vmem:[%s17933_s1 + $0x828] sm:$0xff]  ;;  %v3446_v38 = vadd.f32 %v18661_v5, %v2834_v55  ;;  %v5252_v49 = vadd.f32 %v15760_v60, %v5152_v35  ;;  %v5465_v12 = vrot.slane %v16392_v27, 7  ;;  %v18665_v55 = vld [vmem:[#allocation127_spill] sm:$0xff] }
 0x4e4   : > { %18662 = vst [vmem:[#allocation94_spill] sm:$0xff] %v16414_v52  ;;  %v18666_v52 = vld [vmem:[#allocation54_spill] sm:$0xff] }
 0x4e5   : > { %v4058_v51 = vadd.f32 %v18663_v32, %v3446_v38  ;;  %v16430_v38 = vmax.f32 %v5252_v49, 0.0  ;;  %v18672_v32 = vld [vmem:[#allocation162_spill] sm:$0xff] }
 0x4e6   : > { %5858 = vmatmul.f32.gmra.mxu1 %v5732_v30  ;;  %6948 = vmatmul.f32.gmra.mxu3 %v6823_v61  ;;  %v18667_v30 = vld [vmem:[#allocation57_spill] sm:$0xff]  ;;  %v6824_v36 = vmul.f32 %v18672_v32, %v16426_v37  ;;  %v11096_v49 = vld [vmem:[%s17933_s1 + $0x738] sm:$0xff] }
 0x4e7   : > { %7559 = vmatmul.f32.gmra.mxu0 %v7434_v43  ;;  %9865 = vperm.xlu2 %11277, %v11143_v48   ;;  %v4541_v5 = vadd.f32 %v18665_v55, %v4058_v51  ;;  %v2835_v61 = vadd.f32 %v18667_v30, %v18666_v52  ;;  %v18669_v43 = vld [vmem:[#allocation82_spill] sm:$0xff]  ;;  %18670 = vst [vmem:[#allocation41_spill] sm:$0xff] %v16430_v38  ;;  %v16438_v55 = vpop.permute.xlu2 %8216  ;;  %v16452_v30 = vpop.permute.xlu0 %8221 }
 0x4e8   : > { %9254 = vperm.xlu1 %11276, %v11095_v1   ;;  %9860 = vperm.xlu0 %11275, %v11142_v10   ;;  %v5733_v35 = vmul.f32 %v18669_v43, %v16398_v15  ;;  %v18671_v1 = vld [vmem:[#allocation149_spill] sm:$0xff]  ;;  %v16436_v51 = vsel %vm339_vm0, %v5463_v21, %v5465_v12  ;;  %18674 = vst [vmem:[#allocation123_spill] sm:$0xff] %v16438_v55  ;;  %v11144_v52 = vld [vmem:[%s17933_s1 + $0x838] sm:$0xff]  ;;  %v18677_v55 = vld [vmem:[#allocation132_spill] sm:$0xff] }
 0x4e9   : > { %v5153_v10 = vadd.f32 %v18671_v1, %v4541_v5  ;;  %18673 = vst [vmem:[#allocation88_spill] sm:$0xff] %v16436_v51  ;;  %v18675_v5 = vld [vmem:[#allocation131_spill] sm:$0xff]  ;;  %v6554_v1 = vrot.slane %v16392_v27, 1 }
 0x4ea   : > { %v3447_v21 = vadd.f32 %v18675_v5, %v2835_v61  ;;  %18676 = vst [vmem:[#allocation165_spill] sm:$0xff] %v16452_v30  ;;  %v5467_v61 = vrot.slane %v16430_v38, 7  ;;  %v16461_v5 = vpop.permute.xlu1 %8226 }
 0x4eb   : > { %v5814_v48 = vpop.f32.mrf.mxu1  ;;  %6343 = vmatmul.f32.gmra.mxu2 %v6214_v9  ;;  %v7435_v9 = vmul.f32 %v15871_v44, %v16436_v51  ;;  %v10982_v44 = vld [vmem:[%s17936_s4 + $0x228] sm:$0xff]  ;;  %v5253_v15 = vadd.f32 %v15760_v60, %v5153_v10  ;;  %18678 = vst [vmem:[#allocation96_spill] sm:$0xff] %v16461_v5  ;;  %v16469_v37 = vsel %vm1432_vm1, %v6552_v28, %v6554_v1 }
 0x4ec   : > { %v4059_v4 = vadd.f32 %v18677_v55, %v3447_v21  ;;  %7769 = vmatpush.msrb.mxu1 %v10982_v44  ;;  %18683 = vst [vmem:[#allocation97_spill] sm:$0xff] %v16469_v37  ;;  %v18684_v60 = vld [vmem:[#allocation92_spill] sm:$0xff] }
 0x4ed   : > { %v5734_v10 = vmul.f32 %v18684_v60, %v16436_v51  ;;  %v16473_v21 = vmax.f32 %v5253_v15, 0.0  ;;  %v11146_v28 = vld [vmem:[%s17933_s1 + $0x848] sm:$0xff] }
 0x4ee   : > { %5861 = vmatmul.f32.gmra.mxu1 %v5733_v35  ;;  %v6296_v43 = vpop.f32.mrf.mxu2  ;;  %6951 = vmatmul.f32.gmra.mxu3 %v6824_v36  ;;  %v18679_v35 = vld [vmem:[#allocation98_spill] sm:$0xff]  ;;  %v11098_v15 = vld [vmem:[%s17933_s1 + $0x748] sm:$0xff] }
 0x4ef   : > { %v6392_v32 = vadd.f32 %v6296_v43, %v5814_v48  ;;  %7562 = vmatmul.f32.gmra.mxu0 %v7435_v9  ;;  %9264 = vperm.xlu2 %11277, %v11097_v17   ;;  %v6215_v36 = vmul.f32 %v18679_v35, %v16392_v27  ;;  %v18680_v48 = vld [vmem:[#allocation136_spill] sm:$0xff]  ;;  %v18681_v9 = vld [vmem:[#allocation45_spill] sm:$0xff]  ;;  %18685 = vst [vmem:[#allocation110_spill] sm:$0xff] %v16473_v21  ;;  %v5469_v27 = vrot.slane %v16473_v21, 7 }
 0x4f0   : > { %9870 = vperm.xlu1 %11276, %v11144_v52   ;;  %9259 = vperm.xlu0 %11275, %v11096_v49   ;;  %v4542_v17 = vadd.f32 %v18680_v48, %v4059_v4  ;;  %v18682_v43 = vld [vmem:[#allocation21_spill] sm:$0xff]  ;;  %v18686_v52 = vld [vmem:[#allocation154_spill] sm:$0xff]  ;;  %v16479_v4 = vsel %vm339_vm0, %v5465_v12, %v5467_v61  ;;  %v16493_v12 = vpop.permute.xlu2 %8231  ;;  %v18697_v51 = vld [vmem:[#allocation56_spill] sm:$0xff] }
 0x4f1   : > { %v2836_v30 = vadd.f32 %v18682_v43, %v18681_v9  ;;  %v18687_v35 = vld [vmem:[#allocation177_spill] sm:$0xff]  ;;  %18688 = vst [vmem:[#allocation99_spill] sm:$0xff] %v16479_v4  ;;  %v18689_v9 = vld [vmem:[#allocation44_spill] sm:$0xff]  ;;  %v7436_v43 = vmul.f32 %v15900_v54, %v16479_v4  ;;  %v16500_v54 = vld [vmem:[%s17935_s3] ss:$0 sm:$0xff] }
 0x4f2   : > { %v5154_v49 = vadd.f32 %v18686_v52, %v4542_v17  ;;  %v6825_v44 = vmul.f32 %v18687_v35, %v16469_v37  ;;  %v11145_v17 = vld [vmem:[%s17933_s1 + $0x840] sm:$0xff]  ;;  %18690 = vst [vmem:[#allocation40_spill] sm:$0xff] %v16493_v12  ;;  %v18691_v52 = vld [vmem:[#allocation140_spill] sm:$0xff]  ;;  %v16504_v12 = vpop.permute.xlu0 %8236 }
 0x4f3   : > { %v5817_v55 = vpop.f32.mrf.mxu1  ;;  %6346 = vmatmul.f32.gmra.mxu2 %v6215_v36  ;;  %v3448_v36 = vadd.f32 %v18689_v9, %v2836_v30  ;;  %v6556_v30 = vrot.slane %v16430_v38, 1  ;;  %18692 = vst [vmem:[#allocation83_spill] sm:$0xff] %v16504_v12 }
 0x4f4   : > { %v7518_v48 = vpop.f32.mrf.mxu0  ;;  %v5254_v5 = vadd.f32 %v16500_v54, %v5154_v49 }
 0x4f5   : > { %v4060_v35 = vadd.f32 %v18691_v52, %v3448_v36  ;;  %v18696_v52 = vld [vmem:[#allocation71_spill] sm:$0xff]  ;;  %v16515_v41 = vsel %vm1432_vm1, %v6554_v1, %v6556_v30 }
 0x4f6   : > { %5864 = vmatmul.f32.gmra.mxu1 %v5734_v10  ;;  %v6299_v60 = vpop.f32.mrf.mxu2  ;;  %6954 = vmatmul.f32.gmra.mxu3 %v6825_v44  ;;  %v18693_v10 = vld [vmem:[#allocation141_spill] sm:$0xff]  ;;  %v2837_v37 = vadd.f32 %v18697_v51, %v18696_v52  ;;  %18699 = vst [vmem:[#allocation130_spill] sm:$0xff] %v16515_v41 }
 0x4f7   : > { %v6393_v9 = vadd.f32 %v6299_v60, %v5817_v55  ;;  %7565 = vmatmul.f32.gmra.mxu0 %v7436_v43  ;;  %9880 = vperm.xlu2 %11277, %v11146_v28   ;;  %v4543_v44 = vadd.f32 %v18693_v10, %v4060_v35  ;;  %v18694_v55 = vld [vmem:[#allocation122_spill] sm:$0xff]  ;;  %v16509_v28 = vpop.permute.xlu1 %8241  ;;  %v16519_v35 = vmax.f32 %v5254_v5, 0.0  ;;  %v18702_v10 = vld [vmem:[#allocation176_spill] sm:$0xff]  ;;  %v11147_v5 = vld [vmem:[%s17933_s1 + $0x850] sm:$0xff] }
 0x4f8   : > { %9269 = vperm.xlu1 %11276, %v11098_v15   ;;  %9875 = vperm.xlu0 %11275, %v11145_v17   ;;  %v6216_v43 = vmul.f32 %v18694_v55, %v16430_v38  ;;  %18695 = vst [vmem:[#allocation12_spill] sm:$0xff] %v16509_v28  ;;  %v18700_v15 = vld [vmem:[#allocation91_spill] sm:$0xff]  ;;  %v6826_v55 = vmul.f32 %v18702_v10, %v16515_v41  ;;  %v16547_v38 = vpop.permute.xlu2 %8246  ;;  %v18727_v41 = vld [vmem:[#allocation60_spill] sm:$0xff] }
 0x4f9   : > { %v6907_v36 = vpop.f32.mrf.mxu3  ;;  %v5155_v49 = vadd.f32 %v18698_v45, %v4543_v44  ;;  %v5735_v17 = vmul.f32 %v18700_v15, %v16479_v4  ;;  %18701 = vst [vmem:[#allocation164_spill] sm:$0xff] %v16519_v35  ;;  %v11100_v45 = vld [vmem:[%s17933_s1 + $0x758] sm:$0xff]  ;;  %v11099_v44 = vld [vmem:[%s17933_s1 + $0x750] sm:$0xff]  ;;  %v6558_v15 = vrot.slane %v16473_v21, 1  ;;  %v18706_v10 = vld [vmem:[#allocation147_spill] sm:$0xff] }
 0x4fa   : > { %v7003_v60 = vadd.f32 %v6907_v36, %v6392_v32  ;;  %v16524_v32 = vsel %vm339_vm0, %v5467_v61, %v5469_v27  ;;  %v18705_v61 = vld [vmem:[#allocation146_spill] sm:$0xff]  ;;  %18707 = vst [vmem:[#allocation109_spill] sm:$0xff] %v16547_v38 }
 0x4fb   : > { %v5820_v12 = vpop.f32.mrf.mxu1  ;;  %6349 = vmatmul.f32.gmra.mxu2 %v6216_v43  ;;  %18703 = vst [vmem:[#allocation100_spill] sm:$0xff] %v16524_v32  ;;  %v7437_v1 = vmul.f32 %v15908_v19, %v16524_v32  ;;  %v3449_v43 = vadd.f32 %v18705_v61, %v2837_v37  ;;  %v10981_v19 = vld [vmem:[%s17936_s4 + $0x220] sm:$0xff]  ;;  %v18711_v61 = vld [vmem:[#allocation18_spill] sm:$0xff] }
 0x4fc   : > { %v7521_v36 = vpop.f32.mrf.mxu0  ;;  %v16529_v51 = vadd.f32 %v7518_v48, %v7003_v60  ;;  %v5255_v48 = vadd.f32 %v16500_v54, %v5155_v49  ;;  %7770 = vmatpush.msrb.mxu1 %v10981_v19  ;;  %v18716_v19 = vld [vmem:[#allocation169_spill] sm:$0xff] }
 0x4fd   : > { %v4061_v28 = vadd.f32 %v18706_v10, %v3449_v43  ;;  %v16557_v43 = vsel %vm1432_vm1, %v6556_v30, %v6558_v15  ;;  %v11149_v30 = vld [vmem:[%s17933_s1 + $0x860] sm:$0xff] }
 0x4fe   : > { %18704 = vst [vmem:[#allocation102_spill] sm:$0xff] %v16529_v51  ;;  %5867 = vmatmul.f32.gmra.mxu1 %v5735_v17  ;;  %v6302_v52 = vpop.f32.mrf.mxu2  ;;  %6957 = vmatmul.f32.gmra.mxu3 %v6826_v55  ;;  %v5471_v51 = vrot.slane %v16519_v35, 7  ;;  %v18708_v17 = vld [vmem:[#allocation121_spill] sm:$0xff]  ;;  %v16559_v10 = vmax.f32 %v5255_v48, 0.0 }
 0x4ff   : > { %v6394_v60 = vadd.f32 %v6302_v52, %v5820_v12  ;;  %7568 = vmatmul.f32.gmra.mxu0 %v7437_v1  ;;  %9279 = vperm.xlu2 %11277, %v11100_v45   ;;  %v6217_v55 = vmul.f32 %v18708_v17, %v16473_v21  ;;  %v18709_v12 = vld [vmem:[#allocation148_spill] sm:$0xff]  ;;  %v16552_v45 = vpop.permute.xlu0 %8251  ;;  %18713 = vst [vmem:[#allocation37_spill] sm:$0xff] %v16557_v43  ;;  %v18723_v21 = vld [vmem:[#allocation101_spill] sm:$0xff] }
 0x500   : > { %9885 = vperm.xlu1 %11276, %v11147_v5   ;;  %9274 = vperm.xlu0 %11275, %v11099_v44   ;;  %v4544_v49 = vadd.f32 %v18709_v12, %v4061_v28  ;;  %18710 = vst [vmem:[#allocation106_spill] sm:$0xff] %v16552_v45  ;;  %v18712_v52 = vld [vmem:[#allocation76_spill] sm:$0xff]  ;;  %v18715_v44 = vld [vmem:[#allocation30_spill] sm:$0xff]  ;;  %v6827_v17 = vmul.f32 %v18716_v19, %v16557_v43  ;;  %v18726_v43 = vld [vmem:[#allocation43_spill] sm:$0xff] }
 0x501   : > { %v6910_v37 = vpop.f32.mrf.mxu3  ;;  %v2838_v4 = vadd.f32 %v18712_v52, %v18711_v61  ;;  %18714 = vst [vmem:[#allocation53_spill] sm:$0xff] %v16559_v10  ;;  %v5736_v38 = vmul.f32 %v18715_v44, %v16524_v32  ;;  %v18717_v28 = vld [vmem:[#allocation166_spill] sm:$0xff]  ;;  %v11101_v52 = vld [vmem:[%s17933_s1 + $0x760] sm:$0xff] }
 0x502   : > { %v7004_v1 = vadd.f32 %v6910_v37, %v6393_v9  ;;  %v5156_v12 = vadd.f32 %v18717_v28, %v4544_v49  ;;  %v16567_v9 = vsel %vm339_vm0, %v5469_v27, %v5471_v51  ;;  %v16569_v37 = vpop.permute.xlu1 %8256  ;;  %v11148_v27 = vld [vmem:[%s17933_s1 + $0x858] sm:$0xff]  ;;  %v18721_v49 = vld [vmem:[#allocation151_spill] sm:$0xff]  ;;  %v6560_v28 = vrot.slane %v16519_v35, 1 }
 0x503   : > { %v5823_v5 = vpop.f32.mrf.mxu1  ;;  %6352 = vmatmul.f32.gmra.mxu2 %v6217_v55  ;;  %18718 = vst [vmem:[#allocation81_spill] sm:$0xff] %v16567_v9  ;;  %v7438_v55 = vmul.f32 %v15912_v16, %v16567_v9  ;;  %v3450_v44 = vadd.f32 %v18721_v49, %v2838_v4  ;;  %v18722_v16 = vld [vmem:[#allocation152_spill] sm:$0xff]  ;;  %v6218_v4 = vmul.f32 %v18723_v21, %v16519_v35 }
 0x504   : > { %18719 = vst [vmem:[#allocation135_spill] sm:$0xff] %v16569_v37  ;;  %v7524_v61 = vpop.f32.mrf.mxu0  ;;  %v16574_v48 = vadd.f32 %v7521_v36, %v7004_v1  ;;  %v5473_v36 = vrot.slane %v16559_v10, 7  ;;  %v5256_v45 = vadd.f32 %v16500_v54, %v5156_v12 }
 0x505   : > { %v4062_v37 = vadd.f32 %v18722_v16, %v3450_v44 }
 0x506   : > { %18720 = vst [vmem:[#allocation155_spill] sm:$0xff] %v16574_v48  ;;  %5870 = vmatmul.f32.gmra.mxu1 %v5736_v38  ;;  %v6305_v19 = vpop.f32.mrf.mxu2  ;;  %6960 = vmatmul.f32.gmra.mxu3 %v6827_v17  ;;  %v18724_v38 = vld [vmem:[#allocation153_spill] sm:$0xff]  ;;  %v16592_v17 = vpop.permute.xlu2 %8261  ;;  %v16604_v21 = vmax.f32 %v5256_v45, 0.0 }
 0x507   : > { %v6395_v1 = vadd.f32 %v6305_v19, %v5823_v5  ;;  %7571 = vmatmul.f32.gmra.mxu0 %v7438_v55  ;;  %9895 = vperm.xlu2 %11277, %v11149_v30   ;;  %v4545_v49 = vadd.f32 %v18724_v38, %v4062_v37  ;;  %18725 = vst [vmem:[#allocation108_spill] sm:$0xff] %v16592_v17  ;;  %v18732_v37 = vld [vmem:[#allocation172_spill] sm:$0xff]  ;;  %v16609_v19 = vpop.permute.xlu0 %8266 }
 0x508   : > { %9284 = vperm.xlu1 %11276, %v11101_v52   ;;  %9890 = vperm.xlu0 %11275, %v11148_v27   ;;  %v2839_v5 = vadd.f32 %v18727_v41, %v18726_v43  ;;  %v16597_v30 = vsel %vm1432_vm1, %v6558_v15, %v6560_v28  ;;  %v16600_v55 = vsel %vm339_vm0, %v5471_v51, %v5473_v36  ;;  %v18730_v52 = vld [vmem:[#allocation46_spill] sm:$0xff]  ;;  %v11103_v51 = vld [vmem:[%s17933_s1 + $0x770] sm:$0xff]  ;;  %v18736_v43 = vld [vmem:[#allocation156_spill] sm:$0xff] }
 0x509   : > { %v6913_v48 = vpop.f32.mrf.mxu3  ;;  %18728 = vst [vmem:[#allocation112_spill] sm:$0xff] %v16597_v30  ;;  %v5737_v27 = vmul.f32 %v18730_v52, %v16567_v9  ;;  %v5157_v44 = vadd.f32 %v18732_v37, %v4545_v49  ;;  %v7439_v45 = vmul.f32 %v15942_v22, %v16600_v55  ;;  %v11102_v38 = vld [vmem:[%s17933_s1 + $0x768] sm:$0xff]  ;;  %v10980_v22 = vld [vmem:[%s17936_s4 + $0x218] sm:$0xff]  ;;  %v18803_v9 = vld [vmem:[#allocation203_spill] sm:$0xff] }
 0x50a   : > { %v7005_v32 = vadd.f32 %v6913_v48, %v6394_v60  ;;  %18729 = vst [vmem:[#allocation95_spill] sm:$0xff] %v16600_v55  ;;  %v18733_v60 = vld [vmem:[#allocation184_spill] sm:$0xff]  ;;  %v3451_v16 = vadd.f32 %v18736_v43, %v2839_v5  ;;  %v16625_v49 = vpop.permute.xlu1 %8271  ;;  %v6562_v5 = vrot.slane %v16559_v10, 1  ;;  %v5475_v43 = vrot.slane %v16604_v21, 7  ;;  %7771 = vmatpush.msrb.mxu1 %v10980_v22 }
 0x50b   : > { %v5826_v12 = vpop.f32.mrf.mxu1  ;;  %6355 = vmatmul.f32.gmra.mxu2 %v6218_v4  ;;  %18731 = vst [vmem:[#allocation113_spill] sm:$0xff] %v16604_v21  ;;  %v6828_v48 = vmul.f32 %v18733_v60, %v16597_v30  ;;  %v11150_v4 = vld [vmem:[%s17933_s1 + $0x868] sm:$0xff]  ;;  %v5257_v60 = vadd.f32 %v16500_v54, %v5157_v44 }
 0x50c   : > { %18734 = vst [vmem:[#allocation38_spill] sm:$0xff] %v16609_v19  ;;  %v7527_v41 = vpop.f32.mrf.mxu0  ;;  %v16614_v15 = vadd.f32 %v7524_v61, %v7005_v32  ;;  %v18738_v32 = vld [vmem:[#allocation157_spill] sm:$0xff]  ;;  %v18743_v19 = vld [vmem:[#allocation178_spill] sm:$0xff] }
 0x50d   : > { %18737 = vst [vmem:[#allocation90_spill] sm:$0xff] %v16625_v49  ;;  %v4063_v61 = vadd.f32 %v18738_v32, %v3451_v16  ;;  %v18740_v16 = vld [vmem:[#allocation129_spill] sm:$0xff] }
 0x50e   : > { %18735 = vst [vmem:[#allocation48_spill] sm:$0xff] %v16614_v15  ;;  %5873 = vmatmul.f32.gmra.mxu1 %v5737_v27  ;;  %v6308_v52 = vpop.f32.mrf.mxu2  ;;  %6963 = vmatmul.f32.gmra.mxu3 %v6828_v48  ;;  %v18739_v27 = vld [vmem:[#allocation161_spill] sm:$0xff]  ;;  %v6219_v32 = vmul.f32 %v18740_v16, %v16559_v10  ;;  %v16641_v15 = vsel %vm1432_vm1, %v6560_v28, %v6562_v5  ;;  %v16652_v22 = vpop.permute.xlu2 %8276  ;;  %v11152_v28 = vld [vmem:[%s17933_s1 + $0x878] sm:$0xff] }
 0x50f   : > { %v6396_v37 = vadd.f32 %v6308_v52, %v5826_v12  ;;  %7574 = vmatmul.f32.gmra.mxu0 %v7439_v45  ;;  %9294 = vperm.xlu2 %11277, %v11103_v51   ;;  %v4546_v49 = vadd.f32 %v18739_v27, %v4063_v61  ;;  %v18741_v45 = vld [vmem:[#allocation19_spill] sm:$0xff]  ;;  %v18742_v51 = vld [vmem:[#allocation24_spill] sm:$0xff]  ;;  %18744 = vst [vmem:[#allocation139_spill] sm:$0xff] %v16641_v15  ;;  %v16645_v61 = vmax.f32 %v5257_v60, 0.0 }
 0x510   : > { %9900 = vperm.xlu1 %11276, %v11150_v4   ;;  %9289 = vperm.xlu0 %11275, %v11102_v38   ;;  %v2840_v52 = vadd.f32 %v18742_v51, %v18741_v45  ;;  %v18745_v4 = vld [vmem:[#allocation26_spill] sm:$0xff]  ;;  %v18747_v27 = vld [vmem:[#allocation183_spill] sm:$0xff]  ;;  %18749 = vst [vmem:[#allocation119_spill] sm:$0xff] %v16652_v22 }
 0x511   : > { %v6916_v48 = vpop.f32.mrf.mxu3  ;;  %v5158_v17 = vadd.f32 %v18743_v19, %v4546_v49  ;;  %v5738_v38 = vmul.f32 %v18745_v4, %v16600_v55  ;;  %18746 = vst [vmem:[#allocation171_spill] sm:$0xff] %v16645_v61  ;;  %v6829_v16 = vmul.f32 %v18747_v27, %v16641_v15  ;;  %v6564_v49 = vrot.slane %v16604_v21, 1  ;;  %v18751_v45 = vld [vmem:[#allocation163_spill] sm:$0xff]  ;;  %v16669_v4 = vpop.permute.xlu0 %8281 }
 0x512   : > { %v7006_v12 = vadd.f32 %v6916_v48, %v6395_v1  ;;  %v16650_v1 = vsel %vm339_vm0, %v5473_v36, %v5475_v43  ;;  %v11151_v36 = vld [vmem:[%s17933_s1 + $0x870] sm:$0xff]  ;;  %v3452_v51 = vadd.f32 %v18751_v45, %v2840_v52  ;;  %18752 = vst [vmem:[#allocation120_spill] sm:$0xff] %v16669_v4  ;;  %v16674_v10 = vpop.permute.xlu1 %8286  ;;  %v18757_v4 = vld [vmem:[#allocation168_spill] sm:$0xff] }
 0x513   : > { %v5829_v44 = vpop.f32.mrf.mxu1  ;;  %6358 = vmatmul.f32.gmra.mxu2 %v6219_v32  ;;  %18748 = vst [vmem:[#allocation118_spill] sm:$0xff] %v16650_v1  ;;  %v7440_v60 = vmul.f32 %v15946_v63, %v16650_v1  ;;  %v11104_v32 = vld [vmem:[%s17933_s1 + $0x778] sm:$0xff]  ;;  %v18753_v63 = vld [vmem:[#allocation167_spill] sm:$0xff]  ;;  %v16677_v52 = vsel %vm1432_vm1, %v6562_v5, %v6564_v49 }
 0x514   : > { %v7530_v48 = vpop.f32.mrf.mxu0  ;;  %v16657_v19 = vadd.f32 %v7527_v41, %v7006_v12  ;;  %v5258_v12 = vadd.f32 %v16500_v54, %v5158_v17  ;;  %v4064_v22 = vadd.f32 %v18753_v63, %v3452_v51  ;;  %18754 = vst [vmem:[#allocation16_spill] sm:$0xff] %v16674_v10  ;;  %v18762_v10 = vld [vmem:[#allocation185_spill] sm:$0xff] }
 0x515   : > { %18755 = vst [vmem:[#allocation62_spill] sm:$0xff] %v16677_v52 }
 0x516   : > { %18750 = vst [vmem:[#allocation116_spill] sm:$0xff] %v16657_v19  ;;  %5876 = vmatmul.f32.gmra.mxu1 %v5738_v38  ;;  %v6311_v41 = vpop.f32.mrf.mxu2  ;;  %6966 = vmatmul.f32.gmra.mxu3 %v6829_v16  ;;  %v5477_v19 = vrot.slane %v16645_v61, 7  ;;  %v18756_v38 = vld [vmem:[#allocation128_spill] sm:$0xff]  ;;  %v4547_v17 = vadd.f32 %v18757_v4, %v4064_v22  ;;  %v16684_v51 = vmax.f32 %v5258_v12, 0.0 }
 0x517   : > { %v6397_v27 = vadd.f32 %v6311_v41, %v5829_v44  ;;  %7577 = vmatmul.f32.gmra.mxu0 %v7440_v60  ;;  %9910 = vperm.xlu2 %11277, %v11152_v28   ;;  %v6220_v16 = vmul.f32 %v18756_v38, %v16604_v21  ;;  %v18758_v60 = vld [vmem:[#allocation69_spill] sm:$0xff]  ;;  %v18759_v28 = vld [vmem:[#allocation27_spill] sm:$0xff] }
 0x518   : > { %9299 = vperm.xlu1 %11276, %v11104_v32   ;;  %9905 = vperm.xlu0 %11275, %v11151_v36   ;;  %v2841_v41 = vadd.f32 %v18759_v28, %v18758_v60  ;;  %18760 = vst [vmem:[#allocation86_spill] sm:$0xff] %v16684_v51  ;;  %v18761_v32 = vld [vmem:[#allocation89_spill] sm:$0xff]  ;;  %v5159_v5 = vadd.f32 %v18762_v10, %v4547_v17  ;;  %v18764_v38 = vld [vmem:[#allocation179_spill] sm:$0xff]  ;;  %v16708_v17 = vpop.permute.xlu2 %8742 }
 0x519   : > { %v6919_v45 = vpop.f32.mrf.mxu3  ;;  %v5739_v36 = vmul.f32 %v18761_v32, %v16650_v1  ;;  %v16690_v55 = vsel %vm339_vm0, %v5475_v43, %v5477_v19  ;;  %v6830_v22 = vmul.f32 %v18764_v38, %v16677_v52  ;;  %v11153_v10 = vld [vmem:[%s17933_s1 + $0x880] sm:$0xff]  ;;  %v10979_v28 = vld [vmem:[%s17936_s4 + $0x210] sm:$0xff]  ;;  %v18767_v32 = vld [vmem:[#allocation174_spill] sm:$0xff] }
 0x51a   : > { %v7007_v44 = vadd.f32 %v6919_v45, %v6396_v37  ;;  %18763 = vst [vmem:[#allocation145_spill] sm:$0xff] %v16690_v55  ;;  %v11106_v37 = vld [vmem:[%s17933_s1 + $0x788] sm:$0xff]  ;;  %v7441_v12 = vmul.f32 %v15962_v53, %v16690_v55  ;;  %v11105_v43 = vld [vmem:[%s17933_s1 + $0x780] sm:$0xff]  ;;  %v18766_v45 = vld [vmem:[#allocation173_spill] sm:$0xff]  ;;  %7772 = vmatpush.msrb.mxu1 %v10979_v28 }
 0x51b   : > { %v5832_v63 = vpop.f32.mrf.mxu1  ;;  %6361 = vmatmul.f32.gmra.mxu2 %v6220_v16  ;;  %v3453_v16 = vadd.f32 %v18766_v45, %v2841_v41  ;;  %v5259_v41 = vadd.f32 %v16500_v54, %v5159_v5  ;;  %v16717_v45 = vpop.permute.xlu0 %8747  ;;  %v18770_v21 = vld [vmem:[#allocation55_spill] sm:$0xff]  ;;  %v18771_v1 = vld [vmem:[#allocation70_spill] sm:$0xff] }
 0x51c   : > { %v7533_v15 = vpop.f32.mrf.mxu0  ;;  %v16697_v4 = vadd.f32 %v7530_v48, %v7007_v44  ;;  %v6566_v48 = vrot.slane %v16645_v61, 1  ;;  %v5479_v44 = vrot.slane %v16684_v51, 7  ;;  %v2842_v52 = vadd.f32 %v18771_v1, %v18770_v21  ;;  %v11155_v21 = vld [vmem:[%s17933_s1 + $0x890] sm:$0xff] }
 0x51d   : > { %v4065_v38 = vadd.f32 %v18767_v32, %v3453_v16  ;;  %v16734_v28 = vmax.f32 %v5259_v41, 0.0  ;;  %v18779_v41 = vld [vmem:[#allocation180_spill] sm:$0xff] }
 0x51e   : > { %18765 = vst [vmem:[#allocation170_spill] sm:$0xff] %v16697_v4  ;;  %5879 = vmatmul.f32.gmra.mxu1 %v5739_v36  ;;  %v6314_v60 = vpop.f32.mrf.mxu2  ;;  %6969 = vmatmul.f32.gmra.mxu3 %v6830_v22  ;;  %v18768_v22 = vld [vmem:[#allocation107_spill] sm:$0xff]  ;;  %v16727_v16 = vsel %vm1432_vm1, %v6564_v49, %v6566_v48  ;;  %v16730_v5 = vsel %vm339_vm0, %v5477_v19, %v5479_v44  ;;  %v11107_v49 = vld [vmem:[%s17933_s1 + $0x790] sm:$0xff] }
 0x51f   : > { %v6398_v53 = vadd.f32 %v6314_v60, %v5832_v63  ;;  %7580 = vmatmul.f32.gmra.mxu0 %v7441_v12  ;;  %9309 = vperm.xlu2 %11277, %v11106_v37   ;;  %v6221_v4 = vmul.f32 %v18768_v22, %v16645_v61  ;;  %v18769_v63 = vld [vmem:[#allocation175_spill] sm:$0xff]  ;;  %v16722_v37 = vpop.permute.xlu1 %8752  ;;  %18772 = vst [vmem:[#allocation125_spill] sm:$0xff] %v16727_v16 }
 0x520   : > { %9915 = vperm.xlu1 %11276, %v11153_v10   ;;  %9304 = vperm.xlu0 %11275, %v11105_v43   ;;  %v4548_v12 = vadd.f32 %v18769_v63, %v4065_v38  ;;  %18773 = vst [vmem:[#allocation126_spill] sm:$0xff] %v16730_v5  ;;  %v18774_v43 = vld [vmem:[#allocation33_spill] sm:$0xff]  ;;  %v18776_v38 = vld [vmem:[#allocation190_spill] sm:$0xff]  ;;  %v7442_v19 = vmul.f32 %v15983_v47, %v16730_v5  ;;  %v16757_v61 = vpop.permute.xlu2 %8757 }
 0x521   : > { %v6922_v36 = vpop.f32.mrf.mxu3  ;;  %v5740_v32 = vmul.f32 %v18774_v43, %v16690_v55  ;;  %18775 = vst [vmem:[#allocation115_spill] sm:$0xff] %v16734_v28  ;;  %v6831_v22 = vmul.f32 %v18776_v38, %v16727_v16  ;;  %v6568_v43 = vrot.slane %v16684_v51, 1 }
 0x522   : > { %v7008_v60 = vadd.f32 %v6922_v36, %v6397_v27  ;;  %v18777_v27 = vld [vmem:[#allocation191_spill] sm:$0xff] }
 0x523   : > { %v5835_v10 = vpop.f32.mrf.mxu1  ;;  %6364 = vmatmul.f32.gmra.mxu2 %v6221_v4  ;;  %v5160_v36 = vadd.f32 %v18777_v27, %v4548_v12  ;;  %v11154_v4 = vld [vmem:[%s17933_s1 + $0x888] sm:$0xff]  ;;  %v3454_v12 = vadd.f32 %v18779_v41, %v2842_v52  ;;  %v18781_v52 = vld [vmem:[#allocation134_spill] sm:$0xff] }
 0x524   : > { %v7536_v63 = vpop.f32.mrf.mxu0  ;;  %v16742_v1 = vadd.f32 %v7533_v15, %v7008_v60  ;;  %v18780_v60 = vld [vmem:[#allocation181_spill] sm:$0xff]  ;;  %v6222_v41 = vmul.f32 %v18781_v52, %v16684_v51 }
 0x525   : > { %v4066_v47 = vadd.f32 %v18780_v60, %v3454_v12  ;;  %v5260_v27 = vadd.f32 %v16500_v54, %v5160_v36  ;;  %v18785_v36 = vld [vmem:[#allocation74_spill] sm:$0xff]  ;;  %v18787_v52 = vld [vmem:[#allocation77_spill] sm:$0xff] }
 0x526   : > { %18778 = vst [vmem:[#allocation127_spill] sm:$0xff] %v16742_v1  ;;  %5882 = vmatmul.f32.gmra.mxu1 %v5740_v32  ;;  %v6317_v38 = vpop.f32.mrf.mxu2  ;;  %6972 = vmatmul.f32.gmra.mxu3 %v6831_v22  ;;  %v5481_v1 = vrot.slane %v16734_v28, 7  ;;  %v18782_v32 = vld [vmem:[#allocation182_spill] sm:$0xff]  ;;  %v16765_v22 = vpop.permute.xlu0 %8762  ;;  %v5741_v51 = vmul.f32 %v18787_v52, %v16730_v5 }
 0x527   : > { %v6399_v15 = vadd.f32 %v6317_v38, %v5835_v10  ;;  %7583 = vmatmul.f32.gmra.mxu0 %v7442_v19  ;;  %9925 = vperm.xlu2 %11277, %v11155_v21   ;;  %v4549_v16 = vadd.f32 %v18782_v32, %v4066_v47  ;;  %v16763_v10 = vsel %vm1432_vm1, %v6566_v48, %v6568_v43  ;;  %v18784_v19 = vld [vmem:[#allocation22_spill] sm:$0xff]  ;;  %v18786_v38 = vld [vmem:[#allocation189_spill] sm:$0xff]  ;;  %v16774_v47 = vmax.f32 %v5260_v27, 0.0 }
 0x528   : > { %9314 = vperm.xlu1 %11276, %v11107_v49   ;;  %9920 = vperm.xlu0 %11275, %v11154_v4   ;;  %18783 = vst [vmem:[#allocation54_spill] sm:$0xff] %v16763_v10  ;;  %v2843_v12 = vadd.f32 %v18785_v36, %v18784_v19  ;;  %v6832_v60 = vmul.f32 %v18786_v38, %v16763_v10  ;;  %v18789_v48 = vld [vmem:[#allocation197_spill] sm:$0xff]  ;;  %v11109_v19 = vld [vmem:[%s17933_s1 + $0x7a0] sm:$0xff] }
 0x529   : > { %v6925_v55 = vpop.f32.mrf.mxu3  ;;  %18788 = vst [vmem:[#allocation57_spill] sm:$0xff] %v16774_v47  ;;  %v5161_v32 = vadd.f32 %v18789_v48, %v4549_v16  ;;  %v16778_v35 = vsel %vm339_vm0, %v5479_v44, %v5481_v1  ;;  %v11156_v44 = vld [vmem:[%s17933_s1 + $0x898] sm:$0xff]  ;;  %v18792_v38 = vld [vmem:[#allocation187_spill] sm:$0xff]  ;;  %v18820_v30 = vrot.slane %v16774_v47, 7 }
 0x52a   : > { %v7009_v21 = vadd.f32 %v6925_v55, %v6398_v53  ;;  %18790 = vst [vmem:[#allocation82_spill] sm:$0xff] %v16778_v35  ;;  %v16780_v55 = vpop.permute.xlu1 %8767  ;;  %v7443_v27 = vmul.f32 %v15999_v6, %v16778_v35  ;;  %v11108_v16 = vld [vmem:[%s17933_s1 + $0x798] sm:$0xff]  ;;  %v3455_v52 = vadd.f32 %v18792_v38, %v2843_v12  ;;  %v10978_v6 = vld [vmem:[%s17936_s4 + $0x208] sm:$0xff]  ;;  %v18798_v12 = vld [vmem:[#allocation75_spill] sm:$0xff] }
 0x52b   : > { %v5838_v4 = vpop.f32.mrf.mxu1  ;;  %6367 = vmatmul.f32.gmra.mxu2 %v6222_v41  ;;  %v11040_v41 = vld [vmem:[%s17936_s4 + $0x2f8] sm:$0xff]  ;;  %7773 = vmatpush.msrb.mxu1 %v10978_v6  ;;  %v11038_v38 = vld [vmem:[%s17936_s4 + $0x2e8] sm:$0xff] }
 0x52c   : > { %v7539_v53 = vpop.f32.mrf.mxu0  ;;  %v16788_v36 = vadd.f32 %v7536_v63, %v7009_v21  ;;  %8370 = vmatpush.msra.mxu2 %v11040_v41  ;;  %v11039_v63 = vld [vmem:[%s17936_s4 + $0x2f0] sm:$0xff]  ;;  %v18793_v21 = vld [vmem:[#allocation188_spill] sm:$0xff]  ;;  %v5261_v41 = vadd.f32 %v16500_v54, %v5161_v32 }
 0x52d   : > { %v18797_v32 = vld [vmem:[#allocation192_spill] sm:$0xff] }
 0x52e   : > { %18791 = vst [vmem:[#allocation149_spill] sm:$0xff] %v16788_v36  ;;  %5885 = vmatmul.f32.gmra.mxu1 %v5741_v51  ;;  %v6320_v48 = vpop.f32.mrf.mxu2  ;;  %6975 = vmatmul.f32.gmra.mxu3 %v6832_v60  ;;  %v4067_v36 = vadd.f32 %v18793_v21, %v3455_v52  ;;  %v18794_v51 = vrot.slane %v16734_v28, 1  ;;  %v16828_v10 = vmax.f32 %v5261_v41, 0.0 }
 0x52f   : > { %v6400_v49 = vadd.f32 %v6320_v48, %v5838_v4  ;;  %7586 = vmatmul.f32.gmra.mxu0 %v7443_v27  ;;  %9324 = vperm.xlu2 %11277, %v11109_v19   ;;  %v18796_v19 = vld [vmem:[#allocation133_spill] sm:$0xff]  ;;  %v16819_v48 = vpop.permute.xlu2 %8772 }
 0x530   : > { %v16811_v60 = vsel %vm1432_vm1, %v6568_v43, %v18794_v51  ;;  %9930 = vperm.xlu1 %11276, %v11156_v44   ;;  %9319 = vperm.xlu0 %11275, %v11108_v16   ;;  %v6223_v27 = vmul.f32 %v18796_v19, %v16734_v28  ;;  %v4550_v52 = vadd.f32 %v18797_v32, %v4067_v36  ;;  %v18799_v43 = vld [vmem:[#allocation32_spill] sm:$0xff]  ;;  %v18059_v44 = vrot.slane %v16774_v47, 1  ;;  %v18800_v19 = vld [vmem:[#allocation25_spill] sm:$0xff] }
 0x531   : > { %18795 = vst [vmem:[#allocation162_spill] sm:$0xff] %v16811_v60  ;;  %v6928_v4 = vpop.f32.mrf.mxu3  ;;  %8371 = vmatpush.msra.mxu2 %v11039_v63  ;;  %v2844_v51 = vadd.f32 %v18799_v43, %v18798_v12  ;;  %v5742_v6 = vmul.f32 %v18800_v19, %v16778_v35  ;;  %v18801_v63 = vld [vmem:[#allocation186_spill] sm:$0xff]  ;;  %v18804_v32 = vrot.slane %v16774_v47, 7  ;;  %v16836_v12 = vpop.permute.xlu0 %8777 }
 0x532   : > { %v7010_v21 = vadd.f32 %v6928_v4, %v6399_v15  ;;  %v6833_v5 = vmul.f32 %v18801_v63, %v16811_v60  ;;  %18802 = vst [vmem:[#allocation131_spill] sm:$0xff] %v16828_v10  ;;  %v5162_v36 = vadd.f32 %v18803_v9, %v4550_v52  ;;  %v11110_v9 = vld [vmem:[%s17933_s1 + $0x7a8] sm:$0xff]  ;;  %v18807_v52 = vld [vmem:[#allocation194_spill] sm:$0xff]  ;;  %v16852_v63 = vpop.permute.xlu1 %8782  ;;  %v18819_v60 = vrot.slane %v16828_v10, 7 }
 0x533   : > { %v5841_v16 = vpop.f32.mrf.mxu1  ;;  %6370 = vmatmul.f32.gmra.mxu2 %v6223_v27  ;;  %v16834_v15 = vsel %vm339_vm0, %v5481_v1, %v18804_v32  ;;  %v11158_v27 = vld [vmem:[%s17933_s1 + $0x8a8] sm:$0xff]  ;;  %v11157_v1 = vld [vmem:[%s17933_s1 + $0x8a0] sm:$0xff]  ;;  %v3456_v19 = vadd.f32 %v18807_v52, %v2844_v51  ;;  %v18808_v51 = vld [vmem:[#allocation198_spill] sm:$0xff] }
 0x534   : > { %18805 = vst [vmem:[#allocation132_spill] sm:$0xff] %v16834_v15  ;;  %v7542_v4 = vpop.f32.mrf.mxu0  ;;  %8372 = vmatpush.msra.mxu2 %v11038_v38  ;;  %v16841_v43 = vadd.f32 %v7539_v53, %v7010_v21  ;;  %v7444_v41 = vmul.f32 %v16012_v46, %v16834_v15  ;;  %v11037_v53 = vld [vmem:[%s17936_s4 + $0x2e0] sm:$0xff]  ;;  %v11088_v38 = vld [vmem:[%s17936_s4 + $0x378] sm:$0xff] }
 0x535   : > { %v11136_v21 = vld [vmem:[%s17936_s4 + $0x3f8] sm:$0xff]  ;;  %8981 = vmatpush.msra.mxu3 %v11088_v38  ;;  %v11034_v38 = vld [vmem:[%s17936_s4 + $0x2c8] sm:$0xff] }
 0x536   : > { %18806 = vst [vmem:[#allocation98_spill] sm:$0xff] %v16841_v43  ;;  %5888 = vmatmul.f32.gmra.mxu1 %v5742_v6  ;;  %v6323_v32 = vpop.f32.mrf.mxu2  ;;  %6978 = vmatmul.f32.gmra.mxu3 %v6833_v5  ;;  %v4068_v6 = vadd.f32 %v18808_v51, %v3456_v19  ;;  %v18809_v5 = vrot.slane %v16734_v28, 1  ;;  %v11036_v19 = vld [vmem:[%s17936_s4 + $0x2d8] sm:$0xff]  ;;  %v18812_v51 = vld [vmem:[#allocation199_spill] sm:$0xff] }
 0x537   : > { %v16857_v46 = vadd.f32 %v6323_v32, %v5841_v16  ;;  %7589 = vmatmul.f32.gmra.mxu0 %v7444_v41  ;;  %9940 = vperm.xlu2 %11277, %v11158_v27   ;;  %v5262_v16 = vadd.f32 %v16500_v54, %v5162_v36  ;;  %v18811_v32 = vld [vmem:[#allocation114_spill] sm:$0xff]  ;;  %v11087_v36 = vld [vmem:[%s17936_s4 + $0x370] sm:$0xff] }
 0x538   : > { %v16871_v52 = vsel %vm1432_vm1, %v18809_v5, %v18059_v44  ;;  %9329 = vperm.xlu1 %11276, %v11110_v9   ;;  %9935 = vperm.xlu0 %11275, %v11157_v1   ;;  %v6224_v43 = vmul.f32 %v18811_v32, %v16774_v47  ;;  %v4551_v28 = vadd.f32 %v18812_v51, %v4068_v6  ;;  %v11135_v9 = vld [vmem:[%s17936_s4 + $0x3f0] sm:$0xff]  ;;  %v18813_v1 = vld [vmem:[#allocation23_spill] sm:$0xff]  ;;  %v18814_v32 = vld [vmem:[#allocation36_spill] sm:$0xff] }
 0x539   : > { %18810 = vst [vmem:[#allocation136_spill] sm:$0xff] %v16871_v52  ;;  %v6931_v41 = vpop.f32.mrf.mxu3  ;;  %8373 = vmatpush.msra.mxu2 %v11037_v53  ;;  %9463 = vmatpush.msra.mxu0 %v11136_v21  ;;  %v2845_v53 = vadd.f32 %v18814_v32, %v18813_v1  ;;  %v18815_v44 = vld [vmem:[#allocation196_spill] sm:$0xff]  ;;  %v16894_v6 = vmax.f32 %v5262_v16, 0.0  ;;  %v16902_v1 = vsel %vm339_vm0, %v18820_v30, %v18819_v60  ;;  %v11159_v30 = vld [vmem:[%s17933_s1 + $0x8b0] sm:$0xff] }
 0x53a   : > { %v7011_v5 = vadd.f32 %v6931_v41, %v6400_v49  ;;  %v6834_v27 = vmul.f32 %v18815_v44, %v16871_v52  ;;  %v18816_v49 = vld [vmem:[#allocation47_spill] sm:$0xff]  ;;  %8982 = vmatpush.msra.mxu3 %v11087_v36  ;;  %v18818_v41 = vld [vmem:[#allocation208_spill] sm:$0xff]  ;;  %18821 = vst [vmem:[#allocation21_spill] sm:$0xff] %v16902_v1  ;;  %v16904_v44 = vpop.permute.xlu2 %8787  ;;  %v7445_v36 = vmul.f32 %v16035_v62, %v16902_v1  ;;  %v11111_v60 = vld [vmem:[%s17933_s1 + $0x7b0] sm:$0xff] }
 0x53b   : > { %v5844_v35 = vpop.f32.mrf.mxu1  ;;  %6373 = vmatmul.f32.gmra.mxu2 %v6224_v43  ;;  %v5743_v21 = vmul.f32 %v18816_v49, %v16834_v15  ;;  %18817 = vst [vmem:[#allocation45_spill] sm:$0xff] %v16894_v6  ;;  %v5163_v51 = vadd.f32 %v18818_v41, %v4551_v28  ;;  %v11112_v43 = vld [vmem:[%s17933_s1 + $0x7b8] sm:$0xff]  ;;  %9464 = vmatpush.msra.mxu0 %v11135_v9  ;;  %v11086_v28 = vld [vmem:[%s17936_s4 + $0x368] sm:$0xff]  ;;  %v16923_v49 = vpop.permute.xlu0 %8792  ;;  %v11035_v62 = vld [vmem:[%s17936_s4 + $0x2d0] sm:$0xff] }
 0x53c   : > { %v7545_v32 = vpop.f32.mrf.mxu0  ;;  %8374 = vmatpush.msra.mxu2 %v11036_v19  ;;  %v16912_v16 = vadd.f32 %v7542_v4, %v7011_v5  ;;  %8983 = vmatpush.msra.mxu3 %v11086_v28  ;;  %v18823_v19 = vld [vmem:[#allocation204_spill] sm:$0xff] }
 0x53d   : > { %v3457_v9 = vadd.f32 %v18823_v19, %v2845_v53  ;;  %v11134_v4 = vld [vmem:[%s17936_s4 + $0x3e8] sm:$0xff]  ;;  %v11085_v53 = vld [vmem:[%s17936_s4 + $0x360] sm:$0xff]  ;;  %v5263_v19 = vadd.f32 %v16500_v54, %v5163_v51  ;;  %v18829_v51 = vld [vmem:[#allocation138_spill] sm:$0xff] }
 0x53e   : > { %18822 = vst [vmem:[#allocation92_spill] sm:$0xff] %v16912_v16  ;;  %5891 = vmatmul.f32.gmra.mxu1 %v5743_v21  ;;  %v6326_v41 = vpop.f32.mrf.mxu2  ;;  %6981 = vmatmul.f32.gmra.mxu3 %v6834_v27  ;;  %v10977_v27 = vld [vmem:[%s17936_s4 + $0x200] sm:$0xff]  ;;  %v18824_v21 = vld [vmem:[#allocation205_spill] sm:$0xff]  ;;  %v18825_v16 = vrot.slane %v16828_v10, 1 }
 0x53f   : > { %v16931_v5 = vadd.f32 %v6326_v41, %v5844_v35  ;;  %7592 = vmatmul.f32.gmra.mxu0 %v7445_v36  ;;  %9339 = vperm.xlu2 %11277, %v11112_v43   ;;  %v4069_v28 = vadd.f32 %v18824_v21, %v3457_v9  ;;  %v18826_v35 = vrot.slane %v16774_v47, 1  ;;  %v16949_v36 = vpop.permute.xlu1 %8797  ;;  %v11133_v41 = vld [vmem:[%s17936_s4 + $0x3e0] sm:$0xff]  ;;  %v6225_v21 = vmul.f32 %v18829_v51, %v16828_v10  ;;  %v11132_v51 = vld [vmem:[%s17936_s4 + $0x3d8] sm:$0xff]  ;;  %v18831_v47 = vld [vmem:[#allocation28_spill] sm:$0xff] }
 0x540   : > { %18828 = vst [vmem:[#allocation177_spill] sm:$0xff] %v16949_v36  ;;  %9945 = vperm.xlu1 %11276, %v11159_v30   ;;  %9334 = vperm.xlu0 %11275, %v11111_v60   ;;  %v18830_v30 = vld [vmem:[#allocation206_spill] sm:$0xff]  ;;  %v5744_v15 = vmul.f32 %v18831_v47, %v16902_v1  ;;  %v16971_v36 = vmax.f32 %v5263_v19, 0.0  ;;  %v11161_v47 = vld [vmem:[%s17933_s1 + $0x8c0] sm:$0xff] }
 0x541   : > { %v16947_v43 = vsel %vm1432_vm1, %v18826_v35, %v18825_v16  ;;  %v6934_v9 = vpop.f32.mrf.mxu3  ;;  %8375 = vmatpush.msra.mxu2 %v11035_v62  ;;  %9465 = vmatpush.msra.mxu0 %v11134_v4  ;;  %v11084_v16 = vld [vmem:[%s17936_s4 + $0x358] sm:$0xff]  ;;  %v4552_v60 = vadd.f32 %v18830_v30, %v4069_v28  ;;  %v18832_v4 = vld [vmem:[#allocation195_spill] sm:$0xff]  ;;  %v18834_v28 = vld [vmem:[#allocation209_spill] sm:$0xff] }
 0x542   : > { %18827 = vst [vmem:[#allocation154_spill] sm:$0xff] %v16947_v43  ;;  %v7012_v35 = vadd.f32 %v6934_v9, %v16857_v46  ;;  %8984 = vmatpush.msra.mxu3 %v11085_v53  ;;  %7774 = vmatpush.msrb.mxu1 %v10977_v27  ;;  %v6835_v52 = vmul.f32 %v18832_v4, %v16947_v43  ;;  %v18835_v46 = vrot.slane %v16894_v6, 7  ;;  %v18836_v53 = vrot.slane %v16828_v10, 7  ;;  %v11160_v4 = vld [vmem:[%s17933_s1 + $0x8b8] sm:$0xff] }
 0x543   : > { %v5847_v62 = vpop.f32.mrf.mxu1  ;;  %6376 = vmatmul.f32.gmra.mxu2 %v6225_v21  ;;  %9466 = vmatpush.msra.mxu0 %v11133_v41  ;;  %18833 = vst [vmem:[#allocation44_spill] sm:$0xff] %v16971_v36  ;;  %v5164_v30 = vadd.f32 %v18834_v28, %v4552_v60  ;;  %v18070_v41 = vrot.slane %v16894_v6, 1  ;;  %v11113_v60 = vld [vmem:[%s17933_s1 + $0x7c0] sm:$0xff]  ;;  %v16995_v28 = vpop.permute.xlu2 %8802 }
 0x544   : > { %v16979_v27 = vsel %vm339_vm0, %v18836_v53, %v18835_v46  ;;  %v7548_v9 = vpop.f32.mrf.mxu0  ;;  %8376 = vmatpush.msra.mxu2 %v11034_v38  ;;  %8985 = vmatpush.msra.mxu3 %v11084_v16  ;;  %v16984_v21 = vadd.f32 %v7545_v32, %v7012_v35  ;;  %v11083_v32 = vld [vmem:[%s17936_s4 + $0x350] sm:$0xff]  ;;  %v11082_v46 = vld [vmem:[%s17936_s4 + $0x348] sm:$0xff] }
 0x545   : > { %18837 = vst [vmem:[#allocation140_spill] sm:$0xff] %v16979_v27  ;;  %v7446_v19 = vmul.f32 %v16049_v59, %v16979_v27  ;;  %9467 = vmatpush.msra.mxu0 %v11132_v51  ;;  %v11033_v59 = vld [vmem:[%s17936_s4 + $0x2c0] sm:$0xff]  ;;  %v11131_v35 = vld [vmem:[%s17936_s4 + $0x3d0] sm:$0xff]  ;;  %v5264_v51 = vadd.f32 %v16500_v54, %v5164_v30 }
 0x546   : > { %18838 = vst [vmem:[#allocation141_spill] sm:$0xff] %v16984_v21  ;;  %5894 = vmatmul.f32.gmra.mxu1 %v5744_v15  ;;  %v6329_v38 = vpop.f32.mrf.mxu2  ;;  %6984 = vmatmul.f32.gmra.mxu3 %v6835_v52  ;;  %v18073_v15 = vrot.slane %v16971_v36, 7  ;;  %v17008_v52 = vpop.permute.xlu0 %8807  ;;  %v18841_v54 = vld [vmem:[#allocation137_spill] sm:$0xff]  ;;  %v18844_v21 = vrot.slane %v16894_v6, 7 }
 0x547   : > { %v6403_v16 = vadd.f32 %v6329_v38, %v5847_v62  ;;  %7595 = vmatmul.f32.gmra.mxu0 %v7446_v19  ;;  %9955 = vperm.xlu2 %11277, %v11161_v47   ;;  %v18839_v62 = vrot.slane %v16828_v10, 1  ;;  %v6226_v30 = vmul.f32 %v18841_v54, %v16894_v6  ;;  %v11032_v19 = vld [vmem:[%s17936_s4 + $0x2b8] sm:$0xff] }
 0x548   : > { %9344 = vperm.xlu1 %11276, %v11113_v60   ;;  %9950 = vperm.xlu0 %11275, %v11160_v4   ;;  %v11130_v60 = vld [vmem:[%s17936_s4 + $0x3c8] sm:$0xff]  ;;  %v17028_v4 = vpop.permute.xlu1 %8812  ;;  %v17043_v10 = vsel %vm339_vm0, %v18844_v21, %v18073_v15 }
 0x549   : > { %v17018_v53 = vsel %vm1432_vm1, %v18839_v62, %v18070_v41  ;;  %v6937_v47 = vpop.f32.mrf.mxu3  ;;  %8377 = vmatpush.msra.mxu2 %v11033_v59  ;;  %8986 = vmatpush.msra.mxu3 %v11083_v32  ;;  %v11081_v62 = vld [vmem:[%s17936_s4 + $0x340] sm:$0xff]  ;;  %v18842_v59 = vld [vmem:[#allocation20_spill] sm:$0xff]  ;;  %v17036_v32 = vmax.f32 %v5264_v51, 0.0  ;;  %18845 = vst [vmem:[#allocation56_spill] sm:$0xff] %v17043_v10  ;;  %v7447_v51 = vmul.f32 %v16058_v18, %v17043_v10 }
 0x54a   : > { %18840 = vst [vmem:[#allocation122_spill] sm:$0xff] %v17018_v53  ;;  %v7013_v38 = vadd.f32 %v6937_v47, %v16931_v5  ;;  %9468 = vmatpush.msra.mxu0 %v11131_v35  ;;  %v5745_v41 = vmul.f32 %v18842_v59, %v16979_v27  ;;  %v18846_v35 = vld [vmem:[#allocation193_spill] sm:$0xff]  ;;  %v6578_v59 = vrot.slane %v16971_v36, 1  ;;  %v11114_v21 = vld [vmem:[%s17933_s1 + $0x7c8] sm:$0xff]  ;;  %v11129_v18 = vld [vmem:[%s17936_s4 + $0x3c0] sm:$0xff] }
 0x54b   : > { %v5850_v54 = vpop.f32.mrf.mxu1  ;;  %6379 = vmatmul.f32.gmra.mxu2 %v6226_v30  ;;  %8987 = vmatpush.msra.mxu3 %v11082_v46  ;;  %18843 = vst [vmem:[#allocation71_spill] sm:$0xff] %v17036_v32  ;;  %v6836_v47 = vmul.f32 %v18846_v35, %v17018_v53  ;;  %v11162_v30 = vld [vmem:[%s17933_s1 + $0x8c8] sm:$0xff]  ;;  %v11067_v35 = vld [vmem:[%s17933_s1 + $0x6d0] sm:$0xff] }
 0x54c   : > { %v7551_v5 = vpop.f32.mrf.mxu0  ;;  %8378 = vmatpush.msra.mxu2 %v11032_v19  ;;  %9469 = vmatpush.msra.mxu0 %v11130_v60  ;;  %v17050_v46 = vadd.f32 %v7548_v9, %v7013_v38  ;;  %v11031_v9 = vld [vmem:[%s17936_s4 + $0x2b0] sm:$0xff]  ;;  %v11080_v60 = vld [vmem:[%s17936_s4 + $0x338] sm:$0xff]  ;;  %v5491_v38 = vrot.slane %v17036_v32, 7  ;;  %v11030_v27 = vld [vmem:[%s17936_s4 + $0x2a8] sm:$0xff] }
 0x54d   : > { %8988 = vmatpush.msra.mxu3 %v11081_v62  ;;  %v17074_v62 = vpop.permute.xlu2 %8817 }
 0x54e   : > { %18847 = vst [vmem:[#allocation160_spill] sm:$0xff] %v17050_v46  ;;  %5897 = vmatmul.f32.gmra.mxu1 %v5745_v41  ;;  %v6332_v15 = vpop.f32.mrf.mxu2  ;;  %6987 = vmatmul.f32.gmra.mxu3 %v6836_v47  ;;  %v11184_v41 = vld [vmem:[%s17936_s4 + $0x478] sm:$0xff] }
 0x54f   : > { %v6404_v19 = vadd.f32 %v6332_v15, %v5850_v54  ;;  %7598 = vmatmul.f32.gmra.mxu0 %v7447_v51  ;;  %9960 = vperm.xlu2 %11277, %v11162_v30   ;;  %v11128_v15 = vld [vmem:[%s17936_s4 + $0x3b8] sm:$0xff]  ;;  %v18848_v54 = vrot.slane %v16894_v6, 1  ;;  %v18849_v51 = vld [vmem:[#allocation124_spill] sm:$0xff] }
 0x550   : > { %9349 = vperm.xlu1 %11276, %v11114_v21   ;;  %8872 = vperm.xlu0 %11275, %v11067_v35   ;;  %v6227_v46 = vmul.f32 %v18849_v51, %v16971_v36  ;;  %v11079_v21 = vld [vmem:[%s17936_s4 + $0x330] sm:$0xff]  ;;  %v17092_v35 = vpop.permute.xlu0 %8822  ;;  %v17104_v43 = vpop.permute.xlu1 %8827 }
 0x551   : > { %v17082_v47 = vsel %vm1432_vm1, %v18848_v54, %v6578_v59  ;;  %v6940_v30 = vpop.f32.mrf.mxu3  ;;  %8379 = vmatpush.msra.mxu2 %v11031_v9  ;;  %9470 = vmatpush.msra.mxu0 %v11129_v18  ;;  %v11127_v54 = vld [vmem:[%s17936_s4 + $0x3b0] sm:$0xff]  ;;  %v18850_v9 = vld [vmem:[#allocation80_spill] sm:$0xff]  ;;  %v18851_v18 = vrot.slane %v16971_v36, 7 }
 0x552   : > { %v7014_v6 = vadd.f32 %v6940_v30, %v6403_v16  ;;  %8989 = vmatpush.msra.mxu3 %v11080_v60  ;;  %10074 = vmatpush.msra.mxu1 %v11184_v41  ;;  %v5746_v53 = vmul.f32 %v18850_v9, %v17043_v10  ;;  %v18853_v60 = vld [vmem:[#allocation202_spill] sm:$0xff]  ;;  %v11163_v41 = vld [vmem:[%s17933_s1 + $0x8d0] sm:$0xff]  ;;  %v6580_v9 = vrot.slane %v17036_v32, 1 }
 0x553   : > { %v5853_v51 = vpop.f32.mrf.mxu1  ;;  %6382 = vmatmul.f32.gmra.mxu2 %v6227_v46  ;;  %9471 = vmatpush.msra.mxu0 %v11128_v15  ;;  %v17102_v1 = vsel %vm339_vm0, %v18851_v18, %v5491_v38  ;;  %v6837_v30 = vmul.f32 %v18853_v60, %v17082_v47  ;;  %v11115_v18 = vld [vmem:[%s17933_s1 + $0x7d0] sm:$0xff]  ;;  %v11068_v60 = vld [vmem:[%s17933_s1 + $0x6d8] sm:$0xff] }
 0x554   : > { %18852 = vst [vmem:[#allocation91_spill] sm:$0xff] %v17102_v1  ;;  %v7554_v16 = vpop.f32.mrf.mxu0  ;;  %8380 = vmatpush.msra.mxu2 %v11030_v27  ;;  %8990 = vmatpush.msra.mxu3 %v11079_v21  ;;  %v17111_v46 = vadd.f32 %v7551_v5, %v7014_v6  ;;  %v7448_v15 = vmul.f32 %v16090_v14, %v17102_v1  ;;  %v11029_v6 = vld [vmem:[%s17936_s4 + $0x2a0] sm:$0xff]  ;;  %v11078_v14 = vld [vmem:[%s17936_s4 + $0x328] sm:$0xff] }
 0x555   : > { %9472 = vmatpush.msra.mxu0 %v11127_v54  ;;  %v11126_v5 = vld [vmem:[%s17936_s4 + $0x3a8] sm:$0xff]  ;;  %v17135_v21 = vsel %vm1432_vm1, %v6578_v59, %v6580_v9  ;;  %v11076_v59 = vld [vmem:[%s17936_s4 + $0x318] sm:$0xff] }
 0x556   : > { %18854 = vst [vmem:[#allocation176_spill] sm:$0xff] %v17111_v46  ;;  %5900 = vmatmul.f32.gmra.mxu1 %v5746_v53  ;;  %v6335_v36 = vpop.f32.mrf.mxu2  ;;  %6990 = vmatmul.f32.gmra.mxu3 %v6837_v30  ;;  %v11077_v53 = vld [vmem:[%s17936_s4 + $0x320] sm:$0xff]  ;;  %v18856_v30 = vld [vmem:[#allocation144_spill] sm:$0xff] }
 0x557   : > { %v6405_v27 = vadd.f32 %v6335_v36, %v5853_v51  ;;  %7601 = vmatmul.f32.gmra.mxu0 %v7448_v15  ;;  %9965 = vperm.xlu2 %11277, %v11163_v41   ;;  %18855 = vst [vmem:[#allocation146_spill] sm:$0xff] %v17135_v21  ;;  %v6228_v46 = vmul.f32 %v18856_v30, %v17036_v32  ;;  %v11028_v36 = vld [vmem:[%s17936_s4 + $0x298] sm:$0xff]  ;;  %v11125_v51 = vld [vmem:[%s17936_s4 + $0x3a0] sm:$0xff]  ;;  %v17145_v41 = vpop.permute.xlu2 %8832 }
 0x558   : > { %9354 = vperm.xlu1 %11276, %v11115_v18   ;;  %8877 = vperm.xlu0 %11275, %v11068_v60   ;;  %v18857_v60 = vld [vmem:[#allocation35_spill] sm:$0xff]  ;;  %v17157_v32 = vpop.permute.xlu0 %8837 }
 0x559   : > { %v6943_v54 = vpop.f32.mrf.mxu3  ;;  %8381 = vmatpush.msra.mxu2 %v11029_v6  ;;  %8991 = vmatpush.msra.mxu3 %v11078_v14  ;;  %v5747_v6 = vmul.f32 %v18857_v60, %v17102_v1  ;;  %v18858_v14 = vrot.slane %v15785_v7, 7  ;;  %v11116_v60 = vld [vmem:[%s17933_s1 + $0x7d8] sm:$0xff]  ;;  %v18863_v1 = vld [vmem:[#allocation200_spill] sm:$0xff] }
 0x55a   : > { %v7015_v15 = vadd.f32 %v6943_v54, %v6404_v19  ;;  %9473 = vmatpush.msra.mxu0 %v11126_v5  ;;  %v18859_v19 = vld [vmem:[#allocation201_spill] sm:$0xff]  ;;  %v11164_v54 = vld [vmem:[%s17933_s1 + $0x8d8] sm:$0xff] }
 0x55b   : > { %v5856_v18 = vpop.f32.mrf.mxu1  ;;  %6385 = vmatmul.f32.gmra.mxu2 %v6228_v46  ;;  %8992 = vmatpush.msra.mxu3 %v11077_v53  ;;  %v17155_v30 = vsel %vm339_vm0, %v5491_v38, %v18858_v14  ;;  %v6838_v5 = vmul.f32 %v18859_v19, %v17135_v21  ;;  %v6582_v38 = vrot.slane %v15785_v7, 1  ;;  %v11069_v14 = vld [vmem:[%s17933_s1 + $0x6e0] sm:$0xff]  ;;  %v17175_v19 = vpop.permute.xlu1 %8842 }
 0x55c   : > { %v7557_v10 = vpop.f32.mrf.mxu0  ;;  %8382 = vmatpush.msra.mxu2 %v11028_v36  ;;  %9474 = vmatpush.msra.mxu0 %v11125_v51  ;;  %v17164_v46 = vadd.f32 %v7554_v16, %v7015_v15  ;;  %v7449_v53 = vmul.f32 %v16096_v34, %v17155_v30  ;;  %v11027_v34 = vld [vmem:[%s17936_s4 + $0x290] sm:$0xff]  ;;  %v11124_v16 = vld [vmem:[%s17936_s4 + $0x398] sm:$0xff] }
 0x55d   : > { %8993 = vmatpush.msra.mxu3 %v11076_v59  ;;  %v11075_v15 = vld [vmem:[%s17936_s4 + $0x310] sm:$0xff] }
 0x55e   : > { %18860 = vst [vmem:[#allocation147_spill] sm:$0xff] %v17164_v46  ;;  %5903 = vmatmul.f32.gmra.mxu1 %v5747_v6  ;;  %v6338_v36 = vpop.f32.mrf.mxu2  ;;  %6993 = vmatmul.f32.gmra.mxu3 %v6838_v5  ;;  %v11183_v59 = vld [vmem:[%s17936_s4 + $0x470] sm:$0xff]  ;;  %v17193_v5 = vsel %vm1432_vm1, %v6580_v9, %v6582_v38  ;;  %v11122_v9 = vld [vmem:[%s17936_s4 + $0x388] sm:$0xff] }
 0x55f   : > { %v6406_v51 = vadd.f32 %v6338_v36, %v5856_v18  ;;  %7604 = vmatmul.f32.gmra.mxu0 %v7449_v53  ;;  %9970 = vperm.xlu2 %11277, %v11164_v54   ;;  %v11123_v6 = vld [vmem:[%s17936_s4 + $0x390] sm:$0xff]  ;;  %v18861_v54 = vld [vmem:[#allocation143_spill] sm:$0xff]  ;;  %v11026_v36 = vld [vmem:[%s17936_s4 + $0x288] sm:$0xff]  ;;  %v6839_v21 = vmul.f32 %v18863_v1, %v17193_v5 }
 0x560   : > { %9359 = vperm.xlu1 %11276, %v11116_v60   ;;  %8882 = vperm.xlu0 %11275, %v11069_v14   ;;  %v6229_v53 = vmul.f32 %v18861_v54, %v15785_v7  ;;  %v11074_v60 = vld [vmem:[%s17936_s4 + $0x308] sm:$0xff]  ;;  %v18862_v7 = vld [vmem:[#allocation31_spill] sm:$0xff]  ;;  %v17225_v1 = vpop.permute.xlu0 %8852 }
 0x561   : > { %v6946_v18 = vpop.f32.mrf.mxu3  ;;  %8383 = vmatpush.msra.mxu2 %v11027_v34  ;;  %9475 = vmatpush.msra.mxu0 %v11124_v16  ;;  %v17206_v34 = vpop.permute.xlu2 %8847  ;;  %v5748_v16 = vmul.f32 %v18862_v7, %v17155_v30  ;;  %v11070_v7 = vld [vmem:[%s17933_s1 + $0x6e8] sm:$0xff] }
 0x562   : > { %v7016_v14 = vadd.f32 %v6946_v18, %v6405_v27  ;;  %8994 = vmatpush.msra.mxu3 %v11075_v15  ;;  %10075 = vmatpush.msra.mxu1 %v11183_v59  ;;  %v11165_v27 = vld [vmem:[%s17933_s1 + $0x8e0] sm:$0xff]  ;;  %v7450_v59 = vmul.f32 %v16101_v58, %v15802_v13 }
 0x563   : > { %v5859_v46 = vpop.f32.mrf.mxu1  ;;  %6388 = vmatmul.f32.gmra.mxu2 %v6229_v53  ;;  %9476 = vmatpush.msra.mxu0 %v11123_v6  ;;  %v11117_v6 = vld [vmem:[%s17933_s1 + $0x7e0] sm:$0xff] }
 0x564   : > { %v7560_v54 = vpop.f32.mrf.mxu0  ;;  %8384 = vmatpush.msra.mxu2 %v11026_v36  ;;  %8995 = vmatpush.msra.mxu3 %v11074_v60  ;;  %v17215_v15 = vadd.f32 %v7557_v10, %v7016_v14  ;;  %v11025_v10 = vld [vmem:[%s17936_s4 + $0x280] sm:$0xff]  ;;  %v17236_v60 = vpop.permute.xlu1 %8857  ;;  %v18865_v14 = vrot.slane %v15788_v0, 1 }
 0x565   : > { %9477 = vmatpush.msra.mxu0 %v11122_v9  ;;  %v11073_v58 = vld [vmem:[%s17936_s4 + $0x300] sm:$0xff] }
 0x566   : > { %18864 = vst [vmem:[#allocation121_spill] sm:$0xff] %v17215_v15  ;;  %5906 = vmatmul.f32.gmra.mxu1 %v5748_v16  ;;  %v6341_v18 = vpop.f32.mrf.mxu2  ;;  %6996 = vmatmul.f32.gmra.mxu3 %v6839_v21  ;;  %v11121_v36 = vld [vmem:[%s17936_s4 + $0x380] sm:$0xff]  ;;  %v8289_v21 = vmul.f32 %v16142_v3, %v15915_v50  ;;  %v17243_v9 = vsel %vm1432_vm1, %v6582_v38, %v18865_v14  ;;  %v11166_v3 = vld [vmem:[%s17933_s1 + $0x8e8] sm:$0xff] }
 0x567   : > { %v6407_v53 = vadd.f32 %v6341_v18, %v5859_v46  ;;  %7607 = vmatmul.f32.gmra.mxu0 %v7450_v59  ;;  %9975 = vperm.xlu2 %11277, %v11165_v27   ;;  %v18866_v18 = vld [vmem:[#allocation207_spill] sm:$0xff]  ;;  %v7451_v38 = vmul.f32 %v16137_v20, %v15837_v42  ;;  %v11182_v20 = vld [vmem:[%s17936_s4 + $0x468] sm:$0xff]  ;;  %v8290_v14 = vmul.f32 %v16159_v40, %v15949_v23  ;;  %v11119_v40 = vld [vmem:[%s17933_s1 + $0x7f0] sm:$0xff] }
 0x568   : > { %9364 = vperm.xlu1 %11276, %v11117_v6   ;;  %8887 = vperm.xlu0 %11275, %v11070_v7   ;;  %v6840_v6 = vmul.f32 %v18866_v18, %v17243_v9 }
 0x569   : > { %v6949_v16 = vpop.f32.mrf.mxu3  ;;  %8385 = vmatpush.msra.mxu2 %v11025_v10  ;;  %8996 = vmatpush.msra.mxu3 %v11073_v58  ;;  %v11071_v10 = vld [vmem:[%s17933_s1 + $0x6f0] sm:$0xff]  ;;  %v17260_v58 = vpop.permute.xlu2 %8862 }
 0x56a   : > { %v7017_v46 = vadd.f32 %v6949_v16, %v6406_v51  ;;  %9478 = vmatpush.msra.mxu0 %v11121_v36  ;;  %v11118_v51 = vld [vmem:[%s17933_s1 + $0x7e8] sm:$0xff]  ;;  %10076 = vmatpush.msra.mxu1 %v11182_v20 }
 0x56b   : > { %v5862_v27 = vpop.f32.mrf.mxu1  ;;  %8386 = vmatmul.f32.vlgmr.msra.gmra.mxu2 %v8289_v21 }
 0x56c   : > { %v7563_v59 = vpop.f32.mrf.mxu0  ;;  %v17250_v7 = vadd.f32 %v7560_v54, %v7017_v46  ;;  %v17266_v54 = vpop.permute.xlu0 %8867 }
 0x56d   : > { %v9225_v46 = vpop.permute.xlu1 %9224 }
 0x56e   : > { %18867 = vst [vmem:[#allocation148_spill] sm:$0xff] %v17250_v7  ;;  %v6344_v36 = vpop.f32.mrf.mxu2  ;;  %6999 = vmatmul.f32.gmra.mxu3 %v6840_v6  ;;  %7775 = vmatmul.f32.vlgmr.msrb.gmra.mxu1 %v15807_v31 }
 0x56f   : > { %v6408_v21 = vadd.f32 %v6344_v36, %v5862_v27  ;;  %7610 = vmatmul.f32.gmra.mxu0 %v7451_v38  ;;  %9980 = vperm.xlu2 %11277, %v11166_v3   ;;  %v8900_v27 = vmul.f32 %v16708_v17, %v15926_v33  ;;  %v11167_v38 = vld [vmem:[%s17933_s1 + $0x8f0] sm:$0xff] }
 0x570   : > { %9369 = vperm.xlu1 %11276, %v11118_v51   ;;  %8892 = vperm.xlu0 %11275, %v11071_v10   ;;  %v9382_v51 = vmul.f32 %v9225_v46, %v15881_v29 }
 0x571   : > { %v6952_v16 = vpop.f32.mrf.mxu3  ;;  %v17285_v17 = vpop.permute.xlu2 %9835 }
 0x572   : > { %v7018_v18 = vadd.f32 %v6952_v16, %v6407_v53  ;;  %v11072_v53 = vld [vmem:[%s17933_s1 + $0x6f8] sm:$0xff] }
 0x573   : > { %v5865_v6 = vpop.f32.mrf.mxu1  ;;  %8389 = vmatmul.f32.gmra.mxu2 %v8290_v14 }
 0x574   : > { %v7566_v3 = vpop.f32.mrf.mxu0  ;;  %v17275_v36 = vadd.f32 %v7563_v59, %v7018_v18  ;;  %v8291_v59 = vmul.f32 %v16180_v8, %v15986_v25  ;;  %v9230_v14 = vpop.permute.xlu0 %9229  ;;  %v8901_v18 = vmul.f32 %v16717_v45, %v15960_v24  ;;  %v11120_v8 = vld [vmem:[%s17933_s1 + $0x7f8] sm:$0xff]  ;;  %v11181_v24 = vld [vmem:[%s17936_s4 + $0x460] sm:$0xff] }
 0x575   : > { %v17304_v45 = vpop.permute.xlu1 %9840  ;;  %10077 = vmatpush.msra.mxu1 %v11181_v24  ;;  %v18874_v24 = vld [vmem:[#allocation64_spill] sm:$0xff] }
 0x576   : > { %18868 = vst [vmem:[#allocation18_spill] sm:$0xff] %v17275_v36  ;;  %v6347_v10 = vpop.f32.mrf.mxu2  ;;  %7778 = vmatmul.f32.gmra.mxu1 %v15834_v56  ;;  %8997 = vmatmul.f32.vlgmr.msra.gmra.mxu3 %v8900_v27 }
 0x577   : > { %v6409_v33 = vadd.f32 %v6347_v10, %v5865_v6  ;;  %9479 = vmatmul.f32.vlgmr.msra.gmra.mxu0 %v9382_v51  ;;  %9985 = vperm.xlu2 %11277, %v11167_v38   ;;  %v9383_v6 = vmul.f32 %v9230_v14, %v15919_v11  ;;  %v11168_v38 = vld [vmem:[%s17933_s1 + $0x8f8] sm:$0xff] }
 0x578   : > { %9374 = vperm.xlu1 %11276, %v11119_v40   ;;  %8897 = vperm.xlu0 %11275, %v11072_v53  }
 0x579   : > { %v6955_v20 = vpop.f32.mrf.mxu3  ;;  %v9235_v10 = vpop.permute.xlu2 %9234 }
 0x57a   : > { %v7019_v16 = vadd.f32 %v6955_v20, %v6408_v21 }
 0x57b   : > { %v5868_v46 = vpop.f32.mrf.mxu1  ;;  %8392 = vmatmul.f32.gmra.mxu2 %v8291_v59 }
 0x57c   : > { %v7569_v23 = vpop.f32.mrf.mxu0  ;;  %v17291_v27 = vadd.f32 %v7566_v3, %v7019_v16  ;;  %v18870_v3 = vld [vmem:[#allocation159_spill] sm:$0xff] }
 0x57d   : > { %v8292_v40 = vmul.f32 %v18870_v3, %v16022_v26 }
 0x57e   : > { %18869 = vst [vmem:[#allocation76_spill] sm:$0xff] %v17291_v27  ;;  %v6350_v51 = vpop.f32.mrf.mxu2  ;;  %7781 = vmatmul.f32.gmra.mxu1 %v15881_v29  ;;  %9000 = vmatmul.f32.gmra.mxu3 %v8901_v18  ;;  %v18871_v29 = vld [vmem:[#allocation221_spill] sm:$0xff]  ;;  %v18873_v18 = vld [vmem:[#allocation219_spill] sm:$0xff] }
 0x57f   : > { %v6410_v21 = vadd.f32 %v6350_v51, %v5868_v46  ;;  %9482 = vmatmul.f32.gmra.mxu0 %v9383_v6  ;;  %v8902_v14 = vmul.f32 %v16722_v37, %v18871_v29  ;;  %v9384_v6 = vmul.f32 %v9235_v10, %v18873_v18 }
 0x580   : > { %9990 = vperm.xlu1 %11276, %v11168_v38   ;;  %9379 = vperm.xlu0 %11275, %v11120_v8   ;;  %v17314_v8 = vpop.permute.xlu0 %9845 }
 0x581   : > { %v6958_v53 = vpop.f32.mrf.mxu3 }
 0x582   : > { %v7020_v59 = vadd.f32 %v6958_v53, %v6409_v33  ;;  %v18875_v33 = vld [vmem:[#allocation211_spill] sm:$0xff]  ;;  %v9240_v53 = vpop.permute.xlu1 %9239 }
 0x583   : > { %v5871_v20 = vpop.f32.mrf.mxu1  ;;  %8395 = vmatmul.f32.gmra.mxu2 %v8292_v40  ;;  %v8293_v3 = vmul.f32 %v18875_v33, %v18874_v24  ;;  %v18879_v33 = vld [vmem:[#allocation210_spill] sm:$0xff] }
 0x584   : > { %v7572_v16 = vpop.f32.mrf.mxu0  ;;  %v17310_v46 = vadd.f32 %v7569_v23, %v7020_v59  ;;  %v18876_v23 = vld [vmem:[#allocation72_spill] sm:$0xff] }
 0x585   : > { %v8903_v59 = vmul.f32 %v16757_v61, %v18876_v23  ;;  %v8294_v61 = vmul.f32 %v16238_v39, %v18879_v33 }
 0x586   : > { %18872 = vst [vmem:[#allocation30_spill] sm:$0xff] %v17310_v46  ;;  %v6353_v51 = vpop.f32.mrf.mxu2  ;;  %7784 = vmatmul.f32.gmra.mxu1 %v15919_v11  ;;  %9003 = vmatmul.f32.gmra.mxu3 %v8902_v14  ;;  %v18878_v11 = vld [vmem:[#allocation220_spill] sm:$0xff] }
 0x587   : > { %v6411_v38 = vadd.f32 %v6353_v51, %v5871_v20  ;;  %9485 = vmatmul.f32.gmra.mxu0 %v9384_v6  ;;  %v9385_v14 = vmul.f32 %v9240_v53, %v18878_v11  ;;  %v17327_v51 = vpop.permute.xlu2 %9850  ;;  %v18880_v53 = vld [vmem:[#allocation142_spill] sm:$0xff] }
 0x589   : > { %v6961_v40 = vpop.f32.mrf.mxu3 }
 0x58a   : > { %v7021_v27 = vadd.f32 %v6961_v40, %v6410_v21  ;;  %v11180_v21 = vld [vmem:[%s17936_s4 + $0x458] sm:$0xff]  ;;  %v17337_v39 = vpop.permute.xlu1 %9855 }
 0x58b   : > { %v5874_v37 = vpop.f32.mrf.mxu1  ;;  %8398 = vmatmul.f32.gmra.mxu2 %v8293_v3  ;;  %10078 = vmatpush.msra.mxu1 %v11180_v21 }
 0x58c   : > { %v7575_v10 = vpop.f32.mrf.mxu0  ;;  %v17320_v29 = vadd.f32 %v7572_v16, %v7021_v27  ;;  %v9245_v16 = vpop.permute.xlu0 %9244 }
 0x58e   : > { %18877 = vst [vmem:[#allocation169_spill] sm:$0xff] %v17320_v29  ;;  %v6356_v20 = vpop.f32.mrf.mxu2  ;;  %7787 = vmatmul.f32.gmra.mxu1 %v18873_v18  ;;  %9006 = vmatmul.f32.gmra.mxu3 %v8903_v59  ;;  %v8904_v18 = vmul.f32 %v16765_v22, %v18880_v53  ;;  %v18882_v59 = vld [vmem:[#allocation61_spill] sm:$0xff] }
 0x58f   : > { %v6412_v6 = vadd.f32 %v6356_v20, %v5874_v37  ;;  %9488 = vmatmul.f32.gmra.mxu0 %v9385_v14  ;;  %v9386_v14 = vmul.f32 %v9245_v16, %v18882_v59  ;;  %v18883_v29 = vld [vmem:[#allocation49_spill] sm:$0xff]  ;;  %v9250_v46 = vpop.permute.xlu2 %9249 }
 0x591   : > { %v6964_v27 = vpop.f32.mrf.mxu3 }
 0x592   : > { %v7022_v3 = vadd.f32 %v6964_v27, %v6411_v38  ;;  %v18884_v38 = vld [vmem:[#allocation66_spill] sm:$0xff] }
 0x593   : > { %v5877_v40 = vpop.f32.mrf.mxu1  ;;  %8401 = vmatmul.f32.gmra.mxu2 %v8294_v61  ;;  %v8295_v27 = vmul.f32 %v18884_v38, %v18883_v29  ;;  %v18888_v38 = vld [vmem:[#allocation73_spill] sm:$0xff] }
 0x594   : > { %v7578_v37 = vpop.f32.mrf.mxu0  ;;  %v17333_v23 = vadd.f32 %v7575_v10, %v7022_v3  ;;  %v18885_v10 = vld [vmem:[#allocation59_spill] sm:$0xff] }
 0x595   : > { %v8905_v3 = vmul.f32 %v16780_v55, %v18885_v10  ;;  %v18889_v55 = vld [vmem:[#allocation13_spill] sm:$0xff]  ;;  %v18890_v10 = vld [vmem:[#allocation63_spill] sm:$0xff] }
 0x596   : > { %18881 = vst [vmem:[#allocation166_spill] sm:$0xff] %v17333_v23  ;;  %v6359_v20 = vpop.f32.mrf.mxu2  ;;  %7790 = vmatmul.f32.gmra.mxu1 %v18878_v11  ;;  %9009 = vmatmul.f32.gmra.mxu3 %v8904_v18  ;;  %v18887_v11 = vld [vmem:[#allocation50_spill] sm:$0xff] }
 0x597   : > { %v6413_v21 = vadd.f32 %v6359_v20, %v5877_v40  ;;  %9491 = vmatmul.f32.gmra.mxu0 %v9386_v14  ;;  %v9387_v18 = vmul.f32 %v9250_v46, %v18887_v11  ;;  %v17350_v20 = vpop.permute.xlu0 %9860  ;;  %v18893_v23 = vld [vmem:[#allocation14_spill] sm:$0xff] }
 0x599   : > { %v6967_v61 = vpop.f32.mrf.mxu3 }
 0x59a   : > { %v7023_v50 = vadd.f32 %v6967_v61, %v6412_v6  ;;  %v11179_v6 = vld [vmem:[%s17936_s4 + $0x450] sm:$0xff] }
 0x59b   : > { %v5880_v22 = vpop.f32.mrf.mxu1  ;;  %8404 = vmatmul.f32.gmra.mxu2 %v8295_v27  ;;  %10079 = vmatpush.msra.mxu1 %v11179_v6  ;;  %v8296_v27 = vmul.f32 %v18889_v55, %v18888_v38  ;;  %v17360_v55 = vpop.permute.xlu2 %9865 }
 0x59c   : > { %v7581_v16 = vpop.f32.mrf.mxu0  ;;  %v17343_v53 = vadd.f32 %v7578_v37, %v7023_v50  ;;  %v9255_v37 = vpop.permute.xlu1 %9254 }
 0x59e   : > { %18886 = vst [vmem:[#allocation151_spill] sm:$0xff] %v17343_v53  ;;  %v6362_v40 = vpop.f32.mrf.mxu2  ;;  %7793 = vmatmul.f32.gmra.mxu1 %v18882_v59  ;;  %9012 = vmatmul.f32.gmra.mxu3 %v8905_v3  ;;  %v8906_v59 = vmul.f32 %v16819_v48, %v18890_v10 }
 0x59f   : > { %v6414_v14 = vadd.f32 %v6362_v40, %v5880_v22  ;;  %9494 = vmatmul.f32.gmra.mxu0 %v9387_v18  ;;  %v18892_v18 = vld [vmem:[#allocation11_spill] sm:$0xff] }
 0x5a0   : > { %v9388_v40 = vmul.f32 %v9255_v37, %v18892_v18 }
 0x5a1   : > { %v6970_v50 = vpop.f32.mrf.mxu3 }
 0x5a2   : > { %v7024_v61 = vadd.f32 %v6970_v50, %v6413_v21  ;;  %v8297_v21 = vmul.f32 %v16290_v57, %v18893_v23  ;;  %v9260_v50 = vpop.permute.xlu0 %9259  ;;  %v11178_v57 = vld [vmem:[%s17936_s4 + $0x448] sm:$0xff] }
 0x5a3   : > { %v5883_v46 = vpop.f32.mrf.mxu1  ;;  %8407 = vmatmul.f32.gmra.mxu2 %v8296_v27  ;;  %10080 = vmatpush.msra.mxu1 %v11178_v57 }
 0x5a4   : > { %v7584_v22 = vpop.f32.mrf.mxu0  ;;  %v17356_v3 = vadd.f32 %v7581_v16, %v7024_v61  ;;  %v18894_v16 = vld [vmem:[#allocation105_spill] sm:$0xff] }
 0x5a5   : > { %v8907_v61 = vmul.f32 %v16836_v12, %v18894_v16  ;;  %v18898_v12 = vld [vmem:[#allocation158_spill] sm:$0xff]  ;;  %v18899_v16 = vld [vmem:[#allocation104_spill] sm:$0xff] }
 0x5a6   : > { %18891 = vst [vmem:[#allocation152_spill] sm:$0xff] %v17356_v3  ;;  %v6365_v53 = vpop.f32.mrf.mxu2  ;;  %7796 = vmatmul.f32.gmra.mxu1 %v18887_v11  ;;  %9015 = vmatmul.f32.gmra.mxu3 %v8906_v59  ;;  %v18896_v11 = vld [vmem:[#allocation67_spill] sm:$0xff] }
 0x5a7   : > { %v6415_v6 = vadd.f32 %v6365_v53, %v5883_v46  ;;  %9497 = vmatmul.f32.gmra.mxu0 %v9388_v40  ;;  %v9389_v59 = vmul.f32 %v9260_v50, %v18896_v11  ;;  %v18897_v40 = vld [vmem:[#allocation15_spill] sm:$0xff] }
 0x5a9   : > { %v6973_v27 = vpop.f32.mrf.mxu3 }
 0x5aa   : > { %v7025_v36 = vadd.f32 %v6973_v27, %v6414_v14  ;;  %v17373_v14 = vpop.permute.xlu1 %9870 }
 0x5ab   : > { %v5886_v48 = vpop.f32.mrf.mxu1  ;;  %8410 = vmatmul.f32.gmra.mxu2 %v8297_v21  ;;  %v8298_v21 = vmul.f32 %v18898_v12, %v18897_v40  ;;  %v17383_v12 = vpop.permute.xlu0 %9875 }
 0x5ac   : > { %v7587_v37 = vpop.f32.mrf.mxu0  ;;  %v17366_v10 = vadd.f32 %v7584_v22, %v7025_v36  ;;  %v9265_v22 = vpop.permute.xlu2 %9264 }
 0x5ae   : > { %18895 = vst [vmem:[#allocation101_spill] sm:$0xff] %v17366_v10  ;;  %v6368_v53 = vpop.f32.mrf.mxu2  ;;  %7799 = vmatmul.f32.gmra.mxu1 %v18892_v18  ;;  %9018 = vmatmul.f32.gmra.mxu3 %v8907_v61  ;;  %v8908_v18 = vmul.f32 %v16852_v63, %v18899_v16 }
 0x5af   : > { %v6416_v46 = vadd.f32 %v6368_v53, %v5886_v48  ;;  %9500 = vmatmul.f32.gmra.mxu0 %v9389_v59  ;;  %v18901_v59 = vld [vmem:[#allocation34_spill] sm:$0xff] }
 0x5b0   : > { %v9390_v53 = vmul.f32 %v9265_v22, %v18901_v59 }
 0x5b1   : > { %v6976_v36 = vpop.f32.mrf.mxu3 }
 0x5b2   : > { %v7026_v27 = vadd.f32 %v6976_v36, %v6415_v6  ;;  %v18902_v6 = vld [vmem:[#allocation212_spill] sm:$0xff]  ;;  %v9270_v3 = vpop.permute.xlu1 %9269 }
 0x5b3   : > { %v5889_v50 = vpop.f32.mrf.mxu1  ;;  %8413 = vmatmul.f32.gmra.mxu2 %v8298_v21  ;;  %v8299_v36 = vmul.f32 %v18902_v6, %v16309_v2  ;;  %v18907_v6 = vld [vmem:[#allocation68_spill] sm:$0xff] }
 0x5b4   : > { %v7590_v48 = vpop.f32.mrf.mxu0  ;;  %v17379_v61 = vadd.f32 %v7587_v37, %v7026_v27  ;;  %v18903_v37 = vld [vmem:[#allocation111_spill] sm:$0xff] }
 0x5b5   : > { %v8909_v27 = vmul.f32 %v16904_v44, %v18903_v37  ;;  %v18908_v44 = vld [vmem:[#allocation103_spill] sm:$0xff]  ;;  %v18909_v37 = vld [vmem:[#allocation17_spill] sm:$0xff] }
 0x5b6   : > { %18900 = vst [vmem:[#allocation153_spill] sm:$0xff] %v17379_v61  ;;  %v6371_v10 = vpop.f32.mrf.mxu2  ;;  %7802 = vmatmul.f32.gmra.mxu1 %v18896_v11  ;;  %9021 = vmatmul.f32.gmra.mxu3 %v8908_v18  ;;  %v18905_v11 = vld [vmem:[#allocation52_spill] sm:$0xff]  ;;  %v18913_v61 = vld [vmem:[#allocation65_spill] sm:$0xff] }
 0x5b7   : > { %v6417_v57 = vadd.f32 %v6371_v10, %v5889_v50  ;;  %9503 = vmatmul.f32.gmra.mxu0 %v9390_v53  ;;  %v9391_v18 = vmul.f32 %v9270_v3, %v18905_v11  ;;  %v17396_v53 = vpop.permute.xlu2 %9880 }
 0x5b8   : > { %18906 = vst [vmem:[#allocation60_spill] sm:$0xff] %v17396_v53 }
 0x5b9   : > { %v6979_v21 = vpop.f32.mrf.mxu3 }
 0x5ba   : > { %v7027_v7 = vadd.f32 %v6979_v21, %v6416_v46  ;;  %v11177_v46 = vld [vmem:[%s17936_s4 + $0x440] sm:$0xff] }
 0x5bb   : > { %v5892_v63 = vpop.f32.mrf.mxu1  ;;  %8416 = vmatmul.f32.gmra.mxu2 %v8299_v36  ;;  %10081 = vmatpush.msra.mxu1 %v11177_v46  ;;  %v8300_v36 = vmul.f32 %v18908_v44, %v18907_v6  ;;  %v17406_v44 = vpop.permute.xlu1 %9885 }
 0x5bc   : > { %v7593_v22 = vpop.f32.mrf.mxu0  ;;  %v17389_v16 = vadd.f32 %v7590_v48, %v7027_v7  ;;  %v9275_v48 = vpop.permute.xlu0 %9274  ;;  %18912 = vst [vmem:[#allocation172_spill] sm:$0xff] %v17406_v44 }
 0x5be   : > { %18904 = vst [vmem:[#allocation43_spill] sm:$0xff] %v17389_v16  ;;  %v6374_v10 = vpop.f32.mrf.mxu2  ;;  %7805 = vmatmul.f32.gmra.mxu1 %v18901_v59  ;;  %9024 = vmatmul.f32.gmra.mxu3 %v8909_v27  ;;  %v8910_v59 = vmul.f32 %v16923_v49, %v18909_v37 }
 0x5bf   : > { %v6418_v50 = vadd.f32 %v6374_v10, %v5892_v63  ;;  %9506 = vmatmul.f32.gmra.mxu0 %v9391_v18  ;;  %v18911_v18 = vld [vmem:[#allocation87_spill] sm:$0xff]  ;;  %v9280_v15 = vpop.permute.xlu2 %9279 }
 0x5c0   : > { %v9392_v10 = vmul.f32 %v9275_v48, %v18911_v18 }
 0x5c1   : > { %v6982_v7 = vpop.f32.mrf.mxu3 }
 0x5c2   : > { %v7028_v21 = vadd.f32 %v6982_v7, %v6417_v57  ;;  %v18914_v57 = vld [vmem:[#allocation51_spill] sm:$0xff] }
 0x5c3   : > { %v5895_v3 = vpop.f32.mrf.mxu1  ;;  %8419 = vmatmul.f32.gmra.mxu2 %v8300_v36  ;;  %v8301_v7 = vmul.f32 %v18914_v57, %v18913_v61  ;;  %v18920_v57 = vld [vmem:[#allocation39_spill] sm:$0xff] }
 0x5c4   : > { %v7596_v63 = vpop.f32.mrf.mxu0  ;;  %v17402_v27 = vadd.f32 %v7593_v22, %v7028_v21  ;;  %v18915_v22 = vld [vmem:[#allocation78_spill] sm:$0xff]  ;;  %v18916_v21 = vld [vmem:[#allocation177_spill] sm:$0xff] }
 0x5c5   : > { %v8911_v37 = vmul.f32 %v18916_v21, %v18915_v22  ;;  %v18922_v21 = vld [vmem:[#allocation93_spill] sm:$0xff] }
 0x5c6   : > { %18910 = vst [vmem:[#allocation46_spill] sm:$0xff] %v17402_v27  ;;  %v6377_v16 = vpop.f32.mrf.mxu2  ;;  %7808 = vmatmul.f32.gmra.mxu1 %v18905_v11  ;;  %9027 = vmatmul.f32.gmra.mxu3 %v8910_v59  ;;  %v18918_v11 = vld [vmem:[#allocation42_spill] sm:$0xff] }
 0x5c7   : > { %v6419_v46 = vadd.f32 %v6377_v16, %v5895_v3  ;;  %9509 = vmatmul.f32.gmra.mxu0 %v9392_v10  ;;  %v9393_v59 = vmul.f32 %v9280_v15, %v18918_v11  ;;  %v17419_v10 = vpop.permute.xlu0 %9890 }
 0x5c8   : > { %18919 = vst [vmem:[#allocation156_spill] sm:$0xff] %v17419_v10  ;;  %v18925_v10 = vld [vmem:[#allocation97_spill] sm:$0xff] }
 0x5c9   : > { %v6985_v36 = vpop.f32.mrf.mxu3 }
 0x5ca   : > { %v7029_v53 = vadd.f32 %v6985_v36, %v6418_v50  ;;  %v11176_v50 = vld [vmem:[%s17936_s4 + $0x438] sm:$0xff] }
 0x5cb   : > { %v5898_v49 = vpop.f32.mrf.mxu1  ;;  %8422 = vmatmul.f32.gmra.mxu2 %v8301_v7  ;;  %10082 = vmatpush.msra.mxu1 %v11176_v50  ;;  %v18921_v7 = vld [vmem:[#allocation117_spill] sm:$0xff] }
 0x5cc   : > { %v7599_v48 = vpop.f32.mrf.mxu0  ;;  %v17412_v27 = vadd.f32 %v7596_v63, %v7029_v53  ;;  %v8302_v36 = vmul.f32 %v18921_v7, %v18920_v57  ;;  %v9285_v63 = vpop.permute.xlu1 %9284 }
 0x5cd   : > { %v17429_v7 = vpop.permute.xlu2 %9895 }
 0x5ce   : > { %18917 = vst [vmem:[#allocation184_spill] sm:$0xff] %v17412_v27  ;;  %v6380_v16 = vpop.f32.mrf.mxu2  ;;  %7811 = vmatmul.f32.gmra.mxu1 %v18911_v18  ;;  %9030 = vmatmul.f32.gmra.mxu3 %v8911_v37  ;;  %v8912_v18 = vmul.f32 %v16995_v28, %v18922_v21 }
 0x5cf   : > { %v6420_v3 = vadd.f32 %v6380_v16, %v5898_v49  ;;  %9512 = vmatmul.f32.gmra.mxu0 %v9393_v59  ;;  %v18924_v59 = vld [vmem:[#allocation84_spill] sm:$0xff]  ;;  %v9290_v57 = vpop.permute.xlu0 %9289 }
 0x5d0   : > { %v9394_v16 = vmul.f32 %v9285_v63, %v18924_v59 }
 0x5d1   : > { %v6988_v53 = vpop.f32.mrf.mxu3 }
 0x5d2   : > { %v7030_v22 = vadd.f32 %v6988_v53, %v6419_v46  ;;  %v18926_v46 = vld [vmem:[#allocation150_spill] sm:$0xff] }
 0x5d3   : > { %v5901_v15 = vpop.f32.mrf.mxu1  ;;  %8425 = vmatmul.f32.gmra.mxu2 %v8302_v36  ;;  %v8303_v53 = vmul.f32 %v18926_v46, %v18925_v10  ;;  %v18931_v46 = vld [vmem:[#allocation130_spill] sm:$0xff] }
 0x5d4   : > { %v7602_v49 = vpop.f32.mrf.mxu0  ;;  %v17425_v37 = vadd.f32 %v7599_v48, %v7030_v22  ;;  %v18927_v48 = vld [vmem:[#allocation88_spill] sm:$0xff] }
 0x5d5   : > { %v8913_v22 = vmul.f32 %v17008_v52, %v18927_v48  ;;  %v18932_v52 = vld [vmem:[#allocation85_spill] sm:$0xff]  ;;  %v18933_v48 = vld [vmem:[#allocation99_spill] sm:$0xff] }
 0x5d6   : > { %18923 = vst [vmem:[#allocation157_spill] sm:$0xff] %v17425_v37  ;;  %v6383_v27 = vpop.f32.mrf.mxu2  ;;  %7814 = vmatmul.f32.gmra.mxu1 %v18918_v11  ;;  %9033 = vmatmul.f32.gmra.mxu3 %v8912_v18  ;;  %v18929_v11 = vld [vmem:[#allocation58_spill] sm:$0xff]  ;;  %v18936_v37 = vld [vmem:[#allocation37_spill] sm:$0xff] }
 0x5d7   : > { %v6421_v50 = vadd.f32 %v6383_v27, %v5901_v15  ;;  %9515 = vmatmul.f32.gmra.mxu0 %v9394_v16  ;;  %v9395_v18 = vmul.f32 %v9290_v57, %v18929_v11  ;;  %v17442_v16 = vpop.permute.xlu1 %9900 }
 0x5d8   : > { %18930 = vst [vmem:[#allocation129_spill] sm:$0xff] %v17442_v16 }
 0x5d9   : > { %v6991_v36 = vpop.f32.mrf.mxu3 }
 0x5da   : > { %v7031_v44 = vadd.f32 %v6991_v36, %v6420_v3  ;;  %v11175_v3 = vld [vmem:[%s17936_s4 + $0x430] sm:$0xff] }
 0x5db   : > { %v5904_v28 = vpop.f32.mrf.mxu1  ;;  %8428 = vmatmul.f32.gmra.mxu2 %v8303_v53  ;;  %10083 = vmatpush.msra.mxu1 %v11175_v3  ;;  %v8304_v53 = vmul.f32 %v18932_v52, %v18931_v46  ;;  %v17452_v52 = vpop.permute.xlu0 %9905 }
 0x5dc   : > { %v7605_v63 = vpop.f32.mrf.mxu0  ;;  %v17435_v21 = vadd.f32 %v7602_v49, %v7031_v44  ;;  %v9295_v49 = vpop.permute.xlu2 %9294 }
 0x5de   : > { %18928 = vst [vmem:[#allocation161_spill] sm:$0xff] %v17435_v21  ;;  %v6386_v27 = vpop.f32.mrf.mxu2  ;;  %7817 = vmatmul.f32.gmra.mxu1 %v18924_v59  ;;  %9036 = vmatmul.f32.gmra.mxu3 %v8913_v22  ;;  %v8914_v59 = vmul.f32 %v17028_v4, %v18933_v48  ;;  %v18939_v48 = vld [vmem:[#allocation102_spill] sm:$0xff] }
 0x5df   : > { %v6422_v15 = vadd.f32 %v6386_v27, %v5904_v28  ;;  %9518 = vmatmul.f32.gmra.mxu0 %v9395_v18  ;;  %v18935_v18 = vld [vmem:[#allocation41_spill] sm:$0xff]  ;;  %v9300_v16 = vpop.permute.xlu1 %9299 }
 0x5e0   : > { %v9396_v27 = vmul.f32 %v9295_v49, %v18935_v18 }
 0x5e1   : > { %v6994_v44 = vpop.f32.mrf.mxu3 }
 0x5e2   : > { %v7032_v36 = vadd.f32 %v6994_v44, %v6421_v50  ;;  %v18937_v50 = vld [vmem:[#allocation94_spill] sm:$0xff] }
 0x5e3   : > { %v5907_v57 = vpop.f32.mrf.mxu1  ;;  %8431 = vmatmul.f32.gmra.mxu2 %v8304_v53  ;;  %v8305_v44 = vmul.f32 %v18937_v50, %v18936_v37 }
 0x5e4   : > { %v7608_v28 = vpop.f32.mrf.mxu0  ;;  %v17448_v22 = vadd.f32 %v7605_v63, %v7032_v36  ;;  %v18938_v63 = vld [vmem:[#allocation100_spill] sm:$0xff]  ;;  %v17466_v50 = vpop.permute.xlu2 %9910 }
 0x5e5   : > { %v8915_v36 = vmul.f32 %v17074_v62, %v18938_v63  ;;  %18942 = vst [vmem:[#allocation178_spill] sm:$0xff] %v17466_v50  ;;  %v18943_v62 = vld [vmem:[#allocation112_spill] sm:$0xff] }
 0x5e6   : > { %18934 = vst [vmem:[#allocation19_spill] sm:$0xff] %v17448_v22  ;;  %v6389_v21 = vpop.f32.mrf.mxu2  ;;  %7820 = vmatmul.f32.gmra.mxu1 %v18929_v11  ;;  %9039 = vmatmul.f32.gmra.mxu3 %v8914_v59 }
 0x5e7   : > { %v6423_v3 = vadd.f32 %v6389_v21, %v5907_v57  ;;  %9521 = vmatmul.f32.gmra.mxu0 %v9396_v27  ;;  %v18941_v21 = vld [vmem:[#allocation110_spill] sm:$0xff] }
 0x5e8   : > { %v9397_v57 = vmul.f32 %v9300_v16, %v18941_v21 }
 0x5e9   : > { %v6997_v53 = vpop.f32.mrf.mxu3 }
 0x5ea   : > { %v7033_v46 = vadd.f32 %v6997_v53, %v6422_v15  ;;  %v11174_v15 = vld [vmem:[%s17936_s4 + $0x428] sm:$0xff] }
 0x5eb   : > { %v7776_v4 = vpop.f32.mrf.mxu1  ;;  %8434 = vmatmul.f32.gmra.mxu2 %v8305_v44  ;;  %10084 = vmatpush.msra.mxu1 %v11174_v15  ;;  %v18944_v44 = vld [vmem:[#allocation123_spill] sm:$0xff] }
 0x5ec   : > { %v7611_v49 = vpop.f32.mrf.mxu0  ;;  %v7872_v22 = vadd.f32 %v7776_v4, %v18939_v48  ;;  %v17459_v11 = vadd.f32 %v7608_v28, %v7033_v46  ;;  %v8306_v53 = vmul.f32 %v18944_v44, %v18943_v62  ;;  %v9305_v28 = vpop.permute.xlu0 %9304 }
 0x5ee   : > { %18940 = vst [vmem:[#allocation24_spill] sm:$0xff] %v17459_v11  ;;  %7823 = vmatmul.f32.gmra.mxu1 %v18935_v18  ;;  %v8387_v59 = vpop.f32.mrf.mxu2  ;;  %9042 = vmatmul.f32.gmra.mxu3 %v8915_v36  ;;  %v18945_v18 = vld [vmem:[#allocation81_spill] sm:$0xff]  ;;  %v18947_v36 = vld [vmem:[#allocation155_spill] sm:$0xff]  ;;  %v18949_v11 = vld [vmem:[#allocation164_spill] sm:$0xff] }
 0x5ef   : > { %v8483_v27 = vadd.f32 %v8387_v59, %v7872_v22  ;;  %9524 = vmatmul.f32.gmra.mxu0 %v9397_v57  ;;  %v8916_v63 = vmul.f32 %v17092_v35, %v18945_v18  ;;  %v17472_v22 = vpop.permute.xlu1 %9915  ;;  %v9398_v15 = vmul.f32 %v9305_v28, %v18949_v11  ;;  %v9310_v35 = vpop.permute.xlu2 %9309  ;;  %v18954_v28 = vld [vmem:[#allocation48_spill] sm:$0xff] }
 0x5f0   : > { %18946 = vst [vmem:[#allocation26_spill] sm:$0xff] %v17472_v22 }
 0x5f1   : > { %v7000_v46 = vpop.f32.mrf.mxu3 }
 0x5f2   : > { %v7034_v4 = vadd.f32 %v7000_v46, %v6423_v3  ;;  %v18950_v3 = vld [vmem:[#allocation139_spill] sm:$0xff] }
 0x5f3   : > { %v7779_v16 = vpop.f32.mrf.mxu1  ;;  %8437 = vmatmul.f32.gmra.mxu2 %v8306_v53  ;;  %v18951_v53 = vld [vmem:[#allocation165_spill] sm:$0xff] }
 0x5f4   : > { %v7873_v48 = vadd.f32 %v7779_v16, %v18947_v36  ;;  %v9480_v57 = vpop.f32.mrf.mxu0  ;;  %v17475_v59 = vadd.f32 %v7611_v49, %v7034_v4  ;;  %v8307_v46 = vmul.f32 %v18951_v53, %v18950_v3  ;;  %v18952_v16 = vld [vmem:[#allocation95_spill] sm:$0xff]  ;;  %v17483_v4 = vpop.permute.xlu0 %9920  ;;  %v18957_v53 = vld [vmem:[#allocation96_spill] sm:$0xff] }
 0x5f5   : > { %v8917_v49 = vmul.f32 %v17104_v43, %v18952_v16  ;;  %18953 = vst [vmem:[#allocation163_spill] sm:$0xff] %v17483_v4  ;;  %v11173_v43 = vld [vmem:[%s17936_s4 + $0x420] sm:$0xff] }
 0x5f6   : > { %18948 = vst [vmem:[#allocation183_spill] sm:$0xff] %v17475_v59  ;;  %7826 = vmatmul.f32.gmra.mxu1 %v18941_v21  ;;  %v8390_v44 = vpop.f32.mrf.mxu2  ;;  %9045 = vmatmul.f32.gmra.mxu3 %v8916_v63  ;;  %v18955_v63 = vld [vmem:[#allocation53_spill] sm:$0xff] }
 0x5f7   : > { %v8484_v50 = vadd.f32 %v8390_v44, %v7873_v48  ;;  %9527 = vmatmul.f32.gmra.mxu0 %v9398_v15  ;;  %v9399_v48 = vmul.f32 %v9310_v35, %v18955_v63  ;;  %v9315_v15 = vpop.permute.xlu1 %9314  ;;  %10085 = vmatpush.msra.mxu1 %v11173_v43  ;;  %v18958_v35 = vld [vmem:[#allocation118_spill] sm:$0xff] }
 0x5f8   : > { %v8918_v16 = vmul.f32 %v17145_v41, %v18958_v35  ;;  %v18965_v41 = vld [vmem:[#allocation40_spill] sm:$0xff] }
 0x5f9   : > { %v8998_v62 = vpop.f32.mrf.mxu3 }
 0x5fa   : > { %v9094_v18 = vadd.f32 %v8998_v62, %v8483_v27  ;;  %v18956_v62 = vld [vmem:[#allocation62_spill] sm:$0xff] }
 0x5fb   : > { %v7782_v22 = vpop.f32.mrf.mxu1  ;;  %8440 = vmatmul.f32.gmra.mxu2 %v8307_v46 }
 0x5fc   : > { %v7874_v36 = vadd.f32 %v7782_v22, %v18954_v28  ;;  %v9483_v21 = vpop.f32.mrf.mxu0  ;;  %v17486_v59 = vadd.f32 %v9480_v57, %v9094_v18  ;;  %v8308_v22 = vmul.f32 %v18957_v53, %v18956_v62  ;;  %v9320_v4 = vpop.permute.xlu0 %9319 }
 0x5fe   : > { %7829 = vmatmul.f32.gmra.mxu1 %v18949_v11  ;;  %v8393_v44 = vpop.f32.mrf.mxu2  ;;  %9048 = vmatmul.f32.gmra.mxu3 %v8917_v49  ;;  %v18959_v11 = vld [vmem:[#allocation116_spill] sm:$0xff] }
 0x5ff   : > { %v8485_v27 = vadd.f32 %v8393_v44, %v7874_v36  ;;  %9530 = vmatmul.f32.gmra.mxu0 %v9399_v48  ;;  %v18961_v48 = vld [vmem:[#allocation113_spill] sm:$0xff] }
 0x600   : > { %v9400_v44 = vmul.f32 %v9315_v15, %v18961_v48 }
 0x601   : > { %v9001_v46 = vpop.f32.mrf.mxu3 }
 0x602   : > { %v9095_v57 = vadd.f32 %v9001_v46, %v8484_v50  ;;  %v17502_v50 = vpop.permute.xlu2 %9925  ;;  %v18964_v46 = vld [vmem:[#allocation125_spill] sm:$0xff] }
 0x603   : > { %v7785_v18 = vpop.f32.mrf.mxu1  ;;  %8443 = vmatmul.f32.gmra.mxu2 %v8308_v22  ;;  %18962 = vst [vmem:[#allocation128_spill] sm:$0xff] %v17502_v50  ;;  %v17504_v22 = vpop.permute.xlu1 %9930  ;;  %v8309_v35 = vmul.f32 %v18965_v41, %v18964_v46 }
 0x604   : > { %v7875_v28 = vadd.f32 %v7785_v18, %v18959_v11  ;;  %v9486_v49 = vpop.f32.mrf.mxu0  ;;  %v17498_v36 = vadd.f32 %v9483_v21, %v9095_v57  ;;  %18963 = vst [vmem:[#allocation168_spill] sm:$0xff] %v17504_v22  ;;  %v18966_v57 = vld [vmem:[#allocation145_spill] sm:$0xff]  ;;  %v17518_v41 = vpop.permute.xlu0 %9935 }
 0x605   : > { %v8919_v15 = vmul.f32 %v17157_v32, %v18966_v57  ;;  %18970 = vst [vmem:[#allocation27_spill] sm:$0xff] %v17518_v41  ;;  %v18971_v32 = vld [vmem:[#allocation54_spill] sm:$0xff] }
 0x606   : > { %18960 = vst [vmem:[#allocation167_spill] sm:$0xff] %v17498_v36  ;;  %7832 = vmatmul.f32.gmra.mxu1 %v18955_v63  ;;  %v8396_v43 = vpop.f32.mrf.mxu2  ;;  %9051 = vmatmul.f32.gmra.mxu3 %v8918_v16  ;;  %v18967_v36 = vld [vmem:[#allocation170_spill] sm:$0xff] }
 0x607   : > { %v8486_v53 = vadd.f32 %v8396_v43, %v7875_v28  ;;  %9533 = vmatmul.f32.gmra.mxu0 %v9400_v44  ;;  %v18969_v28 = vld [vmem:[#allocation171_spill] sm:$0xff] }
 0x608   : > { %v9401_v44 = vmul.f32 %v9320_v4, %v18969_v28 }
 0x609   : > { %v9004_v18 = vpop.f32.mrf.mxu3 }
 0x60a   : > { %v9096_v11 = vadd.f32 %v9004_v18, %v8485_v27  ;;  %v11172_v27 = vld [vmem:[%s17936_s4 + $0x418] sm:$0xff]  ;;  %v9325_v18 = vpop.permute.xlu2 %9324 }
 0x60b   : > { %v7788_v21 = vpop.f32.mrf.mxu1  ;;  %8446 = vmatmul.f32.gmra.mxu2 %v8309_v35  ;;  %10086 = vmatpush.msra.mxu1 %v11172_v27 }
 0x60c   : > { %v7876_v63 = vadd.f32 %v7788_v21, %v18967_v36  ;;  %v9489_v62 = vpop.f32.mrf.mxu0  ;;  %v17511_v16 = vadd.f32 %v9486_v49, %v9096_v11  ;;  %v18972_v36 = vld [vmem:[#allocation83_spill] sm:$0xff]  ;;  %v9330_v11 = vpop.permute.xlu1 %9329 }
 0x60d   : > { %v8310_v35 = vmul.f32 %v18972_v36, %v18971_v32  ;;  %v18976_v32 = vld [vmem:[#allocation162_spill] sm:$0xff]  ;;  %v9335_v50 = vpop.permute.xlu0 %9334 }
 0x60e   : > { %18968 = vst [vmem:[#allocation69_spill] sm:$0xff] %v17511_v16  ;;  %7835 = vmatmul.f32.gmra.mxu1 %v18961_v48  ;;  %v8399_v43 = vpop.f32.mrf.mxu2  ;;  %9054 = vmatmul.f32.gmra.mxu3 %v8919_v15  ;;  %v18973_v48 = vld [vmem:[#allocation126_spill] sm:$0xff]  ;;  %v18974_v15 = vld [vmem:[#allocation127_spill] sm:$0xff] }
 0x60f   : > { %v8487_v22 = vadd.f32 %v8399_v43, %v7876_v63  ;;  %9536 = vmatmul.f32.gmra.mxu0 %v9401_v44  ;;  %v8920_v57 = vmul.f32 %v17175_v19, %v18973_v48  ;;  %v18975_v43 = vld [vmem:[#allocation86_spill] sm:$0xff] }
 0x610   : > { %v9402_v16 = vmul.f32 %v9325_v18, %v18975_v43  ;;  %v18980_v18 = vld [vmem:[#allocation149_spill] sm:$0xff] }
 0x611   : > { %v9007_v49 = vpop.f32.mrf.mxu3 }
 0x612   : > { %v9097_v4 = vadd.f32 %v9007_v49, %v8486_v53  ;;  %v18977_v53 = vld [vmem:[#allocation12_spill] sm:$0xff] }
 0x613   : > { %v7791_v21 = vpop.f32.mrf.mxu1  ;;  %8449 = vmatmul.f32.gmra.mxu2 %v8310_v35  ;;  %v8311_v49 = vmul.f32 %v18977_v53, %v18976_v32  ;;  %v18983_v53 = vld [vmem:[#allocation136_spill] sm:$0xff] }
 0x614   : > { %v7877_v63 = vadd.f32 %v7791_v21, %v18974_v15  ;;  %v17525_v44 = vadd.f32 %v9489_v62, %v9097_v4  ;;  %v9492_v41 = vpop.f32.mrf.mxu0  ;;  %v18978_v21 = vld [vmem:[#allocation82_spill] sm:$0xff]  ;;  %v17533_v4 = vpop.permute.xlu1 %9945 }
 0x615   : > { %v8921_v62 = vmul.f32 %v17206_v34, %v18978_v21  ;;  %18979 = vst [vmem:[#allocation89_spill] sm:$0xff] %v17533_v4  ;;  %v17543_v34 = vpop.permute.xlu2 %9940  ;;  %v17549_v21 = vpop.permute.xlu0 %9950 }
 0x616   : > { %7838 = vmatmul.f32.gmra.mxu1 %v18969_v28  ;;  %v8402_v27 = vpop.f32.mrf.mxu2  ;;  %9057 = vmatmul.f32.gmra.mxu3 %v8920_v57  ;;  %v18981_v57 = vld [vmem:[#allocation115_spill] sm:$0xff]  ;;  %18982 = vst [vmem:[#allocation185_spill] sm:$0xff] %v17543_v34 }
 0x617   : > { %v8488_v36 = vadd.f32 %v8402_v27, %v7877_v63  ;;  %9539 = vmatmul.f32.gmra.mxu0 %v9402_v16  ;;  %v9403_v15 = vmul.f32 %v9330_v11, %v18981_v57  ;;  %18986 = vst [vmem:[#allocation179_spill] sm:$0xff] %v17549_v21 }
 0x619   : > { %v9010_v35 = vpop.f32.mrf.mxu3 }
 0x61a   : > { %v9098_v46 = vadd.f32 %v9010_v35, %v8487_v22  ;;  %v11171_v22 = vld [vmem:[%s17936_s4 + $0x410] sm:$0xff] }
 0x61b   : > { %v7794_v19 = vpop.f32.mrf.mxu1  ;;  %8452 = vmatmul.f32.gmra.mxu2 %v8311_v49  ;;  %10087 = vmatpush.msra.mxu1 %v11171_v22  ;;  %v18984_v49 = vld [vmem:[#allocation109_spill] sm:$0xff] }
 0x61c   : > { %v7878_v48 = vadd.f32 %v7794_v19, %v18980_v18  ;;  %v17536_v28 = vadd.f32 %v9492_v41, %v9098_v46  ;;  %v9495_v63 = vpop.f32.mrf.mxu0  ;;  %v8312_v46 = vmul.f32 %v18984_v49, %v18983_v53  ;;  %v9345_v4 = vpop.permute.xlu1 %9344 }
 0x61e   : > { %7841 = vmatmul.f32.gmra.mxu1 %v18975_v43  ;;  %v8405_v16 = vpop.f32.mrf.mxu2  ;;  %9060 = vmatmul.f32.gmra.mxu3 %v8921_v62  ;;  %v18985_v43 = vld [vmem:[#allocation132_spill] sm:$0xff]  ;;  %v18987_v62 = vld [vmem:[#allocation98_spill] sm:$0xff] }
 0x61f   : > { %v8489_v27 = vadd.f32 %v8405_v16, %v7878_v48  ;;  %9542 = vmatmul.f32.gmra.mxu0 %v9403_v15  ;;  %v8922_v19 = vmul.f32 %v17225_v1, %v18985_v43  ;;  %v18988_v15 = vld [vmem:[#allocation57_spill] sm:$0xff]  ;;  %v9340_v43 = vpop.permute.xlu2 %9339 }
 0x620   : > { %v9404_v16 = vmul.f32 %v9335_v50, %v18988_v15 }
 0x621   : > { %v9013_v41 = vpop.f32.mrf.mxu3 }
 0x622   : > { %v9099_v35 = vadd.f32 %v9013_v41, %v8488_v36  ;;  %v18989_v36 = vld [vmem:[#allocation154_spill] sm:$0xff] }
 0x623   : > { %v7797_v11 = vpop.f32.mrf.mxu1  ;;  %8455 = vmatmul.f32.gmra.mxu2 %v8312_v46  ;;  %v18990_v46 = vld [vmem:[#allocation106_spill] sm:$0xff] }
 0x624   : > { %v7879_v18 = vadd.f32 %v7797_v11, %v18987_v62  ;;  %v17552_v48 = vadd.f32 %v9495_v63, %v9099_v35  ;;  %v8313_v41 = vmul.f32 %v18990_v46, %v18989_v36  ;;  %v9498_v34 = vpop.f32.mrf.mxu0  ;;  %v18991_v63 = vld [vmem:[#allocation21_spill] sm:$0xff]  ;;  %v11170_v62 = vld [vmem:[%s17936_s4 + $0x408] sm:$0xff] }
 0x625   : > { %v8923_v50 = vmul.f32 %v17236_v60, %v18991_v63  ;;  %10088 = vmatpush.msra.mxu1 %v11170_v62 }
 0x626   : > { %7844 = vmatmul.f32.gmra.mxu1 %v18981_v57  ;;  %v8408_v22 = vpop.f32.mrf.mxu2  ;;  %9063 = vmatmul.f32.gmra.mxu3 %v8922_v19  ;;  %v18992_v57 = vld [vmem:[#allocation131_spill] sm:$0xff]  ;;  %v8873_v19 = vpop.permute.xlu0 %8872 }
 0x627   : > { %v8490_v49 = vadd.f32 %v8408_v22, %v7879_v18  ;;  %9545 = vmatmul.f32.gmra.mxu0 %v9404_v16  ;;  %v9405_v11 = vmul.f32 %v9340_v43, %v18992_v57  ;;  %v18993_v18 = vld [vmem:[#allocation122_spill] sm:$0xff]  ;;  %v18994_v16 = vld [vmem:[#allocation135_spill] sm:$0xff]  ;;  %v18996_v43 = vld [vmem:[#allocation45_spill] sm:$0xff] }
 0x628   : > { %v8314_v22 = vmul.f32 %v18994_v16, %v18993_v18  ;;  %v9406_v63 = vmul.f32 %v9345_v4, %v18996_v43  ;;  %v11169_v4 = vld [vmem:[%s17936_s4 + $0x400] sm:$0xff] }
 0x629   : > { %v9016_v1 = vpop.f32.mrf.mxu3  ;;  %10089 = vmatpush.msra.mxu1 %v11169_v4 }
 0x62a   : > { %v9100_v21 = vadd.f32 %v9016_v1, %v8489_v27  ;;  %v9350_v27 = vpop.permute.xlu1 %9349 }
 0x62b   : > { %v17558_v53 = vpop.f32.mrf.mxu1  ;;  %8458 = vmatmul.f32.gmra.mxu2 %v8313_v41  ;;  %v18995_v41 = vld [vmem:[#allocation140_spill] sm:$0xff] }
 0x62c   : > { %v17562_v35 = vadd.f32 %v9498_v34, %v9100_v21  ;;  %v9501_v34 = vpop.f32.mrf.mxu0 }
 0x62e   : > { %7847 = vmatmul.f32.gmra.mxu1 %v18988_v15  ;;  %9066 = vmatmul.f32.gmra.mxu3 %v8923_v50  ;;  %v8924_v15 = vmul.f32 %v17260_v58, %v18995_v41  ;;  %v8878_v50 = vpop.permute.xlu0 %8877  ;;  %v18999_v58 = vld [vmem:[#allocation44_spill] sm:$0xff] }
 0x62f   : > { %9548 = vmatmul.f32.gmra.mxu0 %v9405_v11  ;;  %v18997_v11 = vld [vmem:[#allocation108_spill] sm:$0xff]  ;;  %v8927_v4 = vmul.f32 %v8878_v50, %v17155_v30  ;;  %v19008_v50 = vld [vmem:[#allocation214_spill] sm:$0xff] }
 0x630   : > { %v8315_v62 = vmul.f32 %v18997_v11, %v17082_v47  ;;  %v19003_v11 = vld [vmem:[#allocation91_spill] sm:$0xff] }
 0x631   : > { %v9019_v46 = vpop.f32.mrf.mxu3 }
 0x632   : > { %v9101_v60 = vadd.f32 %v9019_v46, %v8490_v49  ;;  %v9355_v49 = vpop.permute.xlu1 %9354 }
 0x633   : > { %v17571_v21 = vpop.f32.mrf.mxu1  ;;  %8461 = vmatmul.f32.gmra.mxu2 %v8314_v22  ;;  %v18998_v22 = vld [vmem:[#allocation56_spill] sm:$0xff] }
 0x634   : > { %v17575_v1 = vadd.f32 %v9501_v34, %v9101_v60  ;;  %v8925_v46 = vmul.f32 %v17266_v54, %v18998_v22  ;;  %v9407_v60 = vmul.f32 %v9350_v27, %v18999_v58  ;;  %v19001_v34 = vld [vmem:[#allocation38_spill] sm:$0xff]  ;;  %v8926_v54 = vmul.f32 %v8873_v19, %v19003_v11  ;;  %v19004_v27 = vld [vmem:[#allocation71_spill] sm:$0xff] }
 0x635   : > { %v9408_v22 = vmul.f32 %v9355_v49, %v19004_v27  ;;  %v19007_v19 = vld [vmem:[#allocation119_spill] sm:$0xff] }
 0x636   : > { %7850 = vmatmul.f32.gmra.mxu1 %v18992_v57  ;;  %9069 = vmatmul.f32.gmra.mxu3 %v8924_v15  ;;  %v19000_v57 = vld [vmem:[#allocation146_spill] sm:$0xff]  ;;  %v8883_v15 = vpop.permute.xlu0 %8882  ;;  %v8318_v49 = vmul.f32 %v19007_v19, %v17243_v9 }
 0x637   : > { %9551 = vmatmul.f32.gmra.mxu0 %v9406_v63  ;;  %v8316_v41 = vmul.f32 %v19001_v34, %v19000_v57  ;;  %v8928_v11 = vmul.f32 %v8883_v15, %v15802_v13  ;;  %v19012_v15 = vld [vmem:[#allocation16_spill] sm:$0xff] }
 0x63b   : > { %v17581_v16 = vpop.f32.mrf.mxu1  ;;  %8464 = vmatmul.f32.gmra.mxu2 %v8315_v62  ;;  %v9360_v62 = vpop.permute.xlu1 %9359 }
 0x63e   : > { %7853 = vmatmul.f32.gmra.mxu1 %v18996_v43  ;;  %9072 = vmatmul.f32.gmra.mxu3 %v8925_v46  ;;  %v19005_v43 = vld [vmem:[#allocation90_spill] sm:$0xff]  ;;  %v8888_v34 = vpop.permute.xlu0 %8887 }
 0x63f   : > { %9554 = vmatmul.f32.gmra.mxu0 %v9407_v60  ;;  %v8317_v46 = vmul.f32 %v19005_v43, %v17193_v5 }
 0x643   : > { %v17592_v63 = vpop.f32.mrf.mxu1  ;;  %8467 = vmatmul.f32.gmra.mxu2 %v8316_v41  ;;  %v9365_v57 = vpop.permute.xlu1 %9364 }
 0x644   : > { %19002 = vst [vmem:[#allocation173_spill] sm:$0xff] %v17592_v63  ;;  %v19006_v63 = vld [vmem:[#allocation213_spill] sm:$0xff] }
 0x645   : > { %v9409_v41 = vmul.f32 %v9360_v62, %v19006_v63  ;;  %v19009_v62 = vld [vmem:[#allocation120_spill] sm:$0xff] }
 0x646   : > { %7856 = vmatmul.f32.gmra.mxu1 %v18999_v58  ;;  %9075 = vmatmul.f32.gmra.mxu3 %v8926_v54  ;;  %v9410_v54 = vmul.f32 %v9365_v57, %v15788_v0  ;;  %v19011_v57 = vld [vmem:[#allocation79_spill] sm:$0xff] }
 0x647   : > { %9557 = vmatmul.f32.gmra.mxu0 %v9408_v22  ;;  %v8893_v22 = vpop.permute.xlu0 %8892 }
 0x64b   : > { %v17599_v60 = vpop.f32.mrf.mxu1  ;;  %8470 = vmatmul.f32.gmra.mxu2 %v8317_v46  ;;  %v9370_v30 = vpop.permute.xlu1 %9369  ;;  %v8929_v46 = vmul.f32 %v8888_v34, %v15837_v42  ;;  %v9993_v34 = vmul.f32 %v17285_v17, %v15986_v25 }
 0x64e   : > { %7859 = vmatmul.f32.gmra.mxu1 %v19004_v27  ;;  %9078 = vmatmul.f32.gmra.mxu3 %v8927_v4  ;;  %v8319_v27 = vmul.f32 %v19009_v62, %v19008_v50  ;;  %v19010_v4 = vld [vmem:[#allocation29_spill] sm:$0xff] }
 0x64f   : > { %9560 = vmatmul.f32.gmra.mxu0 %v9409_v41  ;;  %v9411_v41 = vmul.f32 %v9370_v30, %v19010_v4  ;;  %v8898_v13 = vpop.permute.xlu0 %8897  ;;  %v19014_v30 = vld [vmem:[#allocation216_spill] sm:$0xff] }
 0x653   : > { %v17606_v58 = vpop.f32.mrf.mxu1  ;;  %8473 = vmatmul.f32.gmra.mxu2 %v8318_v49  ;;  %v9375_v19 = vpop.permute.xlu1 %9374 }
 0x654   : > { %v9412_v62 = vmul.f32 %v9375_v19, %v15807_v31  ;;  %v9994_v31 = vmul.f32 %v17304_v45, %v16022_v26  ;;  %v9998_v45 = vmul.f32 %v17350_v20, %v18888_v38  ;;  %v19015_v38 = vld [vmem:[#allocation60_spill] sm:$0xff] }
 0x655   : > { %v19018_v19 = vld [vmem:[#allocation156_spill] sm:$0xff] }
 0x656   : > { %7862 = vmatmul.f32.gmra.mxu1 %v19006_v63  ;;  %9081 = vmatmul.f32.gmra.mxu3 %v8928_v11  ;;  %v8320_v63 = vmul.f32 %v19012_v15, %v19011_v57  ;;  %v19013_v11 = vld [vmem:[#allocation215_spill] sm:$0xff]  ;;  %v10002_v15 = vmul.f32 %v19015_v38, %v18907_v6 }
 0x657   : > { %9563 = vmatmul.f32.gmra.mxu0 %v9410_v54  ;;  %v8930_v54 = vmul.f32 %v8893_v22, %v19013_v11  ;;  %v9380_v42 = vpop.permute.xlu0 %9379 }
 0x65b   : > { %v17613_v43 = vpop.f32.mrf.mxu1  ;;  %8476 = vmatmul.f32.gmra.mxu2 %v8319_v27  ;;  %v8931_v27 = vmul.f32 %v8898_v13, %v19014_v30  ;;  %v9997_v13 = vmul.f32 %v17337_v39, %v18883_v29  ;;  %v10001_v39 = vmul.f32 %v17383_v12, %v16309_v2  ;;  %v10005_v12 = vmul.f32 %v17429_v7, %v18925_v10  ;;  %v17694_v10 = vld [vmem:[%s17937_s5] ss:$0 sm:$0xff] }
 0x65e   : > { %7865 = vmatmul.f32.gmra.mxu1 %v15788_v0  ;;  %9084 = vmatmul.f32.gmra.mxu3 %v8929_v46  ;;  %v9413_v46 = vmul.f32 %v9380_v42, %v15834_v56  ;;  %v9996_v56 = vmul.f32 %v17327_v51, %v18879_v33  ;;  %v10000_v33 = vmul.f32 %v17373_v14, %v18897_v40  ;;  %v19017_v40 = vld [vmem:[#allocation39_spill] sm:$0xff] }
 0x65f   : > { %9566 = vmatmul.f32.gmra.mxu0 %v9411_v41  ;;  %v9995_v41 = vmul.f32 %v17314_v8, %v18874_v24  ;;  %v9999_v24 = vmul.f32 %v17360_v55, %v18893_v23  ;;  %v19016_v55 = vld [vmem:[#allocation172_spill] sm:$0xff]  ;;  %v10004_v11 = vmul.f32 %v19018_v19, %v19017_v40  ;;  %v17710_v40 = vpop.f32.mrf.mxu0 }
 0x663   : > { %v17620_v49 = vpop.f32.mrf.mxu1  ;;  %8479 = vmatmul.f32.gmra.mxu2 %v8320_v63  ;;  %v10003_v63 = vmul.f32 %v19016_v55, %v18913_v61  ;;  %v9022_v55 = vpop.f32.mrf.mxu3 }
 0x666   : > { %7868 = vmatmul.f32.gmra.mxu1 %v19010_v4  ;;  %9087 = vmatmul.f32.gmra.mxu3 %v8930_v54  ;;  %v19019_v54 = vld [vmem:[#allocation130_spill] sm:$0xff] }
 0x667   : > { %9569 = vmatmul.f32.gmra.mxu0 %v9412_v62  ;;  %v19020_v62 = vld [vmem:[#allocation129_spill] sm:$0xff] }
 0x668   : > { %v10006_v42 = vmul.f32 %v19020_v62, %v19019_v54  ;;  %v19029_v62 = vld [vmem:[#allocation69_spill] sm:$0xff] }
 0x66b   : > { %v17625_v0 = vpop.f32.mrf.mxu1 }
 0x66e   : > { %9090 = vmatmul.f32.gmra.mxu3 %v8931_v27  ;;  %10090 = vmatmul.f32.vlgmr.msra.gmra.mxu1 %v9993_v34  ;;  %v10007_v34 = vmul.f32 %v17452_v52, %v18936_v37  ;;  %v19021_v27 = vld [vmem:[#allocation112_spill] sm:$0xff] }
 0x66f   : > { %9572 = vmatmul.f32.gmra.mxu0 %v9413_v46  ;;  %v19022_v46 = vld [vmem:[#allocation178_spill] sm:$0xff] }
 0x673   : > { %v17631_v22 = vpop.f32.mrf.mxu1 }
 0x676   : > { %10093 = vmatmul.f32.gmra.mxu1 %v9994_v31  ;;  %v10008_v31 = vmul.f32 %v19022_v46, %v19021_v27  ;;  %v9025_v46 = vpop.f32.mrf.mxu3 }
 0x67b   : > { %v17635_v4 = vpop.f32.mrf.mxu1 }
 0x67e   : > { %10096 = vmatmul.f32.gmra.mxu1 %v9995_v41  ;;  %v19023_v41 = vld [vmem:[#allocation26_spill] sm:$0xff] }
 0x683   : > { %v17639_v25 = vpop.f32.mrf.mxu1 }
 0x686   : > { %10099 = vmatmul.f32.gmra.mxu1 %v9996_v56  ;;  %v10009_v56 = vmul.f32 %v19023_v41, %v18950_v3  ;;  %v19030_v41 = vld [vmem:[#allocation54_spill] sm:$0xff] }
 0x68b   : > { %v17643_v17 = vpop.f32.mrf.mxu1 }
 0x68e   : > { %10102 = vmatmul.f32.gmra.mxu1 %v9997_v13 }
 0x693   : > { %v17647_v26 = vpop.f32.mrf.mxu1 }
 0x696   : > { %10105 = vmatmul.f32.gmra.mxu1 %v9998_v45  ;;  %v8411_v45 = vpop.f32.mrf.mxu2 }
 0x69b   : > { %v17651_v8 = vpop.f32.mrf.mxu1 }
 0x69e   : > { %10108 = vmatmul.f32.gmra.mxu1 %v9999_v24 }
 0x6a3   : > { %v17655_v51 = vpop.f32.mrf.mxu1 }
 0x6a6   : > { %10111 = vmatmul.f32.gmra.mxu1 %v10000_v33  ;;  %v19024_v33 = vld [vmem:[#allocation62_spill] sm:$0xff] }
 0x6ab   : > { %v17659_v29 = vpop.f32.mrf.mxu1 }
 0x6ae   : > { %10114 = vmatmul.f32.gmra.mxu1 %v10001_v39  ;;  %v19025_v39 = vld [vmem:[#allocation163_spill] sm:$0xff] }
 0x6af   : > { %v10010_v38 = vmul.f32 %v19025_v39, %v19024_v33 }
 0x6b3   : > { %v17663_v20 = vpop.f32.mrf.mxu1 }
 0x6b6   : > { %10117 = vmatmul.f32.gmra.mxu1 %v10002_v15  ;;  %v19026_v15 = vld [vmem:[#allocation167_spill] sm:$0xff] }
 0x6bb   : > { %v17667_v23 = vpop.f32.mrf.mxu1 }
 0x6be   : > { %10120 = vmatmul.f32.gmra.mxu1 %v10003_v63 }
 0x6c3   : > { %v17671_v14 = vpop.f32.mrf.mxu1 }
 0x6c6   : > { %10123 = vmatmul.f32.gmra.mxu1 %v10004_v11  ;;  %v19027_v11 = vld [vmem:[#allocation125_spill] sm:$0xff] }
 0x6cb   : > { %v17675_v2 = vpop.f32.mrf.mxu1 }
 0x6ce   : > { %10126 = vmatmul.f32.gmra.mxu1 %v10005_v12  ;;  %v19028_v12 = vld [vmem:[#allocation128_spill] sm:$0xff] }
 0x6cf   : > { %v10011_v54 = vmul.f32 %v19028_v12, %v19027_v11 }
 0x6d3   : > { %v17679_v6 = vpop.f32.mrf.mxu1 }
 0x6d6   : > { %10129 = vmatmul.f32.gmra.mxu1 %v10006_v42 }
 0x6db   : > { %v17683_v61 = vpop.f32.mrf.mxu1 }
 0x6de   : > { %10132 = vmatmul.f32.gmra.mxu1 %v10007_v34  ;;  %v8414_v34 = vpop.f32.mrf.mxu2 }
 0x6e3   : > { %v17687_v30 = vpop.f32.mrf.mxu1 }
 0x6e6   : > { %10135 = vmatmul.f32.gmra.mxu1 %v10008_v31  ;;  %v17723_v33 = vpop.f32.mrf.mxu2 }
 0x6eb   : > { %v10091_v7 = vpop.f32.mrf.mxu1 }
 0x6ec   : > { %v10187_v13 = vadd.f32 %v10091_v7, %v17486_v59 }
 0x6ee   : > { %v10287_v37 = vadd.f32 %v17694_v10, %v10187_v13  ;;  %10138 = vmatmul.f32.gmra.mxu1 %v10009_v56  ;;  %v19031_v56 = vld [vmem:[#allocation168_spill] sm:$0xff]  ;;  %v17734_v12 = vpop.f32.mrf.mxu2 }
 0x6ef   : > { %v10012_v13 = vmul.f32 %v19031_v56, %v19030_v41 }
 0x6f0   : > { %v10319_v52 = vmax.f32 %v10287_v37, 0.0 }
 0x6f2   : > { %10351 = vst [vmem:[%s17702_s17] sm:$0xff] %v10319_v52  ;;  %v17720_v52 = vpop.f32.mrf.mxu0 }
 0x6f3   : > { %v10094_v24 = vpop.f32.mrf.mxu1 }
 0x6f4   : > { %v10188_v3 = vadd.f32 %v10094_v24, %v19026_v15 }
 0x6f6   : > { %v10288_v59 = vadd.f32 %v17694_v10, %v10188_v3  ;;  %10141 = vmatmul.f32.gmra.mxu1 %v10010_v38  ;;  %v17725_v38 = vpop.f32.mrf.mxu3  ;;  %v19032_v3 = vld [vmem:[#allocation27_spill] sm:$0xff]  ;;  %v17746_v56 = vpop.f32.mrf.mxu2 }
 0x6f8   : > { %v10320_v63 = vmax.f32 %v10288_v59, 0.0  ;;  %v10013_v59 = vmul.f32 %v19032_v3, %v18976_v32 }
 0x6fa   : > { %10352 = vst [vmem:[%s17702_s17 + $0x8] sm:$0xff] %v10320_v63 }
 0x6fb   : > { %v10097_v19 = vpop.f32.mrf.mxu1 }
 0x6fc   : > { %v10189_v42 = vadd.f32 %v10097_v19, %v19029_v62  ;;  %v17732_v19 = vpop.f32.mrf.mxu0 }
 0x6fe   : > { %v10289_v27 = vadd.f32 %v17694_v10, %v10189_v42  ;;  %10144 = vmatmul.f32.gmra.mxu1 %v10011_v54  ;;  %v17737_v54 = vpop.f32.mrf.mxu3  ;;  %v19033_v42 = vld [vmem:[#allocation136_spill] sm:$0xff] }
 0x700   : > { %v10321_v31 = vmax.f32 %v10289_v27, 0.0  ;;  %v19034_v27 = vld [vmem:[#allocation185_spill] sm:$0xff] }
 0x702   : > { %10353 = vst [vmem:[%s17702_s17 + $0x10] sm:$0xff] %v10321_v31  ;;  %v10014_v31 = vmul.f32 %v19034_v27, %v19033_v42  ;;  %v19037_v42 = vld [vmem:[#allocation179_spill] sm:$0xff] }
 0x703   : > { %v10100_v7 = vpop.f32.mrf.mxu1  ;;  %v10016_v27 = vmul.f32 %v19037_v42, %v18993_v18 }
 0x704   : > { %v10190_v37 = vadd.f32 %v10100_v7, %v17525_v44  ;;  %v17743_v41 = vpop.f32.mrf.mxu0 }
 0x706   : > { %v10290_v24 = vadd.f32 %v17694_v10, %v10190_v37  ;;  %10147 = vmatmul.f32.gmra.mxu1 %v10012_v13  ;;  %v9956_v37 = vpop.permute.xlu2 %9955  ;;  %v17751_v3 = vpop.f32.mrf.mxu3 }
 0x708   : > { %v10322_v39 = vmax.f32 %v10290_v24, 0.0  ;;  %v19035_v24 = vld [vmem:[#allocation89_spill] sm:$0xff] }
 0x70a   : > { %10354 = vst [vmem:[%s17702_s17 + $0x18] sm:$0xff] %v10322_v39  ;;  %v10015_v39 = vmul.f32 %v19035_v24, %v18989_v36 }
 0x70b   : > { %v10103_v15 = vpop.f32.mrf.mxu1 }
 0x70c   : > { %v10191_v63 = vadd.f32 %v10103_v15, %v17536_v28 }
 0x70e   : > { %v10291_v44 = vadd.f32 %v17694_v10, %v10191_v63  ;;  %10150 = vmatmul.f32.gmra.mxu1 %v10013_v59  ;;  %v19036_v59 = vld [vmem:[#allocation92_spill] sm:$0xff] }
 0x70f   : > { %v7880_v63 = vadd.f32 %v17558_v53, %v19036_v59  ;;  %v17765_v53 = vpop.f32.mrf.mxu3 }
 0x710   : > { %v10323_v11 = vmax.f32 %v10291_v44, 0.0 }
 0x711   : > { %v8491_v36 = vadd.f32 %v8411_v45, %v7880_v63 }
 0x712   : > { %10355 = vst [vmem:[%s17702_s17 + $0x20] sm:$0xff] %v10323_v11  ;;  %v17757_v11 = vpop.f32.mrf.mxu0 }
 0x713   : > { %v10106_v62 = vpop.f32.mrf.mxu1 }
 0x714   : > { %v10192_v32 = vadd.f32 %v10106_v62, %v17552_v48 }
 0x716   : > { %v10292_v28 = vadd.f32 %v17694_v10, %v10192_v32  ;;  %10153 = vmatmul.f32.gmra.mxu1 %v10014_v31  ;;  %v17762_v31 = vpop.f32.mrf.mxu2  ;;  %v9961_v32 = vpop.permute.xlu2 %9960 }
 0x718   : > { %v10324_v7 = vmax.f32 %v10292_v28, 0.0  ;;  %v9102_v28 = vadd.f32 %v9022_v55, %v8491_v36 }
 0x71a   : > { %10356 = vst [vmem:[%s17702_s17 + $0x28] sm:$0xff] %v10324_v7  ;;  %v9584_v18 = vadd.f32 %v17710_v40, %v9102_v28  ;;  %v17772_v59 = vpop.f32.mrf.mxu0  ;;  %v17779_v40 = vpop.f32.mrf.mxu3 }
 0x71b   : > { %v10109_v13 = vpop.f32.mrf.mxu1 }
 0x71c   : > { %v10193_v15 = vadd.f32 %v10109_v13, %v17562_v35  ;;  %v19038_v13 = vld [vmem:[#allocation141_spill] sm:$0xff] }
 0x71d   : > { %v7881_v24 = vadd.f32 %v17571_v21, %v19038_v13  ;;  %v19039_v21 = vld [vmem:[#allocation160_spill] sm:$0xff] }
 0x71e   : > { %v10293_v48 = vadd.f32 %v17694_v10, %v10193_v15  ;;  %10156 = vmatmul.f32.gmra.mxu1 %v10015_v39  ;;  %v7882_v42 = vadd.f32 %v17581_v16, %v19039_v21  ;;  %v19041_v16 = vld [vmem:[#allocation176_spill] sm:$0xff]  ;;  %v19043_v21 = vld [vmem:[#allocation147_spill] sm:$0xff] }
 0x71f   : > { %v8492_v15 = vadd.f32 %v8414_v34, %v7881_v24  ;;  %v19042_v24 = vld [vmem:[#allocation173_spill] sm:$0xff] }
 0x720   : > { %v10325_v44 = vmax.f32 %v10293_v48, 0.0 }
 0x721   : > { %v9103_v55 = vadd.f32 %v9025_v46, %v8492_v15  ;;  %v8493_v46 = vadd.f32 %v17723_v33, %v7882_v42  ;;  %v7884_v42 = vadd.f32 %v17599_v60, %v19043_v21  ;;  %v19044_v60 = vld [vmem:[#allocation121_spill] sm:$0xff] }
 0x722   : > { %10357 = vst [vmem:[%s17702_s17 + $0x30] sm:$0xff] %v10325_v44  ;;  %v17775_v44 = vpop.f32.mrf.mxu2  ;;  %v17787_v13 = vpop.f32.mrf.mxu0 }
 0x723   : > { %v10112_v62 = vpop.f32.mrf.mxu1  ;;  %v9104_v28 = vadd.f32 %v17725_v38, %v8493_v46  ;;  %v9043_v33 = vpop.f32.mrf.mxu3 }
 0x724   : > { %v10194_v35 = vadd.f32 %v10112_v62, %v17575_v1  ;;  %v10017_v1 = vmul.f32 %v9956_v37, %v17082_v47  ;;  %v9966_v62 = vpop.permute.xlu2 %9965  ;;  %v9585_v47 = vadd.f32 %v17720_v52, %v9103_v55  ;;  %v19040_v37 = vld [vmem:[#allocation146_spill] sm:$0xff] }
 0x725   : > { %v10018_v36 = vmul.f32 %v9961_v32, %v19040_v37  ;;  %v9586_v32 = vadd.f32 %v17732_v19, %v9104_v28  ;;  %v10019_v38 = vmul.f32 %v9966_v62, %v17193_v5  ;;  %v7885_v28 = vadd.f32 %v17606_v58, %v19044_v60  ;;  %v19048_v60 = vld [vmem:[#allocation76_spill] sm:$0xff] }
 0x726   : > { %v10294_v7 = vadd.f32 %v17694_v10, %v10194_v35  ;;  %10159 = vmatmul.f32.gmra.mxu1 %v10016_v27 }
 0x728   : > { %v10326_v39 = vmax.f32 %v10294_v7, 0.0 }
 0x72a   : > { %10358 = vst [vmem:[%s17702_s17 + $0x38] sm:$0xff] %v10326_v39  ;;  %v7883_v39 = vadd.f32 %v19042_v24, %v19041_v16  ;;  %v8496_v24 = vadd.f32 %v17762_v31, %v7885_v28 }
 0x72b   : > { %v10115_v45 = vpop.f32.mrf.mxu1 }
 0x72c   : > { %v10195_v48 = vadd.f32 %v10115_v45, %v9584_v18  ;;  %v17791_v45 = vpop.f32.mrf.mxu2  ;;  %v9971_v52 = vpop.permute.xlu2 %9970  ;;  %v8494_v15 = vadd.f32 %v17734_v12, %v7883_v39  ;;  %v8495_v12 = vadd.f32 %v17746_v56, %v7884_v42 }
 0x72d   : > { %v10020_v5 = vmul.f32 %v9971_v52, %v17243_v9 }
 0x72e   : > { %v10295_v63 = vadd.f32 %v17694_v10, %v10195_v48  ;;  %10162 = vmatmul.f32.gmra.mxu1 %v10017_v1  ;;  %v9105_v55 = vadd.f32 %v17737_v54, %v8494_v15  ;;  %v9106_v46 = vadd.f32 %v17751_v3, %v8495_v12  ;;  %v9107_v3 = vadd.f32 %v17765_v53, %v8496_v24  ;;  %v19049_v24 = vld [vmem:[#allocation218_spill] sm:$0xff] }
 0x730   : > { %v10327_v27 = vmax.f32 %v10295_v63, 0.0  ;;  %v9587_v19 = vadd.f32 %v17743_v41, %v9105_v55  ;;  %v9588_v41 = vadd.f32 %v17757_v11, %v9106_v46  ;;  %v9589_v11 = vadd.f32 %v17772_v59, %v9107_v3 }
 0x732   : > { %10359 = vst [vmem:[%s17702_s17 + $0x40] sm:$0xff] %v10327_v27 }
 0x733   : > { %v10118_v34 = vpop.f32.mrf.mxu1 }
 0x734   : > { %v10196_v35 = vadd.f32 %v10118_v34, %v9585_v47  ;;  %v9525_v47 = vpop.f32.mrf.mxu0  ;;  %v8435_v34 = vpop.f32.mrf.mxu2 }
 0x735   : > { %v9976_v54 = vpop.permute.xlu2 %9975 }
 0x736   : > { %v10296_v7 = vadd.f32 %v17694_v10, %v10196_v35  ;;  %10165 = vmatmul.f32.gmra.mxu1 %v10018_v36  ;;  %v9046_v36 = vpop.f32.mrf.mxu3  ;;  %v10021_v56 = vmul.f32 %v9976_v54, %v19008_v50 }
 0x738   : > { %v10328_v18 = vmax.f32 %v10296_v7, 0.0 }
 0x73a   : > { %10360 = vst [vmem:[%s17702_s17 + $0x48] sm:$0xff] %v10328_v18 }
 0x73b   : > { %v10121_v1 = vpop.f32.mrf.mxu1 }
 0x73c   : > { %v10197_v48 = vadd.f32 %v10121_v1, %v9586_v32  ;;  %v9528_v16 = vpop.f32.mrf.mxu0  ;;  %v8438_v18 = vpop.f32.mrf.mxu2  ;;  %v19045_v1 = vld [vmem:[#allocation148_spill] sm:$0xff] }
 0x73d   : > { %v9981_v32 = vpop.permute.xlu2 %9980 }
 0x73e   : > { %v10297_v63 = vadd.f32 %v17694_v10, %v10197_v48  ;;  %10168 = vmatmul.f32.gmra.mxu1 %v10019_v38  ;;  %v9049_v58 = vpop.f32.mrf.mxu3  ;;  %v7886_v38 = vadd.f32 %v17613_v43, %v19045_v1  ;;  %v10022_v31 = vmul.f32 %v9981_v32, %v19011_v57  ;;  %v19050_v32 = vld [vmem:[#allocation30_spill] sm:$0xff] }
 0x740   : > { %v10329_v27 = vmax.f32 %v10297_v63, 0.0  ;;  %v8497_v48 = vadd.f32 %v17775_v44, %v7886_v38  ;;  %v19047_v44 = vld [vmem:[#allocation217_spill] sm:$0xff] }
 0x742   : > { %10361 = vst [vmem:[%s17702_s17 + $0x50] sm:$0xff] %v10329_v27  ;;  %v9108_v63 = vadd.f32 %v17779_v40, %v8497_v48  ;;  %v19046_v27 = vld [vmem:[#allocation18_spill] sm:$0xff] }
 0x743   : > { %v10124_v37 = vpop.f32.mrf.mxu1  ;;  %v7887_v43 = vadd.f32 %v17620_v49, %v19046_v27  ;;  %v7888_v49 = vadd.f32 %v17625_v0, %v19048_v60  ;;  %v7889_v0 = vadd.f32 %v17631_v22, %v19050_v32 }
 0x744   : > { %v10198_v62 = vadd.f32 %v10124_v37, %v9587_v19  ;;  %v9531_v53 = vpop.f32.mrf.mxu0  ;;  %v8441_v42 = vpop.f32.mrf.mxu2  ;;  %v9590_v57 = vadd.f32 %v17787_v13, %v9108_v63 }
 0x745   : > { %v9986_v37 = vpop.permute.xlu2 %9985 }
 0x746   : > { %v10298_v35 = vadd.f32 %v17694_v10, %v10198_v62  ;;  %10171 = vmatmul.f32.gmra.mxu1 %v10020_v5  ;;  %v9052_v59 = vpop.f32.mrf.mxu3  ;;  %v10023_v12 = vmul.f32 %v9986_v37, %v19047_v44  ;;  %v8498_v62 = vadd.f32 %v17791_v45, %v7887_v43  ;;  %v8499_v45 = vadd.f32 %v8435_v34, %v7888_v49 }
 0x748   : > { %v10330_v7 = vmax.f32 %v10298_v35, 0.0  ;;  %v9109_v54 = vadd.f32 %v9043_v33, %v8498_v62  ;;  %v9110_v33 = vadd.f32 %v9046_v36, %v8499_v45  ;;  %v19051_v36 = vld [vmem:[#allocation169_spill] sm:$0xff] }
 0x749   : > { %v7890_v63 = vadd.f32 %v17635_v4, %v19051_v36 }
 0x74a   : > { %10362 = vst [vmem:[%s17702_s17 + $0x58] sm:$0xff] %v10330_v7  ;;  %v9991_v7 = vpop.permute.xlu1 %9990  ;;  %v9591_v13 = vadd.f32 %v9525_v47, %v9109_v54 }
 0x74b   : > { %v10127_v9 = vpop.f32.mrf.mxu1 }
 0x74c   : > { %v10199_v39 = vadd.f32 %v10127_v9, %v9588_v41  ;;  %v9534_v35 = vpop.f32.mrf.mxu0  ;;  %v8444_v41 = vpop.f32.mrf.mxu2 }
 0x74e   : > { %v10299_v52 = vadd.f32 %v17694_v10, %v10199_v39  ;;  %10174 = vmatmul.f32.gmra.mxu1 %v10021_v56  ;;  %v9055_v9 = vpop.f32.mrf.mxu3  ;;  %v10024_v39 = vmul.f32 %v9991_v7, %v19049_v24 }
 0x750   : > { %v10331_v15 = vmax.f32 %v10299_v52, 0.0 }
 0x752   : > { %10363 = vst [vmem:[%s17702_s17 + $0x60] sm:$0xff] %v10331_v15  ;;  %v9592_v15 = vadd.f32 %v9528_v16, %v9110_v33 }
 0x753   : > { %v10130_v50 = vpop.f32.mrf.mxu1 }
 0x754   : > { %v10200_v55 = vadd.f32 %v10130_v50, %v9589_v11  ;;  %v9537_v38 = vpop.f32.mrf.mxu0  ;;  %v8447_v11 = vpop.f32.mrf.mxu2  ;;  %v8500_v50 = vadd.f32 %v8438_v18, %v7889_v0 }
 0x756   : > { %v10300_v21 = vadd.f32 %v17694_v10, %v10200_v55  ;;  %10177 = vmatmul.f32.gmra.mxu1 %v10022_v31  ;;  %v9058_v48 = vpop.f32.mrf.mxu3  ;;  %v9111_v55 = vadd.f32 %v9049_v58, %v8500_v50  ;;  %v19052_v58 = vld [vmem:[#allocation166_spill] sm:$0xff] }
 0x757   : > { %v7891_v44 = vadd.f32 %v17639_v25, %v19052_v58 }
 0x758   : > { %v10332_v19 = vmax.f32 %v10300_v21, 0.0  ;;  %v9593_v27 = vadd.f32 %v9531_v53, %v9111_v55 }
 0x75a   : > { %10364 = vst [vmem:[%s17702_s17 + $0x68] sm:$0xff] %v10332_v19  ;;  %v8501_v19 = vadd.f32 %v8441_v42, %v7890_v63 }
 0x75b   : > { %v10133_v5 = vpop.f32.mrf.mxu1 }
 0x75c   : > { %v10201_v40 = vadd.f32 %v10133_v5, %v9590_v57  ;;  %v9540_v22 = vpop.f32.mrf.mxu0  ;;  %v8450_v16 = vpop.f32.mrf.mxu2  ;;  %v9112_v57 = vadd.f32 %v9052_v59, %v8501_v19  ;;  %v19053_v59 = vld [vmem:[#allocation151_spill] sm:$0xff] }
 0x75d   : > { %v7892_v49 = vadd.f32 %v17643_v17, %v19053_v59 }
 0x75e   : > { %v10301_v46 = vadd.f32 %v17694_v10, %v10201_v40  ;;  %10180 = vmatmul.f32.gmra.mxu1 %v10023_v12  ;;  %v9061_v5 = vpop.f32.mrf.mxu3  ;;  %v9594_v62 = vadd.f32 %v9534_v35, %v9112_v57  ;;  %v8502_v40 = vadd.f32 %v8444_v41, %v7891_v44 }
 0x760   : > { %v10333_v28 = vmax.f32 %v10301_v46, 0.0  ;;  %v9113_v46 = vadd.f32 %v9055_v9, %v8502_v40  ;;  %v19054_v9 = vld [vmem:[#allocation152_spill] sm:$0xff] }
 0x761   : > { %v7893_v45 = vadd.f32 %v17647_v26, %v19054_v9 }
 0x762   : > { %10365 = vst [vmem:[%s17702_s17 + $0x70] sm:$0xff] %v10333_v28 }
 0x763   : > { %v10136_v56 = vpop.f32.mrf.mxu1  ;;  %v8504_v0 = vadd.f32 %v8450_v16, %v7893_v45  ;;  %v19059_v45 = vld [vmem:[#allocation184_spill] sm:$0xff] }
 0x764   : > { %v10202_v3 = vadd.f32 %v10136_v56, %v9591_v13  ;;  %v9543_v53 = vpop.f32.mrf.mxu0  ;;  %v8453_v60 = vpop.f32.mrf.mxu2  ;;  %v9595_v13 = vadd.f32 %v9537_v38, %v9113_v46  ;;  %v8503_v56 = vadd.f32 %v8447_v11, %v7892_v49  ;;  %v19055_v11 = vld [vmem:[#allocation101_spill] sm:$0xff] }
 0x765   : > { %v9115_v38 = vadd.f32 %v9061_v5, %v8504_v0 }
 0x766   : > { %v10302_v52 = vadd.f32 %v17694_v10, %v10202_v3  ;;  %10183 = vmatmul.f32.gmra.mxu1 %v10024_v39  ;;  %v9064_v7 = vpop.f32.mrf.mxu3  ;;  %v9114_v35 = vadd.f32 %v9058_v48, %v8503_v56 }
 0x767   : > { %v9597_v48 = vadd.f32 %v9543_v53, %v9115_v38 }
 0x768   : > { %v10334_v1 = vmax.f32 %v10302_v52, 0.0  ;;  %v9596_v52 = vadd.f32 %v9540_v22, %v9114_v35  ;;  %v19056_v22 = vld [vmem:[#allocation153_spill] sm:$0xff] }
 0x76a   : > { %10366 = vst [vmem:[%s17702_s17 + $0x78] sm:$0xff] %v10334_v1 }
 0x76b   : > { %v10139_v47 = vpop.f32.mrf.mxu1 }
 0x76c   : > { %v10203_v31 = vadd.f32 %v10139_v47, %v9592_v15  ;;  %v9546_v39 = vpop.f32.mrf.mxu0  ;;  %v8456_v33 = vpop.f32.mrf.mxu2  ;;  %v7894_v47 = vadd.f32 %v17651_v8, %v19055_v11  ;;  %v19060_v11 = vld [vmem:[#allocation157_spill] sm:$0xff] }
 0x76e   : > { %v10303_v34 = vadd.f32 %v17694_v10, %v10203_v31  ;;  %v9067_v17 = vpop.f32.mrf.mxu3 }
 0x770   : > { %v10335_v21 = vmax.f32 %v10303_v34, 0.0  ;;  %v8505_v34 = vadd.f32 %v8453_v60, %v7894_v47  ;;  %v7899_v47 = vadd.f32 %v17671_v14, %v19060_v11 }
 0x772   : > { %10367 = vst [vmem:[%s17702_s17 + $0x80] sm:$0xff] %v10335_v21  ;;  %v9116_v21 = vadd.f32 %v9064_v7, %v8505_v34 }
 0x773   : > { %v10142_v43 = vpop.f32.mrf.mxu1 }
 0x774   : > { %v10204_v37 = vadd.f32 %v10142_v43, %v9593_v27  ;;  %v9549_v31 = vpop.f32.mrf.mxu0  ;;  %v8459_v26 = vpop.f32.mrf.mxu2  ;;  %v7895_v43 = vadd.f32 %v17655_v51, %v19056_v22 }
 0x776   : > { %v10304_v18 = vadd.f32 %v17694_v10, %v10204_v37  ;;  %v9070_v63 = vpop.f32.mrf.mxu3  ;;  %v9598_v37 = vadd.f32 %v9546_v39, %v9116_v21  ;;  %v8506_v57 = vadd.f32 %v8456_v33, %v7895_v43 }
 0x778   : > { %v10336_v12 = vmax.f32 %v10304_v18, 0.0  ;;  %v9117_v58 = vadd.f32 %v9067_v17, %v8506_v57 }
 0x77a   : > { %10368 = vst [vmem:[%s17702_s17 + $0x88] sm:$0xff] %v10336_v12 }
 0x77b   : > { %v10145_v4 = vpop.f32.mrf.mxu1 }
 0x77c   : > { %v10205_v54 = vadd.f32 %v10145_v4, %v9594_v62  ;;  %v9552_v8 = vpop.f32.mrf.mxu0  ;;  %v8462_v5 = vpop.f32.mrf.mxu2  ;;  %v19057_v62 = vld [vmem:[#allocation43_spill] sm:$0xff] }
 0x77d   : > { %v7896_v4 = vadd.f32 %v17659_v29, %v19057_v62 }
 0x77e   : > { %v10305_v42 = vadd.f32 %v17694_v10, %v10205_v54  ;;  %v9073_v12 = vpop.f32.mrf.mxu3  ;;  %v9599_v54 = vadd.f32 %v9549_v31, %v9117_v58 }
 0x77f   : > { %v8507_v53 = vadd.f32 %v8459_v26, %v7896_v4 }
 0x780   : > { %v10337_v28 = vmax.f32 %v10305_v42, 0.0 }
 0x781   : > { %v9118_v60 = vadd.f32 %v9070_v63, %v8507_v53 }
 0x782   : > { %10369 = vst [vmem:[%s17702_s17 + $0x90] sm:$0xff] %v10337_v28  ;;  %v19058_v28 = vld [vmem:[#allocation46_spill] sm:$0xff] }
 0x783   : > { %v10148_v25 = vpop.f32.mrf.mxu1  ;;  %v7897_v7 = vadd.f32 %v17663_v20, %v19058_v28  ;;  %v9600_v56 = vadd.f32 %v9552_v8, %v9118_v60  ;;  %v19063_v60 = vld [vmem:[#allocation24_spill] sm:$0xff] }
 0x784   : > { %v10206_v24 = vadd.f32 %v10148_v25, %v9595_v13  ;;  %v9555_v42 = vpop.f32.mrf.mxu0  ;;  %v8465_v49 = vpop.f32.mrf.mxu2 }
 0x786   : > { %v10306_v41 = vadd.f32 %v17694_v10, %v10206_v24  ;;  %v9076_v25 = vpop.f32.mrf.mxu3  ;;  %v8508_v24 = vadd.f32 %v8462_v5, %v7897_v7 }
 0x788   : > { %v10338_v3 = vmax.f32 %v10306_v41, 0.0  ;;  %v9119_v41 = vadd.f32 %v9073_v12, %v8508_v24 }
 0x78a   : > { %10370 = vst [vmem:[%s17702_s17 + $0x98] sm:$0xff] %v10338_v3  ;;  %v7898_v3 = vadd.f32 %v17667_v23, %v19059_v45  ;;  %v9601_v17 = vadd.f32 %v9555_v42, %v9119_v41 }
 0x78b   : > { %v10151_v32 = vpop.f32.mrf.mxu1 }
 0x78c   : > { %v10207_v1 = vadd.f32 %v10151_v32, %v9596_v52  ;;  %v9558_v9 = vpop.f32.mrf.mxu0  ;;  %v8468_v52 = vpop.f32.mrf.mxu2  ;;  %v8509_v0 = vadd.f32 %v8465_v49, %v7898_v3 }
 0x78e   : > { %v10307_v15 = vadd.f32 %v17694_v10, %v10207_v1  ;;  %v9079_v20 = vpop.f32.mrf.mxu3  ;;  %v9120_v38 = vadd.f32 %v9076_v25, %v8509_v0 }
 0x790   : > { %v10339_v50 = vmax.f32 %v10307_v15, 0.0 }
 0x792   : > { %10371 = vst [vmem:[%s17702_s17 + $0xa0] sm:$0xff] %v10339_v50 }
 0x793   : > { %v10154_v55 = vpop.f32.mrf.mxu1 }
 0x794   : > { %v10208_v36 = vadd.f32 %v10154_v55, %v9597_v48  ;;  %v9561_v31 = vpop.f32.mrf.mxu0  ;;  %v9602_v48 = vadd.f32 %v9558_v9, %v9120_v38  ;;  %v8471_v23 = vpop.f32.mrf.mxu2  ;;  %v8510_v55 = vadd.f32 %v8468_v52, %v7899_v47 }
 0x796   : > { %v10308_v27 = vadd.f32 %v17694_v10, %v10208_v36  ;;  %v9082_v36 = vpop.f32.mrf.mxu3  ;;  %v9121_v63 = vadd.f32 %v9079_v20, %v8510_v55 }
 0x798   : > { %v10340_v19 = vmax.f32 %v10308_v27, 0.0  ;;  %v19061_v27 = vld [vmem:[#allocation161_spill] sm:$0xff] }
 0x799   : > { %v7900_v22 = vadd.f32 %v17675_v2, %v19061_v27 }
 0x79a   : > { %10372 = vst [vmem:[%s17702_s17 + $0xa8] sm:$0xff] %v10340_v19  ;;  %v9603_v19 = vadd.f32 %v9561_v31, %v9121_v63 }
 0x79b   : > { %v10157_v16 = vpop.f32.mrf.mxu1  ;;  %v8511_v8 = vadd.f32 %v8471_v23, %v7900_v22 }
 0x79c   : > { %v10209_v18 = vadd.f32 %v10157_v16, %v9598_v37  ;;  %v9564_v14 = vpop.f32.mrf.mxu0  ;;  %v8474_v57 = vpop.f32.mrf.mxu2 }
 0x79e   : > { %v10309_v44 = vadd.f32 %v17694_v10, %v10209_v18  ;;  %v9122_v18 = vadd.f32 %v9082_v36, %v8511_v8  ;;  %v9085_v58 = vpop.f32.mrf.mxu3 }
 0x7a0   : > { %v10341_v40 = vmax.f32 %v10309_v44, 0.0  ;;  %v19062_v44 = vld [vmem:[#allocation19_spill] sm:$0xff]  ;;  %v9604_v4 = vadd.f32 %v9564_v14, %v9122_v18 }
 0x7a1   : > { %v7901_v12 = vadd.f32 %v17679_v6, %v19062_v44 }
 0x7a2   : > { %10373 = vst [vmem:[%s17702_s17 + $0xb0] sm:$0xff] %v10341_v40 }
 0x7a3   : > { %v10160_v51 = vpop.f32.mrf.mxu1  ;;  %v8512_v40 = vadd.f32 %v8474_v57, %v7901_v12 }
 0x7a4   : > { %v10210_v46 = vadd.f32 %v10160_v51, %v9599_v54  ;;  %v9567_v51 = vpop.f32.mrf.mxu0  ;;  %v8477_v42 = vpop.f32.mrf.mxu2 }
 0x7a5   : > { %v9123_v53 = vadd.f32 %v9085_v58, %v8512_v40 }
 0x7a6   : > { %v10310_v59 = vadd.f32 %v17694_v10, %v10210_v46  ;;  %v9088_v28 = vpop.f32.mrf.mxu3 }
 0x7a7   : > { %v9605_v7 = vadd.f32 %v9567_v51, %v9123_v53 }
 0x7a8   : > { %v10342_v13 = vmax.f32 %v10310_v59, 0.0  ;;  %v7902_v59 = vadd.f32 %v17683_v61, %v19063_v60 }
 0x7aa   : > { %10374 = vst [vmem:[%s17702_s17 + $0xb8] sm:$0xff] %v10342_v13  ;;  %v8513_v13 = vadd.f32 %v8477_v42, %v7902_v59 }
 0x7ab   : > { %v10163_v29 = vpop.f32.mrf.mxu1 }
 0x7ac   : > { %v10211_v35 = vadd.f32 %v10163_v29, %v9600_v56  ;;  %v9124_v56 = vadd.f32 %v9088_v28, %v8513_v13  ;;  %v9570_v24 = vpop.f32.mrf.mxu0  ;;  %v8480_v9 = vpop.f32.mrf.mxu2 }
 0x7ae   : > { %v10311_v39 = vadd.f32 %v17694_v10, %v10211_v35  ;;  %v19064_v35 = vld [vmem:[#allocation183_spill] sm:$0xff]  ;;  %v9606_v61 = vadd.f32 %v9570_v24, %v9124_v56  ;;  %v9091_v45 = vpop.f32.mrf.mxu3 }
 0x7af   : > { %v7903_v41 = vadd.f32 %v17687_v30, %v19064_v35 }
 0x7b0   : > { %v10343_v33 = vmax.f32 %v10311_v39, 0.0 }
 0x7b2   : > { %10375 = vst [vmem:[%s17702_s17 + $0xc0] sm:$0xff] %v10343_v33  ;;  %v8514_v33 = vadd.f32 %v8480_v9, %v7903_v41 }
 0x7b3   : > { %v10166_v32 = vpop.f32.mrf.mxu1 }
 0x7b4   : > { %v10212_v1 = vadd.f32 %v10166_v32, %v9601_v17  ;;  %v9125_v17 = vadd.f32 %v9091_v45, %v8514_v33  ;;  %v9573_v0 = vpop.f32.mrf.mxu0 }
 0x7b6   : > { %v10312_v15 = vadd.f32 %v17694_v10, %v10212_v1  ;;  %v9607_v30 = vadd.f32 %v9573_v0, %v9125_v17 }
 0x7b8   : > { %v10344_v50 = vmax.f32 %v10312_v15, 0.0 }
 0x7ba   : > { %10376 = vst [vmem:[%s17702_s17 + $0xc8] sm:$0xff] %v10344_v50 }
 0x7bb   : > { %v10169_v26 = vpop.f32.mrf.mxu1 }
 0x7bc   : > { %v10213_v34 = vadd.f32 %v10169_v26, %v9602_v48 }
 0x7be   : > { %v10313_v21 = vadd.f32 %v17694_v10, %v10213_v34 }
 0x7c0   : > { %v10345_v43 = vmax.f32 %v10313_v21, 0.0 }
 0x7c2   : > { %10377 = vst [vmem:[%s17702_s17 + $0xd0] sm:$0xff] %v10345_v43 }
 0x7c3   : > { %v10172_v37 = vpop.f32.mrf.mxu1 }
 0x7c4   : > { %v10214_v16 = vadd.f32 %v10172_v37, %v9603_v19 }
 0x7c6   : > { %v10314_v5 = vadd.f32 %v17694_v10, %v10214_v16 }
 0x7c8   : > { %v10346_v62 = vmax.f32 %v10314_v5, 0.0 }
 0x7ca   : > { %10378 = vst [vmem:[%s17702_s17 + $0xd8] sm:$0xff] %v10346_v62 }
 0x7cb   : > { %v10175_v2 = vpop.f32.mrf.mxu1 }
 0x7cc   : > { %v10215_v54 = vadd.f32 %v10175_v2, %v9604_v4 }
 0x7ce   : > { %v10315_v46 = vadd.f32 %v17694_v10, %v10215_v54 }
 0x7d0   : > { %v10347_v49 = vmax.f32 %v10315_v46, 0.0 }
 0x7d2   : > { %10379 = vst [vmem:[%s17702_s17 + $0xe0] sm:$0xff] %v10347_v49 }
 0x7d3   : > { %v10178_v6 = vpop.f32.mrf.mxu1 }
 0x7d4   : > { %v10216_v25 = vadd.f32 %v10178_v6, %v9605_v7 }
 0x7d6   : > { %v10316_v29 = vadd.f32 %v17694_v10, %v10216_v25 }
 0x7d8   : > { %v10348_v39 = vmax.f32 %v10316_v29, 0.0 }
 0x7da   : > { %10380 = vst [vmem:[%s17702_s17 + $0xe8] sm:$0xff] %v10348_v39 }
 0x7db   : > { %v10181_v3 = vpop.f32.mrf.mxu1 }
 0x7dc   : > { %v10217_v52 = vadd.f32 %v10181_v3, %v9606_v61 }
 0x7de   : > { %v10317_v20 = vadd.f32 %v17694_v10, %v10217_v52 }
 0x7e0   : > { %v10349_v32 = vmax.f32 %v10317_v20, 0.0 }
 0x7e2   : > { %10381 = vst [vmem:[%s17702_s17 + $0xf0] sm:$0xff] %v10349_v32 }
 0x7e3   : > { %v10184_v1 = vpop.f32.mrf.mxu1 }
 0x7e4   : > { %v10218_v38 = vadd.f32 %v10184_v1, %v9607_v30 }
 0x7e6   : > { %v10318_v15 = vadd.f32 %v17694_v10, %v10218_v38 }
 0x7e8   : > { %v10350_v11 = vmax.f32 %v10318_v15, 0.0 }
 0x7ea   : > { %10382 = vst [vmem:[%s17702_s17 + $0xf8] sm:$0xff] %v10350_v11 }
 0x7eb   : > { %11369 = shalt.err (!%p11366_p4)
}
 0x7ec   : > { %s11413_s18 = smov 128   ;;  %s11414_s17 = smov 8  }
 0x7ed   : > { %11226 = dma.vmem_to_hbm [thread:$0]  (%p11500_p11), %s10397_s13, 4096, %s10399_s7, %s10384_s25, %s11413_s18, %s11413_s18, %s11414_s17  }
 0x7ee PF: > { %s10413_s28 = sand.u32 1, %s11396_s21   ;;  %p19065_p7 = scmp.ge.s32.totalorder %s11408_s24, 2 }
 0x7ef   : > { %s10414_s19 = scalar_lea.sflag [#allocation7], %s10413_s28 }
 0x7f0   : > { %p11233_p5 = pnand %p19065_p7, %p11504_p12 }
 0x7f2   : > { %p11234_p8 = pneg %p11233_p5 }
 0x7f4   : > { %11391 = dma.done.wait (%p11234_p8), %s10414_s19, 4096  }
 0x7f5   : > { %11393 = vsyncadd (%p11234_p8), %s10414_s19, 4294963200  ;;  %p19_p10 = scmp.ge.s32.totalorder %s11475_s27, 4   ;;  %s19066_s21 = smov %s11400_s22 }
 0x7f6   : > { %s19067_s22 = smov %s11404_s23  ;;  %s19068_s23 = smov %s11487_s30 }
 0x7f7   : > { %s19069_s24 = smov %s11475_s27  ;;  %21 = sbr.rel (!%p19_p10) target bundleno = 5 (0x5), region = 112 }
 0x7fc   :  { %10420 = vsyncpa [#allocation6], 1 }
 0x7fd   :  { %10422 = vsyncpa [#allocation6 + $0x1], 1 }
 0x7fe   :  { %10423 = vsyncpa [#allocation7], 1 }
 0x7ff   :  { %10425 = vsyncpa [#allocation7 + $0x1], 1 }

</bundles_post_ra>
